<compile_context>
chip_gen: v7x
topology: tpu7x:2x2x1
jax: 0.10.0
libtpu: 0.0.40
codegen_flags: <defaults>
</compile_context>

<pallas_src>
import jax
import jax.numpy as jnp
from jax.experimental import pallas as pl
from jax.experimental.pallas import tpu as pltpu


# ----------------------------- Pallas kernel --------------------------------

def _make_fused_kernel(nb, k, s, p, ho, wo):
    """Fused down-conv + conv1 + (conv2 + residual); one grid step = nb images."""
    hw = ho * wo

    def reflect_pad(x, pp, axis):
        """PyTorch-style 'reflect' pad (edge excluded) of a value along `axis`."""
        if pp == 0:
            return x
        n = x.shape[axis]
        top = [jax.lax.slice_in_dim(x, pp - i, pp - i + 1, axis=axis) for i in range(pp)]
        bot = [jax.lax.slice_in_dim(x, n - 2 - i, n - 1 - i, axis=axis) for i in range(pp)]
        return jnp.concatenate(top + [x] + bot, axis=axis)

    def im2col_one(x3, kk, ss, pp, oh, ow):
        """x3: (h, w, C) value -> (oh*ow, kk*kk*C); reflect pad pp, stride ss.
        Built entirely with static slices / reshapes on register values."""
        c = x3.shape[-1]
        xp = reflect_pad(reflect_pad(x3, pp, 0), pp, 1)
        hp, wp = xp.shape[0], xp.shape[1]
        # The stride trick below slices ss*oh rows / ss*ow cols; append zero
        # rows/cols if that overshoots the padded map (never selected anyway).
        eh = max(0, (kk - 1) + ss * oh - hp)
        ew = max(0, (kk - 1) + ss * ow - wp)
        if eh:
            xp = jnp.concatenate(
                [xp, jnp.zeros((eh, xp.shape[1], c), xp.dtype)], axis=0)
        if ew:
            xp = jnp.concatenate(
                [xp, jnp.zeros((xp.shape[0], ew, c), xp.dtype)], axis=1)
        taps = []
        for kh in range(kk):
            rows = jax.lax.slice_in_dim(xp, kh, kh + ss * oh, axis=0)
            if ss > 1:                                   # pick every ss-th row
                rows = rows.reshape(oh, ss, rows.shape[1], c)[:, 0]
            for kw in range(kk):
                cc = jax.lax.slice_in_dim(rows, kw, kw + ss * ow, axis=1)
                if ss > 1:                               # pick every ss-th col
                    cc = cc.reshape(oh, ow, ss, c)[:, :, 0]
                taps.append(cc)                          # (oh, ow, C)
        cols = jnp.concatenate(taps, axis=-1)            # (oh, ow, kk*kk*C)
        return cols.reshape(oh * ow, kk * kk * c)

    def kernel(x_ref, w0_ref, b0_ref, w1_ref, b1_ref, w2_ref, b2_ref, o_ref):
        # ---- down conv (k x k, stride s, reflect pad p): im2col in registers ----
        cols0 = jnp.concatenate(
            [im2col_one(x_ref[i], k, s, p, ho, wo) for i in range(nb)],
            axis=0).astype(jnp.bfloat16)                 # (nb*hw, kk*Cin)
        acc0 = jnp.dot(cols0, w0_ref[...], preferred_element_type=jnp.float32)
        d = jnp.maximum(acc0 + b0_ref[...], 0.0)         # (nb*hw, d_in) f32

        # ---- conv1 (3x3, s=1, p=1 reflect) ----
        cd = d.shape[-1]
        cols1 = jnp.concatenate(
            [im2col_one(d[i * hw:(i + 1) * hw].reshape(ho, wo, cd), 3, 1, 1, ho, wo)
             for i in range(nb)], axis=0).astype(jnp.bfloat16)
        acc1 = jnp.dot(cols1, w1_ref[...], preferred_element_type=jnp.float32)
        c1 = jnp.maximum(acc1 + b1_ref[...], 0.0)        # (nb*hw, d_out) f32

        # ---- conv2 + residual: residual (c1) already resident, no extra DMA ----
        dout = c1.shape[-1]
        cols2 = jnp.concatenate(
            [im2col_one(c1[i * hw:(i + 1) * hw].reshape(ho, wo, dout), 3, 1, 1, ho, wo)
             for i in range(nb)], axis=0).astype(jnp.bfloat16)
        acc2 = jnp.dot(cols2, w2_ref[...], preferred_element_type=jnp.float32)
        c2 = jnp.maximum(acc2 + b2_ref[...], 0.0)
        out = c1 + c2                                    # (nb*hw, d_out) f32

        # lane-dense store: (d_out, nb*hw); nb*hw is a multiple of 128 when nb>=2
        o_ref[0] = jnp.transpose(out).astype(o_ref.dtype)

    return kernel


# ------------------------------- JAX glue ------------------------------------

def fuse(params, eps=1e-5):
    """Fold conv bias + eval-mode BN into the weights:
       returns W' (k*k*Cin, Cout) with BN scale folded in, and bias' (1, Cout)."""
    rstd = 1.0 / jnp.sqrt(params["var"] + eps)
    scale = params["gamma"] * rstd                              # (Cout,)
    bias = params["beta"] + (params["b"] - params["mean"]) * scale
    w = params["w"] * scale[:, None, None, None]                # OIHW, scale folded
    cout, cin, k, _ = params["w"].shape
    w_packed = jnp.transpose(w, (2, 3, 1, 0)).reshape(k * k * cin, cout)
    return w_packed.astype(jnp.float32), bias.reshape(1, cout).astype(jnp.float32)


# --------------------- parameters (deterministic init) -----------------------

def init_conv_bn(key, cin, cout, k):
    kw_, kb_, kg_, kbt, km_, kv_ = jax.random.split(key, 6)
    return dict(
        w=jax.random.normal(kw_, (cout, cin, k, k), jnp.float32) * 0.1,  # OIHW
        b=jax.random.normal(kb_, (cout,), jnp.float32) * 0.1,
        gamma=1.0 + 0.1 * jax.random.normal(kg_, (cout,), jnp.float32),
        beta=0.1 * jax.random.normal(kbt, (cout,), jnp.float32),
        mean=0.1 * jax.random.normal(km_, (cout,), jnp.float32),
        var=0.5 + 0.5 * jnp.abs(jax.random.normal(kv_, (cout,), jnp.float32)),
    )


# --------------------------- DownConvBlock forward ----------------------------

def down_conv_block_forward(x_nchw, params, k, s, p):
    n, cin, h, w_sp = x_nchw.shape
    ho = (h + 2 * p - k) // s + 1
    wo = (w_sp + 2 * p - k) // s + 1
    hw = ho * wo
    # reflect pad validity (PyTorch requires pad < dim; conv1/2 reflect needs >=2)
    assert h > p and w_sp > p and ho >= 2 and wo >= 2, "spatial size too small"

    w0, b0 = fuse(params["down"])                               # (kk*d_in, d_in)
    w1, b1 = fuse(params["conv1"])                              # (9*d_in,  d_out)
    w2, b2 = fuse(params["conv2"])                              # (9*d_out, d_out)
    d_out = w2.shape[-1]

    # Batch fold per grid step: prefer Nb=4 (M=256, v6e/v7x MXU), then Nb=2
    # (M=128, fills v5e MXU), but keep grid length >= 2 so both v7x TCs work.
    nb = 1
    for cand in (4, 2):
        if n % cand == 0 and n // cand >= 2:
            nb = cand
            break
    g = n // nb

    x = jnp.transpose(x_nchw, (0, 2, 3, 1))                     # NCHW -> NHWC (glue)
    bf = jnp.bfloat16

    out = pl.pallas_call(
        _make_fused_kernel(nb, k, s, p, ho, wo),
        out_shape=jax.ShapeDtypeStruct((g, d_out, nb * hw), jnp.float32),
        grid=(g,),
        in_specs=[
            pl.BlockSpec((nb, h, w_sp, cin), lambda i: (i, 0, 0, 0)),
            pl.BlockSpec(w0.shape, lambda i: (0, 0)),
            pl.BlockSpec(b0.shape, lambda i: (0, 0)),
            pl.BlockSpec(w1.shape, lambda i: (0, 0)),
            pl.BlockSpec(b1.shape, lambda i: (0, 0)),
            pl.BlockSpec(w2.shape, lambda i: (0, 0)),
            pl.BlockSpec(b2.shape, lambda i: (0, 0)),
        ],
        out_specs=pl.BlockSpec((1, d_out, nb * hw), lambda i: (i, 0, 0)),
        compiler_params=pltpu.CompilerParams(
            dimension_semantics=("parallel",)),
    )(x, w0.astype(bf), b0, w1.astype(bf), b1, w2.astype(bf), b2)

    # layout plumbing only: (g, d_out, nb, ho, wo) -> NCHW
    out = out.reshape(g, d_out, nb, ho, wo)
    out = jnp.transpose(out, (0, 2, 1, 3, 4)).reshape(n, d_out, ho, wo)
    return out


# ------------------------- pure-JAX reference check ---------------------------

def _ref_conv_layer(x, prm, k, s, p, eps=1e-5):
    xp = jnp.pad(x, ((0, 0), (0, 0), (p, p), (p, p)), mode="reflect")
    y = jax.lax.conv_general_dilated(
        xp, prm["w"], (s, s), "VALID",
        dimension_numbers=("NCHW", "OIHW", "NCHW"))
    y = y + prm["b"][None, :, None, None]
    sc = (prm["gamma"] / jnp.sqrt(prm["var"] + eps))[None, :, None, None]
    y = (y - prm["mean"][None, :, None, None]) * sc + prm["beta"][None, :, None, None]
    return jnp.maximum(y, 0.0)


def _ref_forward(x, params, k, s, p):
    d = _ref_conv_layer(x, params["down"], k, s, p)
    c1 = _ref_conv_layer(d, params["conv1"], 3, 1, 1)
    c2 = _ref_conv_layer(c1, params["conv2"], 3, 1, 1)
    return c1 + c2


# ----------------------------------- main -------------------------------------

if __name__ == "__main__":
    key = jax.random.PRNGKey(0)
    kx, k0, k1, k2 = jax.random.split(key, 4)

    d_in, d_out = 4, 8
    k, s, p = 3, 2, 1                      # down-conv: 16x16 -> 8x8
    # batch 4 -> Nb=2 images per grid step (M=128, lane-dense 128-wide stores)
    # while the grid stays length 2 (both v7x TensorCores busy).
    x = jax.random.normal(kx, (4, d_in, 16, 16), jnp.float32)   # NCHW like PyTorch

    params = {
        "down":  init_conv_bn(k0, d_in, d_in, k),
        "conv1": init_conv_bn(k1, d_in, d_out, 3),
        "conv2": init_conv_bn(k2, d_out, d_out, 3),
    }

    fwd = jax.jit(down_conv_block_forward, static_argnums=(2, 3, 4))
    out = jax.block_until_ready(fwd(x, params, k, s, p))

    ref = _ref_forward(x, params, k, s, p)
    assert out.shape == ref.shape, (out.shape, ref.shape)
    max_err = float(jnp.max(jnp.abs(out - ref)))
    # bf16 MXU operands (f32 accumulation) -> loosened, scale-aware tolerance
    tol = 5e-2 * max(1.0, float(jnp.max(jnp.abs(ref))))
    if max_err > tol:
        raise AssertionError(f"mismatch vs reference: max abs err {max_err} (tol {tol})")

    print("KERNEL_OK")
</pallas_src>

<mosaic_0001>
module attributes {stable_mosaic.version = 11 : i64} {
  func.func @kernel(%arg0: i32, %arg1: memref<2x16x16x4xf32, #tpu.memory_space<vmem>>, %arg2: memref<36x4xbf16, #tpu.memory_space<vmem>>, %arg3: memref<1x4xf32, #tpu.memory_space<vmem>>, %arg4: memref<36x8xbf16, #tpu.memory_space<vmem>>, %arg5: memref<1x8xf32, #tpu.memory_space<vmem>>, %arg6: memref<72x8xbf16, #tpu.memory_space<vmem>>, %arg7: memref<1x8xf32, #tpu.memory_space<vmem>>, %arg8: memref<1x8x128xf32, #tpu.memory_space<vmem>>) attributes {dimension_semantics = [#tpu.dimension_semantics<parallel>], iteration_bounds = array<i64: 2>, scalar_prefetch = 0 : i64, scratch_operands = 0 : i64, tpu.core_type = #tpu.core_type<tc>, window_params = [{transform_indices = @transform_0, window_bounds = array<i64: 2, 16, 16, 4>}, {pipeline_mode = #tpu.pipeline_mode<synchronous>, transform_indices = @transform_1, window_bounds = array<i64: 36, 4>}, {pipeline_mode = #tpu.pipeline_mode<synchronous>, transform_indices = @transform_2, window_bounds = array<i64: 1, 4>}, {pipeline_mode = #tpu.pipeline_mode<synchronous>, transform_indices = @transform_3, window_bounds = array<i64: 36, 8>}, {pipeline_mode = #tpu.pipeline_mode<synchronous>, transform_indices = @transform_4, window_bounds = array<i64: 1, 8>}, {pipeline_mode = #tpu.pipeline_mode<synchronous>, transform_indices = @transform_5, window_bounds = array<i64: 72, 8>}, {pipeline_mode = #tpu.pipeline_mode<synchronous>, transform_indices = @transform_6, window_bounds = array<i64: 1, 8>}, {transform_indices = @transform_7, window_bounds = array<i64: 1, 8, 128>}]} {
    %c0 = arith.constant 0 : index
    %c0_0 = arith.constant 0 : index
    %c0_1 = arith.constant 0 : index
    %c0_2 = arith.constant 0 : index
    %0 = vector.load %arg1[%c0, %c0_0, %c0_1, %c0_2] : memref<2x16x16x4xf32, #tpu.memory_space<vmem>>, vector<1x16x16x4xf32>
    %1 = vector.shape_cast %0 : vector<1x16x16x4xf32> to vector<16x16x4xf32>
    %2 = vector.extract_strided_slice %1 {offsets = [1, 0, 0], sizes = [1, 16, 4], strides = [1, 1, 1]} : vector<16x16x4xf32> to vector<1x16x4xf32>
    %3 = vector.extract_strided_slice %1 {offsets = [14, 0, 0], sizes = [1, 16, 4], strides = [1, 1, 1]} : vector<16x16x4xf32> to vector<1x16x4xf32>
    %4 = tpu.concatenate %2, %1, %3 in 0 : vector<1x16x4xf32>, vector<16x16x4xf32>, vector<1x16x4xf32> -> vector<18x16x4xf32>
    %5 = vector.extract_strided_slice %4 {offsets = [0, 1, 0], sizes = [18, 1, 4], strides = [1, 1, 1]} : vector<18x16x4xf32> to vector<18x1x4xf32>
    %6 = vector.extract_strided_slice %4 {offsets = [0, 14, 0], sizes = [18, 1, 4], strides = [1, 1, 1]} : vector<18x16x4xf32> to vector<18x1x4xf32>
    %7 = tpu.concatenate %5, %4, %6 in 1 : vector<18x1x4xf32>, vector<18x16x4xf32>, vector<18x1x4xf32> -> vector<18x18x4xf32>
    %8 = vector.extract_strided_slice %7 {offsets = [0, 0, 0], sizes = [16, 18, 4], strides = [1, 1, 1]} : vector<18x18x4xf32> to vector<16x18x4xf32>
    %9 = vector.shape_cast %8 : vector<16x18x4xf32> to vector<8x2x18x4xf32>
    %10 = vector.extract_strided_slice %9 {offsets = [0, 0, 0, 0], sizes = [8, 1, 18, 4], strides = [1, 1, 1, 1]} : vector<8x2x18x4xf32> to vector<8x1x18x4xf32>
    %11 = vector.shape_cast %10 : vector<8x1x18x4xf32> to vector<8x18x4xf32>
    %12 = vector.extract_strided_slice %11 {offsets = [0, 0, 0], sizes = [8, 16, 4], strides = [1, 1, 1]} : vector<8x18x4xf32> to vector<8x16x4xf32>
    %13 = vector.shape_cast %12 : vector<8x16x4xf32> to vector<8x8x2x4xf32>
    %14 = vector.extract_strided_slice %13 {offsets = [0, 0, 0, 0], sizes = [8, 8, 1, 4], strides = [1, 1, 1, 1]} : vector<8x8x2x4xf32> to vector<8x8x1x4xf32>
    %15 = vector.shape_cast %14 : vector<8x8x1x4xf32> to vector<8x8x4xf32>
    %16 = vector.extract_strided_slice %11 {offsets = [0, 1, 0], sizes = [8, 16, 4], strides = [1, 1, 1]} : vector<8x18x4xf32> to vector<8x16x4xf32>
    %17 = vector.shape_cast %16 : vector<8x16x4xf32> to vector<8x8x2x4xf32>
    %18 = vector.extract_strided_slice %17 {offsets = [0, 0, 0, 0], sizes = [8, 8, 1, 4], strides = [1, 1, 1, 1]} : vector<8x8x2x4xf32> to vector<8x8x1x4xf32>
    %19 = vector.shape_cast %18 : vector<8x8x1x4xf32> to vector<8x8x4xf32>
    %20 = vector.extract_strided_slice %11 {offsets = [0, 2, 0], sizes = [8, 16, 4], strides = [1, 1, 1]} : vector<8x18x4xf32> to vector<8x16x4xf32>
    %21 = vector.shape_cast %20 : vector<8x16x4xf32> to vector<8x8x2x4xf32>
    %22 = vector.extract_strided_slice %21 {offsets = [0, 0, 0, 0], sizes = [8, 8, 1, 4], strides = [1, 1, 1, 1]} : vector<8x8x2x4xf32> to vector<8x8x1x4xf32>
    %23 = vector.shape_cast %22 : vector<8x8x1x4xf32> to vector<8x8x4xf32>
    %24 = vector.extract_strided_slice %7 {offsets = [1, 0, 0], sizes = [16, 18, 4], strides = [1, 1, 1]} : vector<18x18x4xf32> to vector<16x18x4xf32>
    %25 = vector.shape_cast %24 : vector<16x18x4xf32> to vector<8x2x18x4xf32>
    %26 = vector.extract_strided_slice %25 {offsets = [0, 0, 0, 0], sizes = [8, 1, 18, 4], strides = [1, 1, 1, 1]} : vector<8x2x18x4xf32> to vector<8x1x18x4xf32>
    %27 = vector.shape_cast %26 : vector<8x1x18x4xf32> to vector<8x18x4xf32>
    %28 = vector.extract_strided_slice %27 {offsets = [0, 0, 0], sizes = [8, 16, 4], strides = [1, 1, 1]} : vector<8x18x4xf32> to vector<8x16x4xf32>
    %29 = vector.shape_cast %28 : vector<8x16x4xf32> to vector<8x8x2x4xf32>
    %30 = vector.extract_strided_slice %29 {offsets = [0, 0, 0, 0], sizes = [8, 8, 1, 4], strides = [1, 1, 1, 1]} : vector<8x8x2x4xf32> to vector<8x8x1x4xf32>
    %31 = vector.shape_cast %30 : vector<8x8x1x4xf32> to vector<8x8x4xf32>
    %32 = vector.extract_strided_slice %27 {offsets = [0, 1, 0], sizes = [8, 16, 4], strides = [1, 1, 1]} : vector<8x18x4xf32> to vector<8x16x4xf32>
    %33 = vector.shape_cast %32 : vector<8x16x4xf32> to vector<8x8x2x4xf32>
    %34 = vector.extract_strided_slice %33 {offsets = [0, 0, 0, 0], sizes = [8, 8, 1, 4], strides = [1, 1, 1, 1]} : vector<8x8x2x4xf32> to vector<8x8x1x4xf32>
    %35 = vector.shape_cast %34 : vector<8x8x1x4xf32> to vector<8x8x4xf32>
    %36 = vector.extract_strided_slice %27 {offsets = [0, 2, 0], sizes = [8, 16, 4], strides = [1, 1, 1]} : vector<8x18x4xf32> to vector<8x16x4xf32>
    %37 = vector.shape_cast %36 : vector<8x16x4xf32> to vector<8x8x2x4xf32>
    %38 = vector.extract_strided_slice %37 {offsets = [0, 0, 0, 0], sizes = [8, 8, 1, 4], strides = [1, 1, 1, 1]} : vector<8x8x2x4xf32> to vector<8x8x1x4xf32>
    %39 = vector.shape_cast %38 : vector<8x8x1x4xf32> to vector<8x8x4xf32>
    %40 = vector.extract_strided_slice %7 {offsets = [2, 0, 0], sizes = [16, 18, 4], strides = [1, 1, 1]} : vector<18x18x4xf32> to vector<16x18x4xf32>
    %41 = vector.shape_cast %40 : vector<16x18x4xf32> to vector<8x2x18x4xf32>
    %42 = vector.extract_strided_slice %41 {offsets = [0, 0, 0, 0], sizes = [8, 1, 18, 4], strides = [1, 1, 1, 1]} : vector<8x2x18x4xf32> to vector<8x1x18x4xf32>
    %43 = vector.shape_cast %42 : vector<8x1x18x4xf32> to vector<8x18x4xf32>
    %44 = vector.extract_strided_slice %43 {offsets = [0, 0, 0], sizes = [8, 16, 4], strides = [1, 1, 1]} : vector<8x18x4xf32> to vector<8x16x4xf32>
    %45 = vector.shape_cast %44 : vector<8x16x4xf32> to vector<8x8x2x4xf32>
    %46 = vector.extract_strided_slice %45 {offsets = [0, 0, 0, 0], sizes = [8, 8, 1, 4], strides = [1, 1, 1, 1]} : vector<8x8x2x4xf32> to vector<8x8x1x4xf32>
    %47 = vector.shape_cast %46 : vector<8x8x1x4xf32> to vector<8x8x4xf32>
    %48 = vector.extract_strided_slice %43 {offsets = [0, 1, 0], sizes = [8, 16, 4], strides = [1, 1, 1]} : vector<8x18x4xf32> to vector<8x16x4xf32>
    %49 = vector.shape_cast %48 : vector<8x16x4xf32> to vector<8x8x2x4xf32>
    %50 = vector.extract_strided_slice %49 {offsets = [0, 0, 0, 0], sizes = [8, 8, 1, 4], strides = [1, 1, 1, 1]} : vector<8x8x2x4xf32> to vector<8x8x1x4xf32>
    %51 = vector.shape_cast %50 : vector<8x8x1x4xf32> to vector<8x8x4xf32>
    %52 = vector.extract_strided_slice %43 {offsets = [0, 2, 0], sizes = [8, 16, 4], strides = [1, 1, 1]} : vector<8x18x4xf32> to vector<8x16x4xf32>
    %53 = vector.shape_cast %52 : vector<8x16x4xf32> to vector<8x8x2x4xf32>
    %54 = vector.extract_strided_slice %53 {offsets = [0, 0, 0, 0], sizes = [8, 8, 1, 4], strides = [1, 1, 1, 1]} : vector<8x8x2x4xf32> to vector<8x8x1x4xf32>
    %55 = vector.shape_cast %54 : vector<8x8x1x4xf32> to vector<8x8x4xf32>
    %56 = tpu.concatenate %15, %19, %23, %31, %35, %39, %47, %51, %55 in 2 : vector<8x8x4xf32>, vector<8x8x4xf32>, vector<8x8x4xf32>, vector<8x8x4xf32>, vector<8x8x4xf32>, vector<8x8x4xf32>, vector<8x8x4xf32>, vector<8x8x4xf32>, vector<8x8x4xf32> -> vector<8x8x36xf32>
    %57 = vector.shape_cast %56 : vector<8x8x36xf32> to vector<64x36xf32>
    %c1 = arith.constant 1 : index
    %c0_3 = arith.constant 0 : index
    %c0_4 = arith.constant 0 : index
    %c0_5 = arith.constant 0 : index
    %58 = vector.load %arg1[%c1, %c0_3, %c0_4, %c0_5] : memref<2x16x16x4xf32, #tpu.memory_space<vmem>>, vector<1x16x16x4xf32>
    %59 = vector.shape_cast %58 : vector<1x16x16x4xf32> to vector<16x16x4xf32>
    %60 = vector.extract_strided_slice %59 {offsets = [1, 0, 0], sizes = [1, 16, 4], strides = [1, 1, 1]} : vector<16x16x4xf32> to vector<1x16x4xf32>
    %61 = vector.extract_strided_slice %59 {offsets = [14, 0, 0], sizes = [1, 16, 4], strides = [1, 1, 1]} : vector<16x16x4xf32> to vector<1x16x4xf32>
    %62 = tpu.concatenate %60, %59, %61 in 0 : vector<1x16x4xf32>, vector<16x16x4xf32>, vector<1x16x4xf32> -> vector<18x16x4xf32>
    %63 = vector.extract_strided_slice %62 {offsets = [0, 1, 0], sizes = [18, 1, 4], strides = [1, 1, 1]} : vector<18x16x4xf32> to vector<18x1x4xf32>
    %64 = vector.extract_strided_slice %62 {offsets = [0, 14, 0], sizes = [18, 1, 4], strides = [1, 1, 1]} : vector<18x16x4xf32> to vector<18x1x4xf32>
    %65 = tpu.concatenate %63, %62, %64 in 1 : vector<18x1x4xf32>, vector<18x16x4xf32>, vector<18x1x4xf32> -> vector<18x18x4xf32>
    %66 = vector.extract_strided_slice %65 {offsets = [0, 0, 0], sizes = [16, 18, 4], strides = [1, 1, 1]} : vector<18x18x4xf32> to vector<16x18x4xf32>
    %67 = vector.shape_cast %66 : vector<16x18x4xf32> to vector<8x2x18x4xf32>
    %68 = vector.extract_strided_slice %67 {offsets = [0, 0, 0, 0], sizes = [8, 1, 18, 4], strides = [1, 1, 1, 1]} : vector<8x2x18x4xf32> to vector<8x1x18x4xf32>
    %69 = vector.shape_cast %68 : vector<8x1x18x4xf32> to vector<8x18x4xf32>
    %70 = vector.extract_strided_slice %69 {offsets = [0, 0, 0], sizes = [8, 16, 4], strides = [1, 1, 1]} : vector<8x18x4xf32> to vector<8x16x4xf32>
    %71 = vector.shape_cast %70 : vector<8x16x4xf32> to vector<8x8x2x4xf32>
    %72 = vector.extract_strided_slice %71 {offsets = [0, 0, 0, 0], sizes = [8, 8, 1, 4], strides = [1, 1, 1, 1]} : vector<8x8x2x4xf32> to vector<8x8x1x4xf32>
    %73 = vector.shape_cast %72 : vector<8x8x1x4xf32> to vector<8x8x4xf32>
    %74 = vector.extract_strided_slice %69 {offsets = [0, 1, 0], sizes = [8, 16, 4], strides = [1, 1, 1]} : vector<8x18x4xf32> to vector<8x16x4xf32>
    %75 = vector.shape_cast %74 : vector<8x16x4xf32> to vector<8x8x2x4xf32>
    %76 = vector.extract_strided_slice %75 {offsets = [0, 0, 0, 0], sizes = [8, 8, 1, 4], strides = [1, 1, 1, 1]} : vector<8x8x2x4xf32> to vector<8x8x1x4xf32>
    %77 = vector.shape_cast %76 : vector<8x8x1x4xf32> to vector<8x8x4xf32>
    %78 = vector.extract_strided_slice %69 {offsets = [0, 2, 0], sizes = [8, 16, 4], strides = [1, 1, 1]} : vector<8x18x4xf32> to vector<8x16x4xf32>
    %79 = vector.shape_cast %78 : vector<8x16x4xf32> to vector<8x8x2x4xf32>
    %80 = vector.extract_strided_slice %79 {offsets = [0, 0, 0, 0], sizes = [8, 8, 1, 4], strides = [1, 1, 1, 1]} : vector<8x8x2x4xf32> to vector<8x8x1x4xf32>
    %81 = vector.shape_cast %80 : vector<8x8x1x4xf32> to vector<8x8x4xf32>
    %82 = vector.extract_strided_slice %65 {offsets = [1, 0, 0], sizes = [16, 18, 4], strides = [1, 1, 1]} : vector<18x18x4xf32> to vector<16x18x4xf32>
    %83 = vector.shape_cast %82 : vector<16x18x4xf32> to vector<8x2x18x4xf32>
    %84 = vector.extract_strided_slice %83 {offsets = [0, 0, 0, 0], sizes = [8, 1, 18, 4], strides = [1, 1, 1, 1]} : vector<8x2x18x4xf32> to vector<8x1x18x4xf32>
    %85 = vector.shape_cast %84 : vector<8x1x18x4xf32> to vector<8x18x4xf32>
    %86 = vector.extract_strided_slice %85 {offsets = [0, 0, 0], sizes = [8, 16, 4], strides = [1, 1, 1]} : vector<8x18x4xf32> to vector<8x16x4xf32>
    %87 = vector.shape_cast %86 : vector<8x16x4xf32> to vector<8x8x2x4xf32>
    %88 = vector.extract_strided_slice %87 {offsets = [0, 0, 0, 0], sizes = [8, 8, 1, 4], strides = [1, 1, 1, 1]} : vector<8x8x2x4xf32> to vector<8x8x1x4xf32>
    %89 = vector.shape_cast %88 : vector<8x8x1x4xf32> to vector<8x8x4xf32>
    %90 = vector.extract_strided_slice %85 {offsets = [0, 1, 0], sizes = [8, 16, 4], strides = [1, 1, 1]} : vector<8x18x4xf32> to vector<8x16x4xf32>
    %91 = vector.shape_cast %90 : vector<8x16x4xf32> to vector<8x8x2x4xf32>
    %92 = vector.extract_strided_slice %91 {offsets = [0, 0, 0, 0], sizes = [8, 8, 1, 4], strides = [1, 1, 1, 1]} : vector<8x8x2x4xf32> to vector<8x8x1x4xf32>
    %93 = vector.shape_cast %92 : vector<8x8x1x4xf32> to vector<8x8x4xf32>
    %94 = vector.extract_strided_slice %85 {offsets = [0, 2, 0], sizes = [8, 16, 4], strides = [1, 1, 1]} : vector<8x18x4xf32> to vector<8x16x4xf32>
    %95 = vector.shape_cast %94 : vector<8x16x4xf32> to vector<8x8x2x4xf32>
    %96 = vector.extract_strided_slice %95 {offsets = [0, 0, 0, 0], sizes = [8, 8, 1, 4], strides = [1, 1, 1, 1]} : vector<8x8x2x4xf32> to vector<8x8x1x4xf32>
    %97 = vector.shape_cast %96 : vector<8x8x1x4xf32> to vector<8x8x4xf32>
    %98 = vector.extract_strided_slice %65 {offsets = [2, 0, 0], sizes = [16, 18, 4], strides = [1, 1, 1]} : vector<18x18x4xf32> to vector<16x18x4xf32>
    %99 = vector.shape_cast %98 : vector<16x18x4xf32> to vector<8x2x18x4xf32>
    %100 = vector.extract_strided_slice %99 {offsets = [0, 0, 0, 0], sizes = [8, 1, 18, 4], strides = [1, 1, 1, 1]} : vector<8x2x18x4xf32> to vector<8x1x18x4xf32>
    %101 = vector.shape_cast %100 : vector<8x1x18x4xf32> to vector<8x18x4xf32>
    %102 = vector.extract_strided_slice %101 {offsets = [0, 0, 0], sizes = [8, 16, 4], strides = [1, 1, 1]} : vector<8x18x4xf32> to vector<8x16x4xf32>
    %103 = vector.shape_cast %102 : vector<8x16x4xf32> to vector<8x8x2x4xf32>
    %104 = vector.extract_strided_slice %103 {offsets = [0, 0, 0, 0], sizes = [8, 8, 1, 4], strides = [1, 1, 1, 1]} : vector<8x8x2x4xf32> to vector<8x8x1x4xf32>
    %105 = vector.shape_cast %104 : vector<8x8x1x4xf32> to vector<8x8x4xf32>
    %106 = vector.extract_strided_slice %101 {offsets = [0, 1, 0], sizes = [8, 16, 4], strides = [1, 1, 1]} : vector<8x18x4xf32> to vector<8x16x4xf32>
    %107 = vector.shape_cast %106 : vector<8x16x4xf32> to vector<8x8x2x4xf32>
    %108 = vector.extract_strided_slice %107 {offsets = [0, 0, 0, 0], sizes = [8, 8, 1, 4], strides = [1, 1, 1, 1]} : vector<8x8x2x4xf32> to vector<8x8x1x4xf32>
    %109 = vector.shape_cast %108 : vector<8x8x1x4xf32> to vector<8x8x4xf32>
    %110 = vector.extract_strided_slice %101 {offsets = [0, 2, 0], sizes = [8, 16, 4], strides = [1, 1, 1]} : vector<8x18x4xf32> to vector<8x16x4xf32>
    %111 = vector.shape_cast %110 : vector<8x16x4xf32> to vector<8x8x2x4xf32>
    %112 = vector.extract_strided_slice %111 {offsets = [0, 0, 0, 0], sizes = [8, 8, 1, 4], strides = [1, 1, 1, 1]} : vector<8x8x2x4xf32> to vector<8x8x1x4xf32>
    %113 = vector.shape_cast %112 : vector<8x8x1x4xf32> to vector<8x8x4xf32>
    %114 = tpu.concatenate %73, %77, %81, %89, %93, %97, %105, %109, %113 in 2 : vector<8x8x4xf32>, vector<8x8x4xf32>, vector<8x8x4xf32>, vector<8x8x4xf32>, vector<8x8x4xf32>, vector<8x8x4xf32>, vector<8x8x4xf32>, vector<8x8x4xf32>, vector<8x8x4xf32> -> vector<8x8x36xf32>
    %115 = vector.shape_cast %114 : vector<8x8x36xf32> to vector<64x36xf32>
    %116 = tpu.concatenate %57, %115 in 0 : vector<64x36xf32>, vector<64x36xf32> -> vector<128x36xf32>
    %117 = arith.truncf %116 : vector<128x36xf32> to vector<128x36xbf16>
    %c0_6 = arith.constant 0 : index
    %c0_7 = arith.constant 0 : index
    %118 = vector.load %arg2[%c0_6, %c0_7] : memref<36x4xbf16, #tpu.memory_space<vmem>>, vector<36x4xbf16>
    %cst = arith.constant dense<0.000000e+00> : vector<128x4xf32>
    %119 = tpu.matmul %117, %118, %cst {dimension_numbers = #tpu.dot_dimension_numbers<[1], [0], [0], [1], [0, 0, 1, 1], [], []>} : vector<128x36xbf16>, vector<36x4xbf16>, vector<128x4xf32> -> vector<128x4xf32>
    %c0_8 = arith.constant 0 : index
    %c0_9 = arith.constant 0 : index
    %120 = vector.load %arg3[%c0_8, %c0_9] : memref<1x4xf32, #tpu.memory_space<vmem>>, vector<1x4xf32>
    %121 = vector.broadcast %120 : vector<1x4xf32> to vector<128x4xf32>
    %122 = arith.addf %119, %121 : vector<128x4xf32>
    %cst_10 = arith.constant 0.000000e+00 : f32
    %123 = vector.broadcast %cst_10 : f32 to vector<128x4xf32>
    %124 = arith.maximumf %122, %123 : vector<128x4xf32>
    %125 = vector.extract_strided_slice %124 {offsets = [0, 0], sizes = [64, 4], strides = [1, 1]} : vector<128x4xf32> to vector<64x4xf32>
    %126 = vector.shape_cast %125 : vector<64x4xf32> to vector<8x8x4xf32>
    %127 = vector.extract_strided_slice %126 {offsets = [1, 0, 0], sizes = [1, 8, 4], strides = [1, 1, 1]} : vector<8x8x4xf32> to vector<1x8x4xf32>
    %128 = vector.extract_strided_slice %126 {offsets = [6, 0, 0], sizes = [1, 8, 4], strides = [1, 1, 1]} : vector<8x8x4xf32> to vector<1x8x4xf32>
    %129 = tpu.concatenate %127, %126, %128 in 0 : vector<1x8x4xf32>, vector<8x8x4xf32>, vector<1x8x4xf32> -> vector<10x8x4xf32>
    %130 = vector.extract_strided_slice %129 {offsets = [0, 1, 0], sizes = [10, 1, 4], strides = [1, 1, 1]} : vector<10x8x4xf32> to vector<10x1x4xf32>
    %131 = vector.extract_strided_slice %129 {offsets = [0, 6, 0], sizes = [10, 1, 4], strides = [1, 1, 1]} : vector<10x8x4xf32> to vector<10x1x4xf32>
    %132 = tpu.concatenate %130, %129, %131 in 1 : vector<10x1x4xf32>, vector<10x8x4xf32>, vector<10x1x4xf32> -> vector<10x10x4xf32>
    %133 = vector.extract_strided_slice %132 {offsets = [0, 0, 0], sizes = [8, 10, 4], strides = [1, 1, 1]} : vector<10x10x4xf32> to vector<8x10x4xf32>
    %134 = vector.extract_strided_slice %133 {offsets = [0, 0, 0], sizes = [8, 8, 4], strides = [1, 1, 1]} : vector<8x10x4xf32> to vector<8x8x4xf32>
    %135 = vector.extract_strided_slice %133 {offsets = [0, 1, 0], sizes = [8, 8, 4], strides = [1, 1, 1]} : vector<8x10x4xf32> to vector<8x8x4xf32>
    %136 = vector.extract_strided_slice %133 {offsets = [0, 2, 0], sizes = [8, 8, 4], strides = [1, 1, 1]} : vector<8x10x4xf32> to vector<8x8x4xf32>
    %137 = vector.extract_strided_slice %132 {offsets = [1, 0, 0], sizes = [8, 10, 4], strides = [1, 1, 1]} : vector<10x10x4xf32> to vector<8x10x4xf32>
    %138 = vector.extract_strided_slice %137 {offsets = [0, 0, 0], sizes = [8, 8, 4], strides = [1, 1, 1]} : vector<8x10x4xf32> to vector<8x8x4xf32>
    %139 = vector.extract_strided_slice %137 {offsets = [0, 1, 0], sizes = [8, 8, 4], strides = [1, 1, 1]} : vector<8x10x4xf32> to vector<8x8x4xf32>
    %140 = vector.extract_strided_slice %137 {offsets = [0, 2, 0], sizes = [8, 8, 4], strides = [1, 1, 1]} : vector<8x10x4xf32> to vector<8x8x4xf32>
    %141 = vector.extract_strided_slice %132 {offsets = [2, 0, 0], sizes = [8, 10, 4], strides = [1, 1, 1]} : vector<10x10x4xf32> to vector<8x10x4xf32>
    %142 = vector.extract_strided_slice %141 {offsets = [0, 0, 0], sizes = [8, 8, 4], strides = [1, 1, 1]} : vector<8x10x4xf32> to vector<8x8x4xf32>
    %143 = vector.extract_strided_slice %141 {offsets = [0, 1, 0], sizes = [8, 8, 4], strides = [1, 1, 1]} : vector<8x10x4xf32> to vector<8x8x4xf32>
    %144 = vector.extract_strided_slice %141 {offsets = [0, 2, 0], sizes = [8, 8, 4], strides = [1, 1, 1]} : vector<8x10x4xf32> to vector<8x8x4xf32>
    %145 = tpu.concatenate %134, %135, %136, %138, %139, %140, %142, %143, %144 in 2 : vector<8x8x4xf32>, vector<8x8x4xf32>, vector<8x8x4xf32>, vector<8x8x4xf32>, vector<8x8x4xf32>, vector<8x8x4xf32>, vector<8x8x4xf32>, vector<8x8x4xf32>, vector<8x8x4xf32> -> vector<8x8x36xf32>
    %146 = vector.shape_cast %145 : vector<8x8x36xf32> to vector<64x36xf32>
    %147 = vector.extract_strided_slice %124 {offsets = [64, 0], sizes = [64, 4], strides = [1, 1]} : vector<128x4xf32> to vector<64x4xf32>
    %148 = vector.shape_cast %147 : vector<64x4xf32> to vector<8x8x4xf32>
    %149 = vector.extract_strided_slice %148 {offsets = [1, 0, 0], sizes = [1, 8, 4], strides = [1, 1, 1]} : vector<8x8x4xf32> to vector<1x8x4xf32>
    %150 = vector.extract_strided_slice %148 {offsets = [6, 0, 0], sizes = [1, 8, 4], strides = [1, 1, 1]} : vector<8x8x4xf32> to vector<1x8x4xf32>
    %151 = tpu.concatenate %149, %148, %150 in 0 : vector<1x8x4xf32>, vector<8x8x4xf32>, vector<1x8x4xf32> -> vector<10x8x4xf32>
    %152 = vector.extract_strided_slice %151 {offsets = [0, 1, 0], sizes = [10, 1, 4], strides = [1, 1, 1]} : vector<10x8x4xf32> to vector<10x1x4xf32>
    %153 = vector.extract_strided_slice %151 {offsets = [0, 6, 0], sizes = [10, 1, 4], strides = [1, 1, 1]} : vector<10x8x4xf32> to vector<10x1x4xf32>
    %154 = tpu.concatenate %152, %151, %153 in 1 : vector<10x1x4xf32>, vector<10x8x4xf32>, vector<10x1x4xf32> -> vector<10x10x4xf32>
    %155 = vector.extract_strided_slice %154 {offsets = [0, 0, 0], sizes = [8, 10, 4], strides = [1, 1, 1]} : vector<10x10x4xf32> to vector<8x10x4xf32>
    %156 = vector.extract_strided_slice %155 {offsets = [0, 0, 0], sizes = [8, 8, 4], strides = [1, 1, 1]} : vector<8x10x4xf32> to vector<8x8x4xf32>
    %157 = vector.extract_strided_slice %155 {offsets = [0, 1, 0], sizes = [8, 8, 4], strides = [1, 1, 1]} : vector<8x10x4xf32> to vector<8x8x4xf32>
    %158 = vector.extract_strided_slice %155 {offsets = [0, 2, 0], sizes = [8, 8, 4], strides = [1, 1, 1]} : vector<8x10x4xf32> to vector<8x8x4xf32>
    %159 = vector.extract_strided_slice %154 {offsets = [1, 0, 0], sizes = [8, 10, 4], strides = [1, 1, 1]} : vector<10x10x4xf32> to vector<8x10x4xf32>
    %160 = vector.extract_strided_slice %159 {offsets = [0, 0, 0], sizes = [8, 8, 4], strides = [1, 1, 1]} : vector<8x10x4xf32> to vector<8x8x4xf32>
    %161 = vector.extract_strided_slice %159 {offsets = [0, 1, 0], sizes = [8, 8, 4], strides = [1, 1, 1]} : vector<8x10x4xf32> to vector<8x8x4xf32>
    %162 = vector.extract_strided_slice %159 {offsets = [0, 2, 0], sizes = [8, 8, 4], strides = [1, 1, 1]} : vector<8x10x4xf32> to vector<8x8x4xf32>
    %163 = vector.extract_strided_slice %154 {offsets = [2, 0, 0], sizes = [8, 10, 4], strides = [1, 1, 1]} : vector<10x10x4xf32> to vector<8x10x4xf32>
    %164 = vector.extract_strided_slice %163 {offsets = [0, 0, 0], sizes = [8, 8, 4], strides = [1, 1, 1]} : vector<8x10x4xf32> to vector<8x8x4xf32>
    %165 = vector.extract_strided_slice %163 {offsets = [0, 1, 0], sizes = [8, 8, 4], strides = [1, 1, 1]} : vector<8x10x4xf32> to vector<8x8x4xf32>
    %166 = vector.extract_strided_slice %163 {offsets = [0, 2, 0], sizes = [8, 8, 4], strides = [1, 1, 1]} : vector<8x10x4xf32> to vector<8x8x4xf32>
    %167 = tpu.concatenate %156, %157, %158, %160, %161, %162, %164, %165, %166 in 2 : vector<8x8x4xf32>, vector<8x8x4xf32>, vector<8x8x4xf32>, vector<8x8x4xf32>, vector<8x8x4xf32>, vector<8x8x4xf32>, vector<8x8x4xf32>, vector<8x8x4xf32>, vector<8x8x4xf32> -> vector<8x8x36xf32>
    %168 = vector.shape_cast %167 : vector<8x8x36xf32> to vector<64x36xf32>
    %169 = tpu.concatenate %146, %168 in 0 : vector<64x36xf32>, vector<64x36xf32> -> vector<128x36xf32>
    %170 = arith.truncf %169 : vector<128x36xf32> to vector<128x36xbf16>
    %c0_11 = arith.constant 0 : index
    %c0_12 = arith.constant 0 : index
    %171 = vector.load %arg4[%c0_11, %c0_12] : memref<36x8xbf16, #tpu.memory_space<vmem>>, vector<36x8xbf16>
    %cst_13 = arith.constant dense<0.000000e+00> : vector<128x8xf32>
    %172 = tpu.matmul %170, %171, %cst_13 {dimension_numbers = #tpu.dot_dimension_numbers<[1], [0], [0], [1], [0, 0, 1, 1], [], []>} : vector<128x36xbf16>, vector<36x8xbf16>, vector<128x8xf32> -> vector<128x8xf32>
    %c0_14 = arith.constant 0 : index
    %c0_15 = arith.constant 0 : index
    %173 = vector.load %arg5[%c0_14, %c0_15] : memref<1x8xf32, #tpu.memory_space<vmem>>, vector<1x8xf32>
    %174 = vector.broadcast %173 : vector<1x8xf32> to vector<128x8xf32>
    %175 = arith.addf %172, %174 : vector<128x8xf32>
    %cst_16 = arith.constant 0.000000e+00 : f32
    %176 = vector.broadcast %cst_16 : f32 to vector<128x8xf32>
    %177 = arith.maximumf %175, %176 : vector<128x8xf32>
    %178 = vector.extract_strided_slice %177 {offsets = [0, 0], sizes = [64, 8], strides = [1, 1]} : vector<128x8xf32> to vector<64x8xf32>
    %179 = vector.shape_cast %178 : vector<64x8xf32> to vector<8x8x8xf32>
    %180 = vector.extract_strided_slice %179 {offsets = [1, 0, 0], sizes = [1, 8, 8], strides = [1, 1, 1]} : vector<8x8x8xf32> to vector<1x8x8xf32>
    %181 = vector.extract_strided_slice %179 {offsets = [6, 0, 0], sizes = [1, 8, 8], strides = [1, 1, 1]} : vector<8x8x8xf32> to vector<1x8x8xf32>
    %182 = tpu.concatenate %180, %179, %181 in 0 : vector<1x8x8xf32>, vector<8x8x8xf32>, vector<1x8x8xf32> -> vector<10x8x8xf32>
    %183 = vector.extract_strided_slice %182 {offsets = [0, 1, 0], sizes = [10, 1, 8], strides = [1, 1, 1]} : vector<10x8x8xf32> to vector<10x1x8xf32>
    %184 = vector.extract_strided_slice %182 {offsets = [0, 6, 0], sizes = [10, 1, 8], strides = [1, 1, 1]} : vector<10x8x8xf32> to vector<10x1x8xf32>
    %185 = tpu.concatenate %183, %182, %184 in 1 : vector<10x1x8xf32>, vector<10x8x8xf32>, vector<10x1x8xf32> -> vector<10x10x8xf32>
    %186 = vector.extract_strided_slice %185 {offsets = [0, 0, 0], sizes = [8, 10, 8], strides = [1, 1, 1]} : vector<10x10x8xf32> to vector<8x10x8xf32>
    %187 = vector.extract_strided_slice %186 {offsets = [0, 0, 0], sizes = [8, 8, 8], strides = [1, 1, 1]} : vector<8x10x8xf32> to vector<8x8x8xf32>
    %188 = vector.extract_strided_slice %186 {offsets = [0, 1, 0], sizes = [8, 8, 8], strides = [1, 1, 1]} : vector<8x10x8xf32> to vector<8x8x8xf32>
    %189 = vector.extract_strided_slice %186 {offsets = [0, 2, 0], sizes = [8, 8, 8], strides = [1, 1, 1]} : vector<8x10x8xf32> to vector<8x8x8xf32>
    %190 = vector.extract_strided_slice %185 {offsets = [1, 0, 0], sizes = [8, 10, 8], strides = [1, 1, 1]} : vector<10x10x8xf32> to vector<8x10x8xf32>
    %191 = vector.extract_strided_slice %190 {offsets = [0, 0, 0], sizes = [8, 8, 8], strides = [1, 1, 1]} : vector<8x10x8xf32> to vector<8x8x8xf32>
    %192 = vector.extract_strided_slice %190 {offsets = [0, 1, 0], sizes = [8, 8, 8], strides = [1, 1, 1]} : vector<8x10x8xf32> to vector<8x8x8xf32>
    %193 = vector.extract_strided_slice %190 {offsets = [0, 2, 0], sizes = [8, 8, 8], strides = [1, 1, 1]} : vector<8x10x8xf32> to vector<8x8x8xf32>
    %194 = vector.extract_strided_slice %185 {offsets = [2, 0, 0], sizes = [8, 10, 8], strides = [1, 1, 1]} : vector<10x10x8xf32> to vector<8x10x8xf32>
    %195 = vector.extract_strided_slice %194 {offsets = [0, 0, 0], sizes = [8, 8, 8], strides = [1, 1, 1]} : vector<8x10x8xf32> to vector<8x8x8xf32>
    %196 = vector.extract_strided_slice %194 {offsets = [0, 1, 0], sizes = [8, 8, 8], strides = [1, 1, 1]} : vector<8x10x8xf32> to vector<8x8x8xf32>
    %197 = vector.extract_strided_slice %194 {offsets = [0, 2, 0], sizes = [8, 8, 8], strides = [1, 1, 1]} : vector<8x10x8xf32> to vector<8x8x8xf32>
    %198 = tpu.concatenate %187, %188, %189, %191, %192, %193, %195, %196, %197 in 2 : vector<8x8x8xf32>, vector<8x8x8xf32>, vector<8x8x8xf32>, vector<8x8x8xf32>, vector<8x8x8xf32>, vector<8x8x8xf32>, vector<8x8x8xf32>, vector<8x8x8xf32>, vector<8x8x8xf32> -> vector<8x8x72xf32>
    %199 = vector.shape_cast %198 : vector<8x8x72xf32> to vector<64x72xf32>
    %200 = vector.extract_strided_slice %177 {offsets = [64, 0], sizes = [64, 8], strides = [1, 1]} : vector<128x8xf32> to vector<64x8xf32>
    %201 = vector.shape_cast %200 : vector<64x8xf32> to vector<8x8x8xf32>
    %202 = vector.extract_strided_slice %201 {offsets = [1, 0, 0], sizes = [1, 8, 8], strides = [1, 1, 1]} : vector<8x8x8xf32> to vector<1x8x8xf32>
    %203 = vector.extract_strided_slice %201 {offsets = [6, 0, 0], sizes = [1, 8, 8], strides = [1, 1, 1]} : vector<8x8x8xf32> to vector<1x8x8xf32>
    %204 = tpu.concatenate %202, %201, %203 in 0 : vector<1x8x8xf32>, vector<8x8x8xf32>, vector<1x8x8xf32> -> vector<10x8x8xf32>
    %205 = vector.extract_strided_slice %204 {offsets = [0, 1, 0], sizes = [10, 1, 8], strides = [1, 1, 1]} : vector<10x8x8xf32> to vector<10x1x8xf32>
    %206 = vector.extract_strided_slice %204 {offsets = [0, 6, 0], sizes = [10, 1, 8], strides = [1, 1, 1]} : vector<10x8x8xf32> to vector<10x1x8xf32>
    %207 = tpu.concatenate %205, %204, %206 in 1 : vector<10x1x8xf32>, vector<10x8x8xf32>, vector<10x1x8xf32> -> vector<10x10x8xf32>
    %208 = vector.extract_strided_slice %207 {offsets = [0, 0, 0], sizes = [8, 10, 8], strides = [1, 1, 1]} : vector<10x10x8xf32> to vector<8x10x8xf32>
    %209 = vector.extract_strided_slice %208 {offsets = [0, 0, 0], sizes = [8, 8, 8], strides = [1, 1, 1]} : vector<8x10x8xf32> to vector<8x8x8xf32>
    %210 = vector.extract_strided_slice %208 {offsets = [0, 1, 0], sizes = [8, 8, 8], strides = [1, 1, 1]} : vector<8x10x8xf32> to vector<8x8x8xf32>
    %211 = vector.extract_strided_slice %208 {offsets = [0, 2, 0], sizes = [8, 8, 8], strides = [1, 1, 1]} : vector<8x10x8xf32> to vector<8x8x8xf32>
    %212 = vector.extract_strided_slice %207 {offsets = [1, 0, 0], sizes = [8, 10, 8], strides = [1, 1, 1]} : vector<10x10x8xf32> to vector<8x10x8xf32>
    %213 = vector.extract_strided_slice %212 {offsets = [0, 0, 0], sizes = [8, 8, 8], strides = [1, 1, 1]} : vector<8x10x8xf32> to vector<8x8x8xf32>
    %214 = vector.extract_strided_slice %212 {offsets = [0, 1, 0], sizes = [8, 8, 8], strides = [1, 1, 1]} : vector<8x10x8xf32> to vector<8x8x8xf32>
    %215 = vector.extract_strided_slice %212 {offsets = [0, 2, 0], sizes = [8, 8, 8], strides = [1, 1, 1]} : vector<8x10x8xf32> to vector<8x8x8xf32>
    %216 = vector.extract_strided_slice %207 {offsets = [2, 0, 0], sizes = [8, 10, 8], strides = [1, 1, 1]} : vector<10x10x8xf32> to vector<8x10x8xf32>
    %217 = vector.extract_strided_slice %216 {offsets = [0, 0, 0], sizes = [8, 8, 8], strides = [1, 1, 1]} : vector<8x10x8xf32> to vector<8x8x8xf32>
    %218 = vector.extract_strided_slice %216 {offsets = [0, 1, 0], sizes = [8, 8, 8], strides = [1, 1, 1]} : vector<8x10x8xf32> to vector<8x8x8xf32>
    %219 = vector.extract_strided_slice %216 {offsets = [0, 2, 0], sizes = [8, 8, 8], strides = [1, 1, 1]} : vector<8x10x8xf32> to vector<8x8x8xf32>
    %220 = tpu.concatenate %209, %210, %211, %213, %214, %215, %217, %218, %219 in 2 : vector<8x8x8xf32>, vector<8x8x8xf32>, vector<8x8x8xf32>, vector<8x8x8xf32>, vector<8x8x8xf32>, vector<8x8x8xf32>, vector<8x8x8xf32>, vector<8x8x8xf32>, vector<8x8x8xf32> -> vector<8x8x72xf32>
    %221 = vector.shape_cast %220 : vector<8x8x72xf32> to vector<64x72xf32>
    %222 = tpu.concatenate %199, %221 in 0 : vector<64x72xf32>, vector<64x72xf32> -> vector<128x72xf32>
    %223 = arith.truncf %222 : vector<128x72xf32> to vector<128x72xbf16>
    %c0_17 = arith.constant 0 : index
    %c0_18 = arith.constant 0 : index
    %224 = vector.load %arg6[%c0_17, %c0_18] : memref<72x8xbf16, #tpu.memory_space<vmem>>, vector<72x8xbf16>
    %cst_19 = arith.constant dense<0.000000e+00> : vector<128x8xf32>
    %225 = tpu.matmul %223, %224, %cst_19 {dimension_numbers = #tpu.dot_dimension_numbers<[1], [0], [0], [1], [0, 0, 1, 1], [], []>} : vector<128x72xbf16>, vector<72x8xbf16>, vector<128x8xf32> -> vector<128x8xf32>
    %c0_20 = arith.constant 0 : index
    %c0_21 = arith.constant 0 : index
    %226 = vector.load %arg7[%c0_20, %c0_21] : memref<1x8xf32, #tpu.memory_space<vmem>>, vector<1x8xf32>
    %227 = vector.broadcast %226 : vector<1x8xf32> to vector<128x8xf32>
    %228 = arith.addf %225, %227 : vector<128x8xf32>
    %cst_22 = arith.constant 0.000000e+00 : f32
    %229 = vector.broadcast %cst_22 : f32 to vector<128x8xf32>
    %230 = arith.maximumf %228, %229 : vector<128x8xf32>
    %231 = arith.addf %177, %230 : vector<128x8xf32>
    %232 = tpu.transpose %231, [1, 0] : vector<128x8xf32> -> vector<8x128xf32>
    %c0_23 = arith.constant 0 : index
    %c0_24 = arith.constant 0 : index
    %c0_25 = arith.constant 0 : index
    %233 = vector.load %arg8[%c0_23, %c0_24, %c0_25] : memref<1x8x128xf32, #tpu.memory_space<vmem>>, vector<1x8x128xf32>
    %234 = vector.shape_cast %233 : vector<1x8x128xf32> to vector<8x128xf32>
    %235 = vector.shape_cast %232 : vector<8x128xf32> to vector<1x8x128xf32>
    tpu.vector_store %arg8[%c0_23, %c0_24, %c0_25], %235 {strides = array<i32>} : memref<1x8x128xf32, #tpu.memory_space<vmem>>, vector<1x8x128xf32>,
    return
  }
  func.func @transform_0(%arg0: i32) -> (i32, i32, i32, i32) {
    %c0_i32 = arith.constant 0 : i32
    %c0_i32_0 = arith.constant 0 : i32
    %c0_i32_1 = arith.constant 0 : i32
    %c0_i32_2 = arith.constant 0 : i32
    return %arg0, %c0_i32, %c0_i32_0, %c0_i32_1 : i32, i32, i32, i32
  }
  func.func @transform_1(%arg0: i32) -> (i32, i32) {
    %c0_i32 = arith.constant 0 : i32
    %c0_i32_0 = arith.constant 0 : i32
    %c0_i32_1 = arith.constant 0 : i32
    return %c0_i32, %c0_i32_0 : i32, i32
  }
  func.func @transform_2(%arg0: i32) -> (i32, i32) {
    %c0_i32 = arith.constant 0 : i32
    %c0_i32_0 = arith.constant 0 : i32
    %c0_i32_1 = arith.constant 0 : i32
    return %c0_i32, %c0_i32_0 : i32, i32
  }
  func.func @transform_3(%arg0: i32) -> (i32, i32) {
    %c0_i32 = arith.constant 0 : i32
    %c0_i32_0 = arith.constant 0 : i32
    %c0_i32_1 = arith.constant 0 : i32
    return %c0_i32, %c0_i32_0 : i32, i32
  }
  func.func @transform_4(%arg0: i32) -> (i32, i32) {
    %c0_i32 = arith.constant 0 : i32
    %c0_i32_0 = arith.constant 0 : i32
    %c0_i32_1 = arith.constant 0 : i32
    return %c0_i32, %c0_i32_0 : i32, i32
  }
  func.func @transform_5(%arg0: i32) -> (i32, i32) {
    %c0_i32 = arith.constant 0 : i32
    %c0_i32_0 = arith.constant 0 : i32
    %c0_i32_1 = arith.constant 0 : i32
    return %c0_i32, %c0_i32_0 : i32, i32
  }
  func.func @transform_6(%arg0: i32) -> (i32, i32) {
    %c0_i32 = arith.constant 0 : i32
    %c0_i32_0 = arith.constant 0 : i32
    %c0_i32_1 = arith.constant 0 : i32
    return %c0_i32, %c0_i32_0 : i32, i32
  }
  func.func @transform_7(%arg0: i32) -> (i32, i32, i32) {
    %c0_i32 = arith.constant 0 : i32
    %c0_i32_0 = arith.constant 0 : i32
    %c0_i32_1 = arith.constant 0 : i32
    return %arg0, %c0_i32, %c0_i32_0 : i32, i32, i32
  }
}

</mosaic_0001>

<bundles_post_ra>
// kernel: down_conv_block_forward.1
= control target key start
LH: loop header
LB: loop body
LE: loop exit
PB: predicated region body
PF: predicated region fallthrough
CT: control target
= control target key end

     0   :  { %s9686_s24 = smov 0   ;;  %s16445_s0 = inlined_call_operand.vmem [shape: f32[4,16,16,4], index: 0, kind: input, shape index: {}]   ;;  %s16446_s1 = inlined_call_operand.vmem [shape: bf16[36,4], index: 1, kind: input, shape index: {}]   ;;  %s16447_s2 = inlined_call_operand.vmem [shape: f32[1,4], index: 2, kind: input, shape index: {}]   ;;  %s16448_s3 = inlined_call_operand.vmem [shape: bf16[36,8], index: 3, kind: input, shape index: {}]   ;;  %s16449_s4 = inlined_call_operand.vmem [shape: f32[1,8], index: 4, kind: input, shape index: {}]   ;;  %s16450_s5 = inlined_call_operand.vmem [shape: bf16[72,8], index: 5, kind: input, shape index: {}]   ;;  %s16451_s6 = inlined_call_operand.vmem [shape: f32[1,8], index: 6, kind: input, shape index: {}]   ;;  %s16452_s7 = inlined_call_operand.vmem [shape: f32[2,8,128], index: 7, kind: output, shape index: {}]  }
   0x1 LB: > { %s9692_s25 = sadd.s32 4294967295, %s9631_s24   ;;  %p8474_p0 = scmp.ge.s32.totalorder %s9631_s24, 1  ;;  %s9631_s24 = sphi %s9686_s24, %s17_s24  }
   0x2   : > { %p239_p1 = scmp.lt.s32.totalorder %s9631_s24, 3 }
   0x4   : > { %p240_p2 = pnand %p8474_p0, %p239_p1 }
   0x6   : > { %243 = sbr.rel (%p240_p2) target bundleno = 1921 (0x781), region = 48 }
   0xd   : > { %s8475_s26 = sshll.u32 %s9692_s25, 1  ;;  %v535_v0 = vlaneseq  ;;  %v9633_v1 = vmov 1983009808   ;;  %vm379_vm0 = vcmask 1040384   ;;  %vm1842_vm1 = vcmask 1041409   ;;  %s9634_s8 = smov 12  }
   0xe   : > { %p272_p3 = scmp.lt.s32.totalorder %s8475_s26, 3  ;;  %v533_v2 = vunpack.c.l.s4 %v9633_v1  ;;  %vm825_vm2 = vcmask 1042434   ;;  %vm1845_vm3 = vcmask 1043459   ;;  %vm827_vm4 = vcmask 1044484   ;;  %s9635_s9 = smov 24  }
   0xf   : > { %v536_v4 = vshrl.u32 %v535_v0, 7  ;;  %vm1848_vm5 = vcmask 1045509   ;;  %vm829_vm6 = vcmask 1046534   ;;  %vm1851_vm7 = vcmask 1047559   ;;  %s9636_s10 = smov 8   ;;  %vm10570_vm8 = vmor %vm379_vm0, %vm825_vm2  ;;  %s9637_s11 = smov 20  }
  0x10   : > { %s17465_s26 = smov (!%p272_p3, %s8475_s26), 3  ;;  %v534_v3 = vunpack.c.0.s8 %v533_v2  ;;  %vm10604_vm9 = vmor %vm10570_vm8, %vm827_vm4  ;;  %s9638_s12 = smov 32   ;;  %vm3239_vm11 = vcmask 31744   ;;  %vm3247_vm12 = vcmask 64512   ;;  %vm3255_vm13 = vcmask 97280  }
  0x11   : > { %s8583_s27 = sshll.u32 %s17465_s26, 8  ;;  %v9717_v17 = vsub.s32 0, %v536_v4  ;;  %vm10635_vm10 = vmor %vm10604_vm9, %vm829_vm6  ;;  %s9639_s13 = smov 4   ;;  %vm3264_vm14 = vcmask 130048   ;;  %vm3273_vm15 = vcmask 162816   ;;  %vm8251_vm8 = vcmask 1043456  }
  0x12   : > { %s9700_s30 = scalar_lea.vmem %s16445_s0, %s8583_s27  ;;  %v9707_v8 = vsub.s32 %v534_v3, %v536_v4  ;;  %s9640_s14 = smov 16   ;;  %vm7773_vm9 = vcmask 392192  }
  0x13   : > { %v291_v5 = vld [vmem:[%s9700_s30 + $0x40] sm:$0xff]  ;;  %v9704_v6 = vld [vmem:[%s9700_s30 + $0x48] sm:$0xff]  ;;  %s9641_s15 = smov 28   ;;  %s9644_s17 = smov 56  }
  0x14   : > { %v295_v7 = vld [vmem:[%s9700_s30 + $0x60] sm:$0xff]  ;;  %v9710_v9 = vld [vmem:[%s9700_s30 + $0x68] sm:$0xff]  ;;  %v335_v10 = vrot.slane %v291_v5, 1  ;;  %v392_v12 = vrot.slane %v291_v5, 7  ;;  %v16462_v13 = vrot.slane %v9704_v6, 7  ;;  %s9645_s18 = smov 64  }
  0x15   : > { %v337_v11 = vrot.slane %v295_v7, 1  ;;  %v9714_v14 = vld [vmem:[%s9700_s30] sm:$0xff]  ;;  %v398_v15 = vrot.slane %v295_v7, 7  ;;  %v16461_v16 = vrot.slane %v9710_v9, 7  ;;  %p278_p4 = scmp.lt.s32.totalorder %s9692_s25, 1 }
  0x16   : > { %v9720_v18 = vld [vmem:[%s9700_s30 + $0x20] sm:$0xff]  ;;  %v332_v19 = vrot.slane %v9714_v14, 1  ;;  %v394_v20 = vsel %vm379_vm0, %v392_v12, %v16462_v13  ;;  %v496_v21 = vsel %vm379_vm0, %v335_v10, %v392_v12  ;;  %v383_v23 = vrot.slane %v9714_v14, 7 }
  0x17   : > { %v333_v22 = vrot.slane %v9720_v18, 1  ;;  %v400_v24 = vsel %vm379_vm0, %v398_v15, %v16461_v16  ;;  %v498_v25 = vsel %vm379_vm0, %v337_v11, %v398_v15  ;;  %v1082_v26 = vcombine.high %v496_v21, %v496_v21  ;;  %s17467_s25 = smov (!%p278_p4, %s9692_s25), 1 }
  0x18   : > { %v9734_v27 = vrot.slane %v496_v21, %v9707_v8  ;;  %v1099_v28 = vcombine.high %v394_v20, %v394_v20  ;;  %v9737_v29 = vrot.slane %v394_v20, %v9707_v8  ;;  %v1116_v30 = vcombine.high %v498_v25, %v498_v25  ;;  %v9867_v21 = vld [vmem:[%s9700_s30 + $0x8] sm:$0xff] }
  0x19   : > { %v9740_v31 = vrot.slane %v498_v25, %v9707_v8  ;;  %v9743_v32 = vrot.slane %v1082_v26, %v9707_v8  ;;  %v1133_v34 = vcombine.high %v400_v24, %v400_v24  ;;  %v9750_v35 = vrot.slane %v400_v24, %v9707_v8 }
  0x1a   : > { %16756 = vst [vmem:[#allocation2_spill] sm:$0xff] %v9734_v27  ;;  %16757 = vst [vmem:[#allocation3_spill] sm:$0xff] %v9737_v29  ;;  %v9747_v33 = vcombine.high %v9734_v27, %v9734_v27  ;;  %v9753_v36 = vrot.slane %v1099_v28, %v9707_v8  ;;  %v9757_v37 = vcombine.high %v9737_v29, %v9737_v29  ;;  %v16464_v54 = vrot.slane %v9867_v21, 7 }
  0x1b   : > { %16758 = vst [vmem:[#allocation4_spill] sm:$0xff] %v9740_v31  ;;  %16759 = vst [vmem:[#allocation5_spill] sm:$0xff] %v9743_v32  ;;  %v9760_v38 = vrot.slane %v1116_v30, %v9707_v8  ;;  %v9764_v39 = vcombine.high %v9740_v31, %v9740_v31  ;;  %v9768_v40 = vcombine.high %v9743_v32, %v9743_v32  ;;  %v9886_v30 = vld [vmem:[%s9700_s30 + $0x28] sm:$0xff] }
  0x1c   : > { %16760 = vst [vmem:[#allocation6_spill] sm:$0xff] %v9747_v33  ;;  %16761 = vst [vmem:[#allocation7_spill] sm:$0xff] %v9750_v35  ;;  %v9771_v41 = vrot.slane %v1133_v34, %v9707_v8  ;;  %v9775_v42 = vcombine.high %v9750_v35, %v9750_v35  ;;  %v16459_v43 = vrot.slane %v9747_v33, 7  ;;  %v9780_v44 = vcombine.high %v9753_v36, %v9753_v36 }
  0x1d   : > { %16762 = vst [vmem:[#allocation8_spill] sm:$0xff] %v9753_v36  ;;  %16763 = vst [vmem:[#allocation9_spill] sm:$0xff] %v9757_v37  ;;  %v9784_v45 = vcombine.high %v9760_v38, %v9760_v38  ;;  %v16458_v50 = vrot.slane %v9757_v37, 7  ;;  %v16456_v53 = vrot.slane %v9764_v39, 7  ;;  %v2361_v1 = vrot.slane %v9734_v27, %v9717_v17 }
  0x1e   : > { %16764 = vst [vmem:[#allocation10_spill] sm:$0xff] %v9760_v38  ;;  %16765 = vst [vmem:[#allocation11_spill] sm:$0xff] %v9764_v39  ;;  %v9790_v48 = vcombine.high %v9771_v41, %v9771_v41  ;;  %v9794_v49 = vrot.slane %v16459_v43, 2  ;;  %v16457_v52 = vrot.slane %v9780_v44, 7  ;;  %v16454_v58 = vrot.slane %v9775_v42, 7 }
  0x1f   : > { %16766 = vst [vmem:[#allocation12_spill] sm:$0xff] %v9768_v40  ;;  %16767 = vst [vmem:[#allocation13_spill] sm:$0xff] %v9771_v41  ;;  %v16455_v55 = vrot.slane %v9784_v45, 7  ;;  %v9804_v56 = vrot.slane %v16458_v50, 2  ;;  %v9815_v61 = vrot.slane %v16456_v53, 2  ;;  %v9830_v2 = vrot.slane %v9747_v33, %v9717_v17 }
  0x20   : > { %16768 = vst [vmem:[#allocation14_spill] sm:$0xff] %v9775_v42  ;;  %16769 = vst [vmem:[#allocation15_spill] sm:$0xff] %v9780_v44  ;;  %v9811_v60 = vrot.slane %v16457_v52, 2  ;;  %v16453_v63 = vrot.slane %v9790_v48, 7  ;;  %v9824_v0 = vrot.slane %v16454_v58, 2  ;;  %v9834_v3 = vrot.slane %v9743_v32, %v9717_v17 }
  0x21   : > { %16770 = vst [vmem:[#allocation16_spill] sm:$0xff] %v9784_v45  ;;  %16771 = vst [vmem:[#allocation17_spill] sm:$0xff] %v9790_v48  ;;  %v9819_v62 = vrot.slane %v16455_v55, 2  ;;  %v9842_v5 = vrot.slane %v9768_v40, %v9717_v17  ;;  %v9846_v7 = vrot.slane %v9737_v29, %v9717_v17  ;;  %v9850_v10 = vrot.slane %v9757_v37, %v9717_v17  ;;  %v10284_v29 = vld [vmem:[%s9700_s30 + $0x18] sm:$0xff] }
  0x22   : > { %16772 = vst [vmem:[#allocation18_spill] sm:$0xff] %v9794_v49  ;;  %16773 = vst [vmem:[#allocation19_spill] sm:$0xff] %v9804_v56  ;;  %v9838_v4 = vrot.slane %v16453_v63, 2  ;;  %v9854_v11 = vrot.slane %v9753_v36, %v9717_v17  ;;  %v9858_v12 = vrot.slane %v9780_v44, %v9717_v17  ;;  %v2393_v15 = vrot.slane %v9740_v31, %v9717_v17 }
  0x23   : > { %16774 = vst [vmem:[#allocation20_spill] sm:$0xff] %v9811_v60  ;;  %16775 = vst [vmem:[#allocation21_spill] sm:$0xff] %v9815_v61  ;;  %v9864_v20 = vrot.slane %v9764_v39, %v9717_v17  ;;  %v9871_v24 = vrot.slane %v9760_v38, %v9717_v17  ;;  %v9875_v25 = vrot.slane %v9784_v45, %v9717_v17  ;;  %v16460_v53 = vrot.slane %v9768_v40, 7 }
  0x24   : > { %16776 = vst [vmem:[#allocation22_spill] sm:$0xff] %v9819_v62  ;;  %16777 = vst [vmem:[#allocation23_spill] sm:$0xff] %v9824_v0  ;;  %v9879_v26 = vrot.slane %v9750_v35, %v9717_v17  ;;  %v9883_v28 = vrot.slane %v9775_v42, %v9717_v17  ;;  %v9890_v34 = vrot.slane %v9771_v41, %v9717_v17 }
  0x25   : > { %16778 = vst [vmem:[#allocation24_spill] sm:$0xff] %v9838_v4  ;;  %16779 = vst [vmem:[#allocation25_spill] sm:$0xff] %v9842_v5  ;;  %v9894_v63 = vrot.slane %v9790_v48, %v9717_v17  ;;  %v2564_v58 = vsel %vm1842_vm1, %v9830_v2, %v2361_v1  ;;  %v2571_v55 = vsel %vm1842_vm1, %v9864_v20, %v2393_v15  ;;  %v386_v1 = vrot.slane %v9720_v18, 7 }
  0x26   : > { %16780 = vst [vmem:[#allocation26_spill] sm:$0xff] %v9846_v7  ;;  %16781 = vst [vmem:[#allocation27_spill] sm:$0xff] %v9850_v10  ;;  %v2565_v59 = vsel %vm825_vm2, %v9834_v3, %v2564_v58  ;;  %v2572_v57 = vsel %vm825_vm2, %v9871_v24, %v2571_v55  ;;  %v16463_v15 = vrot.slane %v9886_v30, 7  ;;  %v9918_v51 = vrot.slane %v16460_v53, 2 }
  0x27   : > { %16782 = vst [vmem:[#allocation28_spill] sm:$0xff] %v9854_v11  ;;  %16783 = vst [vmem:[#allocation29_spill] sm:$0xff] %v9858_v12  ;;  %v2566_v52 = vsel %vm1845_vm3, %v9842_v5, %v2565_v59  ;;  %v2573_v50 = vsel %vm1845_vm3, %v9875_v25, %v2572_v57  ;;  %v385_v57 = vsel %vm379_vm0, %v383_v23, %v16464_v54 }
  0x28   : > { %16784 = vst [vmem:[#allocation30_spill] sm:$0xff] %v9864_v20  ;;  %16785 = vst [vmem:[#allocation31_spill] sm:$0xff] %v9871_v24  ;;  %v2567_v58 = vsel %vm827_vm4, %v9846_v7, %v2566_v52  ;;  %v2574_v55 = vsel %vm827_vm4, %v9879_v26, %v2573_v50  ;;  %v388_v50 = vsel %vm379_vm0, %v386_v1, %v16463_v15 }
  0x29   : > { %16786 = vst [vmem:[#allocation32_spill] sm:$0xff] %v9875_v25  ;;  %16787 = vst [vmem:[#allocation33_spill] sm:$0xff] %v9879_v26  ;;  %v2568_v59 = vsel %vm1848_vm5, %v9850_v10, %v2567_v58  ;;  %v2575_v43 = vsel %vm1848_vm5, %v9883_v28, %v2574_v55  ;;  %v493_v52 = vsel %vm379_vm0, %v332_v19, %v383_v23 }
  0x2a   : > { %16788 = vst [vmem:[#allocation34_spill] sm:$0xff] %v9883_v28  ;;  %16789 = vst [vmem:[#allocation35_spill] sm:$0xff] %v9890_v34  ;;  %v2569_v53 = vsel %vm829_vm6, %v9854_v11, %v2568_v59  ;;  %v2576_v47 = vsel %vm829_vm6, %v9890_v34, %v2575_v43  ;;  %v494_v58 = vsel %vm379_vm0, %v333_v22, %v386_v1 }
  0x2b   : > { %16790 = vst [vmem:[#allocation36_spill] sm:$0xff] %v9894_v63  ;;  %16791 = vst [vmem:[#allocation37_spill] sm:$0xff] %v9918_v51  ;;  %v1014_v55 = vcombine.high %v493_v52, %v493_v52  ;;  %v2570_v46 = vsel %vm1851_vm7, %v9858_v12, %v2569_v53  ;;  %v2577_v16 = vsel %vm1851_vm7, %v9894_v63, %v2576_v47 }
  0x2c   : > { %v9949_v14 = vrot.slane %v493_v52, %v9707_v8  ;;  %v1031_v19 = vcombine.high %v385_v57, %v385_v57  ;;  %v8729_v23 = vpack.i.bf16 %v2577_v16, %v2570_v46  ;;  %v9955_v43 = vrot.slane %v385_v57, %v9707_v8 }
  0x2d   : > { %v9952_v59 = vrot.slane %v1014_v55, %v9707_v8  ;;  %v1048_v18 = vcombine.high %v494_v58, %v494_v58  ;;  %v9965_v47 = vrot.slane %v494_v58, %v9707_v8  ;;  %v1065_v1 = vcombine.high %v388_v50, %v388_v50 }
  0x2e   : > { %16792 = vst [vmem:[#allocation38_spill] sm:$0xff] %v9949_v14  ;;  %16794 = vst [vmem:[#allocation40_spill] sm:$0xff] %v9955_v43  ;;  %v9959_v22 = vcombine.high %v9949_v14, %v9949_v14  ;;  %v9962_v53 = vrot.slane %v1031_v19, %v9707_v8  ;;  %8730 = vrot.lane.b32.xlu1 %v8729_v23, %s9634_s8  ;;  %v9974_v46 = vcombine.high %v9955_v43, %v9955_v43 }
  0x2f   : > { %16793 = vst [vmem:[#allocation39_spill] sm:$0xff] %v9952_v59  ;;  %16797 = vst [vmem:[#allocation43_spill] sm:$0xff] %v9965_v47  ;;  %v9970_v16 = vcombine.high %v9952_v59, %v9952_v59  ;;  %v9977_v57 = vrot.slane %v1048_v18, %v9707_v8  ;;  %v9980_v52 = vrot.slane %v388_v50, %v9707_v8 }
  0x30   : > { %16795 = vst [vmem:[#allocation41_spill] sm:$0xff] %v9959_v22  ;;  %16796 = vst [vmem:[#allocation42_spill] sm:$0xff] %v9962_v53  ;;  %v9984_v58 = vcombine.high %v9962_v53, %v9962_v53  ;;  %v9988_v55 = vcombine.high %v9965_v47, %v9965_v47  ;;  %v9991_v19 = vrot.slane %v1065_v1, %v9707_v8  ;;  %v16470_v23 = vrot.slane %v9959_v22, 7 }
  0x31   : > { %16798 = vst [vmem:[#allocation44_spill] sm:$0xff] %v9970_v16  ;;  %16799 = vst [vmem:[#allocation45_spill] sm:$0xff] %v9974_v46  ;;  %v9996_v18 = vcombine.high %v9977_v57, %v9977_v57  ;;  %v10000_v50 = vcombine.high %v9980_v52, %v9980_v52  ;;  %v16471_v48 = vrot.slane %v9974_v46, 7 }
  0x32   : > { %16800 = vst [vmem:[#allocation46_spill] sm:$0xff] %v9977_v57  ;;  %16801 = vst [vmem:[#allocation47_spill] sm:$0xff] %v9980_v52  ;;  %v10006_v54 = vcombine.high %v9991_v19, %v9991_v19  ;;  %v10010_v1 = vrot.slane %v16470_v23, 2  ;;  %v16472_v45 = vrot.slane %v9984_v58, 7  ;;  %v16473_v4 = vrot.slane %v9988_v55, 7 }
  0x33   : > { %16802 = vst [vmem:[#allocation48_spill] sm:$0xff] %v9984_v58  ;;  %16803 = vst [vmem:[#allocation49_spill] sm:$0xff] %v9988_v55  ;;  %v16474_v15 = vrot.slane %v9996_v18, 7  ;;  %v10020_v0 = vrot.slane %v16471_v48, 2  ;;  %v16475_v23 = vrot.slane %v10000_v50, 7 }
  0x34   : > { %16804 = vst [vmem:[#allocation50_spill] sm:$0xff] %v9991_v19  ;;  %16805 = vst [vmem:[#allocation51_spill] sm:$0xff] %v9996_v18  ;;  %v10027_v42 = vrot.slane %v16472_v45, 2  ;;  %v10031_v13 = vrot.slane %v16473_v4, 2  ;;  %v16476_v48 = vrot.slane %v10006_v54, 7  ;;  %v10046_v45 = vrot.slane %v9959_v22, %v9717_v17  ;;  %v297_v22 = vld [vmem:[%s9700_s30 + $0x70] sm:$0xff] }
  0x35   : > { %16806 = vst [vmem:[#allocation52_spill] sm:$0xff] %v10000_v50  ;;  %16807 = vst [vmem:[#allocation53_spill] sm:$0xff] %v10006_v54  ;;  %v10035_v62 = vrot.slane %v16474_v15, 2  ;;  %v10040_v41 = vrot.slane %v16475_v23, 2  ;;  %v10050_v4 = vrot.slane %v9952_v59, %v9717_v17  ;;  %v10058_v23 = vrot.slane %v9970_v16, %v9717_v17 }
  0x36   : > { %16808 = vst [vmem:[#allocation54_spill] sm:$0xff] %v10010_v1  ;;  %16809 = vst [vmem:[#allocation55_spill] sm:$0xff] %v10020_v0  ;;  %v2297_v1 = vrot.slane %v9949_v14, %v9717_v17  ;;  %v10054_v15 = vrot.slane %v16476_v48, 2  ;;  %v10074_v48 = vrot.slane %v9984_v58, %v9717_v17  ;;  %v293_v0 = vld [vmem:[%s9700_s30 + $0x50] sm:$0xff]  ;;  %v10093_v58 = vrot.slane %v9980_v52, %v9717_v17  ;;  %v10121_v14 = vld [vmem:[%s9700_s30 + $0x78] sm:$0xff] }
  0x37   : > { %16810 = vst [vmem:[#allocation56_spill] sm:$0xff] %v10027_v42  ;;  %16811 = vst [vmem:[#allocation57_spill] sm:$0xff] %v10031_v13  ;;  %v10070_v13 = vrot.slane %v9962_v53, %v9717_v17  ;;  %v10080_v42 = vrot.slane %v9988_v55, %v9717_v17  ;;  %v10089_v53 = vrot.slane %v9996_v18, %v9717_v17  ;;  %v395_v39 = vrot.slane %v293_v0, 7 }
  0x38   : > { %16812 = vst [vmem:[#allocation58_spill] sm:$0xff] %v10035_v62  ;;  %16813 = vst [vmem:[#allocation59_spill] sm:$0xff] %v10040_v41  ;;  %v10062_v41 = vrot.slane %v9955_v43, %v9717_v17  ;;  %v10066_v62 = vrot.slane %v9974_v46, %v9717_v17  ;;  %v10085_v46 = vrot.slane %v9977_v57, %v9717_v17  ;;  %v10113_v43 = vld [vmem:[%s9700_s30 + $0x58] sm:$0xff]  ;;  %v401_v44 = vrot.slane %v297_v22, 7 }
  0x39   : > { %16814 = vst [vmem:[#allocation60_spill] sm:$0xff] %v10054_v15  ;;  %v2329_v15 = vrot.slane %v9965_v47, %v9717_v17  ;;  %v10097_v47 = vrot.slane %v10000_v50, %v9717_v17  ;;  %v10102_v55 = vrot.slane %v9991_v19, %v9717_v17  ;;  %v10106_v57 = vrot.slane %v10006_v54, %v9717_v17 }
  0x3a   : > { %v2550_v18 = vsel %vm1842_vm1, %v10046_v45, %v2297_v1  ;;  %v16504_v19 = vrot.slane %v9970_v16, 7  ;;  %v336_v54 = vrot.slane %v293_v0, 1  ;;  %v16507_v38 = vrot.slane %v10113_v43, 7 }
  0x3b   : > { %v2557_v52 = vsel %vm1842_vm1, %v10080_v42, %v2329_v15  ;;  %v2551_v50 = vsel %vm825_vm2, %v10050_v4, %v2550_v18  ;;  %v338_v15 = vrot.slane %v297_v22, 1  ;;  %v16508_v0 = vrot.slane %v10121_v14, 7 }
  0x3c   : > { %v2558_v59 = vsel %vm825_vm2, %v10085_v46, %v2557_v52  ;;  %v2552_v35 = vsel %vm1845_vm3, %v10058_v23, %v2551_v50  ;;  %v10133_v52 = vrot.slane %v16504_v19, 2  ;;  %v397_v19 = vsel %vm379_vm0, %v395_v39, %v16507_v38 }
  0x3d   : > { %v2559_v1 = vsel %vm1845_vm3, %v10089_v53, %v2558_v59  ;;  %v2553_v61 = vsel %vm827_vm4, %v10062_v41, %v2552_v35  ;;  %v497_v16 = vsel %vm379_vm0, %v336_v54, %v395_v39  ;;  %v616_v38 = vcombine.high %v397_v19, %v397_v19 }
  0x3e   : > { %v2560_v18 = vsel %vm827_vm4, %v10093_v58, %v2559_v1  ;;  %16815 = vst [vmem:[#allocation61_spill] sm:$0xff] %v10133_v52  ;;  %v2554_v50 = vsel %vm1848_vm5, %v10066_v62, %v2553_v61  ;;  %v10158_v31 = vrot.slane %v497_v16, %v9707_v8  ;;  %v10161_v39 = vrot.slane %v397_v19, %v9707_v8 }
  0x3f   : > { %v2561_v59 = vsel %vm1848_vm5, %v10097_v47, %v2560_v18  ;;  %v2555_v35 = vsel %vm829_vm6, %v10070_v13, %v2554_v50  ;;  %v403_v18 = vsel %vm379_vm0, %v401_v44, %v16508_v0  ;;  %v499_v50 = vsel %vm379_vm0, %v338_v15, %v401_v44 }
  0x40   : > { %v2562_v1 = vsel %vm829_vm6, %v10102_v55, %v2561_v59  ;;  %v2556_v61 = vsel %vm1851_vm7, %v10074_v48, %v2555_v35  ;;  %v599_v59 = vcombine.high %v497_v16, %v497_v16  ;;  %16816 = vst [vmem:[#allocation62_spill] sm:$0xff] %v10158_v31  ;;  %16817 = vst [vmem:[#allocation63_spill] sm:$0xff] %v10161_v39 }
  0x41   : > { %v2563_v22 = vsel %vm1851_vm7, %v10106_v57, %v2562_v1  ;;  %v633_v54 = vcombine.high %v499_v50, %v499_v50  ;;  %v10164_v35 = vrot.slane %v499_v50, %v9707_v8  ;;  %v650_v1 = vcombine.high %v403_v18, %v403_v18 }
  0x42   : > { %v8724_v52 = vpack.i.bf16 %v2563_v22, %v2556_v61  ;;  %v10168_v0 = vrot.slane %v599_v59, %v9707_v8  ;;  %v10172_v44 = vcombine.high %v10158_v31, %v10158_v31  ;;  %v10175_v16 = vrot.slane %v616_v38, %v9707_v8 }
  0x43   : > { %16818 = vst [vmem:[#allocation64_spill] sm:$0xff] %v10164_v35  ;;  %v10178_v19 = vrot.slane %v403_v18, %v9707_v8  ;;  %v10182_v15 = vcombine.high %v10161_v39, %v10161_v39  ;;  %v10185_v61 = vrot.slane %v633_v54, %v9707_v8  ;;  %v10192_v22 = vrot.slane %v650_v1, %v9707_v8 }
  0x44   : > { %8725 = vrot.lane.b32.xlu0 %v8724_v52, %s9634_s8  ;;  %16819 = vst [vmem:[#allocation65_spill] sm:$0xff] %v10168_v0  ;;  %16820 = vst [vmem:[#allocation66_spill] sm:$0xff] %v10172_v44  ;;  %v10189_v52 = vcombine.high %v10164_v35, %v10164_v35  ;;  %v10196_v38 = vcombine.high %v10168_v0, %v10168_v0  ;;  %v10200_v18 = vcombine.high %v10175_v16, %v10175_v16 }
  0x45   : > { %16821 = vst [vmem:[#allocation67_spill] sm:$0xff] %v10175_v16  ;;  %16822 = vst [vmem:[#allocation68_spill] sm:$0xff] %v10178_v19  ;;  %v10204_v50 = vcombine.high %v10178_v19, %v10178_v19  ;;  %v10209_v54 = vcombine.high %v10185_v61, %v10185_v61  ;;  %v10213_v1 = vcombine.high %v10192_v22, %v10192_v22 }
  0x46   : > { %16823 = vst [vmem:[#allocation69_spill] sm:$0xff] %v10182_v15  ;;  %16824 = vst [vmem:[#allocation70_spill] sm:$0xff] %v10185_v61  ;;  %v1685_v59 = vrot.slane %v10158_v31, %v9717_v17  ;;  %v10223_v40 = vrot.slane %v10172_v44, %v9717_v17  ;;  %v10229_v60 = vrot.slane %v10168_v0, %v9717_v17  ;;  %v285_v0 = vld [vmem:[%s9700_s30 + $0x10] sm:$0xff] }
  0x47   : > { %16825 = vst [vmem:[#allocation71_spill] sm:$0xff] %v10189_v52  ;;  %16826 = vst [vmem:[#allocation72_spill] sm:$0xff] %v10192_v22  ;;  %v10233_v36 = vrot.slane %v10196_v38, %v9717_v17  ;;  %v10237_v37 = vrot.slane %v10161_v39, %v9717_v17  ;;  %v10241_v56 = vrot.slane %v10182_v15, %v9717_v17  ;;  %v289_v31 = vld [vmem:[%s9700_s30 + $0x30] sm:$0xff]  ;;  %v331_v32 = vrot.slane %v285_v0, 1 }
  0x48   : > { %16827 = vst [vmem:[#allocation73_spill] sm:$0xff] %v10196_v38  ;;  %16828 = vst [vmem:[#allocation74_spill] sm:$0xff] %v10200_v18  ;;  %v10245_v51 = vrot.slane %v10175_v16, %v9717_v17  ;;  %v10249_v33 = vrot.slane %v10200_v18, %v9717_v17  ;;  %v1717_v44 = vrot.slane %v10164_v35, %v9717_v17  ;;  %v334_v27 = vrot.slane %v289_v31, 1 }
  0x49   : > { %16829 = vst [vmem:[#allocation75_spill] sm:$0xff] %v10204_v50  ;;  %16830 = vst [vmem:[#allocation76_spill] sm:$0xff] %v10209_v54  ;;  %v10256_v39 = vrot.slane %v10189_v52, %v9717_v17  ;;  %v10260_v15 = vrot.slane %v10185_v61, %v9717_v17  ;;  %v10264_v16 = vrot.slane %v10209_v54, %v9717_v17  ;;  %v380_v63 = vrot.slane %v285_v0, 7 }
  0x4a   : > { %16831 = vst [vmem:[#allocation77_spill] sm:$0xff] %v10213_v1  ;;  %v10269_v18 = vrot.slane %v10178_v19, %v9717_v17  ;;  %v10273_v35 = vrot.slane %v10204_v50, %v9717_v17  ;;  %v10277_v52 = vrot.slane %v10192_v22, %v9717_v17  ;;  %v10281_v61 = vrot.slane %v10213_v1, %v9717_v17  ;;  %v10292_v50 = vld [vmem:[%s9700_s30 + $0x38] sm:$0xff] }
  0x4b   : > { %v1860_v54 = vsel %vm1842_vm1, %v10223_v40, %v1685_v59  ;;  %v1867_v19 = vsel %vm1842_vm1, %v10256_v39, %v1717_v44  ;;  %v16546_v44 = vrot.slane %v10284_v29, 7  ;;  %v389_v49 = vrot.slane %v289_v31, 7 }
  0x4c   : > { %16832 = vst [vmem:[#allocation78_spill] sm:$0xff] %v10269_v18  ;;  %16833 = vst [vmem:[#allocation79_spill] sm:$0xff] %v10273_v35  ;;  %v1861_v22 = vsel %vm825_vm2, %v10229_v60, %v1860_v54  ;;  %v1868_v1 = vsel %vm825_vm2, %v10260_v15, %v1867_v19  ;;  %v16547_v28 = vrot.slane %v10292_v50, 7  ;;  %v492_v19 = vsel %vm379_vm0, %v331_v32, %v380_v63 }
  0x4d   : > { %16834 = vst [vmem:[#allocation80_spill] sm:$0xff] %v10277_v52  ;;  %16835 = vst [vmem:[#allocation81_spill] sm:$0xff] %v10281_v61  ;;  %v1862_v34 = vsel %vm1845_vm3, %v10233_v36, %v1861_v22  ;;  %v1869_v59 = vsel %vm1845_vm3, %v10264_v16, %v1868_v1  ;;  %v382_v31 = vsel %vm379_vm0, %v380_v63, %v16546_v44 }
  0x4e   : > { %v1863_v38 = vsel %vm827_vm4, %v10237_v37, %v1862_v34  ;;  %v1870_v54 = vsel %vm827_vm4, %v10269_v18, %v1869_v59  ;;  %v495_v1 = vsel %vm379_vm0, %v334_v27, %v389_v49  ;;  %v391_v32 = vsel %vm379_vm0, %v389_v49, %v16547_v28 }
  0x4f   : > { %v1864_v0 = vsel %vm1848_vm5, %v10241_v56, %v1863_v38  ;;  %v1871_v22 = vsel %vm1848_vm5, %v10273_v35, %v1870_v54  ;;  %v531_v38 = vcombine.high %v492_v19, %v492_v19  ;;  %v10333_v27 = vrot.slane %v492_v19, %v9707_v8 }
  0x50   : > { %v1865_v34 = vsel %vm829_vm6, %v10245_v51, %v1864_v0  ;;  %v1872_v59 = vsel %vm829_vm6, %v10277_v52, %v1871_v22  ;;  %v548_v0 = vcombine.high %v382_v31, %v382_v31  ;;  %v10341_v49 = vrot.slane %v382_v31, %v9707_v8 }
  0x51   : > { %v10326_v54 = vsel %vm1851_vm7, %v10249_v33, %v1865_v34  ;;  %v10330_v63 = vsel %vm1851_vm7, %v10281_v61, %v1872_v59  ;;  %16838 = vst [vmem:[#allocation84_spill] sm:$0xff] %v10333_v27  ;;  %v10338_v44 = vrot.slane %v531_v38, %v9707_v8  ;;  %v565_v28 = vcombine.high %v495_v1, %v495_v1 }
  0x52   : > { %16836 = vst [vmem:[#allocation82_spill] sm:$0xff] %v10326_v54  ;;  %16837 = vst [vmem:[#allocation83_spill] sm:$0xff] %v10330_v63  ;;  %v8739_v22 = vpack.i.bf16 %v10330_v63, %v10326_v54  ;;  %v10345_v34 = vcombine.high %v10333_v27, %v10333_v27  ;;  %v10348_v59 = vrot.slane %v548_v0, %v9707_v8 }
  0x53   : > { %16839 = vst [vmem:[#allocation85_spill] sm:$0xff] %v10338_v44  ;;  %16840 = vst [vmem:[#allocation86_spill] sm:$0xff] %v10341_v49  ;;  %v10351_v19 = vrot.slane %v495_v1, %v9707_v8  ;;  %v582_v26 = vcombine.high %v391_v32, %v391_v32  ;;  %v10356_v38 = vcombine.high %v10338_v44, %v10338_v44 }
  0x54   : > { %16841 = vst [vmem:[#allocation87_spill] sm:$0xff] %v10345_v34  ;;  %16842 = vst [vmem:[#allocation88_spill] sm:$0xff] %v10348_v59  ;;  %8740 = vrot.lane.b32.xlu1 %v8739_v22, %s9635_s9  ;;  %v10360_v31 = vcombine.high %v10341_v49, %v10341_v49  ;;  %v10363_v63 = vrot.slane %v565_v28, %v9707_v8  ;;  %v10366_v0 = vrot.slane %v391_v32, %v9707_v8 }
  0x55   : > { %16843 = vst [vmem:[#allocation89_spill] sm:$0xff] %v10351_v19  ;;  %16844 = vst [vmem:[#allocation90_spill] sm:$0xff] %v10356_v38  ;;  %v10370_v1 = vcombine.high %v10348_v59, %v10348_v59  ;;  %v10374_v22 = vcombine.high %v10351_v19, %v10351_v19  ;;  %v10377_v54 = vrot.slane %v582_v26, %v9707_v8 }
  0x56   : > { %16845 = vst [vmem:[#allocation91_spill] sm:$0xff] %v10360_v31  ;;  %16846 = vst [vmem:[#allocation92_spill] sm:$0xff] %v10363_v63  ;;  %v10382_v28 = vcombine.high %v10363_v63, %v10363_v63  ;;  %v10386_v32 = vcombine.high %v10366_v0, %v10366_v0  ;;  %v1621_v11 = vrot.slane %v10333_v27, %v9717_v17 }
  0x57   : > { %16847 = vst [vmem:[#allocation93_spill] sm:$0xff] %v10366_v0  ;;  %16848 = vst [vmem:[#allocation94_spill] sm:$0xff] %v10370_v1  ;;  %v10393_v10 = vcombine.high %v10377_v54, %v10377_v54  ;;  %v1625_v61 = vrot.slane %v10345_v34, %v9717_v17  ;;  %v1629_v12 = vrot.slane %v10338_v44, %v9717_v17 }
  0x58   : > { %16849 = vst [vmem:[#allocation95_spill] sm:$0xff] %v10374_v22  ;;  %16850 = vst [vmem:[#allocation96_spill] sm:$0xff] %v10377_v54  ;;  %v1633_v27 = vrot.slane %v10356_v38, %v9717_v17  ;;  %v1637_v26 = vrot.slane %v10341_v49, %v9717_v17  ;;  %v1641_v25 = vrot.slane %v10360_v31, %v9717_v17  ;;  %v16855_v38 = vrot.slane %v10292_v50, 7 }
  0x59   : > { %16851 = vst [vmem:[#allocation97_spill] sm:$0xff] %v10382_v28  ;;  %16852 = vst [vmem:[#allocation98_spill] sm:$0xff] %v10386_v32  ;;  %v1645_v34 = vrot.slane %v10348_v59, %v9717_v17  ;;  %v1649_v20 = vrot.slane %v10370_v1, %v9717_v17  ;;  %v1653_v24 = vrot.slane %v10351_v19, %v9717_v17 }
  0x5a   : > { %16853 = vst [vmem:[#allocation99_spill] sm:$0xff] %v10393_v10  ;;  %v1657_v44 = vrot.slane %v10374_v22, %v9717_v17  ;;  %v1661_v7 = vrot.slane %v10363_v63, %v9717_v17  ;;  %v1665_v49 = vrot.slane %v10382_v28, %v9717_v17  ;;  %v1669_v31 = vrot.slane %v10366_v0, %v9717_v17 }
  0x5b   : > { %v1673_v59 = vrot.slane %v10386_v32, %v9717_v17  ;;  %v1677_v1 = vrot.slane %v10377_v54, %v9717_v17  ;;  %v1681_v19 = vrot.slane %v10393_v10, %v9717_v17  ;;  %v1843_v22 = vsel %vm1842_vm1, %v1625_v61, %v1621_v11 }
  0x5c   : > { %v1853_v52 = vsel %vm1842_vm1, %v1657_v44, %v1653_v24  ;;  %v1844_v28 = vsel %vm825_vm2, %v1629_v12, %v1843_v22  ;;  %v460_v0 = vrot.slane %v10284_v29, 5  ;;  %v463_v32 = vrot.slane %v10292_v50, 5 }
  0x5d   : > { %v1854_v35 = vsel %vm825_vm2, %v1661_v7, %v1853_v52  ;;  %v1846_v5 = vsel %vm1845_vm3, %v1633_v27, %v1844_v28  ;;  %v2224_v10 = vsel %vm1842_vm1, %v1629_v12, %v1625_v61  ;;  %v2231_v11 = vsel %vm1842_vm1, %v1661_v7, %v1657_v44 }
  0x5e   : > { %v1855_v54 = vsel %vm1845_vm3, %v1665_v49, %v1854_v35  ;;  %v1847_v24 = vsel %vm827_vm4, %v1637_v26, %v1846_v5  ;;  %v16854_v22 = vrot.slane %v10284_v29, 7  ;;  %v511_v18 = vsel %vm379_vm0, %v16855_v38, %v463_v32 }
  0x5f   : > { %v1856_v63 = vsel %vm827_vm4, %v1669_v31, %v1855_v54  ;;  %v1849_v28 = vsel %vm1848_vm5, %v1641_v25, %v1847_v24  ;;  %v10455_v7 = vrot.slane %v511_v18, %v9707_v8  ;;  %v2225_v61 = vsel %vm825_vm2, %v1633_v27, %v2224_v10 }
  0x60   : > { %v508_v52 = vsel %vm379_vm0, %v16854_v22, %v460_v0  ;;  %v1857_v35 = vsel %vm1848_vm5, %v1673_v59, %v1856_v63  ;;  %v1850_v5 = vsel %vm829_vm6, %v1645_v34, %v1849_v28  ;;  %v2232_v50 = vsel %vm825_vm2, %v1665_v49, %v2231_v11 }
  0x61   : > { %v10452_v12 = vrot.slane %v508_v52, %v9707_v8  ;;  %v1858_v29 = vsel %vm829_vm6, %v1677_v1, %v1857_v35  ;;  %v10462_v44 = vsel %vm1851_vm7, %v1649_v20, %v1850_v5  ;;  %v879_v38 = vrot.slane %v10455_v7, 7 }
  0x62   : > { %16856 = vst [vmem:[#allocation100_spill] sm:$0xff] %v10462_v44  ;;  %v10465_v54 = vsel %vm1851_vm7, %v1681_v19, %v1858_v29  ;;  %v2203_v10 = vrot.slane %v10455_v7, %v9717_v17  ;;  %v2226_v27 = vsel %vm1845_vm3, %v1637_v26, %v2225_v61  ;;  %v2233_v32 = vsel %vm1845_vm3, %v1669_v31, %v2232_v50 }
  0x63   : > { %16857 = vst [vmem:[#allocation101_spill] sm:$0xff] %v10465_v54  ;;  %v854_v63 = vrot.slane %v10452_v12, 7  ;;  %v8734_v18 = vpack.i.bf16 %v10465_v54, %v10462_v44  ;;  %v2199_v0 = vrot.slane %v10452_v12, %v9717_v17  ;;  %v2227_v49 = vsel %vm827_vm4, %v1641_v25, %v2226_v27 }
  0x64   : > { %v461_v11 = vrot.slane %v9867_v21, 5  ;;  %v462_v24 = vrot.slane %v9886_v30, 5  ;;  %v2228_v22 = vsel %vm1848_vm5, %v1645_v34, %v2227_v49  ;;  %v2234_v52 = vsel %vm827_vm4, %v1673_v59, %v2233_v32 }
  0x65   : > { %8735 = vrot.lane.b32.xlu0 %v8734_v18, %s9635_s9  ;;  %v2998_v28 = vsel %vm1842_vm1, %v10050_v4, %v10046_v45  ;;  %v3005_v25 = vsel %vm1842_vm1, %v10085_v46, %v10080_v42  ;;  %v2229_v31 = vsel %vm829_vm6, %v1649_v20, %v2228_v22  ;;  %v2235_v26 = vsel %vm1848_vm5, %v1677_v1, %v2234_v52 }
  0x66   : > { %v16858_v35 = vrot.slane %v9867_v21, 7  ;;  %v16859_v34 = vrot.slane %v9886_v30, 7  ;;  %v2230_v29 = vsel %vm1851_vm7, %v2199_v0, %v2229_v31  ;;  %v2236_v45 = vsel %vm829_vm6, %v1681_v19, %v2235_v26 }
  0x67   : > { %v2237_v20 = vsel %vm1851_vm7, %v2203_v10, %v2236_v45  ;;  %v2999_v21 = vsel %vm825_vm2, %v10058_v23, %v2998_v28  ;;  %v3006_v30 = vsel %vm825_vm2, %v10089_v53, %v3005_v25  ;;  %v465_v46 = vrot.slane %v10113_v43, 5 }
  0x68   : > { %v509_v5 = vsel %vm379_vm0, %v16858_v35, %v461_v11  ;;  %v510_v59 = vsel %vm379_vm0, %v16859_v34, %v462_v24  ;;  %v8744_v1 = vpack.i.bf16 %v2237_v20, %v2230_v29  ;;  %v3000_v0 = vsel %vm1845_vm3, %v10062_v41, %v2999_v21  ;;  %v16864_v34 = vld [vmem:[#allocation78_spill] sm:$0xff]  ;;  %v16867_v21 = vld [vmem:[#allocation79_spill] sm:$0xff] }
  0x69   : > { %v10500_v4 = vrot.slane %v509_v5, %v9707_v8  ;;  %v10503_v42 = vrot.slane %v510_v59, %v9707_v8  ;;  %v3007_v23 = vsel %vm1845_vm3, %v10093_v58, %v3006_v30  ;;  %v467_v53 = vrot.slane %v10121_v14, 5 }
  0x6a   : > { %8745 = vrot.lane.b32.xlu1 %v8744_v1, %s9636_s10  ;;  %v3001_v10 = vsel %vm827_vm4, %v10066_v62, %v3000_v0  ;;  %v3008_v27 = vsel %vm827_vm4, %v10097_v47, %v3007_v23  ;;  %v16860_v49 = vrot.slane %v10113_v43, 7  ;;  %v2238_v41 = vsel %vm1842_vm1, %v10229_v60, %v10223_v40  ;;  %v16872_v0 = vld [vmem:[#allocation26_spill] sm:$0xff] }
  0x6b   : > { %v1373_v61 = vrot.slane %v10500_v4, 7  ;;  %v1398_v19 = vrot.slane %v10503_v42, 7  ;;  %v2969_v50 = vrot.slane %v10500_v4, %v9717_v17  ;;  %v2973_v18 = vrot.slane %v10503_v42, %v9717_v17  ;;  %v16873_v23 = vld [vmem:[#allocation30_spill] sm:$0xff] }
  0x6c   : > { %v513_v32 = vsel %vm379_vm0, %v16860_v49, %v465_v46  ;;  %v3002_v58 = vsel %vm1848_vm5, %v10070_v13, %v3001_v10  ;;  %v3009_v11 = vsel %vm1848_vm5, %v10102_v55, %v3008_v27  ;;  %v16861_v24 = vrot.slane %v10121_v14, 7  ;;  %v16871_v46 = vld [vmem:[#allocation80_spill] sm:$0xff]  ;;  %v16875_v27 = vld [vmem:[#allocation81_spill] sm:$0xff] }
  0x6d   : > { %v10541_v47 = vrot.slane %v513_v32, %v9707_v8  ;;  %v3003_v43 = vsel %vm829_vm6, %v10074_v48, %v3002_v58  ;;  %v3010_v22 = vsel %vm829_vm6, %v10106_v57, %v3009_v11  ;;  %v2239_v13 = vsel %vm825_vm2, %v10233_v36, %v2238_v41  ;;  %v16876_v58 = vld [vmem:[#allocation27_spill] sm:$0xff] }
  0x6e   : > { %v515_v62 = vsel %vm379_vm0, %v16861_v24, %v467_v53  ;;  %v3004_v60 = vsel %vm1851_vm7, %v2969_v50, %v3003_v43  ;;  %v3011_v14 = vsel %vm1851_vm7, %v2973_v18, %v3010_v22  ;;  %v2240_v25 = vsel %vm1845_vm3, %v10237_v37, %v2239_v13  ;;  %v16874_v53 = vld [vmem:[#allocation31_spill] sm:$0xff]  ;;  %v16877_v22 = vld [vmem:[#allocation28_spill] sm:$0xff] }
  0x6f   : > { %v10548_v40 = vrot.slane %v515_v62, %v9707_v8  ;;  %v904_v55 = vrot.slane %v10541_v47, 7  ;;  %v2207_v52 = vrot.slane %v10541_v47, %v9717_v17  ;;  %v8754_v28 = vpack.i.bf16 %v3011_v14, %v3004_v60  ;;  %v16880_v14 = vld [vmem:[#allocation29_spill] sm:$0xff] }
  0x70   : > { %v2241_v36 = vsel %vm827_vm4, %v10241_v56, %v2240_v25  ;;  %v2245_v31 = vsel %vm1842_vm1, %v10260_v15, %v10256_v39  ;;  %v464_v26 = vrot.slane %v9704_v6, 5  ;;  %v466_v5 = vrot.slane %v9710_v9, 5  ;;  %v16882_v25 = vld [vmem:[#allocation84_spill] sm:$0xff] }
  0x71   : > { %v929_v48 = vrot.slane %v10548_v40, 7  ;;  %v2211_v57 = vrot.slane %v10548_v40, %v9717_v17  ;;  %8755 = vrot.lane.b32.xlu0 %v8754_v28, %s9637_s11  ;;  %v2242_v37 = vsel %vm1848_vm5, %v10245_v51, %v2241_v36  ;;  %v2246_v56 = vsel %vm825_vm2, %v10264_v16, %v2245_v31  ;;  %v16866_v51 = vld [vmem:[#allocation25_spill] sm:$0xff]  ;;  %v16881_v28 = vld [vmem:[#allocation32_spill] sm:$0xff] }
  0x72   : > { %v3012_v39 = vsel %vm1842_vm1, %v9834_v3, %v9830_v2  ;;  %v2243_v15 = vsel %vm829_vm6, %v10249_v33, %v2242_v37  ;;  %v2247_v59 = vsel %vm1845_vm3, %v16864_v34, %v2246_v56  ;;  %v16865_v29 = vrot.slane %v9704_v6, 7  ;;  %v16884_v37 = vld [vmem:[#allocation87_spill] sm:$0xff]  ;;  %v16887_v34 = vld [vmem:[#allocation34_spill] sm:$0xff] }
  0x73   : > { %v3013_v20 = vsel %vm825_vm2, %v16866_v51, %v3012_v39  ;;  %v2244_v16 = vsel %vm1851_vm7, %v2207_v52, %v2243_v15  ;;  %v2248_v30 = vsel %vm827_vm4, %v16867_v21, %v2247_v59  ;;  %v16868_v2 = vrot.slane %v9710_v9, 7  ;;  %v16886_v39 = vld [vmem:[#allocation85_spill] sm:$0xff]  ;;  %v16889_v51 = vld [vmem:[#allocation90_spill] sm:$0xff] }
  0x74   : > { %v512_v45 = vsel %vm379_vm0, %v16865_v29, %v464_v26  ;;  %v2249_v50 = vsel %vm1848_vm5, %v16871_v46, %v2248_v30  ;;  %v3014_v9 = vsel %vm1845_vm3, %v16872_v0, %v3013_v20  ;;  %v3019_v10 = vsel %vm1842_vm1, %v16874_v53, %v16873_v23  ;;  %v16883_v26 = vld [vmem:[#allocation33_spill] sm:$0xff]  ;;  %v16891_v21 = vld [vmem:[#allocation86_spill] sm:$0xff]  ;;  %v16895_v23 = vld [vmem:[#allocation36_spill] sm:$0xff] }
  0x75   : > { %v514_v3 = vsel %vm379_vm0, %v16868_v2, %v466_v5  ;;  %v10599_v33 = vrot.slane %v512_v45, %v9707_v8  ;;  %v2250_v49 = vsel %vm829_vm6, %v16875_v27, %v2249_v50  ;;  %8765 = vrot.lane.b32.xlu0 %v8744_v1, %s9638_s12  ;;  %v3015_v11 = vsel %vm827_vm4, %v16876_v58, %v3014_v9  ;;  %v16892_v2 = vld [vmem:[#allocation35_spill] sm:$0xff] }
  0x76   : > { %v10611_v18 = vrot.slane %v514_v3, %v9707_v8  ;;  %v2251_v24 = vsel %vm1851_vm7, %v2211_v57, %v2250_v49  ;;  %v3016_v13 = vsel %vm1848_vm5, %v16877_v22, %v3015_v11  ;;  %v3020_v57 = vsel %vm825_vm2, %v16881_v28, %v3019_v10  ;;  %v16893_v50 = vld [vmem:[#allocation91_spill] sm:$0xff]  ;;  %v16896_v49 = vld [vmem:[#allocation88_spill] sm:$0xff]  ;;  %v16898_v22 = vld [vmem:[#allocation94_spill] sm:$0xff] }
  0x77   : > { %v1423_v32 = vrot.slane %v10599_v33, 7  ;;  %v2977_v41 = vrot.slane %v10599_v33, %v9717_v17  ;;  %v10639_v60 = vpack.i.bf16 %v2251_v24, %v2244_v16  ;;  %v3017_v52 = vsel %vm829_vm6, %v16880_v14, %v3016_v13 }
  0x78   : > { %v1448_v62 = vrot.slane %v10611_v18, 7  ;;  %v2981_v43 = vrot.slane %v10611_v18, %v9717_v17  ;;  %v8479_v36 = vrot.slane %v16882_v25, 9  ;;  %v3021_v35 = vsel %vm1845_vm3, %v16883_v26, %v3020_v57  ;;  %v16958_v18 = vld [vmem:[#allocation14_spill] sm:$0xff] }
  0x79   : > { %v3018_v31 = vsel %vm1851_vm7, %v2977_v41, %v3017_v52  ;;  %v16885_v56 = vrot.slane %v16884_v37, 7  ;;  %v836_v15 = vrot.slane %v16886_v39, 7  ;;  %8750 = vrot.lane.b32.xlu1 %v10639_v60, %s9636_s10  ;;  %v3022_v59 = vsel %vm827_vm4, %v16887_v34, %v3021_v35  ;;  %v16900_v52 = vld [vmem:[#allocation89_spill] sm:$0xff]  ;;  %v16902_v37 = vld [vmem:[#allocation95_spill] sm:$0xff] }
  0x7a   : > { %v16890_v20 = vrot.slane %v16889_v51, 7  ;;  %v842_v30 = vrot.slane %v16891_v21, 7  ;;  %v3023_v3 = vsel %vm1848_vm5, %v16892_v2, %v3022_v59  ;;  %v16894_v0 = vrot.slane %v16893_v50, 7  ;;  %v16910_v21 = vld [vmem:[#allocation98_spill] sm:$0xff]  ;;  %v16912_v50 = vld [vmem:[#allocation96_spill] sm:$0xff] }
  0x7b   : > { %v835_v5 = vrot.slane %v16885_v56, 2  ;;  %v16888_v29 = vmov %v16885_v56  ;;  %v838_v46 = vrot.slane %v836_v15, 2  ;;  %v3024_v53 = vsel %vm829_vm6, %v16895_v23, %v3023_v3 }
  0x7c   : > { %v834_v45 = vsel %vm10635_vm10, %v8479_v36, %v16888_v29  ;;  %v841_v16 = vrot.slane %v16890_v20, 2  ;;  %v847_v9 = vrot.slane %v16894_v0, 2  ;;  %v844_v27 = vrot.slane %v842_v30, 2  ;;  %v16907_v29 = vld [vmem:[#allocation97_spill] sm:$0xff] }
  0x7d   : > { %v837_v6 = vsel %vm10635_vm10, %v835_v5, %v836_v15  ;;  %v848_v41 = vrot.slane %v16896_v49, 7  ;;  %v3025_v58 = vsel %vm1851_vm7, %v2981_v43, %v3024_v53  ;;  %v16897_v11 = vmov %v16890_v20  ;;  %v16905_v15 = vld [vmem:[#allocation92_spill] sm:$0xff]  ;;  %v16909_v20 = vld [vmem:[#allocation93_spill] sm:$0xff] }
  0x7e   : > { %v843_v10 = vsel %vm10635_vm10, %v841_v16, %v842_v30  ;;  %v840_v24 = vsel %vm10635_vm10, %v838_v46, %v16897_v11  ;;  %v16899_v13 = vrot.slane %v16898_v22, 7  ;;  %v8480_v28 = vrot.slane %v16900_v52, 9 }
  0x7f   : > { %v8759_v57 = vpack.i.bf16 %v3025_v58, %v3018_v31  ;;  %v16901_v25 = vmov %v16894_v0  ;;  %v849_v26 = vsel %vm10635_vm10, %v847_v9, %v848_v41  ;;  %v850_v43 = vrot.slane %v848_v41, 2  ;;  %v16913_v9 = vld [vmem:[#allocation99_spill] sm:$0xff] }
  0x80   : > { %v853_v14 = vrot.slane %v16899_v13, 2  ;;  %v846_v36 = vsel %vm10635_vm10, %v844_v27, %v16901_v25  ;;  %v16903_v56 = vrot.slane %v16902_v37, 7  ;;  %v861_v34 = vrot.slane %v16905_v15, 7 }
  0x81   : > { %8760 = vrot.lane.b32.xlu1 %v8759_v57, %s9637_s11  ;;  %v16906_v59 = vmov %v16899_v13  ;;  %v867_v16 = vrot.slane %v16909_v20, 7  ;;  %v16911_v30 = vrot.slane %v16910_v21, 7  ;;  %v873_v0 = vrot.slane %v16912_v50, 7  ;;  %v16925_v50 = vld [vmem:[#allocation37_spill] sm:$0xff] }
  0x82   : > { %v10692_v35 = vsel %vm10635_vm10, %v853_v14, %v854_v63  ;;  %v859_v31 = vsel %vm10635_vm10, %v8480_v28, %v16903_v56  ;;  %v16904_v5 = vmov %v16903_v56  ;;  %v852_v12 = vsel %vm10635_vm10, %v850_v43, %v16906_v59 }
  0x83   : > { %v860_v39 = vrot.slane %v16904_v5, 2  ;;  %v16908_v63 = vrot.slane %v16907_v29, 7  ;;  %v872_v2 = vrot.slane %v16911_v30, 2  ;;  %v863_v46 = vrot.slane %v861_v34, 2  ;;  %v16919_v29 = vld [vmem:[#allocation5_spill] sm:$0xff] }
  0x84   : > { %v16914_v23 = vrot.slane %v16913_v9, 7  ;;  %v869_v49 = vrot.slane %v867_v16, 2  ;;  %v1905_v41 = vrot.slane %v834_v45, %v9717_v17  ;;  %v1909_v58 = vrot.slane %v837_v6, %v9717_v17 }
  0x85   : > { %v866_v51 = vrot.slane %v16908_v63, 2  ;;  %v862_v3 = vsel %vm10635_vm10, %v860_v39, %v861_v34  ;;  %v16915_v11 = vmov %v16908_v63  ;;  %v874_v13 = vsel %vm10635_vm10, %v872_v2, %v873_v0 }
  0x86   : > { %v878_v53 = vrot.slane %v16914_v23, 2  ;;  %v865_v22 = vsel %vm10635_vm10, %v863_v46, %v16915_v11  ;;  %v875_v14 = vrot.slane %v873_v0, 2  ;;  %v16916_v28 = vmov %v16911_v30 }
  0x87   : > { %v868_v27 = vsel %vm10635_vm10, %v866_v51, %v867_v16  ;;  %v871_v45 = vsel %vm10635_vm10, %v869_v49, %v16916_v28  ;;  %v1913_v6 = vrot.slane %v840_v24, %v9717_v17  ;;  %v1917_v57 = vrot.slane %v843_v10, %v9717_v17  ;;  %v16921_v51 = vld [vmem:[#allocation18_spill] sm:$0xff]  ;;  %v16931_v28 = vld [vmem:[#allocation8_spill] sm:$0xff] }
  0x88   : > { %v880_v52 = vsel %vm10635_vm10, %v878_v53, %v879_v38  ;;  %v1921_v25 = vrot.slane %v846_v36, %v9717_v17  ;;  %v16917_v43 = vmov %v16914_v23  ;;  %v1925_v7 = vrot.slane %v849_v26, %v9717_v17  ;;  %v16926_v53 = vld [vmem:[#allocation6_spill] sm:$0xff] }
  0x89   : > { %v877_v37 = vsel %vm10635_vm10, %v875_v14, %v16917_v43  ;;  %v1929_v38 = vrot.slane %v852_v12, %v9717_v17  ;;  %v1933_v56 = vrot.slane %v10692_v35, %v9717_v17  ;;  %v1937_v5 = vrot.slane %v859_v31, %v9717_v17  ;;  %v16918_v12 = vld [vmem:[#allocation2_spill] sm:$0xff] }
  0x8a   : > { %v1941_v24 = vrot.slane %v862_v3, %v9717_v17  ;;  %v1945_v10 = vrot.slane %v865_v22, %v9717_v17  ;;  %v1949_v36 = vrot.slane %v868_v27, %v9717_v17  ;;  %v1953_v39 = vrot.slane %v871_v45, %v9717_v17  ;;  %v16923_v3 = vld [vmem:[#allocation3_spill] sm:$0xff] }
  0x8b   : > { %v1957_v15 = vrot.slane %v874_v13, %v9717_v17  ;;  %v1961_v34 = vrot.slane %v877_v37, %v9717_v17  ;;  %v1965_v26 = vrot.slane %v880_v52, %v9717_v17  ;;  %v2126_v59 = vsel %vm1842_vm1, %v1909_v58, %v1905_v41  ;;  %v16929_v13 = vld [vmem:[#allocation12_spill] sm:$0xff] }
  0x8c   : > { %v2133_v35 = vsel %vm1842_vm1, %v1941_v24, %v1937_v5  ;;  %v8488_v31 = vrot.slane %v16918_v12, 9  ;;  %v16920_v63 = vrot.slane %v16919_v29, 7  ;;  %v2127_v16 = vsel %vm825_vm2, %v1913_v6, %v2126_v59  ;;  %v16933_v6 = vld [vmem:[#allocation19_spill] sm:$0xff]  ;;  %v16934_v5 = vld [vmem:[#allocation9_spill] sm:$0xff]  ;;  %v16938_v12 = vld [vmem:[#allocation4_spill] sm:$0xff] }
  0x8d   : > { %v2134_v21 = vsel %vm825_vm2, %v1945_v10, %v2133_v35  ;;  %v16924_v46 = vrot.slane %v16923_v3, 7  ;;  %v2128_v9 = vsel %vm1845_vm3, %v1917_v57, %v2127_v16  ;;  %v16927_v27 = vrot.slane %v16926_v53, 7  ;;  %v16937_v35 = vld [vmem:[#allocation20_spill] sm:$0xff] }
  0x8e   : > { %v1406_v20 = vsel %vm10635_vm10, %v16921_v51, %v16920_v63  ;;  %v16922_v30 = vmov %v16920_v63  ;;  %v2135_v23 = vsel %vm1845_vm3, %v1949_v36, %v2134_v21  ;;  %v2129_v11 = vsel %vm827_vm4, %v1921_v25, %v2128_v9  ;;  %v16939_v63 = vld [vmem:[#allocation15_spill] sm:$0xff]  ;;  %v16949_v9 = vld [vmem:[#allocation22_spill] sm:$0xff] }
  0x8f   : > { %v1407_v2 = vrot.slane %v16922_v30, 2  ;;  %v1412_v0 = vsel %vm10635_vm10, %v16925_v50, %v16924_v46  ;;  %v1403_v49 = vsel %vm10635_vm10, %v8488_v31, %v16927_v27  ;;  %v16928_v41 = vmov %v16924_v46  ;;  %v16947_v46 = vld [vmem:[#allocation7_spill] sm:$0xff] }
  0x90   : > { %v1413_v58 = vrot.slane %v16928_v41, 2  ;;  %v2136_v22 = vsel %vm827_vm4, %v1953_v39, %v2135_v23  ;;  %v16930_v14 = vrot.slane %v16929_v13, 7  ;;  %v16932_v45 = vrot.slane %v16931_v28, 7  ;;  %v16951_v41 = vld [vmem:[#allocation13_spill] sm:$0xff]  ;;  %v16955_v28 = vld [vmem:[#allocation24_spill] sm:$0xff] }
  0x91   : > { %v2130_v43 = vsel %vm1848_vm5, %v1925_v7, %v2129_v11  ;;  %v2137_v37 = vsel %vm1848_vm5, %v1957_v15, %v2136_v22  ;;  %v16935_v24 = vrot.slane %v16934_v5, 7  ;;  %v1424_v7 = vsel %vm10635_vm10, %v16937_v35, %v1423_v32  ;;  %v16944_v32 = vld [vmem:[#allocation11_spill] sm:$0xff] }
  0x92   : > { %v1409_v52 = vsel %vm10635_vm10, %v1407_v2, %v16930_v14  ;;  %v1418_v57 = vsel %vm10635_vm10, %v16933_v6, %v16932_v45  ;;  %v16936_v10 = vmov %v16932_v45  ;;  %v2131_v39 = vsel %vm829_vm6, %v1929_v38, %v2130_v43  ;;  %v16941_v38 = vld [vmem:[#allocation10_spill] sm:$0xff]  ;;  %v16953_v11 = vld [vmem:[#allocation23_spill] sm:$0xff]  ;;  %v16956_v6 = vld [vmem:[#allocation16_spill] sm:$0xff] }
  0x93   : > { %v1415_v25 = vsel %vm10635_vm10, %v1413_v58, %v16935_v24  ;;  %v1419_v36 = vrot.slane %v16936_v10, 2  ;;  %v2138_v59 = vsel %vm829_vm6, %v1961_v34, %v2137_v37  ;;  %v8489_v15 = vrot.slane %v16938_v12, 9  ;;  %v16943_v34 = vld [vmem:[#allocation21_spill] sm:$0xff] }
  0x94   : > { %v2132_v31 = vsel %vm1851_vm7, %v1933_v56, %v2131_v39  ;;  %v2139_v29 = vsel %vm1851_vm7, %v1965_v26, %v2138_v59  ;;  %v16940_v51 = vrot.slane %v16939_v63, 7  ;;  %v16942_v21 = vrot.slane %v16941_v38, 7  ;;  %v16960_v39 = vld [vmem:[#allocation17_spill] sm:$0xff] }
  0x95   : > { %v10816_v30 = vpack.i.bf16 %v2139_v29, %v2132_v31  ;;  %v16945_v2 = vrot.slane %v16944_v32, 7  ;;  %v16948_v50 = vrot.slane %v16947_v46, 7  ;;  %v16952_v58 = vrot.slane %v16951_v41, 7  ;;  %v16963_v32 = vld [vmem:[#allocation66_spill] sm:$0xff]  ;;  %v16965_v46 = vld [vmem:[#allocation65_spill] sm:$0xff] }
  0x96   : > { %v1421_v16 = vsel %vm10635_vm10, %v1419_v36, %v16940_v51  ;;  %v1431_v33 = vsel %vm10635_vm10, %v16943_v34, %v16942_v21  ;;  %v16946_v26 = vmov %v16942_v21  ;;  %v1449_v45 = vsel %vm10635_vm10, %v16955_v28, %v1448_v62  ;;  %v16962_v34 = vld [vmem:[#allocation62_spill] sm:$0xff] }
  0x97   : > { %v1428_v56 = vsel %vm10635_vm10, %v8489_v15, %v16945_v2  ;;  %v1432_v3 = vrot.slane %v16946_v26, 2  ;;  %v1437_v23 = vsel %vm10635_vm10, %v16949_v9, %v16948_v50  ;;  %v16950_v53 = vmov %v16948_v50  ;;  %8770 = vrot.lane.b32.xlu0 %v10816_v30, %s9639_s13  ;;  %v16966_v9 = vld [vmem:[#allocation73_spill] sm:$0xff] }
  0x98   : > { %v1438_v27 = vrot.slane %v16950_v53, 2  ;;  %v1443_v22 = vsel %vm10635_vm10, %v16953_v11, %v16952_v58  ;;  %v16954_v13 = vmov %v16952_v58  ;;  %v16957_v43 = vrot.slane %v16956_v6, 7 }
  0x99   : > { %v1444_v14 = vrot.slane %v16954_v13, 2  ;;  %v2697_v5 = vrot.slane %v1403_v49, %v9717_v17  ;;  %v2701_v24 = vrot.slane %v1406_v20, %v9717_v17  ;;  %v2705_v10 = vrot.slane %v1409_v52, %v9717_v17 }
  0x9a   : > { %v1434_v37 = vsel %vm10635_vm10, %v1432_v3, %v16957_v43  ;;  %v16959_v36 = vrot.slane %v16958_v18, 7  ;;  %v16961_v59 = vrot.slane %v16960_v39, 7  ;;  %v2709_v12 = vrot.slane %v1412_v0, %v9717_v17  ;;  %v16971_v39 = vld [vmem:[#allocation69_spill] sm:$0xff] }
  0x9b   : > { %v2713_v15 = vrot.slane %v1415_v25, %v9717_v17  ;;  %v2717_v49 = vrot.slane %v1418_v57, %v9717_v17  ;;  %v2721_v20 = vrot.slane %v1421_v16, %v9717_v17  ;;  %v2725_v52 = vrot.slane %v1424_v7, %v9717_v17 }
  0x9c   : > { %v1440_v62 = vsel %vm10635_vm10, %v1438_v27, %v16959_v36  ;;  %v1446_v35 = vsel %vm10635_vm10, %v1444_v14, %v16961_v59  ;;  %v2729_v31 = vrot.slane %v1428_v56, %v9717_v17  ;;  %v2733_v29 = vrot.slane %v1431_v33, %v9717_v17 }
  0x9d   : > { %v2737_v63 = vrot.slane %v1434_v37, %v9717_v17  ;;  %v2741_v51 = vrot.slane %v1437_v23, %v9717_v17  ;;  %v2745_v38 = vrot.slane %v1440_v62, %v9717_v17  ;;  %v2749_v0 = vrot.slane %v1443_v22, %v9717_v17  ;;  %v16969_v22 = vld [vmem:[#allocation63_spill] sm:$0xff] }
  0x9e   : > { %v2753_v25 = vrot.slane %v1446_v35, %v9717_v17  ;;  %v2757_v57 = vrot.slane %v1449_v45, %v9717_v17  ;;  %v2900_v16 = vsel %vm1842_vm1, %v2701_v24, %v2697_v5  ;;  %v2907_v21 = vsel %vm1842_vm1, %v2733_v29, %v2729_v31 }
  0x9f   : > { %v2901_v7 = vsel %vm825_vm2, %v2705_v10, %v2900_v16  ;;  %v8481_v33 = vrot.slane %v16962_v34, 9  ;;  %v16964_v2 = vrot.slane %v16963_v32, 7  ;;  %v2908_v3 = vsel %vm825_vm2, %v2737_v63, %v2907_v21  ;;  %v16980_v21 = vld [vmem:[#allocation70_spill] sm:$0xff] }
  0xa0   : > { %v2902_v26 = vsel %vm1845_vm3, %v2709_v12, %v2901_v7  ;;  %v886_v50 = vrot.slane %v16965_v46, 7  ;;  %v16967_v23 = vrot.slane %v16966_v9, 7  ;;  %v2909_v41 = vsel %vm1845_vm3, %v2741_v51, %v2908_v3 }
  0xa1   : > { %v885_v56 = vrot.slane %v16964_v2, 2  ;;  %v2903_v27 = vsel %vm827_vm4, %v2713_v15, %v2902_v26  ;;  %v16968_v58 = vmov %v16964_v2  ;;  %v892_v13 = vrot.slane %v16969_v22, 7  ;;  %v16981_v2 = vld [vmem:[#allocation76_spill] sm:$0xff] }
  0xa2   : > { %v891_v53 = vrot.slane %v16967_v23, 2  ;;  %v884_v11 = vsel %vm10635_vm10, %v8481_v33, %v16968_v58  ;;  %v2904_v14 = vsel %vm1848_vm5, %v2717_v49, %v2903_v27  ;;  %v2910_v28 = vsel %vm827_vm4, %v2745_v38, %v2909_v41  ;;  %v16977_v38 = vld [vmem:[#allocation64_spill] sm:$0xff]  ;;  %v16986_v27 = vld [vmem:[#allocation75_spill] sm:$0xff] }
  0xa3   : > { %v887_v45 = vsel %vm10635_vm10, %v885_v56, %v886_v50  ;;  %v888_v6 = vrot.slane %v886_v50, 2  ;;  %v2905_v43 = vsel %vm829_vm6, %v2721_v20, %v2904_v14  ;;  %v2911_v37 = vsel %vm1848_vm5, %v2749_v0, %v2910_v28  ;;  %v16974_v20 = vld [vmem:[#allocation67_spill] sm:$0xff]  ;;  %v16988_v22 = vld [vmem:[#allocation72_spill] sm:$0xff]  ;;  %v16989_v14 = vld [vmem:[#allocation77_spill] sm:$0xff] }
  0xa4   : > { %v893_v5 = vsel %vm10635_vm10, %v891_v53, %v892_v13  ;;  %v894_v24 = vrot.slane %v892_v13, 2  ;;  %v2906_v10 = vsel %vm1851_vm7, %v2725_v52, %v2905_v43  ;;  %v2912_v18 = vsel %vm829_vm6, %v2753_v25, %v2911_v37  ;;  %v16975_v52 = vld [vmem:[#allocation74_spill] sm:$0xff]  ;;  %v16978_v25 = vld [vmem:[#allocation71_spill] sm:$0xff] }
  0xa5   : > { %v16970_v36 = vmov %v16967_v23  ;;  %v16972_v59 = vrot.slane %v16971_v39, 7  ;;  %v2913_v12 = vsel %vm1851_vm7, %v2757_v57, %v2912_v18  ;;  %v898_v31 = vrot.slane %v16974_v20, 7  ;;  %v16984_v23 = vld [vmem:[#allocation68_spill] sm:$0xff] }
  0xa6   : > { %v890_v62 = vsel %vm10635_vm10, %v888_v6, %v16970_v36  ;;  %v16976_v29 = vrot.slane %v16975_v52, 7  ;;  %v8784_v51 = vpack.i.bf16 %v2913_v12, %v2906_v10  ;;  %v8482_v0 = vrot.slane %v16977_v38, 9 }
  0xa7   : > { %v897_v35 = vrot.slane %v16972_v59, 2  ;;  %v16973_v15 = vmov %v16972_v59  ;;  %v16979_v16 = vrot.slane %v16978_v25, 7  ;;  %v911_v34 = vrot.slane %v16980_v21, 7  ;;  %v16994_v21 = vld [vmem:[#allocation38_spill] sm:$0xff] }
  0xa8   : > { %v896_v49 = vsel %vm10635_vm10, %v894_v24, %v16973_v15  ;;  %v903_v63 = vrot.slane %v16976_v29, 2  ;;  %v900_v33 = vrot.slane %v898_v31, 2  ;;  %v16982_v56 = vrot.slane %v16981_v2, 7  ;;  %8785 = vrot.lane.b32.xlu1 %v8784_v51, %s9640_s14 }
  0xa9   : > { %v910_v7 = vrot.slane %v16979_v16, 2  ;;  %v899_v57 = vsel %vm10635_vm10, %v897_v35, %v898_v31  ;;  %v16983_v3 = vmov %v16979_v16  ;;  %v913_v9 = vrot.slane %v911_v34, 2 }
  0xaa   : > { %v905_v32 = vsel %vm10635_vm10, %v903_v63, %v904_v55  ;;  %v916_v26 = vrot.slane %v16982_v56, 2  ;;  %v909_v46 = vsel %vm10635_vm10, %v8482_v0, %v16983_v3  ;;  %v917_v47 = vrot.slane %v16984_v23, 7  ;;  %v17001_v23 = vld [vmem:[#allocation61_spill] sm:$0xff] }
  0xab   : > { %v912_v50 = vsel %vm10635_vm10, %v910_v7, %v911_v34  ;;  %v16985_v53 = vmov %v16976_v29  ;;  %v16987_v41 = vrot.slane %v16986_v27, 7  ;;  %v923_v13 = vrot.slane %v16988_v22, 7  ;;  %v17002_v27 = vld [vmem:[#allocation41_spill] sm:$0xff] }
  0xac   : > { %v902_v55 = vsel %vm10635_vm10, %v900_v33, %v16985_v53  ;;  %v16990_v28 = vrot.slane %v16989_v14, 7  ;;  %v16991_v43 = vmov %v16982_v56  ;;  %v918_v24 = vsel %vm10635_vm10, %v916_v26, %v917_v47 }
  0xad   : > { %v922_v58 = vrot.slane %v16987_v41, 2  ;;  %v915_v37 = vsel %vm10635_vm10, %v913_v9, %v16991_v43  ;;  %v919_v10 = vrot.slane %v917_v47, 2  ;;  %v1969_v18 = vrot.slane %v884_v11, %v9717_v17 }
  0xae   : > { %v928_v6 = vrot.slane %v16990_v28, 2  ;;  %v925_v39 = vrot.slane %v923_v13, 2  ;;  %v1973_v35 = vrot.slane %v887_v45, %v9717_v17  ;;  %v16992_v12 = vmov %v16987_v41 }
  0xaf   : > { %v924_v36 = vsel %vm10635_vm10, %v922_v58, %v923_v13  ;;  %v921_v15 = vsel %vm10635_vm10, %v919_v10, %v16992_v12  ;;  %v1977_v20 = vrot.slane %v890_v62, %v9717_v17  ;;  %v1981_v11 = vrot.slane %v893_v5, %v9717_v17 }
  0xb0   : > { %v930_v59 = vsel %vm10635_vm10, %v928_v6, %v929_v48  ;;  %v1985_v31 = vrot.slane %v896_v49, %v9717_v17  ;;  %v16993_v52 = vmov %v16990_v28  ;;  %v1989_v48 = vrot.slane %v899_v57, %v9717_v17  ;;  %v16995_v57 = vld [vmem:[#allocation39_spill] sm:$0xff]  ;;  %v17005_v6 = vld [vmem:[#allocation44_spill] sm:$0xff] }
  0xb1   : > { %v927_v40 = vsel %vm10635_vm10, %v925_v39, %v16993_v52  ;;  %v1993_v45 = vrot.slane %v902_v55, %v9717_v17  ;;  %v1997_v29 = vrot.slane %v905_v32, %v9717_v17  ;;  %v2001_v63 = vrot.slane %v909_v46, %v9717_v17  ;;  %v16997_v32 = vld [vmem:[#allocation54_spill] sm:$0xff] }
  0xb2   : > { %v2005_v51 = vrot.slane %v912_v50, %v9717_v17  ;;  %v2009_v62 = vrot.slane %v915_v37, %v9717_v17  ;;  %v2013_v5 = vrot.slane %v918_v24, %v9717_v17  ;;  %v2017_v49 = vrot.slane %v921_v15, %v9717_v17  ;;  %v16999_v50 = vld [vmem:[#allocation40_spill] sm:$0xff]  ;;  %v17007_v24 = vld [vmem:[#allocation42_spill] sm:$0xff] }
  0xb3   : > { %v2021_v38 = vrot.slane %v924_v36, %v9717_v17  ;;  %v2025_v0 = vrot.slane %v927_v40, %v9717_v17  ;;  %v2029_v25 = vrot.slane %v930_v59, %v9717_v17  ;;  %v2140_v16 = vsel %vm1842_vm1, %v1973_v35, %v1969_v18  ;;  %v17009_v18 = vld [vmem:[#allocation55_spill] sm:$0xff]  ;;  %v17010_v35 = vld [vmem:[#allocation45_spill] sm:$0xff]  ;;  %v17013_v40 = vld [vmem:[#allocation56_spill] sm:$0xff] }
  0xb4   : > { %v2147_v7 = vsel %vm1842_vm1, %v2005_v51, %v2001_v63  ;;  %v8486_v34 = vrot.slane %v16994_v21, 9  ;;  %v16996_v33 = vrot.slane %v16995_v57, 7  ;;  %v2141_v56 = vsel %vm825_vm2, %v1977_v20, %v2140_v16  ;;  %v17014_v63 = vld [vmem:[#allocation43_spill] sm:$0xff]  ;;  %v17017_v16 = vld [vmem:[#allocation46_spill] sm:$0xff]  ;;  %v301_v21 = vld [vmem:[%s9700_s30 + $0x90] sm:$0xff] }
  0xb5   : > { %v2148_v26 = vsel %vm825_vm2, %v2009_v62, %v2147_v7  ;;  %v17000_v9 = vrot.slane %v16999_v50, 7  ;;  %v2142_v53 = vsel %vm1845_vm3, %v1981_v11, %v2141_v56  ;;  %v17003_v41 = vrot.slane %v17002_v27, 7  ;;  %v17019_v7 = vld [vmem:[#allocation57_spill] sm:$0xff] }
  0xb6   : > { %v1356_v2 = vsel %vm10635_vm10, %v16997_v32, %v16996_v33  ;;  %v16998_v3 = vmov %v16996_v33  ;;  %v2149_v55 = vsel %vm1845_vm3, %v2013_v5, %v2148_v26  ;;  %v2143_v14 = vsel %vm827_vm4, %v1985_v31, %v2142_v53  ;;  %v17023_v32 = vld [vmem:[#allocation47_spill] sm:$0xff]  ;;  %v17025_v26 = vld [vmem:[#allocation58_spill] sm:$0xff] }
  0xb7   : > { %v1357_v46 = vrot.slane %v16998_v3, 2  ;;  %v10997_v47 = vsel %vm10635_vm10, %v17001_v23, %v17000_v9  ;;  %v1353_v58 = vsel %vm10635_vm10, %v8486_v34, %v17003_v41  ;;  %v17004_v22 = vmov %v17000_v9  ;;  %v17020_v34 = vld [vmem:[#allocation49_spill] sm:$0xff]  ;;  %v17027_v9 = vld [vmem:[#allocation50_spill] sm:$0xff]  ;;  %v17029_v53 = vld [vmem:[#allocation59_spill] sm:$0xff] }
  0xb8   : > { %v1363_v13 = vrot.slane %v17004_v22, 2  ;;  %v2150_v28 = vsel %vm827_vm4, %v2017_v49, %v2149_v55  ;;  %v17006_v43 = vrot.slane %v17005_v6, 7  ;;  %v17008_v10 = vrot.slane %v17007_v24, 7  ;;  %v17015_v49 = vld [vmem:[#allocation48_spill] sm:$0xff]  ;;  %v17031_v22 = vld [vmem:[#allocation51_spill] sm:$0xff] }
  0xb9   : > { %v2144_v39 = vsel %vm1848_vm5, %v1989_v48, %v2143_v14  ;;  %v2151_v59 = vsel %vm1848_vm5, %v2021_v38, %v2150_v28  ;;  %v17011_v12 = vrot.slane %v17010_v35, 7  ;;  %v11035_v48 = vsel %vm10635_vm10, %v17013_v40, %v1373_v61  ;;  %v17033_v28 = vld [vmem:[#allocation60_spill] sm:$0xff] }
  0xba   : > { %v1359_v37 = vsel %vm10635_vm10, %v1357_v46, %v17006_v43  ;;  %v11018_v36 = vsel %vm10635_vm10, %v17009_v18, %v17008_v10  ;;  %v17012_v20 = vmov %v17008_v10  ;;  %v2145_v31 = vsel %vm829_vm6, %v1993_v45, %v2144_v39  ;;  %v17034_v10 = vld [vmem:[#allocation52_spill] sm:$0xff] }
  0xbb   : > { %v1365_v15 = vsel %vm10635_vm10, %v1363_v13, %v17011_v12  ;;  %v1369_v11 = vrot.slane %v17012_v20, 2  ;;  %v2152_v52 = vsel %vm829_vm6, %v2025_v0, %v2151_v59  ;;  %v8487_v51 = vrot.slane %v17014_v63, 9  ;;  %v17036_v59 = vld [vmem:[#allocation53_spill] sm:$0xff] }
  0xbc   : > { %v2146_v62 = vsel %vm1851_vm7, %v1997_v29, %v2145_v31  ;;  %v2153_v5 = vsel %vm1851_vm7, %v2029_v25, %v2152_v52  ;;  %v17016_v38 = vrot.slane %v17015_v49, 7  ;;  %v17018_v0 = vrot.slane %v17017_v16, 7  ;;  %v305_v52 = vld [vmem:[%s9700_s30 + $0xb0] sm:$0xff] }
  0xbd   : > { %v8774_v61 = vpack.i.bf16 %v2153_v5, %v2146_v62  ;;  %v17021_v57 = vrot.slane %v17020_v34, 7  ;;  %v17024_v56 = vrot.slane %v17023_v32, 7  ;;  %v17028_v23 = vrot.slane %v17027_v9, 7  ;;  %v306_v5 = vld [vmem:[%s9700_s30 + $0xb8] sm:$0xff] }
  0xbe   : > { %v1371_v45 = vsel %vm10635_vm10, %v1369_v11, %v17016_v38  ;;  %v1381_v4 = vsel %vm10635_vm10, %v17019_v7, %v17018_v0  ;;  %v17022_v25 = vmov %v17018_v0  ;;  %v17032_v13 = vrot.slane %v17031_v22, 7 }
  0xbf   : > { %v1378_v29 = vsel %vm10635_vm10, %v8487_v51, %v17021_v57  ;;  %v1382_v33 = vrot.slane %v17022_v25, 2  ;;  %v1387_v3 = vsel %vm10635_vm10, %v17025_v26, %v17024_v56  ;;  %v17026_v46 = vmov %v17024_v56  ;;  %8775 = vrot.lane.b32.xlu0 %v8774_v61, %s9639_s13  ;;  %8800 = vrot.lane.b32.xlu1 %v8774_v61, %s9641_s15  ;;  %v302_v51 = vld [vmem:[%s9700_s30 + $0x98] sm:$0xff] }
  0xc0   : > { %v1388_v50 = vrot.slane %v17026_v46, 2  ;;  %v1393_v55 = vsel %vm10635_vm10, %v17029_v53, %v17028_v23  ;;  %v17030_v27 = vmov %v17028_v23  ;;  %v1399_v6 = vsel %vm10635_vm10, %v17033_v28, %v1398_v19 }
  0xc1   : > { %v1394_v41 = vrot.slane %v17030_v27, 2  ;;  %v1384_v14 = vsel %vm10635_vm10, %v1382_v33, %v17032_v13  ;;  %v2633_v43 = vrot.slane %v1353_v58, %v9717_v17  ;;  %v340_v24 = vrot.slane %v301_v21, 1 }
  0xc2   : > { %v17035_v18 = vrot.slane %v17034_v10, 7  ;;  %v17037_v35 = vrot.slane %v17036_v59, 7  ;;  %v2637_v42 = vrot.slane %v1356_v2, %v9717_v17  ;;  %v2641_v20 = vrot.slane %v1359_v37, %v9717_v17 }
  0xc3   : > { %v2645_v19 = vrot.slane %v10997_v47, %v9717_v17  ;;  %v2649_v58 = vrot.slane %v1365_v15, %v9717_v17  ;;  %v2653_v11 = vrot.slane %v11018_v36, %v9717_v17  ;;  %v2657_v31 = vrot.slane %v1371_v45, %v9717_v17 }
  0xc4   : > { %v1390_v39 = vsel %vm10635_vm10, %v1388_v50, %v17035_v18  ;;  %v1396_v12 = vsel %vm10635_vm10, %v1394_v41, %v17037_v35  ;;  %v2661_v40 = vrot.slane %v11035_v48, %v9717_v17  ;;  %v2665_v63 = vrot.slane %v1378_v29, %v9717_v17 }
  0xc5   : > { %v2669_v2 = vrot.slane %v1381_v4, %v9717_v17  ;;  %v2673_v37 = vrot.slane %v1384_v14, %v9717_v17  ;;  %v2677_v47 = vrot.slane %v1387_v3, %v9717_v17  ;;  %v2681_v15 = vrot.slane %v1390_v39, %v9717_v17 }
  0xc6   : > { %v2685_v62 = vrot.slane %v1393_v55, %v9717_v17  ;;  %v2689_v36 = vrot.slane %v1396_v12, %v9717_v17  ;;  %v2693_v49 = vrot.slane %v1399_v6, %v9717_v17  ;;  %v2886_v48 = vsel %vm1842_vm1, %v2637_v42, %v2633_v43 }
  0xc7   : > { %v2893_v38 = vsel %vm1842_vm1, %v2669_v2, %v2665_v63  ;;  %v342_v45 = vrot.slane %v305_v52, 1  ;;  %v2887_v16 = vsel %vm825_vm2, %v2641_v20, %v2886_v48  ;;  %v407_v7 = vrot.slane %v301_v21, 7 }
  0xc8   : > { %v2894_v0 = vsel %vm825_vm2, %v2673_v37, %v2893_v38  ;;  %v408_v4 = vrot.slane %v302_v51, 7  ;;  %v2888_v61 = vsel %vm1845_vm3, %v2645_v19, %v2887_v16  ;;  %v413_v57 = vrot.slane %v305_v52, 7 }
  0xc9   : > { %v2895_v34 = vsel %vm1845_vm3, %v2677_v47, %v2894_v0  ;;  %v414_v29 = vrot.slane %v306_v5, 7  ;;  %v2889_v25 = vsel %vm827_vm4, %v2649_v58, %v2888_v61  ;;  %v469_v56 = vrot.slane %v302_v51, 5 }
  0xca   : > { %v2896_v33 = vsel %vm827_vm4, %v2681_v15, %v2895_v34  ;;  %v409_v32 = vsel %vm379_vm0, %v407_v7, %v408_v4  ;;  %v2890_v26 = vsel %vm1848_vm5, %v2653_v11, %v2889_v25  ;;  %v471_v46 = vrot.slane %v306_v5, 5 }
  0xcb   : > { %v2897_v3 = vsel %vm1848_vm5, %v2685_v62, %v2896_v33  ;;  %v415_v21 = vsel %vm379_vm0, %v413_v57, %v414_v29  ;;  %v2891_v50 = vsel %vm829_vm6, %v2657_v31, %v2890_v26  ;;  %v501_v23 = vsel %vm379_vm0, %v340_v24, %v407_v7 }
  0xcc   : > { %v2898_v9 = vsel %vm829_vm6, %v2689_v36, %v2897_v3  ;;  %v503_v53 = vsel %vm379_vm0, %v342_v45, %v413_v57  ;;  %v2892_v55 = vsel %vm1851_vm7, %v2661_v40, %v2891_v50  ;;  %v517_v41 = vsel %vm379_vm0, %v408_v4, %v469_v56 }
  0xcd   : > { %v2899_v27 = vsel %vm1851_vm7, %v2693_v49, %v2898_v9  ;;  %v519_v22 = vsel %vm379_vm0, %v414_v29, %v471_v46  ;;  %v667_v14 = vcombine.high %v501_v23, %v501_v23  ;;  %v11132_v28 = vrot.slane %v501_v23, %v9707_v8 }
  0xce   : > { %v8779_v13 = vpack.i.bf16 %v2899_v27, %v2892_v55  ;;  %v684_v6 = vcombine.high %v409_v32, %v409_v32  ;;  %v11135_v43 = vrot.slane %v409_v32, %v9707_v8  ;;  %v701_v24 = vcombine.high %v503_v53, %v503_v53 }
  0xcf   : > { %17038 = vst [vmem:[#allocation78_spill] sm:$0xff] %v11132_v28  ;;  %v11138_v10 = vrot.slane %v503_v53, %v9707_v8  ;;  %v718_v18 = vcombine.high %v415_v21, %v415_v21  ;;  %v11142_v39 = vrot.slane %v667_v14, %v9707_v8  ;;  %v11146_v59 = vcombine.high %v11132_v28, %v11132_v28 }
  0xd0   : > { %8780 = vrot.lane.b32.xlu0 %v8779_v13, %s9640_s14  ;;  %v11149_v35 = vrot.slane %v684_v6, %v9707_v8  ;;  %v11152_v12 = vrot.slane %v415_v21, %v9707_v8  ;;  %v11156_v42 = vcombine.high %v11135_v43, %v11135_v43  ;;  %v11159_v20 = vrot.slane %v701_v24, %v9707_v8 }
  0xd1   : > { %17039 = vst [vmem:[#allocation25_spill] sm:$0xff] %v11138_v10  ;;  %v11163_v19 = vcombine.high %v11138_v10, %v11138_v10  ;;  %v11166_v58 = vrot.slane %v718_v18, %v9707_v8  ;;  %v11170_v11 = vcombine.high %v11142_v39, %v11142_v39  ;;  %v11181_v40 = vrot.slane %v517_v41, %v9707_v8 }
  0xd2   : > { %v11174_v31 = vcombine.high %v11149_v35, %v11149_v35  ;;  %v11178_v52 = vcombine.high %v11152_v12, %v11152_v12  ;;  %v11185_v63 = vcombine.high %v11159_v20, %v11159_v20  ;;  %v11192_v37 = vrot.slane %v519_v22, %v9707_v8 }
  0xd3   : > { %v11189_v2 = vcombine.high %v11166_v58, %v11166_v58  ;;  %v8483_v51 = vrot.slane %v11132_v28, 9  ;;  %v933_v47 = vrot.slane %v11146_v59, 7  ;;  %v936_v15 = vrot.slane %v11142_v39, 7 }
  0xd4   : > { %v939_v62 = vrot.slane %v11170_v11, 7  ;;  %v942_v36 = vrot.slane %v11135_v43, 7  ;;  %v945_v5 = vrot.slane %v11156_v42, 7  ;;  %v948_v49 = vrot.slane %v11149_v35, 7  ;;  %8790 = vrot.lane.b32.xlu0 %v10816_v30, %s9641_s15 }
  0xd5   : > { %v951_v48 = vrot.slane %v11174_v31, 7  ;;  %v954_v38 = vrot.slane %v11181_v40, 7  ;;  %v934_v45 = vsel %vm10635_vm10, %v8483_v51, %v933_v47  ;;  %v935_v16 = vrot.slane %v933_v47, 2 }
  0xd6   : > { %v938_v0 = vrot.slane %v936_v15, 2  ;;  %v941_v7 = vrot.slane %v939_v62, 2  ;;  %v944_v4 = vrot.slane %v942_v36, 2  ;;  %v947_v61 = vrot.slane %v945_v5, 2 }
  0xd7   : > { %v950_v34 = vrot.slane %v948_v49, 2  ;;  %v953_v57 = vrot.slane %v951_v48, 2  ;;  %v937_v29 = vsel %vm10635_vm10, %v935_v16, %v936_v15  ;;  %v8484_v32 = vrot.slane %v11138_v10, 9 }
  0xd8   : > { %v940_v25 = vsel %vm10635_vm10, %v938_v0, %v939_v62  ;;  %v943_v33 = vsel %vm10635_vm10, %v941_v7, %v942_v36  ;;  %v946_v56 = vsel %vm10635_vm10, %v944_v4, %v945_v5  ;;  %v949_v26 = vsel %vm10635_vm10, %v947_v61, %v948_v49  ;;  %8795 = vrot.lane.b32.xlu0 %v10639_v60, %s9638_s12 }
  0xd9   : > { %v11218_v3 = vsel %vm10635_vm10, %v950_v34, %v951_v48  ;;  %v11222_v21 = vsel %vm10635_vm10, %v953_v57, %v954_v38  ;;  %v958_v46 = vrot.slane %v11163_v19, 7  ;;  %v961_v50 = vrot.slane %v11159_v20, 7 }
  0xda   : > { %v964_v9 = vrot.slane %v11185_v63, 7  ;;  %v967_v23 = vrot.slane %v11152_v12, 7  ;;  %v970_v53 = vrot.slane %v11178_v52, 7  ;;  %v973_v55 = vrot.slane %v11166_v58, 7 }
  0xdb   : > { %v976_v27 = vrot.slane %v11189_v2, 7  ;;  %v979_v41 = vrot.slane %v11192_v37, 7  ;;  %v959_v22 = vsel %vm10635_vm10, %v8484_v32, %v958_v46  ;;  %v960_v13 = vrot.slane %v958_v46, 2  ;;  %v309_v46 = vld [vmem:[%s9700_s30 + $0xd0] sm:$0xff] }
  0xdc   : > { %v963_v14 = vrot.slane %v961_v50, 2  ;;  %v966_v6 = vrot.slane %v964_v9, 2  ;;  %v969_v24 = vrot.slane %v967_v23, 2  ;;  %v972_v18 = vrot.slane %v970_v53, 2 }
  0xdd   : > { %v975_v51 = vrot.slane %v973_v55, 2  ;;  %v978_v47 = vrot.slane %v976_v27, 2  ;;  %v962_v15 = vsel %vm10635_vm10, %v960_v13, %v961_v50  ;;  %v2033_v5 = vrot.slane %v934_v45, %v9717_v17 }
  0xde   : > { %v965_v62 = vsel %vm10635_vm10, %v963_v14, %v964_v9  ;;  %v968_v36 = vsel %vm10635_vm10, %v966_v6, %v967_v23  ;;  %v971_v49 = vsel %vm10635_vm10, %v969_v24, %v970_v53  ;;  %v974_v48 = vsel %vm10635_vm10, %v972_v18, %v973_v55  ;;  %v11270_v23 = vld [vmem:[%s9700_s30 + $0x110] sm:$0xff] }
  0xdf   : > { %v977_v38 = vsel %vm10635_vm10, %v975_v51, %v976_v27  ;;  %v980_v16 = vsel %vm10635_vm10, %v978_v47, %v979_v41  ;;  %v2037_v0 = vrot.slane %v937_v29, %v9717_v17  ;;  %v2041_v7 = vrot.slane %v940_v25, %v9717_v17 }
  0xe0   : > { %v2045_v4 = vrot.slane %v943_v33, %v9717_v17  ;;  %v2049_v45 = vrot.slane %v946_v56, %v9717_v17  ;;  %v2053_v61 = vrot.slane %v949_v26, %v9717_v17  ;;  %v2057_v34 = vrot.slane %v11218_v3, %v9717_v17  ;;  %v310_v56 = vld [vmem:[%s9700_s30 + $0xd8] sm:$0xff] }
  0xe1   : > { %v2061_v57 = vrot.slane %v11222_v21, %v9717_v17  ;;  %v2065_v32 = vrot.slane %v959_v22, %v9717_v17  ;;  %v2069_v29 = vrot.slane %v962_v15, %v9717_v17  ;;  %v2073_v25 = vrot.slane %v965_v62, %v9717_v17 }
  0xe2   : > { %v2077_v33 = vrot.slane %v968_v36, %v9717_v17  ;;  %v2081_v50 = vrot.slane %v971_v49, %v9717_v17  ;;  %v2085_v26 = vrot.slane %v974_v48, %v9717_v17  ;;  %v2089_v9 = vrot.slane %v977_v38, %v9717_v17 }
  0xe3   : > { %v2093_v3 = vrot.slane %v980_v16, %v9717_v17  ;;  %v2154_v21 = vsel %vm1842_vm1, %v2037_v0, %v2033_v5  ;;  %v2161_v55 = vsel %vm1842_vm1, %v2069_v29, %v2065_v32  ;;  %v344_v27 = vrot.slane %v309_v46, 1 }
  0xe4   : > { %v2155_v53 = vsel %vm825_vm2, %v2041_v7, %v2154_v21  ;;  %v2162_v22 = vsel %vm825_vm2, %v2073_v25, %v2161_v55  ;;  %v419_v13 = vrot.slane %v309_v46, 7  ;;  %v420_v14 = vrot.slane %v310_v56, 7 }
  0xe5   : > { %v2156_v41 = vsel %vm1845_vm3, %v2045_v4, %v2155_v53  ;;  %v2163_v24 = vsel %vm1845_vm3, %v2077_v33, %v2162_v22  ;;  %v473_v18 = vrot.slane %v310_v56, 5  ;;  %v3358_v51 = vrot.slane %v11270_v23, 1 }
  0xe6   : > { %v2157_v6 = vsel %vm827_vm4, %v2049_v45, %v2156_v41  ;;  %v2164_v15 = vsel %vm827_vm4, %v2081_v50, %v2163_v24  ;;  %v421_v62 = vsel %vm379_vm0, %v419_v13, %v420_v14  ;;  %v505_v36 = vsel %vm379_vm0, %v344_v27, %v419_v13 }
  0xe7   : > { %v2158_v47 = vsel %vm1848_vm5, %v2053_v61, %v2157_v6  ;;  %v2165_v49 = vsel %vm1848_vm5, %v2085_v26, %v2164_v15  ;;  %v521_v48 = vsel %vm379_vm0, %v420_v14, %v473_v18  ;;  %v735_v38 = vcombine.high %v505_v36, %v505_v36 }
  0xe8   : > { %v2159_v5 = vsel %vm829_vm6, %v2057_v34, %v2158_v47  ;;  %v2166_v16 = vsel %vm829_vm6, %v2089_v9, %v2165_v49  ;;  %v11291_v0 = vrot.slane %v505_v36, %v9707_v8  ;;  %v752_v7 = vcombine.high %v421_v62, %v421_v62 }
  0xe9   : > { %v2160_v30 = vsel %vm1851_vm7, %v2061_v57, %v2159_v5  ;;  %v2167_v4 = vsel %vm1851_vm7, %v2093_v3, %v2166_v16  ;;  %v749_v45 = vrot.slane %v735_v38, %v9707_v8  ;;  %v11296_v61 = vrot.slane %v421_v62, %v9707_v8 }
  0xea   : > { %17040 = vst [vmem:[#allocation79_spill] sm:$0xff] %v11291_v0  ;;  %v11299_v34 = vrot.slane %v521_v48, %v9707_v8  ;;  %v11301_v32 = vpack.i.bf16 %v2167_v4, %v2160_v30  ;;  %v750_v57 = vcombine.high %v11291_v0, %v11291_v0  ;;  %v11306_v46 = vrot.slane %v752_v7, %v9707_v8  ;;  %v8498_v7 = vld [vmem:[%s9700_s30 + $0x118] sm:$0xff] }
  0xeb   : > { %v8485_v29 = vrot.slane %v11291_v0, 9  ;;  %v751_v25 = vcombine.high %v749_v45, %v749_v45  ;;  %v11311_v33 = vcombine.high %v11296_v61, %v11296_v61  ;;  %v986_v50 = vrot.slane %v749_v45, 7 }
  0xec   : > { %17041 = vst [vmem:[#allocation80_spill] sm:$0xff] %v11301_v32  ;;  %v992_v56 = vrot.slane %v11296_v61, 7  ;;  %8805 = vrot.lane.b32.xlu1 %v11301_v32, %s9639_s13  ;;  %v11318_v26 = vcombine.high %v11306_v46, %v11306_v46  ;;  %v983_v9 = vrot.slane %v750_v57, 7  ;;  %v998_v3 = vrot.slane %v11306_v46, 7 }
  0xed   : > { %v1004_v21 = vrot.slane %v11299_v34, 7  ;;  %v988_v53 = vrot.slane %v986_v50, 2  ;;  %v989_v55 = vrot.slane %v751_v25, 7  ;;  %v995_v41 = vrot.slane %v11311_v33, 7 }
  0xee   : > { %v994_v27 = vrot.slane %v992_v56, 2  ;;  %v984_v22 = vsel %vm10635_vm10, %v8485_v29, %v983_v9  ;;  %v985_v13 = vrot.slane %v983_v9, 2  ;;  %v1000_v14 = vrot.slane %v998_v3, 2 }
  0xef   : > { %v1001_v6 = vrot.slane %v11318_v26, 7  ;;  %v990_v24 = vsel %vm10635_vm10, %v988_v53, %v989_v55  ;;  %v991_v18 = vrot.slane %v989_v55, 2  ;;  %v997_v15 = vrot.slane %v995_v41, 2 }
  0xf0   : > { %v996_v47 = vsel %vm10635_vm10, %v994_v27, %v995_v41  ;;  %v987_v62 = vsel %vm10635_vm10, %v985_v13, %v986_v50  ;;  %v2097_v49 = vrot.slane %v984_v22, %v9717_v17  ;;  %v2105_v16 = vrot.slane %v990_v24, %v9717_v17 }
  0xf1   : > { %v1002_v36 = vsel %vm10635_vm10, %v1000_v14, %v1001_v6  ;;  %v1003_v5 = vrot.slane %v1001_v6, 2  ;;  %v993_v48 = vsel %vm10635_vm10, %v991_v18, %v992_v56  ;;  %v999_v38 = vsel %vm10635_vm10, %v997_v15, %v998_v3 }
  0xf2   : > { %v2101_v30 = vrot.slane %v987_v62, %v9717_v17  ;;  %v2109_v29 = vrot.slane %v993_v48, %v9717_v17  ;;  %v2113_v50 = vrot.slane %v996_v47, %v9717_v17  ;;  %v2117_v9 = vrot.slane %v999_v38, %v9717_v17 }
  0xf3   : > { %v1005_v4 = vsel %vm10635_vm10, %v1003_v5, %v1004_v21  ;;  %v2121_v53 = vrot.slane %v1002_v36, %v9717_v17  ;;  %v3406_v55 = vrot.slane %v11270_v23, 7  ;;  %v3407_v41 = vrot.slane %v8498_v7, 7 }
  0xf4   : > { %v2125_v56 = vrot.slane %v1005_v4, %v9717_v17  ;;  %v2168_v3 = vsel %vm1842_vm1, %v2101_v30, %v2097_v49  ;;  %v3486_v22 = vrot.slane %v8498_v7, 5  ;;  %v11357_v14 = vrot.slane %v750_v57, %v9717_v17 }
  0xf5   : > { %v2169_v27 = vsel %vm825_vm2, %v2105_v16, %v2168_v3  ;;  %v3518_v13 = vsel %vm379_vm0, %v3358_v51, %v3406_v55  ;;  %v11360_v6 = vrot.slane %v749_v45, %v9717_v17  ;;  %v3408_v18 = vsel %vm379_vm0, %v3406_v55, %v3407_v41 }
  0xf6   : > { %v2170_v21 = vsel %vm1845_vm3, %v2109_v29, %v2169_v27  ;;  %17042 = vst [vmem:[#allocation26_spill] sm:$0xff] %v11357_v14  ;;  %v3534_v47 = vsel %vm379_vm0, %v3407_v41, %v3486_v22  ;;  %v3557_v15 = vcombine.high %v3518_v13, %v3518_v13  ;;  %v11369_v51 = vrot.slane %v3518_v13, %v9707_v8 }
  0xf7   : > { %17043 = vst [vmem:[#allocation30_spill] sm:$0xff] %v11360_v6  ;;  %v2171_v24 = vsel %vm827_vm4, %v2113_v50, %v2170_v21  ;;  %v3574_v57 = vcombine.high %v3408_v18, %v3408_v18  ;;  %v3581_v62 = vrot.slane %v3408_v18, %v9707_v8  ;;  %v11375_v5 = vrot.slane %v3534_v47, %v9707_v8 }
  0xf8   : > { %v2172_v23 = vsel %vm1848_vm5, %v2117_v9, %v2171_v24  ;;  %17044 = vst [vmem:[#allocation31_spill] sm:$0xff] %v11369_v51  ;;  %v3571_v36 = vrot.slane %v3557_v15, %v9707_v8  ;;  %v11378_v49 = vrot.slane %v751_v25, %v9717_v17  ;;  %v3572_v48 = vcombine.high %v11369_v51, %v11369_v51 }
  0xf9   : > { %v2173_v45 = vsel %vm829_vm6, %v2121_v53, %v2172_v23  ;;  %v3588_v38 = vrot.slane %v3574_v57, %v9707_v8  ;;  %v3589_v30 = vcombine.high %v3581_v62, %v3581_v62  ;;  %v8527_v7 = vrot.slane %v11369_v51, 9 }
  0xfa   : > { %17045 = vst [vmem:[#allocation81_spill] sm:$0xff] %v11378_v49  ;;  %v11381_v60 = vsel %vm1851_vm7, %v2125_v56, %v2173_v45  ;;  %v3573_v16 = vcombine.high %v3571_v36, %v3571_v36  ;;  %v3856_v4 = vrot.slane %v3571_v36, 7  ;;  %v3862_v29 = vrot.slane %v3581_v62, 7 }
  0xfb   : > { %17046 = vst [vmem:[#allocation27_spill] sm:$0xff] %v11381_v60  ;;  %v3590_v50 = vcombine.high %v3588_v38, %v3588_v38  ;;  %v3853_v9 = vrot.slane %v3572_v48, 7  ;;  %v3865_v53 = vrot.slane %v3589_v30, 7  ;;  %v3868_v3 = vrot.slane %v3588_v38, 7 }
  0xfc   : > { %v3858_v25 = vrot.slane %v3856_v4, 2  ;;  %v3859_v55 = vrot.slane %v3573_v16, 7  ;;  %v3864_v27 = vrot.slane %v3862_v29, 2  ;;  %v3874_v56 = vrot.slane %v11375_v5, 7 }
  0xfd   : > { %v3854_v41 = vsel %vm10635_vm10, %v8527_v7, %v3853_v9  ;;  %v3855_v22 = vrot.slane %v3853_v9, 2  ;;  %v3867_v21 = vrot.slane %v3865_v53, 2  ;;  %v3870_v13 = vrot.slane %v3868_v3, 2 }
  0xfe   : > { %v3860_v24 = vsel %vm10635_vm10, %v3858_v25, %v3859_v55  ;;  %v3861_v18 = vrot.slane %v3859_v55, 2  ;;  %v3866_v47 = vsel %vm10635_vm10, %v3864_v27, %v3865_v53  ;;  %v3871_v15 = vrot.slane %v3590_v50, 7 }
  0xff   : > { %v3857_v23 = vsel %vm10635_vm10, %v3855_v22, %v3856_v4  ;;  %v3869_v57 = vsel %vm10635_vm10, %v3867_v21, %v3868_v3  ;;  %v4921_v45 = vrot.slane %v3854_v41, %v9717_v17  ;;  %v4929_v7 = vrot.slane %v3860_v24, %v9717_v17 }
 0x100   : > { %v3863_v9 = vsel %vm10635_vm10, %v3861_v18, %v3862_v29  ;;  %v3872_v25 = vsel %vm10635_vm10, %v3870_v13, %v3871_v15  ;;  %v3873_v55 = vrot.slane %v3871_v15, 2  ;;  %v4925_v53 = vrot.slane %v3857_v23, %v9717_v17 }
 0x101   : > { %v4933_v27 = vrot.slane %v3863_v9, %v9717_v17  ;;  %v4937_v4 = vrot.slane %v3866_v47, %v9717_v17  ;;  %v4941_v22 = vrot.slane %v3869_v57, %v9717_v17  ;;  %v4945_v3 = vrot.slane %v3872_v25, %v9717_v17 }
 0x102   : > { %v3875_v41 = vsel %vm10635_vm10, %v3873_v55, %v3874_v56  ;;  %v5142_v21 = vsel %vm1842_vm1, %v4925_v53, %v4921_v45  ;;  %v11414_v29 = vrot.slane %v11296_v61, %v9717_v17  ;;  %v11418_v13 = vrot.slane %v11311_v33, %v9717_v17 }
 0x103   : > { %v4949_v24 = vrot.slane %v3875_v41, %v9717_v17  ;;  %v5143_v18 = vsel %vm825_vm2, %v4929_v7, %v5142_v21  ;;  %v11424_v47 = vrot.slane %v11306_v46, %v9717_v17  ;;  %v11428_v56 = vrot.slane %v11318_v26, %v9717_v17 }
 0x104   : > { %17047 = vst [vmem:[#allocation28_spill] sm:$0xff] %v11414_v29  ;;  %17048 = vst [vmem:[#allocation29_spill] sm:$0xff] %v11418_v13  ;;  %v5144_v15 = vsel %vm1845_vm3, %v4933_v27, %v5143_v18  ;;  %v2223_v61 = vrot.slane %v11299_v34, %v9717_v17  ;;  %v2266_v33 = vsel %vm1842_vm1, %v11360_v6, %v11357_v14 }
 0x105   : > { %17049 = vst [vmem:[#allocation32_spill] sm:$0xff] %v11424_v47  ;;  %17050 = vst [vmem:[#allocation84_spill] sm:$0xff] %v11428_v56  ;;  %v11437_v23 = vrot.slane %v3572_v48, %v9717_v17  ;;  %v5145_v57 = vsel %vm827_vm4, %v4937_v4, %v5144_v15  ;;  %v2267_v46 = vsel %vm825_vm2, %v11378_v49, %v2266_v33  ;;  %v307_v33 = vld [vmem:[%s9700_s30 + $0xc0] sm:$0xff] }
 0x106   : > { %v11443_v26 = vrot.slane %v3571_v36, %v9717_v17  ;;  %v11446_v45 = vrot.slane %v3573_v16, %v9717_v17  ;;  %v5146_v34 = vsel %vm1848_vm5, %v4941_v22, %v5145_v57  ;;  %v2268_v7 = vsel %vm1845_vm3, %v11414_v29, %v2267_v46  ;;  %v311_v57 = vld [vmem:[%s9700_s30 + $0xe0] sm:$0xff] }
 0x107   : > { %17051 = vst [vmem:[#allocation33_spill] sm:$0xff] %v11437_v23  ;;  %v11452_v9 = vrot.slane %v3581_v62, %v9717_v17  ;;  %v11455_v48 = vrot.slane %v3589_v30, %v9717_v17  ;;  %v5147_v25 = vsel %vm829_vm6, %v4945_v3, %v5146_v34  ;;  %v2269_v36 = vsel %vm827_vm4, %v11418_v13, %v2268_v7  ;;  %v11558_v34 = vld [vmem:[%s9700_s30 + $0xc8] sm:$0xff] }
 0x108   : > { %17052 = vst [vmem:[#allocation87_spill] sm:$0xff] %v11443_v26  ;;  %17053 = vst [vmem:[#allocation85_spill] sm:$0xff] %v11446_v45  ;;  %v11461_v55 = vrot.slane %v3588_v38, %v9717_v17  ;;  %v11464_v16 = vrot.slane %v3590_v50, %v9717_v17  ;;  %v11467_v53 = vsel %vm1851_vm7, %v4949_v24, %v5147_v25  ;;  %v11571_v25 = vld [vmem:[%s9700_s30 + $0xe8] sm:$0xff] }
 0x109   : > { %17054 = vst [vmem:[#allocation34_spill] sm:$0xff] %v11452_v9  ;;  %17055 = vst [vmem:[#allocation90_spill] sm:$0xff] %v11455_v48  ;;  %v2270_v62 = vsel %vm1848_vm5, %v11424_v47, %v2269_v36  ;;  %v5215_v30 = vrot.slane %v11375_v5, %v9717_v17  ;;  %v5240_v27 = vsel %vm1842_vm1, %v11443_v26, %v11437_v23 }
 0x10a   : > { %17056 = vst [vmem:[#allocation86_spill] sm:$0xff] %v11461_v55  ;;  %17057 = vst [vmem:[#allocation35_spill] sm:$0xff] %v11464_v16  ;;  %v8809_v38 = vpack.i.bf16 %v11467_v53, %v11381_v60  ;;  %v2271_v50 = vsel %vm829_vm6, %v11428_v56, %v2270_v62  ;;  %v5241_v4 = vsel %vm825_vm2, %v11446_v45, %v5240_v27  ;;  %v343_v62 = vrot.slane %v307_v33, 1 }
 0x10b   : > { %17058 = vst [vmem:[#allocation91_spill] sm:$0xff] %v11467_v53  ;;  %v11484_v22 = vrot.slane %v11146_v59, %v9717_v17  ;;  %v11487_v3 = vsel %vm1851_vm7, %v2223_v61, %v2271_v50  ;;  %v5242_v5 = vsel %vm1845_vm3, %v11452_v9, %v5241_v4  ;;  %v11493_v41 = vrot.slane %v11142_v39, %v9717_v17  ;;  %v299_v9 = vld [vmem:[%s9700_s30 + $0x80] sm:$0xff] }
 0x10c   : > { %17060 = vst [vmem:[#allocation88_spill] sm:$0xff] %v11487_v3  ;;  %v11497_v21 = vrot.slane %v11170_v11, %v9717_v17  ;;  %8810 = vrot.lane.b32.xlu1 %v8809_v38, %s9639_s13  ;;  %v5243_v59 = vsel %vm827_vm4, %v11455_v48, %v5242_v5  ;;  %v11504_v24 = vrot.slane %v11135_v43, %v9717_v17  ;;  %v416_v38 = vrot.slane %v307_v33, 7 }
 0x10d   : > { %17059 = vst [vmem:[#allocation36_spill] sm:$0xff] %v11484_v22  ;;  %17061 = vst [vmem:[#allocation94_spill] sm:$0xff] %v11493_v41  ;;  %v11508_v18 = vrot.slane %v11156_v42, %v9717_v17  ;;  %v11512_v39 = vrot.slane %v11149_v35, %v9717_v17  ;;  %v5244_v11 = vsel %vm1848_vm5, %v11461_v55, %v5243_v59  ;;  %v16587_v50 = vrot.slane %v11558_v34, 7 }
 0x10e   : > { %17062 = vst [vmem:[#allocation89_spill] sm:$0xff] %v11497_v21  ;;  %17063 = vst [vmem:[#allocation95_spill] sm:$0xff] %v11504_v24  ;;  %v11518_v15 = vrot.slane %v11174_v31, %v9717_v17  ;;  %v11522_v43 = vrot.slane %v11163_v19, %v9717_v17  ;;  %v11526_v42 = vrot.slane %v11159_v20, %v9717_v17  ;;  %v422_v59 = vrot.slane %v311_v57, 7 }
 0x10f   : > { %17064 = vst [vmem:[#allocation92_spill] sm:$0xff] %v11508_v18  ;;  %17065 = vst [vmem:[#allocation97_spill] sm:$0xff] %v11512_v39  ;;  %v5245_v35 = vsel %vm829_vm6, %v11464_v16, %v5244_v11  ;;  %v11532_v61 = vrot.slane %v11185_v63, %v9717_v17  ;;  %v11536_v31 = vrot.slane %v11152_v12, %v9717_v17  ;;  %v16588_v11 = vrot.slane %v11571_v25, 7 }
 0x110   : > { %17066 = vst [vmem:[#allocation93_spill] sm:$0xff] %v11518_v15  ;;  %17067 = vst [vmem:[#allocation98_spill] sm:$0xff] %v11522_v43  ;;  %v11540_v19 = vrot.slane %v11178_v52, %v9717_v17  ;;  %v11545_v20 = vsel %vm1851_vm7, %v5215_v30, %v5245_v35  ;;  %v11549_v46 = vrot.slane %v11166_v58, %v9717_v17  ;;  %v345_v30 = vrot.slane %v311_v57, 1 }
 0x111   : > { %17068 = vst [vmem:[#allocation96_spill] sm:$0xff] %v11526_v42  ;;  %17069 = vst [vmem:[#allocation99_spill] sm:$0xff] %v11532_v61  ;;  %v11553_v63 = vrot.slane %v11189_v2, %v9717_v17  ;;  %v2215_v12 = vrot.slane %v11181_v40, %v9717_v17  ;;  %v8819_v52 = vpack.i.bf16 %v11545_v20, %v11487_v3  ;;  %v303_v3 = vld [vmem:[%s9700_s30 + $0xa0] sm:$0xff] }
 0x112   : > { %17070 = vst [vmem:[#allocation2_spill] sm:$0xff] %v11536_v31  ;;  %17071 = vst [vmem:[#allocation5_spill] sm:$0xff] %v11540_v19  ;;  %v2219_v7 = vrot.slane %v11192_v37, %v9717_v17  ;;  %v2252_v58 = vsel %vm1842_vm1, %v11493_v41, %v11484_v22  ;;  %v2259_v2 = vsel %vm1842_vm1, %v11526_v42, %v11522_v43  ;;  %v404_v42 = vrot.slane %v299_v9, 7 }
 0x113   : > { %17072 = vst [vmem:[#allocation18_spill] sm:$0xff] %v11545_v20  ;;  %17073 = vst [vmem:[#allocation3_spill] sm:$0xff] %v11549_v46  ;;  %v2253_v40 = vsel %vm825_vm2, %v11497_v21, %v2252_v58  ;;  %v2260_v36 = vsel %vm825_vm2, %v11532_v61, %v2259_v2  ;;  %8820 = vrot.lane.b32.xlu1 %v8819_v52, %s9636_s10  ;;  %v418_v33 = vsel %vm379_vm0, %v416_v38, %v16587_v50 }
 0x114   : > { %17074 = vst [vmem:[#allocation37_spill] sm:$0xff] %v11553_v63  ;;  %v2254_v37 = vsel %vm1845_vm3, %v11504_v24, %v2253_v40  ;;  %v2261_v27 = vsel %vm1845_vm3, %v11536_v31, %v2260_v36  ;;  %v504_v58 = vsel %vm379_vm0, %v343_v62, %v416_v38  ;;  %v424_v40 = vsel %vm379_vm0, %v422_v59, %v16588_v11 }
 0x115   : > { %v2255_v4 = vsel %vm827_vm4, %v11508_v18, %v2254_v37  ;;  %v2262_v5 = vsel %vm827_vm4, %v11540_v19, %v2261_v27  ;;  %v506_v36 = vsel %vm379_vm0, %v345_v30, %v422_v59  ;;  %v1235_v38 = vcombine.high %v418_v33, %v418_v33 }
 0x116   : > { %v2256_v35 = vsel %vm1848_vm5, %v11512_v39, %v2255_v4  ;;  %v2263_v52 = vsel %vm1848_vm5, %v11549_v46, %v2262_v5  ;;  %v1218_v4 = vcombine.high %v504_v58, %v504_v58  ;;  %v11607_v5 = vrot.slane %v504_v58, %v9707_v8  ;;  %v11740_v46 = vld [vmem:[%s9700_s30 + $0x88] sm:$0xff] }
 0x117   : > { %v2257_v2 = vsel %vm829_vm6, %v11518_v15, %v2256_v35  ;;  %v2264_v57 = vsel %vm829_vm6, %v11553_v63, %v2263_v52  ;;  %v11612_v35 = vrot.slane %v418_v33, %v9707_v8  ;;  %v1252_v52 = vcombine.high %v506_v36, %v506_v36  ;;  %v11748_v39 = vld [vmem:[%s9700_s30 + $0xa8] sm:$0xff] }
 0x118   : > { %v2258_v37 = vsel %vm1851_vm7, %v2215_v12, %v2257_v2  ;;  %v2265_v27 = vsel %vm1851_vm7, %v2219_v7, %v2264_v57  ;;  %v11615_v50 = vrot.slane %v1218_v4, %v9707_v8  ;;  %v11619_v30 = vcombine.high %v11607_v5, %v11607_v5 }
 0x119   : > { %v11609_v62 = vpack.i.bf16 %v2265_v27, %v2258_v37  ;;  %v11622_v12 = vrot.slane %v506_v36, %v9707_v8  ;;  %v1269_v7 = vcombine.high %v424_v40, %v424_v40  ;;  %v11627_v59 = vrot.slane %v1235_v38, %v9707_v8 }
 0x11a   : > { %v11631_v33 = vcombine.high %v11612_v35, %v11612_v35  ;;  %v11634_v58 = vrot.slane %v1252_v52, %v9707_v8  ;;  %v11637_v2 = vrot.slane %v424_v40, %v9707_v8  ;;  %v11641_v57 = vcombine.high %v11615_v50, %v11615_v50 }
 0x11b   : > { %17075 = vst [vmem:[#allocation6_spill] sm:$0xff] %v11609_v62  ;;  %8815 = vrot.lane.b32.xlu0 %v11609_v62, %s9636_s10  ;;  %v11645_v36 = vcombine.high %v11622_v12, %v11622_v12  ;;  %v11648_v37 = vrot.slane %v1269_v7, %v9707_v8  ;;  %v11653_v4 = vcombine.high %v11627_v59, %v11627_v59  ;;  %v339_v61 = vrot.slane %v299_v9, 1 }
 0x11c   : > { %v11657_v40 = vcombine.high %v11634_v58, %v11634_v58  ;;  %v11661_v38 = vcombine.high %v11637_v2, %v11637_v2  ;;  %v2489_v27 = vrot.slane %v11607_v5, %v9717_v17  ;;  %v11673_v44 = vrot.slane %v11619_v30, %v9717_v17 }
 0x11d   : > { %v11666_v7 = vcombine.high %v11648_v37, %v11648_v37  ;;  %v11680_v53 = vrot.slane %v11615_v50, %v9717_v17  ;;  %v11685_v16 = vrot.slane %v11641_v57, %v9717_v17  ;;  %v11689_v55 = vrot.slane %v11612_v35, %v9717_v17 }
 0x11e   : > { %v11693_v20 = vrot.slane %v11631_v33, %v9717_v17  ;;  %v11697_v52 = vrot.slane %v11627_v59, %v9717_v17  ;;  %v11701_v11 = vrot.slane %v11653_v4, %v9717_v17  ;;  %v2521_v54 = vrot.slane %v11622_v12, %v9717_v17 }
 0x11f   : > { %17076 = vst [vmem:[#allocation12_spill] sm:$0xff] %v11680_v53  ;;  %17077 = vst [vmem:[#allocation8_spill] sm:$0xff] %v11685_v16  ;;  %v11707_v48 = vrot.slane %v11645_v36, %v9717_v17  ;;  %v11712_v45 = vrot.slane %v11634_v58, %v9717_v17  ;;  %v11716_v26 = vrot.slane %v11657_v40, %v9717_v17  ;;  %v410_v31 = vrot.slane %v303_v3, 7 }
 0x120   : > { %17078 = vst [vmem:[#allocation19_spill] sm:$0xff] %v11689_v55  ;;  %17079 = vst [vmem:[#allocation9_spill] sm:$0xff] %v11693_v20  ;;  %v11720_v23 = vrot.slane %v11637_v2, %v9717_v17  ;;  %v11724_v51 = vrot.slane %v11661_v38, %v9717_v17  ;;  %v11729_v60 = vrot.slane %v11648_v37, %v9717_v17  ;;  %v16620_v21 = vrot.slane %v11748_v39, 7 }
 0x121   : > { %17080 = vst [vmem:[#allocation20_spill] sm:$0xff] %v11697_v52  ;;  %17081 = vst [vmem:[#allocation4_spill] sm:$0xff] %v11701_v11  ;;  %v11733_v62 = vrot.slane %v11666_v7, %v9717_v17  ;;  %v2592_v32 = vsel %vm1842_vm1, %v11673_v44, %v2489_v27  ;;  %v2599_v63 = vsel %vm1842_vm1, %v11707_v48, %v2521_v54  ;;  %v341_v54 = vrot.slane %v303_v3, 1 }
 0x122   : > { %17082 = vst [vmem:[#allocation15_spill] sm:$0xff] %v11707_v48  ;;  %17083 = vst [vmem:[#allocation10_spill] sm:$0xff] %v11712_v45  ;;  %v2593_v19 = vsel %vm825_vm2, %v11680_v53, %v2592_v32  ;;  %v2600_v15 = vsel %vm825_vm2, %v11712_v45, %v2599_v63  ;;  %v16619_v63 = vrot.slane %v11740_v46, 7  ;;  %v474_v53 = vrot.slane %v11571_v25, 5 }
 0x123   : > { %17084 = vst [vmem:[#allocation21_spill] sm:$0xff] %v11716_v26  ;;  %17085 = vst [vmem:[#allocation11_spill] sm:$0xff] %v11720_v23  ;;  %v2594_v18 = vsel %vm1845_vm3, %v11685_v16, %v2593_v19  ;;  %v2601_v27 = vsel %vm1845_vm3, %v11716_v26, %v2600_v15  ;;  %v500_v15 = vsel %vm379_vm0, %v339_v61, %v404_v42  ;;  %v472_v16 = vrot.slane %v11558_v34, 5 }
 0x124   : > { %17086 = vst [vmem:[#allocation7_spill] sm:$0xff] %v11724_v51  ;;  %17087 = vst [vmem:[#allocation22_spill] sm:$0xff] %v11729_v60  ;;  %v2595_v24 = vsel %vm827_vm4, %v11689_v55, %v2594_v18  ;;  %v2602_v32 = vsel %vm827_vm4, %v11720_v23, %v2601_v27  ;;  %v406_v3 = vsel %vm379_vm0, %v404_v42, %v16619_v63  ;;  %v17094_v26 = vrot.slane %v11558_v34, 7 }
 0x125   : > { %17088 = vst [vmem:[#allocation13_spill] sm:$0xff] %v11733_v62  ;;  %v2596_v43 = vsel %vm1848_vm5, %v11693_v20, %v2595_v24  ;;  %v2603_v19 = vsel %vm1848_vm5, %v11724_v51, %v2602_v32  ;;  %v502_v27 = vsel %vm379_vm0, %v341_v54, %v410_v31  ;;  %v412_v61 = vsel %vm379_vm0, %v410_v31, %v16620_v21 }
 0x126   : > { %v2597_v9 = vsel %vm829_vm6, %v11697_v52, %v2596_v43  ;;  %v2604_v18 = vsel %vm829_vm6, %v11729_v60, %v2603_v19  ;;  %v1150_v43 = vcombine.high %v500_v15, %v500_v15  ;;  %v11781_v19 = vrot.slane %v500_v15, %v9707_v8 }
 0x127   : > { %v2598_v24 = vsel %vm1851_vm7, %v11701_v11, %v2597_v9  ;;  %v2605_v32 = vsel %vm1851_vm7, %v11733_v62, %v2604_v18  ;;  %v1167_v22 = vcombine.high %v406_v3, %v406_v3  ;;  %v11784_v42 = vrot.slane %v406_v3, %v9707_v8 }
 0x128   : > { %v8829_v41 = vpack.i.bf16 %v2605_v32, %v2598_v24  ;;  %v11787_v54 = vrot.slane %v1150_v43, %v9707_v8  ;;  %v1184_v9 = vcombine.high %v502_v27, %v502_v27  ;;  %v11790_v63 = vrot.slane %v502_v27, %v9707_v8 }
 0x129   : > { %v1201_v18 = vcombine.high %v412_v61, %v412_v61  ;;  %v11795_v31 = vcombine.high %v11781_v19, %v11781_v19  ;;  %v11798_v15 = vrot.slane %v1167_v22, %v9707_v8  ;;  %v11802_v3 = vcombine.high %v11784_v42, %v11784_v42 }
 0x12a   : > { %8830 = vrot.lane.b32.xlu1 %v8829_v41, %s9634_s8  ;;  %v11805_v24 = vrot.slane %v412_v61, %v9707_v8  ;;  %v11809_v27 = vcombine.high %v11787_v54, %v11787_v54  ;;  %v11812_v41 = vrot.slane %v1184_v9, %v9707_v8  ;;  %v11816_v32 = vcombine.high %v11790_v63, %v11790_v63 }
 0x12b   : > { %v11819_v22 = vrot.slane %v1201_v18, %v9707_v8  ;;  %v11823_v43 = vcombine.high %v11798_v15, %v11798_v15  ;;  %v2425_v47 = vrot.slane %v11781_v19, %v9717_v17  ;;  %v11846_v9 = vrot.slane %v11795_v31, %v9717_v17 }
 0x12c   : > { %v11827_v61 = vcombine.high %v11805_v24, %v11805_v24  ;;  %v11833_v10 = vcombine.high %v11812_v41, %v11812_v41  ;;  %v11850_v21 = vrot.slane %v11787_v54, %v9717_v17  ;;  %v11856_v56 = vrot.slane %v11809_v27, %v9717_v17 }
 0x12d   : > { %v11837_v18 = vcombine.high %v11819_v22, %v11819_v22  ;;  %v11860_v13 = vrot.slane %v11784_v42, %v9717_v17  ;;  %v11864_v29 = vrot.slane %v11802_v3, %v9717_v17  ;;  %v11868_v14 = vrot.slane %v11798_v15, %v9717_v17 }
 0x12e   : > { %17089 = vst [vmem:[#allocation23_spill] sm:$0xff] %v11850_v21  ;;  %v11872_v49 = vrot.slane %v11823_v43, %v9717_v17  ;;  %v2457_v6 = vrot.slane %v11790_v63, %v9717_v17  ;;  %v11878_v28 = vrot.slane %v11816_v32, %v9717_v17  ;;  %v11882_v0 = vrot.slane %v11812_v41, %v9717_v17 }
 0x12f   : > { %17090 = vst [vmem:[#allocation24_spill] sm:$0xff] %v11860_v13  ;;  %v11886_v62 = vrot.slane %v11833_v10, %v9717_v17  ;;  %v11890_v11 = vrot.slane %v11805_v24, %v9717_v17  ;;  %v11894_v60 = vrot.slane %v11827_v61, %v9717_v17  ;;  %v11898_v52 = vrot.slane %v11819_v22, %v9717_v17 }
 0x130   : > { %17091 = vst [vmem:[#allocation16_spill] sm:$0xff] %v11878_v28  ;;  %17092 = vst [vmem:[#allocation14_spill] sm:$0xff] %v11882_v0  ;;  %v11902_v51 = vrot.slane %v11837_v18, %v9717_v17  ;;  %v2578_v20 = vsel %vm1842_vm1, %v11846_v9, %v2425_v47  ;;  %v2585_v55 = vsel %vm1842_vm1, %v11878_v28, %v2457_v6  ;;  %v8492_v47 = vrot.slane %v11607_v5, 9 }
 0x131   : > { %17093 = vst [vmem:[#allocation17_spill] sm:$0xff] %v11898_v52  ;;  %v2579_v23 = vsel %vm825_vm2, %v11850_v21, %v2578_v20  ;;  %v2586_v48 = vsel %vm825_vm2, %v11882_v0, %v2585_v55  ;;  %v520_v28 = vsel %vm379_vm0, %v17094_v26, %v472_v16  ;;  %v17095_v21 = vrot.slane %v11619_v30, 7 }
 0x132   : > { %v2580_v45 = vsel %vm1845_vm3, %v11856_v56, %v2579_v23  ;;  %v2587_v6 = vsel %vm1845_vm3, %v11886_v62, %v2586_v48  ;;  %v17096_v5 = vrot.slane %v11571_v25, 7  ;;  %v1505_v25 = vrot.slane %v11615_v50, 7 }
 0x133   : > { %v2581_v20 = vsel %vm827_vm4, %v11860_v13, %v2580_v45  ;;  %v1504_v23 = vrot.slane %v17095_v21, 2  ;;  %v2588_v0 = vsel %vm827_vm4, %v11890_v11, %v2587_v6  ;;  %v11935_v13 = vrot.slane %v520_v28, %v9707_v8 }
 0x134   : > { %v2582_v55 = vsel %vm1848_vm5, %v11864_v29, %v2581_v20  ;;  %v522_v45 = vsel %vm379_vm0, %v17096_v5, %v474_v53  ;;  %v2589_v26 = vsel %vm1848_vm5, %v11894_v60, %v2588_v0  ;;  %v1503_v34 = vsel %vm10635_vm10, %v8492_v47, %v17095_v21 }
 0x135   : > { %v2583_v48 = vsel %vm829_vm6, %v11868_v14, %v2582_v55  ;;  %v11942_v16 = vrot.slane %v522_v45, %v9707_v8  ;;  %v2590_v28 = vsel %vm829_vm6, %v11898_v52, %v2589_v26  ;;  %v17097_v20 = vrot.slane %v11641_v57, 7 }
 0x136   : > { %v2584_v53 = vsel %vm1851_vm7, %v11872_v49, %v2583_v48  ;;  %v2591_v0 = vsel %vm1851_vm7, %v11902_v51, %v2590_v28  ;;  %v1511_v55 = vrot.slane %v11612_v35, 7  ;;  %v17098_v30 = vrot.slane %v11631_v33, 7 }
 0x137   : > { %v1510_v6 = vrot.slane %v17097_v20, 2  ;;  %v1517_v47 = vrot.slane %v11627_v59, 7  ;;  %v8824_v45 = vpack.i.bf16 %v2591_v0, %v2584_v53  ;;  %v1506_v48 = vsel %vm10635_vm10, %v1504_v23, %v1505_v25 }
 0x138   : > { %v1516_v5 = vrot.slane %v17098_v30, 2  ;;  %v1507_v26 = vrot.slane %v1505_v25, 2  ;;  %v17099_v50 = vrot.slane %v11653_v4, 7  ;;  %v1513_v52 = vrot.slane %v1511_v55, 2 }
 0x139   : > { %v1512_v20 = vsel %vm10635_vm10, %v1510_v6, %v1511_v55  ;;  %v1519_v28 = vrot.slane %v1517_v47, 2  ;;  %8825 = vrot.lane.b32.xlu0 %v8824_v45, %s9634_s8  ;;  %v17100_v59 = vrot.slane %v11641_v57, 7  ;;  %v1523_v23 = vrot.slane %v11935_v13, 7 }
 0x13a   : > { %v1522_v21 = vrot.slane %v17099_v50, 2  ;;  %v1518_v35 = vsel %vm10635_vm10, %v1516_v5, %v1517_v47  ;;  %v8493_v25 = vrot.slane %v11622_v12, 9  ;;  %v17101_v0 = vrot.slane %v11645_v36, 7 }
 0x13b   : > { %v1509_v53 = vsel %vm10635_vm10, %v1507_v26, %v17100_v59  ;;  %v17102_v6 = vrot.slane %v11631_v33, 7  ;;  %v17103_v5 = vmov %v17099_v50  ;;  %v1530_v47 = vrot.slane %v11634_v58, 7 }
 0x13c   : > { %v1529_v30 = vrot.slane %v17101_v0, 2  ;;  %v1521_v57 = vsel %vm10635_vm10, %v1519_v28, %v17103_v5  ;;  %v17104_v45 = vrot.slane %v11657_v40, 7  ;;  %v1524_v12 = vsel %vm10635_vm10, %v1522_v21, %v1523_v23 }
 0x13d   : > { %v1515_v55 = vsel %vm10635_vm10, %v1513_v52, %v17102_v6  ;;  %v17105_v50 = vmov %v17101_v0  ;;  %v1536_v52 = vrot.slane %v11637_v2, 7  ;;  %v17106_v4 = vrot.slane %v11661_v38, 7 }
 0x13e   : > { %v1535_v26 = vrot.slane %v17104_v45, 2  ;;  %v1528_v33 = vsel %vm10635_vm10, %v8493_v25, %v17105_v50  ;;  %v1531_v28 = vsel %vm10635_vm10, %v1529_v30, %v1530_v47  ;;  %v1532_v58 = vrot.slane %v1530_v47, 2 }
 0x13f   : > { %v1541_v59 = vrot.slane %v17106_v4, 2  ;;  %v1542_v0 = vrot.slane %v11648_v37, 7  ;;  %v17107_v6 = vrot.slane %v11666_v7, 7  ;;  %v1538_v21 = vrot.slane %v1536_v52, 2 }
 0x140   : > { %v1537_v36 = vsel %vm10635_vm10, %v1535_v26, %v1536_v52  ;;  %v1548_v23 = vrot.slane %v11942_v16, 7  ;;  %v2825_v2 = vrot.slane %v1503_v34, %v9717_v17  ;;  %v17108_v25 = vmov %v17104_v45 }
 0x141   : > { %v1547_v5 = vrot.slane %v17107_v6, 2  ;;  %v1534_v45 = vsel %vm10635_vm10, %v1532_v58, %v17108_v25  ;;  %v1543_v30 = vsel %vm10635_vm10, %v1541_v59, %v1542_v0  ;;  %v1544_v37 = vrot.slane %v1542_v0, 2 }
 0x142   : > { %v2829_v47 = vrot.slane %v1506_v48, %v9717_v17  ;;  %v17109_v50 = vmov %v17106_v4  ;;  %v2833_v34 = vrot.slane %v1509_v53, %v9717_v17  ;;  %v2837_v40 = vrot.slane %v1512_v20, %v9717_v17 }
 0x143   : > { %v1540_v26 = vsel %vm10635_vm10, %v1538_v21, %v17109_v50  ;;  %v1549_v52 = vsel %vm10635_vm10, %v1547_v5, %v1548_v23  ;;  %v17110_v4 = vmov %v17107_v6  ;;  %v2841_v58 = vrot.slane %v1515_v55, %v9717_v17 }
 0x144   : > { %v1546_v59 = vsel %vm10635_vm10, %v1544_v37, %v17110_v4  ;;  %v2845_v48 = vrot.slane %v1518_v35, %v9717_v17  ;;  %v2849_v38 = vrot.slane %v1521_v57, %v9717_v17  ;;  %v2853_v0 = vrot.slane %v1524_v12, %v9717_v17 }
 0x145   : > { %v2857_v6 = vrot.slane %v1528_v33, %v9717_v17  ;;  %v2861_v5 = vrot.slane %v1531_v28, %v9717_v17  ;;  %v2865_v53 = vrot.slane %v1534_v45, %v9717_v17  ;;  %v2869_v20 = vrot.slane %v1537_v36, %v9717_v17 }
 0x146   : > { %v2873_v7 = vrot.slane %v1540_v26, %v9717_v17  ;;  %v2877_v21 = vrot.slane %v1543_v30, %v9717_v17  ;;  %v2881_v55 = vrot.slane %v1546_v59, %v9717_v17  ;;  %v2885_v35 = vrot.slane %v1549_v52, %v9717_v17 }
 0x147   : > { %v2928_v57 = vsel %vm1842_vm1, %v2829_v47, %v2825_v2  ;;  %v2935_v12 = vsel %vm1842_vm1, %v2861_v5, %v2857_v6  ;;  %v468_v33 = vrot.slane %v11740_v46, 5  ;;  %v470_v36 = vrot.slane %v11748_v39, 5 }
 0x148   : > { %v2929_v28 = vsel %vm825_vm2, %v2833_v34, %v2928_v57  ;;  %v2936_v23 = vsel %vm825_vm2, %v2865_v53, %v2935_v12  ;;  %v8490_v25 = vrot.slane %v11781_v19, 9  ;;  %v17111_v37 = vrot.slane %v11740_v46, 7 }
 0x149   : > { %v2930_v45 = vsel %vm1845_vm3, %v2837_v40, %v2929_v28  ;;  %v2937_v30 = vsel %vm1845_vm3, %v2869_v20, %v2936_v23  ;;  %v17112_v47 = vrot.slane %v11795_v31, 7  ;;  %v17113_v34 = vrot.slane %v11748_v39, 7 }
 0x14a   : > { %v516_v2 = vsel %vm379_vm0, %v17111_v37, %v468_v33  ;;  %v2931_v26 = vsel %vm827_vm4, %v2841_v58, %v2930_v45  ;;  %v2938_v52 = vsel %vm827_vm4, %v2873_v7, %v2937_v30  ;;  %v1455_v53 = vrot.slane %v11787_v54, 7 }
 0x14b   : > { %v1454_v50 = vrot.slane %v17112_v47, 2  ;;  %v518_v4 = vsel %vm379_vm0, %v17113_v34, %v470_v36  ;;  %v12058_v19 = vrot.slane %v516_v2, %v9707_v8  ;;  %v2932_v40 = vsel %vm1848_vm5, %v2845_v48, %v2931_v26 }
 0x14c   : > { %v2939_v46 = vsel %vm1848_vm5, %v2877_v21, %v2938_v52  ;;  %v12063_v59 = vrot.slane %v518_v4, %v9707_v8  ;;  %v17114_v6 = vmov %v17112_v47  ;;  %v2933_v5 = vsel %vm829_vm6, %v2849_v38, %v2932_v40 }
 0x14d   : > { %v1453_v58 = vsel %vm10635_vm10, %v8490_v25, %v17114_v6  ;;  %v2940_v39 = vsel %vm829_vm6, %v2881_v55, %v2939_v46  ;;  %v17115_v20 = vrot.slane %v11809_v27, 7  ;;  %v2934_v48 = vsel %vm1851_vm7, %v2853_v0, %v2933_v5 }
 0x14e   : > { %v2941_v21 = vsel %vm1851_vm7, %v2885_v35, %v2940_v39  ;;  %v1461_v57 = vrot.slane %v11784_v42, 7  ;;  %v17116_v31 = vrot.slane %v11802_v3, 7  ;;  %v1456_v38 = vsel %vm10635_vm10, %v1454_v50, %v1455_v53 }
 0x14f   : > { %v1460_v7 = vrot.slane %v17115_v20, 2  ;;  %v8839_v33 = vpack.i.bf16 %v2941_v21, %v2934_v48  ;;  %v1457_v28 = vrot.slane %v1455_v53, 2  ;;  %v1467_v55 = vrot.slane %v11798_v15, 7 }
 0x150   : > { %v1466_v12 = vrot.slane %v17116_v31, 2  ;;  %v1463_v23 = vrot.slane %v1461_v57, 2  ;;  %v17117_v0 = vrot.slane %v11823_v43, 7  ;;  %v1473_v35 = vrot.slane %v12058_v19, 7 }
 0x151   : > { %v1462_v54 = vsel %vm10635_vm10, %v1460_v7, %v1461_v57  ;;  %8840 = vrot.lane.b32.xlu1 %v8839_v33, %s9640_s14  ;;  %v17118_v42 = vmov %v17115_v20  ;;  %v1469_v15 = vrot.slane %v1467_v55, 2  ;;  %v8491_v30 = vrot.slane %v11790_v63, 9 }
 0x152   : > { %v1472_v36 = vrot.slane %v17117_v0, 2  ;;  %v1459_v25 = vsel %vm10635_vm10, %v1457_v28, %v17118_v42  ;;  %v1468_v45 = vsel %vm10635_vm10, %v1466_v12, %v1467_v55  ;;  %v17119_v37 = vmov %v17116_v31 }
 0x153   : > { %v1465_v2 = vsel %vm10635_vm10, %v1463_v23, %v17119_v37  ;;  %v17120_v50 = vrot.slane %v11816_v32, 7  ;;  %v1480_v26 = vrot.slane %v11812_v41, 7  ;;  %v17121_v52 = vmov %v17117_v0 }
 0x154   : > { %v1474_v47 = vsel %vm10635_vm10, %v1472_v36, %v1473_v35  ;;  %v1471_v34 = vsel %vm10635_vm10, %v1469_v15, %v17121_v52  ;;  %v17123_v4 = vrot.slane %v11833_v10, 7  ;;  %v1486_v46 = vrot.slane %v11805_v24, 7 }
 0x155   : > { %v1479_v27 = vrot.slane %v17120_v50, 2  ;;  %v17122_v63 = vmov %v17120_v50  ;;  %v1482_v5 = vrot.slane %v1480_v26, 2  ;;  %v17124_v41 = vrot.slane %v11827_v61, 7 }
 0x156   : > { %v1478_v3 = vsel %vm10635_vm10, %v8491_v30, %v17122_v63  ;;  %v1485_v40 = vrot.slane %v17123_v4, 2  ;;  %v1492_v39 = vrot.slane %v11819_v22, 7  ;;  %v1488_v53 = vrot.slane %v1486_v46, 2 }
 0x157   : > { %v1481_v6 = vsel %vm10635_vm10, %v1479_v27, %v1480_v26  ;;  %v1491_v43 = vrot.slane %v17124_v41, 2  ;;  %v17125_v20 = vrot.slane %v11837_v18, 7  ;;  %v1498_v48 = vrot.slane %v12063_v59, 7 }
 0x158   : > { %v1487_v32 = vsel %vm10635_vm10, %v1485_v40, %v1486_v46  ;;  %v17126_v24 = vmov %v17123_v4  ;;  %v1494_v31 = vrot.slane %v1492_v39, 2  ;;  %v2761_v22 = vrot.slane %v1453_v58, %v9717_v17  ;;  %v17130_v40 = vld [vmem:[#allocation15_spill] sm:$0xff]  ;;  %v17131_v46 = vld [vmem:[#allocation10_spill] sm:$0xff] }
 0x159   : > { %v1497_v7 = vrot.slane %v17125_v20, 2  ;;  %v1484_v21 = vsel %vm10635_vm10, %v1482_v5, %v17126_v24  ;;  %v1493_v57 = vsel %vm10635_vm10, %v1491_v43, %v1492_v39  ;;  %v17127_v12 = vmov %v17124_v41  ;;  %v17132_v41 = vld [vmem:[#allocation8_spill] sm:$0xff]  ;;  %v17133_v43 = vld [vmem:[#allocation21_spill] sm:$0xff] }
 0x15a   : > { %v1490_v33 = vsel %vm10635_vm10, %v1488_v53, %v17127_v12  ;;  %v2765_v55 = vrot.slane %v1456_v38, %v9717_v17  ;;  %v2769_v10 = vrot.slane %v1459_v25, %v9717_v17  ;;  %v17128_v23 = vmov %v17125_v20 }
 0x15b   : > { %v1499_v28 = vsel %vm10635_vm10, %v1497_v7, %v1498_v48  ;;  %v1496_v0 = vsel %vm10635_vm10, %v1494_v31, %v17128_v23  ;;  %v2773_v36 = vrot.slane %v1462_v54, %v9717_v17  ;;  %v2777_v58 = vrot.slane %v1465_v2, %v9717_v17  ;;  %v17135_v7 = vld [vmem:[#allocation11_spill] sm:$0xff]  ;;  %v17139_v23 = vld [vmem:[#allocation22_spill] sm:$0xff] }
 0x15c   : > { %v2781_v61 = vrot.slane %v1468_v45, %v9717_v17  ;;  %v2785_v35 = vrot.slane %v1471_v34, %v9717_v17  ;;  %v2789_v42 = vrot.slane %v1474_v47, %v9717_v17  ;;  %v2793_v15 = vrot.slane %v1478_v3, %v9717_v17  ;;  %v17129_v3 = vld [vmem:[#allocation12_spill] sm:$0xff] }
 0x15d   : > { %v2797_v38 = vrot.slane %v1481_v6, %v9717_v17  ;;  %v2801_v25 = vrot.slane %v1484_v21, %v9717_v17  ;;  %v2805_v18 = vrot.slane %v1487_v32, %v9717_v17  ;;  %v2809_v30 = vrot.slane %v1490_v33, %v9717_v17 }
 0x15e   : > { %v2813_v54 = vrot.slane %v1493_v57, %v9717_v17  ;;  %v2817_v37 = vrot.slane %v1496_v0, %v9717_v17  ;;  %v2821_v45 = vrot.slane %v1499_v28, %v9717_v17  ;;  %v2914_v2 = vsel %vm1842_vm1, %v2765_v55, %v2761_v22  ;;  %v17136_v57 = vld [vmem:[#allocation9_spill] sm:$0xff]  ;;  %v17137_v22 = vld [vmem:[#allocation7_spill] sm:$0xff]  ;;  %v17138_v55 = vld [vmem:[#allocation20_spill] sm:$0xff] }
 0x15f   : > { %v2921_v47 = vsel %vm1842_vm1, %v2797_v38, %v2793_v15  ;;  %v2915_v50 = vsel %vm825_vm2, %v2769_v10, %v2914_v2  ;;  %v2993_v26 = vrot.slane %v11935_v13, %v9717_v17  ;;  %v2997_v52 = vrot.slane %v11942_v16, %v9717_v17  ;;  %v17141_v15 = vld [vmem:[#allocation13_spill] sm:$0xff] }
 0x160   : > { %v2922_v27 = vsel %vm825_vm2, %v2801_v25, %v2921_v47  ;;  %v2916_v34 = vsel %vm1845_vm3, %v2773_v36, %v2915_v50  ;;  %v3040_v4 = vsel %vm1842_vm1, %v17129_v3, %v11673_v44  ;;  %v3047_v6 = vsel %vm1842_vm1, %v17131_v46, %v17130_v40  ;;  %v17134_v44 = vld [vmem:[#allocation19_spill] sm:$0xff]  ;;  %v313_v36 = vld [vmem:[%s9700_s30 + $0xf0] sm:$0xff]  ;;  %v17144_v50 = vld [vmem:[#allocation14_spill] sm:$0xff] }
 0x161   : > { %v2923_v63 = vsel %vm1845_vm3, %v2805_v18, %v2922_v27  ;;  %v2917_v5 = vsel %vm827_vm4, %v2777_v58, %v2916_v34  ;;  %v3041_v16 = vsel %vm825_vm2, %v17132_v41, %v3040_v4  ;;  %v3048_v39 = vsel %vm825_vm2, %v17133_v43, %v3047_v6  ;;  %v17145_v34 = vld [vmem:[#allocation24_spill] sm:$0xff]  ;;  %v17146_v4 = vld [vmem:[#allocation79_spill] sm:$0xff]  ;;  %v17147_v46 = vld [vmem:[#allocation78_spill] sm:$0xff] }
 0x162   : > { %v2924_v13 = vsel %vm827_vm4, %v2809_v30, %v2923_v63  ;;  %v2918_v32 = vsel %vm1848_vm5, %v2781_v61, %v2917_v5  ;;  %v3042_v20 = vsel %vm1845_vm3, %v17134_v44, %v3041_v16  ;;  %v3049_v48 = vsel %vm1845_vm3, %v17135_v7, %v3048_v39  ;;  %v17140_v61 = vld [vmem:[#allocation4_spill] sm:$0xff]  ;;  %v17149_v7 = vld [vmem:[#allocation26_spill] sm:$0xff] }
 0x163   : > { %v2925_v53 = vsel %vm1848_vm5, %v2813_v54, %v2924_v13  ;;  %v2919_v24 = vsel %vm829_vm6, %v2785_v35, %v2918_v32  ;;  %v3043_v31 = vsel %vm827_vm4, %v17136_v57, %v3042_v20  ;;  %v3050_v12 = vsel %vm827_vm4, %v17137_v22, %v3049_v48 }
 0x164   : > { %v2926_v21 = vsel %vm829_vm6, %v2817_v37, %v2925_v53  ;;  %v2920_v33 = vsel %vm1851_vm7, %v2789_v42, %v2919_v24  ;;  %v3044_v10 = vsel %vm1848_vm5, %v17138_v55, %v3043_v31  ;;  %v3051_v0 = vsel %vm1848_vm5, %v17139_v23, %v3050_v12  ;;  %v12205_v42 = vld [vmem:[%s9700_s30 + $0xf8] sm:$0xff]  ;;  %v17142_v37 = vld [vmem:[#allocation23_spill] sm:$0xff] }
 0x165   : > { %v2927_v28 = vsel %vm1851_vm7, %v2821_v45, %v2926_v21  ;;  %v3045_v35 = vsel %vm829_vm6, %v17140_v61, %v3044_v10  ;;  %v3052_v38 = vsel %vm829_vm6, %v17141_v15, %v3051_v0  ;;  %v2985_v25 = vrot.slane %v12058_v19, %v9717_v17  ;;  %v17143_v19 = vld [vmem:[#allocation16_spill] sm:$0xff] }
 0x166   : > { %v8834_v58 = vpack.i.bf16 %v2927_v28, %v2920_v33  ;;  %v3046_v18 = vsel %vm1851_vm7, %v2993_v26, %v3045_v35  ;;  %v3053_v30 = vsel %vm1851_vm7, %v2997_v52, %v3052_v38  ;;  %v2989_v54 = vrot.slane %v12063_v59, %v9717_v17  ;;  %v17151_v33 = vld [vmem:[#allocation81_spill] sm:$0xff]  ;;  %v17152_v0 = vld [vmem:[#allocation28_spill] sm:$0xff] }
 0x167   : > { %v3026_v45 = vsel %vm1842_vm1, %v17142_v37, %v11846_v9  ;;  %v8849_v2 = vpack.i.bf16 %v3053_v30, %v3046_v18  ;;  %v3033_v27 = vsel %vm1842_vm1, %v17144_v50, %v17143_v19  ;;  %v346_v26 = vrot.slane %v313_v36, 1  ;;  %v17153_v35 = vld [vmem:[#allocation29_spill] sm:$0xff]  ;;  %v17154_v30 = vld [vmem:[#allocation32_spill] sm:$0xff] }
 0x168   : > { %8835 = vrot.lane.b32.xlu0 %v8834_v58, %s9640_s14  ;;  %v3027_v47 = vsel %vm825_vm2, %v11856_v56, %v3026_v45  ;;  %v3034_v59 = vsel %vm825_vm2, %v11886_v62, %v3033_v27  ;;  %v425_v63 = vrot.slane %v313_v36, 7  ;;  %v426_v9 = vrot.slane %v12205_v42, 7 }
 0x169   : > { %v3028_v52 = vsel %vm1845_vm3, %v17145_v34, %v3027_v47  ;;  %8850 = vrot.lane.b32.xlu1 %v8849_v2, %s9637_s11  ;;  %v3035_v56 = vsel %vm1845_vm3, %v11890_v11, %v3034_v59  ;;  %v1813_v40 = vrot.slane %v17146_v4, %v9717_v17  ;;  %v1749_v6 = vrot.slane %v17147_v46, %v9717_v17  ;;  %v17148_v11 = vld [vmem:[#allocation17_spill] sm:$0xff]  ;;  %v17155_v2 = vld [vmem:[#allocation84_spill] sm:$0xff]  ;;  %v17159_v4 = vld [vmem:[#allocation94_spill] sm:$0xff] }
 0x16a   : > { %v3029_v3 = vsel %vm827_vm4, %v11864_v29, %v3028_v52  ;;  %v3036_v5 = vsel %vm827_vm4, %v11894_v60, %v3035_v56  ;;  %v427_v13 = vsel %vm379_vm0, %v425_v63, %v426_v9  ;;  %v507_v41 = vsel %vm379_vm0, %v346_v26, %v425_v63  ;;  %v17157_v34 = vld [vmem:[#allocation25_spill] sm:$0xff]  ;;  %v17158_v59 = vld [vmem:[#allocation36_spill] sm:$0xff] }
 0x16b   : > { %v3030_v62 = vsel %vm1848_vm5, %v11868_v14, %v3029_v3  ;;  %v3037_v16 = vsel %vm1848_vm5, %v17148_v11, %v3036_v5  ;;  %v1551_v43 = vcombine.high %v507_v41, %v507_v41  ;;  %v1558_v39 = vrot.slane %v507_v41, %v9707_v8 }
 0x16c   : > { %v3031_v29 = vsel %vm829_vm6, %v11872_v49, %v3030_v62  ;;  %v3038_v14 = vsel %vm829_vm6, %v11902_v51, %v3037_v16  ;;  %v1568_v53 = vcombine.high %v427_v13, %v427_v13  ;;  %v12249_v60 = vrot.slane %v427_v13, %v9707_v8  ;;  %v17150_v51 = vld [vmem:[#allocation30_spill] sm:$0xff]  ;;  %v17160_v13 = vld [vmem:[#allocation89_spill] sm:$0xff]  ;;  %v17162_v16 = vld [vmem:[#allocation95_spill] sm:$0xff] }
 0x16d   : > { %v3032_v32 = vsel %vm1851_vm7, %v2985_v25, %v3031_v29  ;;  %v3039_v44 = vsel %vm1851_vm7, %v2989_v54, %v3038_v14  ;;  %v1565_v20 = vrot.slane %v1551_v43, %v9707_v8  ;;  %v1566_v49 = vcombine.high %v1558_v39, %v1558_v39  ;;  %v17161_v29 = vld [vmem:[#allocation98_spill] sm:$0xff] }
 0x16e   : > { %v1888_v48 = vsel %vm1842_vm1, %v17149_v7, %v1813_v40  ;;  %v8844_v24 = vpack.i.bf16 %v3039_v44, %v3032_v32  ;;  %v12256_v21 = vrot.slane %v1568_v53, %v9707_v8  ;;  %v12260_v57 = vcombine.high %v12249_v60, %v12249_v60  ;;  %v17163_v32 = vld [vmem:[#allocation96_spill] sm:$0xff]  ;;  %v17165_v7 = vld [vmem:[#allocation99_spill] sm:$0xff] }
 0x16f   : > { %v1889_v31 = vsel %vm825_vm2, %v17150_v51, %v1888_v48  ;;  %v1567_v22 = vcombine.high %v1565_v20, %v1565_v20  ;;  %v1595_v12 = vrot.slane %v1566_v49, 7  ;;  %v3081_v55 = vrot.slane %v1558_v39, %v9717_v17  ;;  %v17164_v44 = vld [vmem:[#allocation92_spill] sm:$0xff] }
 0x170   : > { %v1890_v28 = vsel %vm1845_vm3, %v17151_v33, %v1889_v31  ;;  %8845 = vrot.lane.b32.xlu0 %v8844_v24, %s9637_s11  ;;  %v12270_v10 = vcombine.high %v12256_v21, %v12256_v21  ;;  %v1607_v23 = vrot.slane %v12260_v57, 7  ;;  %v12276_v58 = vrot.slane %v1566_v49, %v9717_v17  ;;  %v17167_v31 = vld [vmem:[#allocation2_spill] sm:$0xff] }
 0x171   : > { %v1891_v36 = vsel %vm827_vm4, %v17152_v0, %v1890_v28  ;;  %v1601_v61 = vrot.slane %v1567_v22, 7  ;;  %v12281_v38 = vrot.slane %v1565_v20, %v9717_v17  ;;  %v12284_v25 = vrot.slane %v1567_v22, %v9717_v17  ;;  %v17170_v0 = vld [vmem:[#allocation5_spill] sm:$0xff] }
 0x172   : > { %v1892_v15 = vsel %vm1848_vm5, %v17153_v35, %v1891_v36  ;;  %v1613_v18 = vrot.slane %v12270_v10, 7  ;;  %v12291_v37 = vrot.slane %v12249_v60, %v9717_v17  ;;  %v12295_v45 = vrot.slane %v12260_v57, %v9717_v17  ;;  %v17166_v57 = vld [vmem:[#allocation97_spill] sm:$0xff]  ;;  %v17171_v35 = vld [vmem:[#allocation3_spill] sm:$0xff] }
 0x173   : > { %v1893_v54 = vsel %vm829_vm6, %v17154_v30, %v1892_v15  ;;  %v12303_v19 = vrot.slane %v12256_v21, %v9717_v17  ;;  %v12307_v50 = vrot.slane %v12270_v10, %v9717_v17  ;;  %v3110_v27 = vsel %vm1842_vm1, %v12276_v58, %v3081_v55  ;;  %v17168_v55 = vld [vmem:[#allocation93_spill] sm:$0xff] }
 0x174   : > { %v12299_v47 = vsel %vm1851_vm7, %v17155_v2, %v1893_v54  ;;  %v3111_v26 = vsel %vm825_vm2, %v12281_v38, %v3110_v27  ;;  %v1781_v52 = vrot.slane %v17157_v34, %v9717_v17  ;;  %v1874_v63 = vsel %vm1842_vm1, %v17158_v59, %v1749_v6 }
 0x175   : > { %17156 = vst [vmem:[#allocation62_spill] sm:$0xff] %v12299_v47  ;;  %v475_v3 = vrot.slane %v12205_v42, 5  ;;  %v3112_v56 = vsel %vm1845_vm3, %v12284_v25, %v3111_v26  ;;  %v1875_v40 = vsel %vm825_vm2, %v17159_v4, %v1874_v63  ;;  %v8494_v46 = vrot.slane %v1558_v39, 9 }
 0x176   : > { %v1597_v62 = vrot.slane %v1595_v12, 2  ;;  %v3113_v5 = vsel %vm827_vm4, %v12291_v37, %v3112_v56  ;;  %v1876_v41 = vsel %vm1845_vm3, %v17160_v13, %v1875_v40  ;;  %v1881_v11 = vsel %vm1842_vm1, %v17161_v29, %v1781_v52 }
 0x177   : > { %v523_v6 = vsel %vm379_vm0, %v426_v9, %v475_v3  ;;  %v3114_v42 = vsel %vm1848_vm5, %v12295_v45, %v3113_v5  ;;  %v1877_v43 = vsel %vm827_vm4, %v17162_v16, %v1876_v41  ;;  %v1882_v39 = vsel %vm825_vm2, %v17163_v32, %v1881_v11  ;;  %v8502_v32 = vld [vmem:[%s9700_s30 + $0x138] sm:$0xff] }
 0x178   : > { %v12336_v14 = vrot.slane %v523_v6, %v9707_v8  ;;  %v3115_v53 = vsel %vm829_vm6, %v12303_v19, %v3114_v42  ;;  %v1878_v49 = vsel %vm1848_vm5, %v17164_v44, %v1877_v43  ;;  %v1883_v9 = vsel %vm1845_vm3, %v17165_v7, %v1882_v39  ;;  %v8501_v6 = vld [vmem:[%s9700_s30 + $0x130] sm:$0xff]  ;;  %v8506_v44 = vld [vmem:[%s9700_s30 + $0x158] sm:$0xff] }
 0x179   : > { %v1596_v48 = vsel %vm10635_vm10, %v8494_v46, %v1595_v12  ;;  %v3116_v24 = vsel %vm1851_vm7, %v12307_v50, %v3115_v53  ;;  %v1879_v51 = vsel %vm829_vm6, %v17166_v57, %v1878_v49  ;;  %v1884_v22 = vsel %vm827_vm4, %v17167_v31, %v1883_v9  ;;  %v8505_v42 = vld [vmem:[%s9700_s30 + $0x150] sm:$0xff] }
 0x17a   : > { %v1598_v33 = vrot.slane %v1565_v20, 7  ;;  %v8859_v28 = vpack.i.bf16 %v3116_v24, %v12299_v47  ;;  %v12355_v10 = vsel %vm1851_vm7, %v17168_v55, %v1879_v51  ;;  %v1885_v36 = vsel %vm1848_vm5, %v17170_v0, %v1884_v22  ;;  %v17172_v20 = vld [vmem:[#allocation37_spill] sm:$0xff]  ;;  %v17174_v7 = vld [vmem:[#allocation80_spill] sm:$0xff] }
 0x17b   : > { %17169 = vst [vmem:[#allocation66_spill] sm:$0xff] %v12355_v10  ;;  %v1603_v12 = vrot.slane %v1601_v61, 2  ;;  %v1886_v15 = vsel %vm829_vm6, %v17171_v35, %v1885_v36  ;;  %v1604_v2 = vrot.slane %v12249_v60, 7  ;;  %v1609_v26 = vrot.slane %v1607_v23, 2 }
 0x17c   : > { %v1599_v30 = vsel %vm10635_vm10, %v1597_v62, %v1598_v33  ;;  %v1600_v54 = vrot.slane %v1598_v33, 2  ;;  %8860 = vrot.lane.b32.xlu1 %v8859_v28, %s9635_s9  ;;  %v12367_v27 = vsel %vm1851_vm7, %v17172_v20, %v1886_v15  ;;  %v1610_v34 = vrot.slane %v12256_v21, 7  ;;  %v17176_v15 = vld [vmem:[#allocation27_spill] sm:$0xff]  ;;  %v17177_v20 = vld [vmem:[#allocation88_spill] sm:$0xff] }
 0x17d   : > { %17173 = vst [vmem:[#allocation65_spill] sm:$0xff] %v12367_v27  ;;  %v1615_v52 = vrot.slane %v1613_v18, 2  ;;  %v8854_v59 = vpack.i.bf16 %v12367_v27, %v12355_v10  ;;  %v1605_v60 = vsel %vm10635_vm10, %v1603_v12, %v1604_v2  ;;  %v1606_v3 = vrot.slane %v1604_v2, 2  ;;  %v17175_v12 = vld [vmem:[#allocation6_spill] sm:$0xff]  ;;  %v12844_v27 = vld [vmem:[%s9700_s30 + $0x128] sm:$0xff] }
 0x17e   : > { %v1602_v63 = vsel %vm10635_vm10, %v1600_v54, %v1601_v61  ;;  %v1611_v56 = vsel %vm10635_vm10, %v1609_v26, %v1610_v34  ;;  %v1612_v4 = vrot.slane %v1610_v34, 2  ;;  %v1616_v40 = vrot.slane %v12336_v14, 7 }
 0x17f   : > { %v3144_v21 = vrot.slane %v1596_v48, %v9717_v17  ;;  %8855 = vrot.lane.b32.xlu0 %v8854_v59, %s9635_s9  ;;  %v1608_v61 = vsel %vm10635_vm10, %v1606_v3, %v1607_v23  ;;  %v3148_v46 = vrot.slane %v1599_v30, %v9717_v17  ;;  %v3152_v62 = vrot.slane %v1602_v63, %v9717_v17 }
 0x180   : > { %v3156_v5 = vrot.slane %v1605_v60, %v9717_v17  ;;  %v1614_v13 = vsel %vm10635_vm10, %v1612_v4, %v1613_v18  ;;  %v1617_v41 = vsel %vm10635_vm10, %v1615_v52, %v1616_v40  ;;  %v3160_v29 = vrot.slane %v1608_v61, %v9717_v17 }
 0x181   : > { %v3164_v11 = vrot.slane %v1611_v56, %v9717_v17  ;;  %v3168_v23 = vrot.slane %v1614_v13, %v9717_v17  ;;  %v3172_v16 = vrot.slane %v1617_v41, %v9717_v17  ;;  %v3173_v43 = vsel %vm1842_vm1, %v3148_v46, %v3144_v21 }
 0x182   : > { %v3174_v39 = vsel %vm825_vm2, %v3152_v62, %v3173_v43  ;;  %v3207_v18 = vrot.slane %v12336_v14, %v9717_v17  ;;  %v3208_v53 = vsel %vm1842_vm1, %v12281_v38, %v12276_v58  ;;  %v3361_v48 = vrot.slane %v8501_v6, 1 }
 0x183   : > { %v3175_v49 = vsel %vm1845_vm3, %v3156_v5, %v3174_v39  ;;  %8865 = vrot.lane.b32.xlu0 %v17174_v7, %s9641_s15  ;;  %v3209_v9 = vsel %vm825_vm2, %v12284_v25, %v3208_v53  ;;  %v3363_v24 = vrot.slane %v8505_v42, 1  ;;  %v3415_v51 = vrot.slane %v8501_v6, 7 }
 0x184   : > { %v3176_v57 = vsel %vm827_vm4, %v3160_v29, %v3175_v49  ;;  %v3210_v14 = vsel %vm1845_vm3, %v12291_v37, %v3209_v9  ;;  %v3416_v31 = vrot.slane %v8502_v32, 7  ;;  %v3421_v22 = vrot.slane %v8505_v42, 7 }
 0x185   : > { %v3177_v58 = vsel %vm1848_vm5, %v3164_v11, %v3176_v57  ;;  %v3211_v38 = vsel %vm827_vm4, %v12295_v45, %v3210_v14  ;;  %v3422_v33 = vrot.slane %v8506_v44, 7  ;;  %v3489_v0 = vrot.slane %v8502_v32, 5 }
 0x186   : > { %v3178_v28 = vsel %vm829_vm6, %v3168_v23, %v3177_v58  ;;  %v3212_v25 = vsel %vm1848_vm5, %v12303_v19, %v3211_v38  ;;  %v3417_v55 = vsel %vm379_vm0, %v3415_v51, %v3416_v31  ;;  %v3491_v35 = vrot.slane %v8506_v44, 5 }
 0x187   : > { %v3179_v36 = vsel %vm1851_vm7, %v3172_v16, %v3178_v28  ;;  %v3213_v37 = vsel %vm829_vm6, %v12307_v50, %v3212_v25  ;;  %8875 = vrot.lane.b32.xlu0 %v17175_v12, %s9638_s12  ;;  %v3423_v45 = vsel %vm379_vm0, %v3421_v22, %v3422_v33  ;;  %v3521_v19 = vsel %vm379_vm0, %v3361_v48, %v3415_v51 }
 0x188   : > { %v8869_v30 = vpack.i.bf16 %v3179_v36, %v17176_v15  ;;  %v3214_v54 = vsel %vm1851_vm7, %v3207_v18, %v3213_v37  ;;  %v3523_v2 = vsel %vm379_vm0, %v3363_v24, %v3421_v22  ;;  %v3537_v34 = vsel %vm379_vm0, %v3416_v31, %v3489_v0 }
 0x189   : > { %v8879_v26 = vpack.i.bf16 %v3214_v54, %v17177_v20  ;;  %v3539_v50 = vsel %vm379_vm0, %v3422_v33, %v3491_v35  ;;  %v3591_v52 = vcombine.high %v3521_v19, %v3521_v19  ;;  %v12435_v59 = vrot.slane %v3521_v19, %v9707_v8 }
 0x18a   : > { %8870 = vrot.lane.b32.xlu1 %v8869_v30, %s9641_s15  ;;  %v3608_v63 = vcombine.high %v3417_v55, %v3417_v55  ;;  %v12438_v60 = vrot.slane %v3417_v55, %v9707_v8  ;;  %v3625_v3 = vcombine.high %v3523_v2, %v3523_v2  ;;  %v12442_v4 = vrot.slane %v3523_v2, %v9707_v8 }
 0x18b   : > { %17178 = vst [vmem:[#allocation73_spill] sm:$0xff] %v12435_v59  ;;  %v3605_v56 = vrot.slane %v3591_v52, %v9707_v8  ;;  %v3642_v40 = vcombine.high %v3423_v45, %v3423_v45  ;;  %v12445_v21 = vrot.slane %v3423_v45, %v9707_v8  ;;  %v3606_v61 = vcombine.high %v12435_v59, %v12435_v59 }
 0x18c   : > { %17179 = vst [vmem:[#allocation63_spill] sm:$0xff] %v12442_v4  ;;  %v12450_v46 = vrot.slane %v3608_v63, %v9707_v8  ;;  %v12454_v62 = vcombine.high %v12438_v60, %v12438_v60  ;;  %v12457_v5 = vrot.slane %v3625_v3, %v9707_v8  ;;  %v12461_v41 = vcombine.high %v12442_v4, %v12442_v4 }
 0x18d   : > { %v3607_v13 = vcombine.high %v3605_v56, %v3605_v56  ;;  %v12464_v29 = vrot.slane %v3642_v40, %v9707_v8  ;;  %v12468_v11 = vcombine.high %v12445_v21, %v12445_v21  ;;  %v12480_v23 = vrot.slane %v3537_v34, %v9707_v8 }
 0x18e   : > { %8880 = vrot.lane.b32.xlu1 %v8879_v26, %s9638_s12  ;;  %v12473_v6 = vcombine.high %v12450_v46, %v12450_v46  ;;  %v12477_v42 = vcombine.high %v12457_v5, %v12457_v5  ;;  %v12483_v16 = vrot.slane %v3539_v50, %v9707_v8  ;;  %v3878_v32 = vrot.slane %v3606_v61, 7 }
 0x18f   : > { %v12487_v43 = vcombine.high %v12464_v29, %v12464_v29  ;;  %v3890_v39 = vrot.slane %v12454_v62, 7  ;;  %v3903_v18 = vrot.slane %v12461_v41, 7  ;;  %v3899_v44 = vrot.slane %v12480_v23, 7 }
 0x190   : > { %v3896_v53 = vrot.slane %v12473_v6, 7  ;;  %v3909_v49 = vrot.slane %v12477_v42, 7  ;;  %v3915_v7 = vrot.slane %v12468_v11, 7  ;;  %v3924_v48 = vrot.slane %v12483_v16, 7 }
 0x191   : > { %v3921_v9 = vrot.slane %v12487_v43, 7  ;;  %v12498_v24 = vrot.slane %v3606_v61, %v9717_v17  ;;  %v12501_v57 = vrot.slane %v3605_v56, %v9717_v17  ;;  %v12504_v14 = vrot.slane %v3607_v13, %v9717_v17 }
 0x192   : > { %v12508_v51 = vrot.slane %v12438_v60, %v9717_v17  ;;  %v12512_v31 = vrot.slane %v12454_v62, %v9717_v17  ;;  %v12516_v58 = vrot.slane %v12450_v46, %v9717_v17  ;;  %v12520_v38 = vrot.slane %v12473_v6, %v9717_v17 }
 0x193   : > { %17180 = vst [vmem:[#allocation69_spill] sm:$0xff] %v12498_v24  ;;  %17181 = vst [vmem:[#allocation67_spill] sm:$0xff] %v12501_v57  ;;  %v12524_v22 = vrot.slane %v12461_v41, %v9717_v17  ;;  %v12528_v33 = vrot.slane %v12457_v5, %v9717_v17  ;;  %v12532_v28 = vrot.slane %v12477_v42, %v9717_v17  ;;  %v3884_v54 = vrot.slane %v3607_v13, 7 }
 0x194   : > { %17182 = vst [vmem:[#allocation74_spill] sm:$0xff] %v12504_v14  ;;  %17183 = vst [vmem:[#allocation64_spill] sm:$0xff] %v12508_v51  ;;  %v12536_v25 = vrot.slane %v12445_v21, %v9717_v17  ;;  %v12540_v55 = vrot.slane %v12468_v11, %v9717_v17  ;;  %v12544_v0 = vrot.slane %v12464_v29, %v9717_v17  ;;  %v8528_v19 = vrot.slane %v12435_v59, 9 }
 0x195   : > { %17184 = vst [vmem:[#allocation71_spill] sm:$0xff] %v12512_v31  ;;  %17185 = vst [vmem:[#allocation70_spill] sm:$0xff] %v12516_v58  ;;  %v12548_v36 = vrot.slane %v12487_v43, %v9717_v17  ;;  %v5219_v37 = vrot.slane %v12480_v23, %v9717_v17  ;;  %v5223_v12 = vrot.slane %v12483_v16, %v9717_v17  ;;  %v3880_v26 = vrot.slane %v3878_v32, 2 }
 0x196   : > { %17186 = vst [vmem:[#allocation76_spill] sm:$0xff] %v12520_v38  ;;  %17187 = vst [vmem:[#allocation68_spill] sm:$0xff] %v12524_v22  ;;  %v5247_v45 = vsel %vm1842_vm1, %v12501_v57, %v12498_v24  ;;  %v5254_v35 = vsel %vm1842_vm1, %v12528_v33, %v12524_v22  ;;  %v3881_v34 = vrot.slane %v3605_v56, 7  ;;  %v12575_v63 = vsel %vm10635_vm10, %v8528_v19, %v3878_v32 }
 0x197   : > { %17188 = vst [vmem:[#allocation75_spill] sm:$0xff] %v12528_v33  ;;  %17189 = vst [vmem:[#allocation72_spill] sm:$0xff] %v12532_v28  ;;  %v5248_v15 = vsel %vm825_vm2, %v12504_v14, %v5247_v45  ;;  %v5255_v30 = vsel %vm825_vm2, %v12532_v28, %v5254_v35  ;;  %v3886_v3 = vrot.slane %v3884_v54, 2  ;;  %v3887_v23 = vrot.slane %v12438_v60, 7 }
 0x198   : > { %17190 = vst [vmem:[#allocation77_spill] sm:$0xff] %v12536_v25  ;;  %17191 = vst [vmem:[#allocation38_spill] sm:$0xff] %v12540_v55  ;;  %v5249_v2 = vsel %vm1845_vm3, %v12508_v51, %v5248_v15  ;;  %v5256_v20 = vsel %vm1845_vm3, %v12536_v25, %v5255_v30  ;;  %v3882_v56 = vsel %vm10635_vm10, %v3880_v26, %v3881_v34  ;;  %v3883_v62 = vrot.slane %v3881_v34, 2 }
 0x199   : > { %17192 = vst [vmem:[#allocation39_spill] sm:$0xff] %v12544_v0  ;;  %17193 = vst [vmem:[#allocation54_spill] sm:$0xff] %v12548_v36  ;;  %v5250_v50 = vsel %vm827_vm4, %v12512_v31, %v5249_v2  ;;  %v5257_v52 = vsel %vm827_vm4, %v12540_v55, %v5256_v20  ;;  %v3892_v32 = vrot.slane %v3890_v39, 2  ;;  %v3893_v30 = vrot.slane %v12450_v46, 7 }
 0x19a   : > { %v5251_v40 = vsel %vm1848_vm5, %v12516_v58, %v5250_v50  ;;  %v5258_v61 = vsel %vm1848_vm5, %v12544_v0, %v5257_v52  ;;  %v3885_v15 = vsel %vm10635_vm10, %v3883_v62, %v3884_v54  ;;  %v3888_v2 = vsel %vm10635_vm10, %v3886_v3, %v3887_v23 }
 0x19b   : > { %v5252_v13 = vsel %vm829_vm6, %v12520_v38, %v5251_v40  ;;  %v5259_v6 = vsel %vm829_vm6, %v12548_v36, %v5258_v61  ;;  %v3889_v20 = vrot.slane %v3887_v23, 2  ;;  %v3898_v60 = vrot.slane %v3896_v53, 2 }
 0x19c   : > { %v12589_v45 = vsel %vm1851_vm7, %v5219_v37, %v5252_v13  ;;  %v12592_v35 = vsel %vm1851_vm7, %v5223_v12, %v5259_v6  ;;  %v12603_v37 = vsel %vm10635_vm10, %v3892_v32, %v3893_v30  ;;  %v3895_v26 = vrot.slane %v3893_v30, 2  ;;  %v8503_v30 = vld [vmem:[%s9700_s30 + $0x140] sm:$0xff] }
 0x19d   : > { %17194 = vst [vmem:[#allocation40_spill] sm:$0xff] %v12589_v45  ;;  %17195 = vst [vmem:[#allocation61_spill] sm:$0xff] %v12592_v35  ;;  %v8889_v19 = vpack.i.bf16 %v12592_v35, %v12589_v45  ;;  %v8529_v12 = vrot.slane %v12442_v4, 9  ;;  %v3905_v54 = vrot.slane %v3903_v18, 2  ;;  %v3891_v46 = vsel %vm10635_vm10, %v3889_v20, %v3890_v39 }
 0x19e   : > { %v12613_v34 = vsel %vm10635_vm10, %v3898_v60, %v3899_v44  ;;  %v3906_v50 = vrot.slane %v12457_v5, 7  ;;  %v3911_v52 = vrot.slane %v3909_v49, 2  ;;  %v3897_v3 = vsel %vm10635_vm10, %v3895_v26, %v3896_v53  ;;  %v12670_v60 = vld [vmem:[%s9700_s30 + $0x148] sm:$0xff] }
 0x19f   : > { %8890 = vrot.lane.b32.xlu1 %v8889_v19, %s9636_s10  ;;  %v3904_v40 = vsel %vm10635_vm10, %v8529_v12, %v3903_v18  ;;  %v3912_v61 = vrot.slane %v12445_v21, 7  ;;  %v3917_v39 = vrot.slane %v3915_v7, 2  ;;  %v3918_v62 = vrot.slane %v12464_v29, 7 }
 0x1a0   : > { %v3907_v44 = vsel %vm10635_vm10, %v3905_v54, %v3906_v50  ;;  %v3908_v5 = vrot.slane %v3906_v50, 2  ;;  %v3923_v13 = vrot.slane %v3921_v9, 2  ;;  %v4953_v21 = vrot.slane %v12575_v63, %v9717_v17  ;;  %v12677_v54 = vld [vmem:[%s9700_s30 + $0x168] sm:$0xff] }
 0x1a1   : > { %v3913_v41 = vsel %vm10635_vm10, %v3911_v52, %v3912_v61  ;;  %v3914_v53 = vrot.slane %v3912_v61, 2  ;;  %v4957_v18 = vrot.slane %v3882_v56, %v9717_v17  ;;  %v3919_v29 = vsel %vm10635_vm10, %v3917_v39, %v3918_v62 }
 0x1a2   : > { %v3910_v6 = vsel %vm10635_vm10, %v3908_v5, %v3909_v49  ;;  %v3920_v23 = vrot.slane %v3918_v62, 2  ;;  %v3925_v32 = vsel %vm10635_vm10, %v3923_v13, %v3924_v48  ;;  %v4961_v42 = vrot.slane %v3885_v15, %v9717_v17  ;;  %v8507_v15 = vld [vmem:[%s9700_s30 + $0x160] sm:$0xff] }
 0x1a3   : > { %v3916_v63 = vsel %vm10635_vm10, %v3914_v53, %v3915_v7  ;;  %v4965_v56 = vrot.slane %v3888_v2, %v9717_v17  ;;  %v4969_v49 = vrot.slane %v3891_v46, %v9717_v17  ;;  %v4973_v48 = vrot.slane %v12603_v37, %v9717_v17 }
 0x1a4   : > { %v3922_v16 = vsel %vm10635_vm10, %v3920_v23, %v3921_v9  ;;  %v4977_v11 = vrot.slane %v3897_v3, %v9717_v17  ;;  %v4981_v7 = vrot.slane %v12613_v34, %v9717_v17  ;;  %v4985_v19 = vrot.slane %v3904_v40, %v9717_v17 }
 0x1a5   : > { %v4989_v2 = vrot.slane %v3907_v44, %v9717_v17  ;;  %v4993_v43 = vrot.slane %v3910_v6, %v9717_v17  ;;  %v4997_v20 = vrot.slane %v3913_v41, %v9717_v17  ;;  %v5001_v9 = vrot.slane %v3916_v63, %v9717_v17 }
 0x1a6   : > { %v5005_v37 = vrot.slane %v3919_v29, %v9717_v17  ;;  %v5009_v26 = vrot.slane %v3922_v16, %v9717_v17  ;;  %v5013_v12 = vrot.slane %v3925_v32, %v9717_v17  ;;  %v5149_v46 = vsel %vm1842_vm1, %v4957_v18, %v4953_v21 }
 0x1a7   : > { %v5156_v34 = vsel %vm1842_vm1, %v4989_v2, %v4985_v19  ;;  %v3362_v50 = vrot.slane %v8503_v30, 1  ;;  %v3364_v52 = vrot.slane %v8507_v15, 1  ;;  %v5150_v3 = vsel %vm825_vm2, %v4961_v42, %v5149_v46 }
 0x1a8   : > { %v5157_v40 = vsel %vm825_vm2, %v4993_v43, %v5156_v34  ;;  %v3418_v61 = vrot.slane %v8503_v30, 7  ;;  %v16650_v39 = vrot.slane %v12670_v60, 7  ;;  %v5151_v44 = vsel %vm1845_vm3, %v4965_v56, %v5150_v3 }
 0x1a9   : > { %v5158_v5 = vsel %vm1845_vm3, %v4997_v20, %v5157_v40  ;;  %v3424_v62 = vrot.slane %v8507_v15, 7  ;;  %v16649_v13 = vrot.slane %v12677_v54, 7  ;;  %v5152_v41 = vsel %vm827_vm4, %v4969_v49, %v5151_v44 }
 0x1aa   : > { %v5159_v53 = vsel %vm827_vm4, %v5001_v9, %v5158_v5  ;;  %v3420_v21 = vsel %vm379_vm0, %v3418_v61, %v16650_v39  ;;  %v3522_v18 = vsel %vm379_vm0, %v3362_v50, %v3418_v61  ;;  %v5153_v6 = vsel %vm1848_vm5, %v4973_v48, %v5152_v41  ;;  %v12836_v39 = vld [vmem:[%s9700_s30 + $0x108] sm:$0xff] }
 0x1ab   : > { %v5160_v29 = vsel %vm1848_vm5, %v5005_v37, %v5159_v53  ;;  %v3426_v23 = vsel %vm379_vm0, %v3424_v62, %v16649_v13  ;;  %v3524_v32 = vsel %vm379_vm0, %v3364_v52, %v3424_v62  ;;  %v5154_v63 = vsel %vm829_vm6, %v4977_v11, %v5153_v6  ;;  %v8499_v6 = vld [vmem:[%s9700_s30 + $0x120] sm:$0xff] }
 0x1ac   : > { %v5161_v42 = vsel %vm829_vm6, %v5009_v26, %v5160_v29  ;;  %v4102_v56 = vcombine.high %v3522_v18, %v3522_v18  ;;  %v12702_v49 = vrot.slane %v3522_v18, %v9707_v8  ;;  %v12705_v16 = vsel %vm1851_vm7, %v4981_v7, %v5154_v63 }
 0x1ad   : > { %17196 = vst [vmem:[#allocation41_spill] sm:$0xff] %v12705_v16  ;;  %v12708_v48 = vsel %vm1851_vm7, %v5013_v12, %v5161_v42  ;;  %v4119_v30 = vcombine.high %v3420_v21, %v3420_v21  ;;  %v12711_v15 = vrot.slane %v3420_v21, %v9707_v8  ;;  %v4136_v43 = vcombine.high %v3524_v32, %v3524_v32 }
 0x1ae   : > { %17197 = vst [vmem:[#allocation44_spill] sm:$0xff] %v12708_v48  ;;  %v8884_v19 = vpack.i.bf16 %v12708_v48, %v12705_v16  ;;  %v12716_v11 = vrot.slane %v4102_v56, %v9707_v8  ;;  %v12720_v2 = vcombine.high %v12702_v49, %v12702_v49  ;;  %v12730_v9 = vrot.slane %v3524_v32, %v9707_v8 }
 0x1af   : > { %v12723_v7 = vrot.slane %v4119_v30, %v9707_v8  ;;  %v12727_v20 = vcombine.high %v12711_v15, %v12711_v15  ;;  %v4153_v37 = vcombine.high %v3426_v23, %v3426_v23  ;;  %v12738_v12 = vrot.slane %v4136_v43, %v9707_v8 }
 0x1b0   : > { %8885 = vrot.lane.b32.xlu0 %v8884_v19, %s9639_s13  ;;  %v12735_v26 = vcombine.high %v12716_v11, %v12716_v11  ;;  %v12741_v46 = vrot.slane %v3426_v23, %v9707_v8  ;;  %v12750_v52 = vcombine.high %v12730_v9, %v12730_v9  ;;  %v5377_v5 = vrot.slane %v12702_v49, %v9717_v17  ;;  %v8495_v19 = vld [vmem:[%s9700_s30 + $0x100] sm:$0xff] }
 0x1b1   : > { %v12746_v50 = vcombine.high %v12723_v7, %v12723_v7  ;;  %v12753_v3 = vrot.slane %v4153_v37, %v9707_v8  ;;  %v12758_v61 = vcombine.high %v12738_v12, %v12738_v12  ;;  %v12768_v62 = vrot.slane %v12720_v2, %v9717_v17 }
 0x1b2   : > { %v12762_v44 = vcombine.high %v12741_v46, %v12741_v46  ;;  %v12778_v18 = vrot.slane %v12716_v11, %v9717_v17  ;;  %v12784_v23 = vrot.slane %v12735_v26, %v9717_v17  ;;  %v12788_v32 = vrot.slane %v12711_v15, %v9717_v17 }
 0x1b3   : > { %v12772_v41 = vcombine.high %v12753_v3, %v12753_v3  ;;  %v12793_v42 = vrot.slane %v12727_v20, %v9717_v17  ;;  %v12797_v56 = vrot.slane %v12723_v7, %v9717_v17  ;;  %v12801_v30 = vrot.slane %v12746_v50, %v9717_v17 }
 0x1b4   : > { %17198 = vst [vmem:[#allocation42_spill] sm:$0xff] %v12778_v18  ;;  %17199 = vst [vmem:[#allocation55_spill] sm:$0xff] %v12784_v23  ;;  %v5409_v43 = vrot.slane %v12730_v9, %v9717_v17  ;;  %v12808_v37 = vrot.slane %v12750_v52, %v9717_v17  ;;  %v12812_v63 = vrot.slane %v12738_v12, %v9717_v17  ;;  %v3359_v35 = vrot.slane %v8495_v19, 1 }
 0x1b5   : > { %17200 = vst [vmem:[#allocation45_spill] sm:$0xff] %v12788_v32  ;;  %17201 = vst [vmem:[#allocation56_spill] sm:$0xff] %v12793_v42  ;;  %v12816_v29 = vrot.slane %v12758_v61, %v9717_v17  ;;  %v12821_v21 = vrot.slane %v12741_v46, %v9717_v17  ;;  %v12825_v53 = vrot.slane %v12762_v44, %v9717_v17  ;;  %v3360_v16 = vrot.slane %v8499_v6, 1 }
 0x1b6   : > { %17202 = vst [vmem:[#allocation43_spill] sm:$0xff] %v12797_v56  ;;  %17203 = vst [vmem:[#allocation48_spill] sm:$0xff] %v12801_v30  ;;  %v12829_v40 = vrot.slane %v12753_v3, %v9717_v17  ;;  %v12833_v13 = vrot.slane %v12772_v41, %v9717_v17  ;;  %v5580_v34 = vsel %vm1842_vm1, %v12768_v62, %v5377_v5  ;;  %v3409_v38 = vrot.slane %v8495_v19, 7 }
 0x1b7   : > { %17204 = vst [vmem:[#allocation46_spill] sm:$0xff] %v12808_v37  ;;  %17205 = vst [vmem:[#allocation57_spill] sm:$0xff] %v12812_v63  ;;  %v5587_v47 = vsel %vm1842_vm1, %v12808_v37, %v5409_v43  ;;  %v5581_v48 = vsel %vm825_vm2, %v12778_v18, %v5580_v34  ;;  %v16663_v43 = vrot.slane %v12836_v39, 7  ;;  %v3412_v10 = vrot.slane %v8499_v6, 7 }
 0x1b8   : > { %17206 = vst [vmem:[#allocation49_spill] sm:$0xff] %v12816_v29  ;;  %17207 = vst [vmem:[#allocation47_spill] sm:$0xff] %v12821_v21  ;;  %v5588_v45 = vsel %vm825_vm2, %v12812_v63, %v5587_v47  ;;  %v5582_v58 = vsel %vm1845_vm3, %v12784_v23, %v5581_v48  ;;  %v16665_v51 = vrot.slane %v12844_v27, 7  ;;  %v3519_v47 = vsel %vm379_vm0, %v3359_v35, %v3409_v38 }
 0x1b9   : > { %17208 = vst [vmem:[#allocation58_spill] sm:$0xff] %v12825_v53  ;;  %17209 = vst [vmem:[#allocation50_spill] sm:$0xff] %v12829_v40  ;;  %v5589_v5 = vsel %vm1845_vm3, %v12816_v29, %v5588_v45  ;;  %v5583_v31 = vsel %vm827_vm4, %v12788_v32, %v5582_v58  ;;  %v3411_v45 = vsel %vm379_vm0, %v3409_v38, %v16663_v43  ;;  %v3490_v63 = vrot.slane %v12670_v60, 5 }
 0x1ba   : > { %17210 = vst [vmem:[#allocation59_spill] sm:$0xff] %v12833_v13  ;;  %v5590_v34 = vsel %vm827_vm4, %v12821_v21, %v5589_v5  ;;  %v5584_v19 = vsel %vm1848_vm5, %v12793_v42, %v5583_v31  ;;  %v3520_v6 = vsel %vm379_vm0, %v3360_v16, %v3412_v10  ;;  %v3414_v35 = vsel %vm379_vm0, %v3412_v10, %v16665_v51 }
 0x1bb   : > { %v5591_v48 = vsel %vm1848_vm5, %v12825_v53, %v5590_v34  ;;  %v5585_v58 = vsel %vm829_vm6, %v12797_v56, %v5584_v19  ;;  %v4034_v31 = vcombine.high %v3519_v47, %v3519_v47  ;;  %v12881_v38 = vrot.slane %v3519_v47, %v9707_v8 }
 0x1bc   : > { %v5592_v5 = vsel %vm829_vm6, %v12829_v40, %v5591_v48  ;;  %v5586_v34 = vsel %vm1851_vm7, %v12801_v30, %v5585_v58  ;;  %v4051_v16 = vcombine.high %v3411_v45, %v3411_v45  ;;  %v12887_v48 = vrot.slane %v3411_v45, %v9707_v8 }
 0x1bd   : > { %v5593_v36 = vsel %vm1851_vm7, %v12833_v13, %v5592_v5  ;;  %v12884_v19 = vrot.slane %v4034_v31, %v9707_v8  ;;  %v4068_v14 = vcombine.high %v3520_v6, %v3520_v6  ;;  %v12891_v10 = vcombine.high %v12881_v38, %v12881_v38 }
 0x1be   : > { %v8899_v43 = vpack.i.bf16 %v5593_v36, %v5586_v34  ;;  %v12894_v58 = vrot.slane %v4051_v16, %v9707_v8  ;;  %v12897_v5 = vrot.slane %v3520_v6, %v9707_v8  ;;  %v4085_v47 = vcombine.high %v3414_v35, %v3414_v35 }
 0x1bf   : > { %v12902_v36 = vcombine.high %v12884_v19, %v12884_v19  ;;  %v12906_v45 = vcombine.high %v12887_v48, %v12887_v48  ;;  %v12909_v31 = vrot.slane %v4068_v14, %v9707_v8  ;;  %v12912_v34 = vrot.slane %v3414_v35, %v9707_v8 }
 0x1c0   : > { %8900 = vrot.lane.b32.xlu1 %v8899_v43, %s9634_s8  ;;  %v12916_v6 = vcombine.high %v12894_v58, %v12894_v58  ;;  %v12920_v43 = vcombine.high %v12897_v5, %v12897_v5  ;;  %v12923_v16 = vrot.slane %v4085_v47, %v9707_v8  ;;  %v5313_v57 = vrot.slane %v12881_v38, %v9717_v17 }
 0x1c1   : > { %v12928_v14 = vcombine.high %v12909_v31, %v12909_v31  ;;  %v12932_v35 = vcombine.high %v12912_v34, %v12912_v34  ;;  %v12945_v24 = vrot.slane %v12891_v10, %v9717_v17  ;;  %v12951_v0 = vrot.slane %v12884_v19, %v9717_v17 }
 0x1c2   : > { %v12939_v55 = vcombine.high %v12923_v16, %v12923_v16  ;;  %v12955_v59 = vrot.slane %v12902_v36, %v9717_v17  ;;  %v12960_v51 = vrot.slane %v12887_v48, %v9717_v17  ;;  %v12964_v33 = vrot.slane %v12906_v45, %v9717_v17 }
 0x1c3   : > { %17211 = vst [vmem:[#allocation51_spill] sm:$0xff] %v12951_v0  ;;  %v12968_v28 = vrot.slane %v12894_v58, %v9717_v17  ;;  %v12972_v25 = vrot.slane %v12916_v6, %v9717_v17  ;;  %v5345_v22 = vrot.slane %v12897_v5, %v9717_v17  ;;  %v12978_v47 = vrot.slane %v12920_v43, %v9717_v17 }
 0x1c4   : > { %17212 = vst [vmem:[#allocation60_spill] sm:$0xff] %v12955_v59  ;;  %v12982_v4 = vrot.slane %v12909_v31, %v9717_v17  ;;  %v12986_v13 = vrot.slane %v12928_v14, %v9717_v17  ;;  %v12990_v30 = vrot.slane %v12912_v34, %v9717_v17  ;;  %v12994_v40 = vrot.slane %v12932_v35, %v9717_v17 }
 0x1c5   : > { %17213 = vst [vmem:[#allocation52_spill] sm:$0xff] %v12978_v47  ;;  %v12998_v56 = vrot.slane %v12923_v16, %v9717_v17  ;;  %v13002_v53 = vrot.slane %v12939_v55, %v9717_v17  ;;  %v5566_v42 = vsel %vm1842_vm1, %v12945_v24, %v5313_v57  ;;  %v5573_v21 = vsel %vm1842_vm1, %v12978_v47, %v5345_v22 }
 0x1c6   : > { %17214 = vst [vmem:[#allocation53_spill] sm:$0xff] %v12982_v4  ;;  %v5567_v29 = vsel %vm825_vm2, %v12951_v0, %v5566_v42  ;;  %v5574_v23 = vsel %vm825_vm2, %v12982_v4, %v5573_v21  ;;  %v3492_v37 = vrot.slane %v12677_v54, 5  ;;  %v8536_v22 = vrot.slane %v12702_v49, 9 }
 0x1c7   : > { %17215 = vst [vmem:[#allocation12_spill] sm:$0xff] %v13002_v53  ;;  %v5568_v18 = vsel %vm1845_vm3, %v12955_v59, %v5567_v29  ;;  %v5575_v57 = vsel %vm1845_vm3, %v12986_v13, %v5574_v23  ;;  %v17216_v32 = vrot.slane %v12720_v2, 7  ;;  %v17217_v4 = vrot.slane %v12670_v60, 7 }
 0x1c8   : > { %v5569_v42 = vsel %vm827_vm4, %v12960_v51, %v5568_v18  ;;  %v5576_v21 = vsel %vm827_vm4, %v12990_v30, %v5575_v57  ;;  %v17218_v29 = vrot.slane %v12677_v54, 7  ;;  %v17219_v54 = vrot.slane %v12720_v2, 7 }
 0x1c9   : > { %v4424_v47 = vrot.slane %v17216_v32, 2  ;;  %v3538_v0 = vsel %vm379_vm0, %v17217_v4, %v3490_v63  ;;  %v5570_v49 = vsel %vm1848_vm5, %v12964_v33, %v5569_v42  ;;  %v5577_v23 = vsel %vm1848_vm5, %v12994_v40, %v5576_v21 }
 0x1ca   : > { %v3540_v59 = vsel %vm379_vm0, %v17218_v29, %v3492_v37  ;;  %v13037_v32 = vrot.slane %v3538_v0, %v9707_v8  ;;  %v5571_v60 = vsel %vm829_vm6, %v12968_v28, %v5570_v49  ;;  %v5578_v4 = vsel %vm829_vm6, %v12998_v56, %v5577_v23 }
 0x1cb   : > { %v13040_v18 = vrot.slane %v3540_v59, %v9707_v8  ;;  %v4423_v63 = vsel %vm10635_vm10, %v8536_v22, %v17219_v54  ;;  %v4425_v37 = vrot.slane %v12716_v11, 7  ;;  %v5572_v0 = vsel %vm1851_vm7, %v12972_v25, %v5571_v60 }
 0x1cc   : > { %v5579_v59 = vsel %vm1851_vm7, %v13002_v53, %v5578_v4  ;;  %v17220_v57 = vrot.slane %v12735_v26, 7  ;;  %v4431_v21 = vrot.slane %v12711_v15, 7  ;;  %v17221_v22 = vrot.slane %v12727_v20, 7 }
 0x1cd   : > { %v8894_v29 = vpack.i.bf16 %v5579_v59, %v5572_v0  ;;  %v4426_v2 = vsel %vm10635_vm10, %v4424_v47, %v4425_v37  ;;  %v4427_v49 = vrot.slane %v4425_v37, 2  ;;  %v4437_v54 = vrot.slane %v12723_v7, 7 }
 0x1ce   : > { %v4430_v42 = vrot.slane %v17220_v57, 2  ;;  %v4436_v23 = vrot.slane %v17221_v22, 2  ;;  %v4433_v60 = vrot.slane %v4431_v21, 2  ;;  %v17222_v4 = vrot.slane %v12746_v50, 7 }
 0x1cf   : > { %8895 = vrot.lane.b32.xlu0 %v8894_v29, %s9634_s8  ;;  %v17223_v15 = vmov %v17220_v57  ;;  %v4443_v37 = vrot.slane %v13037_v32, 7  ;;  %v8537_v0 = vrot.slane %v12730_v9, 9  ;;  %v17224_v59 = vrot.slane %v12750_v52, 7 }
 0x1d0   : > { %v4432_v11 = vsel %vm10635_vm10, %v4430_v42, %v4431_v21  ;;  %v4442_v53 = vrot.slane %v17222_v4, 2  ;;  %v4429_v47 = vsel %vm10635_vm10, %v4427_v49, %v17223_v15  ;;  %v17225_v42 = vmov %v17221_v22 }
 0x1d1   : > { %v4449_v57 = vrot.slane %v17224_v59, 2  ;;  %v4435_v7 = vsel %vm10635_vm10, %v4433_v60, %v17225_v42  ;;  %v4438_v21 = vsel %vm10635_vm10, %v4436_v23, %v4437_v54  ;;  %v4439_v29 = vrot.slane %v4437_v54, 2 }
 0x1d2   : > { %v4450_v26 = vrot.slane %v12738_v12, 7  ;;  %v4444_v49 = vsel %vm10635_vm10, %v4442_v53, %v4443_v37  ;;  %v17226_v22 = vmov %v17224_v59  ;;  %v17227_v4 = vrot.slane %v12758_v61, 7 }
 0x1d3   : > { %v4448_v9 = vsel %vm10635_vm10, %v8537_v0, %v17226_v22  ;;  %v4456_v15 = vrot.slane %v12741_v46, 7  ;;  %v17228_v60 = vrot.slane %v12746_v50, 7  ;;  %v17229_v53 = vrot.slane %v12762_v44, 7 }
 0x1d4   : > { %v4455_v20 = vrot.slane %v17227_v4, 2  ;;  %v4451_v12 = vsel %vm10635_vm10, %v4449_v57, %v4450_v26  ;;  %v4452_v54 = vrot.slane %v4450_v26, 2  ;;  %v4462_v59 = vrot.slane %v12753_v3, 7 }
 0x1d5   : > { %v4441_v23 = vsel %vm10635_vm10, %v4439_v29, %v17228_v60  ;;  %v4461_v52 = vrot.slane %v17229_v53, 2  ;;  %v4458_v0 = vrot.slane %v4456_v15, 2  ;;  %v17230_v46 = vrot.slane %v12772_v41, 7 }
 0x1d6   : > { %v4457_v37 = vsel %vm10635_vm10, %v4455_v20, %v4456_v15  ;;  %v17231_v50 = vmov %v17227_v4  ;;  %v4468_v57 = vrot.slane %v13040_v18, 7  ;;  %v5713_v26 = vrot.slane %v4423_v63, %v9717_v17 }
 0x1d7   : > { %v4467_v42 = vrot.slane %v17230_v46, 2  ;;  %v4454_v29 = vsel %vm10635_vm10, %v4452_v54, %v17231_v50  ;;  %v5717_v22 = vrot.slane %v4426_v2, %v9717_v17  ;;  %v17232_v4 = vmov %v17229_v53 }
 0x1d8   : > { %v4460_v20 = vsel %vm10635_vm10, %v4458_v0, %v17232_v4  ;;  %v4463_v3 = vsel %vm10635_vm10, %v4461_v52, %v4462_v59  ;;  %v4464_v15 = vrot.slane %v4462_v59, 2  ;;  %v5721_v61 = vrot.slane %v4429_v47, %v9717_v17 }
 0x1d9   : > { %v4469_v60 = vsel %vm10635_vm10, %v4467_v42, %v4468_v57  ;;  %v5725_v54 = vrot.slane %v4432_v11, %v9717_v17  ;;  %v5729_v63 = vrot.slane %v4435_v7, %v9717_v17  ;;  %v5733_v2 = vrot.slane %v4438_v21, %v9717_v17 }
 0x1da   : > { %v17233_v44 = vmov %v17230_v46  ;;  %v5737_v0 = vrot.slane %v4441_v23, %v9717_v17  ;;  %v5741_v52 = vrot.slane %v4444_v49, %v9717_v17  ;;  %v5745_v47 = vrot.slane %v4448_v9, %v9717_v17 }
 0x1db   : > { %v4466_v53 = vsel %vm10635_vm10, %v4464_v15, %v17233_v44  ;;  %v5749_v59 = vrot.slane %v4451_v12, %v9717_v17  ;;  %v5753_v46 = vrot.slane %v4454_v29, %v9717_v17  ;;  %v5757_v11 = vrot.slane %v4457_v37, %v9717_v17 }
 0x1dc   : > { %v5761_v7 = vrot.slane %v4460_v20, %v9717_v17  ;;  %v5765_v21 = vrot.slane %v4463_v3, %v9717_v17  ;;  %v5769_v41 = vrot.slane %v4466_v53, %v9717_v17  ;;  %v5773_v42 = vrot.slane %v4469_v60, %v9717_v17 }
 0x1dd   : > { %v5916_v23 = vsel %vm1842_vm1, %v5717_v22, %v5713_v26  ;;  %v5923_v9 = vsel %vm1842_vm1, %v5749_v59, %v5745_v47  ;;  %v3487_v12 = vrot.slane %v12836_v39, 5  ;;  %v3488_v50 = vrot.slane %v12844_v27, 5 }
 0x1de   : > { %v5917_v49 = vsel %vm825_vm2, %v5721_v61, %v5916_v23  ;;  %v5924_v29 = vsel %vm825_vm2, %v5753_v46, %v5923_v9  ;;  %v8534_v57 = vrot.slane %v12881_v38, 9  ;;  %v17234_v4 = vrot.slane %v12891_v10, 7 }
 0x1df   : > { %v5918_v37 = vsel %vm1845_vm3, %v5725_v54, %v5917_v49  ;;  %v5925_v26 = vsel %vm1845_vm3, %v5757_v11, %v5924_v29  ;;  %v17235_v22 = vrot.slane %v12836_v39, 7  ;;  %v17236_v61 = vrot.slane %v12844_v27, 7 }
 0x1e0   : > { %v4374_v20 = vrot.slane %v17234_v4, 2  ;;  %v5919_v3 = vsel %vm827_vm4, %v5729_v63, %v5918_v37  ;;  %v5926_v44 = vsel %vm827_vm4, %v5761_v7, %v5925_v26  ;;  %v17237_v47 = vmov %v17234_v4 }
 0x1e1   : > { %v3535_v15 = vsel %vm379_vm0, %v17235_v22, %v3487_v12  ;;  %v3536_v60 = vsel %vm379_vm0, %v17236_v61, %v3488_v50  ;;  %v5920_v54 = vsel %vm1848_vm5, %v5733_v2, %v5919_v3  ;;  %v5927_v39 = vsel %vm1848_vm5, %v5765_v21, %v5926_v44 }
 0x1e2   : > { %v13159_v38 = vrot.slane %v3535_v15, %v9707_v8  ;;  %v13162_v53 = vrot.slane %v3536_v60, %v9707_v8  ;;  %v5921_v63 = vsel %vm829_vm6, %v5737_v0, %v5920_v54  ;;  %v4373_v27 = vsel %vm10635_vm10, %v8534_v57, %v17237_v47 }
 0x1e3   : > { %v4375_v59 = vrot.slane %v12884_v19, 7  ;;  %v5922_v2 = vsel %vm1851_vm7, %v5741_v52, %v5921_v63  ;;  %v5928_v46 = vsel %vm829_vm6, %v5769_v41, %v5927_v39  ;;  %v17238_v11 = vrot.slane %v12902_v36, 7 }
 0x1e4   : > { %v4381_v23 = vrot.slane %v12887_v48, 7  ;;  %v5929_v0 = vsel %vm1851_vm7, %v5773_v42, %v5928_v46  ;;  %v17239_v49 = vrot.slane %v12906_v45, 7  ;;  %v4387_v41 = vrot.slane %v12894_v58, 7 }
 0x1e5   : > { %v4380_v7 = vrot.slane %v17238_v11, 2  ;;  %v4376_v21 = vsel %vm10635_vm10, %v4374_v20, %v4375_v59  ;;  %v4377_v10 = vrot.slane %v4375_v59, 2  ;;  %v8909_v12 = vpack.i.bf16 %v5929_v0, %v5922_v2 }
 0x1e6   : > { %v4386_v9 = vrot.slane %v17239_v49, 2  ;;  %v4383_v52 = vrot.slane %v4381_v23, 2  ;;  %v17240_v50 = vmov %v17238_v11  ;;  %v17241_v42 = vrot.slane %v12916_v6, 7 }
 0x1e7   : > { %v4382_v19 = vsel %vm10635_vm10, %v4380_v7, %v4381_v23  ;;  %v4379_v48 = vsel %vm10635_vm10, %v4377_v10, %v17240_v50  ;;  %v4393_v29 = vrot.slane %v13159_v38, 7  ;;  %v8535_v57 = vrot.slane %v12897_v5, 9  ;;  %8910 = vrot.lane.b32.xlu1 %v8909_v12, %s9640_s14 }
 0x1e8   : > { %v4392_v37 = vrot.slane %v17241_v42, 2  ;;  %v17242_v4 = vmov %v17239_v49  ;;  %v4388_v58 = vsel %vm10635_vm10, %v4386_v9, %v4387_v41  ;;  %v4389_v36 = vrot.slane %v4387_v41, 2 }
 0x1e9   : > { %v4385_v20 = vsel %vm10635_vm10, %v4383_v52, %v17242_v4  ;;  %v17243_v3 = vrot.slane %v12920_v43, 7  ;;  %v4400_v45 = vrot.slane %v12909_v31, 7  ;;  %v17245_v61 = vrot.slane %v12928_v14, 7 }
 0x1ea   : > { %v4394_v22 = vsel %vm10635_vm10, %v4392_v37, %v4393_v29  ;;  %v17246_v54 = vmov %v17241_v42  ;;  %v4406_v63 = vrot.slane %v12912_v34, 7  ;;  %v17247_v39 = vrot.slane %v12932_v35, 7 }
 0x1eb   : > { %v4399_v26 = vrot.slane %v17243_v3, 2  ;;  %v17244_v15 = vmov %v17243_v3  ;;  %v4405_v60 = vrot.slane %v17245_v61, 2  ;;  %v4391_v44 = vsel %vm10635_vm10, %v4389_v36, %v17246_v54  ;;  %v17254_v54 = vld [vmem:[#allocation57_spill] sm:$0xff] }
 0x1ec   : > { %v4398_v5 = vsel %vm10635_vm10, %v8535_v57, %v17244_v15  ;;  %v4411_v47 = vrot.slane %v17247_v39, 2  ;;  %v4412_v43 = vrot.slane %v12923_v16, 7  ;;  %v4402_v2 = vrot.slane %v4400_v45, 2 }
 0x1ed   : > { %v4401_v59 = vsel %vm10635_vm10, %v4399_v26, %v4400_v45  ;;  %v17248_v31 = vrot.slane %v12939_v55, 7  ;;  %v4418_v11 = vrot.slane %v13162_v53, 7  ;;  %v4407_v6 = vsel %vm10635_vm10, %v4405_v60, %v4406_v63  ;;  %v17252_v45 = vld [vmem:[#allocation42_spill] sm:$0xff] }
 0x1ee   : > { %v4408_v7 = vrot.slane %v4406_v63, 2  ;;  %v4413_v34 = vsel %vm10635_vm10, %v4411_v47, %v4412_v43  ;;  %v4414_v23 = vrot.slane %v4412_v43, 2  ;;  %v17249_v0 = vmov %v17245_v61  ;;  %v17253_v60 = vld [vmem:[#allocation46_spill] sm:$0xff] }
 0x1ef   : > { %v4417_v46 = vrot.slane %v17248_v31, 2  ;;  %v4404_v16 = vsel %vm10635_vm10, %v4402_v2, %v17249_v0  ;;  %v5649_v49 = vrot.slane %v4373_v27, %v9717_v17  ;;  %v5653_v9 = vrot.slane %v4376_v21, %v9717_v17  ;;  %v17260_v0 = vld [vmem:[#allocation58_spill] sm:$0xff] }
 0x1f0   : > { %v17250_v12 = vmov %v17247_v39  ;;  %v17251_v41 = vmov %v17248_v31  ;;  %v5657_v50 = vrot.slane %v4379_v48, %v9717_v17  ;;  %v5661_v42 = vrot.slane %v4382_v19, %v9717_v17 }
 0x1f1   : > { %v4419_v10 = vsel %vm10635_vm10, %v4417_v46, %v4418_v11  ;;  %v4410_v52 = vsel %vm10635_vm10, %v4408_v7, %v17250_v12  ;;  %v4416_v14 = vsel %vm10635_vm10, %v4414_v23, %v17251_v41  ;;  %v5665_v37 = vrot.slane %v4385_v20, %v9717_v17  ;;  %v17258_v46 = vld [vmem:[#allocation47_spill] sm:$0xff] }
 0x1f2   : > { %v5669_v27 = vrot.slane %v4388_v58, %v9717_v17  ;;  %v5673_v21 = vrot.slane %v4391_v44, %v9717_v17  ;;  %v5677_v35 = vrot.slane %v4394_v22, %v9717_v17  ;;  %v5681_v29 = vrot.slane %v4398_v5, %v9717_v17 }
 0x1f3   : > { %v5685_v57 = vrot.slane %v4401_v59, %v9717_v17  ;;  %v5689_v55 = vrot.slane %v4404_v16, %v9717_v17  ;;  %v5693_v4 = vrot.slane %v4407_v6, %v9717_v17  ;;  %v5697_v48 = vrot.slane %v4410_v52, %v9717_v17  ;;  %v17262_v52 = vld [vmem:[#allocation50_spill] sm:$0xff] }
 0x1f4   : > { %v5701_v19 = vrot.slane %v4413_v34, %v9717_v17  ;;  %v5705_v20 = vrot.slane %v4416_v14, %v9717_v17  ;;  %v5709_v58 = vrot.slane %v4419_v10, %v9717_v17  ;;  %v5902_v36 = vsel %vm1842_vm1, %v5653_v9, %v5649_v49  ;;  %v17259_v34 = vld [vmem:[#allocation56_spill] sm:$0xff]  ;;  %v17261_v9 = vld [vmem:[#allocation43_spill] sm:$0xff] }
 0x1f5   : > { %v5909_v3 = vsel %vm1842_vm1, %v5685_v57, %v5681_v29  ;;  %v5993_v26 = vrot.slane %v13037_v32, %v9717_v17  ;;  %v5997_v22 = vrot.slane %v13040_v18, %v9717_v17  ;;  %v5903_v15 = vsel %vm825_vm2, %v5657_v50, %v5902_v36  ;;  %v17255_v32 = vld [vmem:[#allocation55_spill] sm:$0xff]  ;;  %v17256_v18 = vld [vmem:[#allocation49_spill] sm:$0xff]  ;;  %v8509_v57 = vld [vmem:[%s9700_s30 + $0x170] sm:$0xff] }
 0x1f6   : > { %v5910_v5 = vsel %vm825_vm2, %v5689_v55, %v5909_v3  ;;  %v6028_v61 = vsel %vm1842_vm1, %v17252_v45, %v12768_v62  ;;  %v6035_v44 = vsel %vm1842_vm1, %v17254_v54, %v17253_v60  ;;  %v5904_v63 = vsel %vm1845_vm3, %v5661_v42, %v5903_v15  ;;  %v17257_v62 = vld [vmem:[#allocation45_spill] sm:$0xff]  ;;  %v17263_v42 = vld [vmem:[#allocation48_spill] sm:$0xff]  ;;  %v17269_v54 = vld [vmem:[#allocation63_spill] sm:$0xff] }
 0x1f7   : > { %v5911_v39 = vsel %vm1845_vm3, %v5693_v4, %v5910_v5  ;;  %v6029_v47 = vsel %vm825_vm2, %v17255_v32, %v6028_v61  ;;  %v6036_v43 = vsel %vm825_vm2, %v17256_v18, %v6035_v44  ;;  %v5905_v59 = vsel %vm827_vm4, %v5665_v37, %v5904_v63  ;;  %v17266_v3 = vld [vmem:[#allocation52_spill] sm:$0xff]  ;;  %v17267_v15 = vld [vmem:[#allocation53_spill] sm:$0xff]  ;;  %v17270_v32 = vld [vmem:[#allocation31_spill] sm:$0xff] }
 0x1f8   : > { %v5912_v2 = vsel %vm827_vm4, %v5697_v48, %v5911_v39  ;;  %v6030_v31 = vsel %vm1845_vm3, %v17257_v62, %v6029_v47  ;;  %v6037_v11 = vsel %vm1845_vm3, %v17258_v46, %v6036_v43  ;;  %v5906_v6 = vsel %vm1848_vm5, %v5669_v27, %v5905_v59  ;;  %v17264_v27 = vld [vmem:[#allocation59_spill] sm:$0xff] }
 0x1f9   : > { %v5913_v7 = vsel %vm1848_vm5, %v5701_v19, %v5912_v2  ;;  %v6031_v23 = vsel %vm827_vm4, %v17259_v34, %v6030_v31  ;;  %v6038_v16 = vsel %vm827_vm4, %v17260_v0, %v6037_v11  ;;  %v5907_v10 = vsel %vm829_vm6, %v5673_v21, %v5906_v6  ;;  %v13307_v19 = vld [vmem:[%s9700_s30 + $0x178] sm:$0xff] }
 0x1fa   : > { %v5914_v49 = vsel %vm829_vm6, %v5705_v20, %v5913_v7  ;;  %v6032_v12 = vsel %vm1848_vm5, %v17261_v9, %v6031_v23  ;;  %v6039_v41 = vsel %vm1848_vm5, %v17262_v52, %v6038_v16  ;;  %v5908_v14 = vsel %vm1851_vm7, %v5677_v35, %v5907_v10 }
 0x1fb   : > { %v5915_v50 = vsel %vm1851_vm7, %v5709_v58, %v5914_v49  ;;  %v6033_v37 = vsel %vm829_vm6, %v17263_v42, %v6032_v12  ;;  %v6040_v29 = vsel %vm829_vm6, %v17264_v27, %v6039_v41  ;;  %v5985_v48 = vrot.slane %v13159_v38, %v9717_v17  ;;  %v17265_v58 = vld [vmem:[#allocation51_spill] sm:$0xff]  ;;  %v17272_v27 = vld [vmem:[#allocation68_spill] sm:$0xff] }
 0x1fc   : > { %v8904_v21 = vpack.i.bf16 %v5915_v50, %v5908_v14  ;;  %v6034_v55 = vsel %vm1851_vm7, %v5993_v26, %v6033_v37  ;;  %v6041_v4 = vsel %vm1851_vm7, %v5997_v22, %v6040_v29  ;;  %v5989_v20 = vrot.slane %v13162_v53, %v9717_v17  ;;  %v17268_v26 = vld [vmem:[#allocation60_spill] sm:$0xff] }
 0x1fd   : > { %v8919_v35 = vpack.i.bf16 %v6041_v4, %v6034_v55  ;;  %v6014_v36 = vsel %vm1842_vm1, %v17265_v58, %v12945_v24  ;;  %v6021_v5 = vsel %vm1842_vm1, %v17267_v15, %v17266_v3  ;;  %v3365_v45 = vrot.slane %v8509_v57, 1 }
 0x1fe   : > { %8905 = vrot.lane.b32.xlu0 %v8904_v21, %s9640_s14  ;;  %v6015_v22 = vsel %vm825_vm2, %v17268_v26, %v6014_v36  ;;  %v6022_v38 = vsel %vm825_vm2, %v12986_v13, %v6021_v5  ;;  %v3427_v61 = vrot.slane %v8509_v57, 7  ;;  %v3428_v60 = vrot.slane %v13307_v19, 7  ;;  %v17273_v21 = vld [vmem:[#allocation75_spill] sm:$0xff]  ;;  %v17276_v36 = vld [vmem:[#allocation72_spill] sm:$0xff] }
 0x1ff   : > { %8920 = vrot.lane.b32.xlu1 %v8919_v35, %s9637_s11  ;;  %v6016_v53 = vsel %vm1845_vm3, %v12960_v51, %v6015_v22  ;;  %v6023_v24 = vsel %vm1845_vm3, %v12990_v30, %v6022_v38  ;;  %v4705_v44 = vrot.slane %v17269_v54, %v9717_v17  ;;  %v4641_v47 = vrot.slane %v17270_v32, %v9717_v17  ;;  %v17277_v5 = vld [vmem:[#allocation87_spill] sm:$0xff]  ;;  %v17278_v38 = vld [vmem:[#allocation77_spill] sm:$0xff]  ;;  %v17282_v32 = vld [vmem:[#allocation34_spill] sm:$0xff] }
 0x200   : > { %v6017_v63 = vsel %vm827_vm4, %v12964_v33, %v6016_v53  ;;  %v6024_v13 = vsel %vm827_vm4, %v12994_v40, %v6023_v24  ;;  %v3525_v39 = vsel %vm379_vm0, %v3365_v45, %v3427_v61  ;;  %v3429_v18 = vsel %vm379_vm0, %v3427_v61, %v3428_v60  ;;  %v17271_v40 = vld [vmem:[#allocation12_spill] sm:$0xff]  ;;  %v17279_v53 = vld [vmem:[#allocation85_spill] sm:$0xff] }
 0x201   : > { %v6018_v51 = vsel %vm1848_vm5, %v12968_v28, %v6017_v63  ;;  %v6025_v30 = vsel %vm1848_vm5, %v12998_v56, %v6024_v13  ;;  %v3659_v43 = vcombine.high %v3525_v39, %v3525_v39  ;;  %v13349_v2 = vrot.slane %v3525_v39, %v9707_v8  ;;  %v17280_v54 = vld [vmem:[#allocation69_spill] sm:$0xff]  ;;  %v17281_v63 = vld [vmem:[#allocation38_spill] sm:$0xff] }
 0x202   : > { %v6019_v33 = vsel %vm829_vm6, %v12972_v25, %v6018_v51  ;;  %v6026_v59 = vsel %vm829_vm6, %v17271_v40, %v6025_v30  ;;  %v3676_v62 = vcombine.high %v3429_v18, %v3429_v18  ;;  %v13357_v46 = vrot.slane %v3429_v18, %v9707_v8  ;;  %v17283_v51 = vld [vmem:[#allocation67_spill] sm:$0xff]  ;;  %v17285_v40 = vld [vmem:[#allocation90_spill] sm:$0xff] }
 0x203   : > { %v6020_v28 = vsel %vm1851_vm7, %v5985_v48, %v6019_v33  ;;  %v6027_v31 = vsel %vm1851_vm7, %v5989_v20, %v6026_v59  ;;  %v13354_v56 = vrot.slane %v3659_v43, %v9707_v8  ;;  %v3674_v25 = vcombine.high %v13349_v2, %v13349_v2  ;;  %v17274_v48 = vld [vmem:[#allocation73_spill] sm:$0xff]  ;;  %v17284_v18 = vld [vmem:[#allocation39_spill] sm:$0xff] }
 0x204   : > { %v8914_v11 = vpack.i.bf16 %v6027_v31, %v6020_v28  ;;  %v13362_v6 = vrot.slane %v3676_v62, %v9707_v8  ;;  %v4737_v7 = vrot.slane %v13349_v2, %v9717_v17  ;;  %v13372_v23 = vcombine.high %v13357_v46, %v13357_v46  ;;  %v17275_v20 = vld [vmem:[#allocation33_spill] sm:$0xff]  ;;  %v17286_v62 = vld [vmem:[#allocation74_spill] sm:$0xff] }
 0x205   : > { %v13368_v34 = vcombine.high %v13354_v56, %v13354_v56  ;;  %v13376_v0 = vrot.slane %v13354_v56, %v9717_v17  ;;  %v13380_v16 = vrot.slane %v13357_v46, %v9717_v17  ;;  %v3928_v49 = vrot.slane %v3674_v25, 7  ;;  %v17287_v31 = vld [vmem:[#allocation54_spill] sm:$0xff] }
 0x206   : > { %8915 = vrot.lane.b32.xlu0 %v8914_v11, %s9637_s11  ;;  %v13385_v10 = vcombine.high %v13362_v6, %v13362_v6  ;;  %v13388_v9 = vrot.slane %v3674_v25, %v9717_v17  ;;  %v13392_v12 = vrot.slane %v13362_v6, %v9717_v17  ;;  %v3940_v41 = vrot.slane %v13372_v23, 7 }
 0x207   : > { %v3934_v52 = vrot.slane %v13368_v34, 7  ;;  %v13398_v14 = vrot.slane %v13368_v34, %v9717_v17  ;;  %v13402_v50 = vrot.slane %v13372_v23, %v9717_v17  ;;  %v4876_v29 = vsel %vm1842_vm1, %v17272_v27, %v4705_v44  ;;  %v17291_v23 = vld [vmem:[#allocation64_spill] sm:$0xff] }
 0x208   : > { %v3946_v42 = vrot.slane %v13385_v10, 7  ;;  %v13407_v37 = vrot.slane %v13385_v10, %v9717_v17  ;;  %v4883_v57 = vsel %vm1842_vm1, %v13388_v9, %v4737_v7  ;;  %v4877_v55 = vsel %vm825_vm2, %v17273_v21, %v4876_v29  ;;  %v17290_v7 = vld [vmem:[#allocation86_spill] sm:$0xff]  ;;  %v17292_v29 = vld [vmem:[#allocation35_spill] sm:$0xff] }
 0x209   : > { %v4884_v4 = vsel %vm825_vm2, %v13376_v0, %v4883_v57  ;;  %v4673_v35 = vrot.slane %v17274_v48, %v9717_v17  ;;  %v4862_v58 = vsel %vm1842_vm1, %v17275_v20, %v4641_v47  ;;  %v4878_v3 = vsel %vm1845_vm3, %v17276_v36, %v4877_v55  ;;  %v17294_v21 = vld [vmem:[#allocation71_spill] sm:$0xff]  ;;  %v17295_v48 = vld [vmem:[#allocation70_spill] sm:$0xff] }
 0x20a   : > { %v4885_v15 = vsel %vm1845_vm3, %v13398_v14, %v4884_v4  ;;  %v4863_v26 = vsel %vm825_vm2, %v17277_v5, %v4862_v58  ;;  %v3493_v22 = vrot.slane %v13307_v19, 5  ;;  %v4879_v45 = vsel %vm827_vm4, %v17278_v38, %v4878_v3  ;;  %v17296_v3 = vld [vmem:[#allocation76_spill] sm:$0xff] }
 0x20b   : > { %v4886_v61 = vsel %vm827_vm4, %v13380_v16, %v4885_v15  ;;  %v4864_v24 = vsel %vm1845_vm3, %v17279_v53, %v4863_v26  ;;  %v4869_v44 = vsel %vm1842_vm1, %v17280_v54, %v4673_v35  ;;  %v4880_v13 = vsel %vm1848_vm5, %v17281_v63, %v4879_v45 }
 0x20c   : > { %v4887_v39 = vsel %vm1848_vm5, %v13402_v50, %v4886_v61  ;;  %v4865_v47 = vsel %vm827_vm4, %v17282_v32, %v4864_v24  ;;  %v4870_v30 = vsel %vm825_vm2, %v17283_v51, %v4869_v44  ;;  %v4881_v43 = vsel %vm829_vm6, %v17284_v18, %v4880_v13 }
 0x20d   : > { %v4888_v33 = vsel %vm829_vm6, %v13392_v12, %v4887_v39  ;;  %v4866_v59 = vsel %vm1848_vm5, %v17285_v40, %v4865_v47  ;;  %v4871_v28 = vsel %vm1845_vm3, %v17286_v62, %v4870_v30  ;;  %v13454_v11 = vsel %vm1851_vm7, %v17287_v31, %v4881_v43  ;;  %v17298_v40 = vld [vmem:[#allocation91_spill] sm:$0xff] }
 0x20e   : > { %17288 = vst [vmem:[#allocation15_spill] sm:$0xff] %v13454_v11  ;;  %v13458_v25 = vsel %vm1851_vm7, %v13407_v37, %v4888_v33  ;;  %v4867_v34 = vsel %vm829_vm6, %v17290_v7, %v4866_v59  ;;  %v4872_v10 = vsel %vm827_vm4, %v17291_v23, %v4871_v28  ;;  %v3541_v4 = vsel %vm379_vm0, %v3428_v60, %v3493_v22  ;;  %v8521_v33 = vld [vmem:[%s9700_s30 + $0x1d0] sm:$0xff]  ;;  %v17299_v59 = vld [vmem:[#allocation41_spill] sm:$0xff] }
 0x20f   : > { %17289 = vst [vmem:[#allocation10_spill] sm:$0xff] %v13458_v25  ;;  %v8929_v27 = vpack.i.bf16 %v13458_v25, %v13454_v11  ;;  %v13468_v57 = vsel %vm1851_vm7, %v17292_v29, %v4867_v34  ;;  %v4873_v55 = vsel %vm1848_vm5, %v17294_v21, %v4872_v10  ;;  %v13478_v20 = vrot.slane %v3541_v4, %v9707_v8  ;;  %v8518_v7 = vld [vmem:[%s9700_s30 + $0x1b8] sm:$0xff]  ;;  %v17300_v10 = vld [vmem:[#allocation18_spill] sm:$0xff] }
 0x210   : > { %17293 = vst [vmem:[#allocation8_spill] sm:$0xff] %v13468_v57  ;;  %v4874_v35 = vsel %vm829_vm6, %v17295_v48, %v4873_v55  ;;  %v8530_v58 = vrot.slane %v13349_v2, 9  ;;  %v3930_v36 = vrot.slane %v3928_v49, 2  ;;  %v3931_v5 = vrot.slane %v13354_v56, 7  ;;  %v8522_v21 = vld [vmem:[%s9700_s30 + $0x1d8] sm:$0xff] }
 0x211   : > { %8930 = vrot.lane.b32.xlu1 %v8929_v27, %s9635_s9  ;;  %v13484_v15 = vsel %vm1851_vm7, %v17296_v3, %v4874_v35  ;;  %v3936_v19 = vrot.slane %v3934_v52, 2  ;;  %v3937_v60 = vrot.slane %v13357_v46, 7  ;;  %v3942_v38 = vrot.slane %v3940_v41, 2  ;;  %v17301_v27 = vld [vmem:[#allocation40_spill] sm:$0xff] }
 0x212   : > { %17297 = vst [vmem:[#allocation21_spill] sm:$0xff] %v13484_v15  ;;  %v8924_v26 = vpack.i.bf16 %v13484_v15, %v13468_v57  ;;  %v3929_v22 = vsel %vm10635_vm10, %v8530_v58, %v3928_v49  ;;  %v3943_v2 = vrot.slane %v13362_v6, 7  ;;  %v3932_v45 = vsel %vm10635_vm10, %v3930_v36, %v3931_v5 }
 0x213   : > { %v3933_v61 = vrot.slane %v3931_v5, 2  ;;  %v3938_v56 = vsel %vm10635_vm10, %v3936_v19, %v3937_v60  ;;  %v3939_v53 = vrot.slane %v3937_v60, 2  ;;  %v3948_v49 = vrot.slane %v3946_v42, 2 }
 0x214   : > { %8925 = vrot.lane.b32.xlu0 %v8924_v26, %s9635_s9  ;;  %v3944_v46 = vsel %vm10635_vm10, %v3942_v38, %v3943_v2  ;;  %v3945_v24 = vrot.slane %v3943_v2, 2  ;;  %v3949_v54 = vrot.slane %v13478_v20, 7  ;;  %v5017_v63 = vrot.slane %v3929_v22, %v9717_v17 }
 0x215   : > { %v3935_v6 = vsel %vm10635_vm10, %v3933_v61, %v3934_v52  ;;  %v3941_v44 = vsel %vm10635_vm10, %v3939_v53, %v3940_v41  ;;  %v5021_v13 = vrot.slane %v3932_v45, %v9717_v17  ;;  %v5029_v51 = vrot.slane %v3938_v56, %v9717_v17  ;;  %v8517_v52 = vld [vmem:[%s9700_s30 + $0x1b0] sm:$0xff]  ;;  %v17303_v56 = vld [vmem:[#allocation61_spill] sm:$0xff] }
 0x216   : > { %v3947_v39 = vsel %vm10635_vm10, %v3945_v24, %v3946_v42  ;;  %v3950_v32 = vsel %vm10635_vm10, %v3948_v49, %v3949_v54  ;;  %v5025_v47 = vrot.slane %v3935_v6, %v9717_v17  ;;  %v5033_v30 = vrot.slane %v3941_v44, %v9717_v17  ;;  %v17302_v45 = vld [vmem:[#allocation44_spill] sm:$0xff] }
 0x217   : > { %v5037_v41 = vrot.slane %v3944_v46, %v9717_v17  ;;  %v5041_v18 = vrot.slane %v3947_v39, %v9717_v17  ;;  %v5045_v43 = vrot.slane %v3950_v32, %v9717_v17  ;;  %v5163_v42 = vsel %vm1842_vm1, %v5021_v13, %v5017_v63 }
 0x218   : > { %v8934_v62 = vpack.i.bf16 %v17299_v59, %v17298_v40  ;;  %v5227_v28 = vrot.slane %v13478_v20, %v9717_v17  ;;  %v5261_v31 = vsel %vm1842_vm1, %v13376_v0, %v13388_v9  ;;  %v5164_v34 = vsel %vm825_vm2, %v5025_v47, %v5163_v42 }
 0x219   : > { %v5262_v23 = vsel %vm825_vm2, %v13398_v14, %v5261_v31  ;;  %v8944_v29 = vpack.i.bf16 %v17301_v27, %v17300_v10  ;;  %v3369_v55 = vrot.slane %v8517_v52, 1  ;;  %v5165_v4 = vsel %vm1845_vm3, %v5029_v51, %v5164_v34 }
 0x21a   : > { %8935 = vrot.lane.b32.xlu0 %v8934_v62, %s9641_s15  ;;  %v5263_v48 = vsel %vm1845_vm3, %v13380_v16, %v5262_v23  ;;  %v3371_v35 = vrot.slane %v8521_v33, 1  ;;  %v3439_v0 = vrot.slane %v8517_v52, 7  ;;  %v5166_v9 = vsel %vm827_vm4, %v5033_v30, %v5165_v4 }
 0x21b   : > { %v5264_v20 = vsel %vm827_vm4, %v13402_v50, %v5263_v48  ;;  %v3440_v14 = vrot.slane %v8518_v7, 7  ;;  %v3445_v58 = vrot.slane %v8521_v33, 7  ;;  %v5167_v36 = vsel %vm1848_vm5, %v5037_v41, %v5166_v9 }
 0x21c   : > { %v5265_v3 = vsel %vm1848_vm5, %v13392_v12, %v5264_v20  ;;  %v3446_v5 = vrot.slane %v8522_v21, 7  ;;  %v3497_v19 = vrot.slane %v8518_v7, 5  ;;  %v5168_v60 = vsel %vm829_vm6, %v5041_v18, %v5167_v36 }
 0x21d   : > { %v5266_v16 = vsel %vm829_vm6, %v13407_v37, %v5265_v3  ;;  %v3441_v26 = vsel %vm379_vm0, %v3439_v0, %v3440_v14  ;;  %v3499_v22 = vrot.slane %v8522_v21, 5  ;;  %v13549_v38 = vsel %vm1851_vm7, %v5045_v43, %v5168_v60 }
 0x21e   : > { %v13552_v50 = vsel %vm1851_vm7, %v5227_v28, %v5266_v16  ;;  %8945 = vrot.lane.b32.xlu0 %v8944_v29, %s9638_s12  ;;  %v3447_v12 = vsel %vm379_vm0, %v3445_v58, %v3446_v5  ;;  %v3529_v2 = vsel %vm379_vm0, %v3369_v55, %v3439_v0  ;;  %v8939_v61 = vpack.i.bf16 %v13549_v38, %v17302_v45 }
 0x21f   : > { %v8949_v37 = vpack.i.bf16 %v13552_v50, %v17303_v56  ;;  %v3531_v53 = vsel %vm379_vm0, %v3371_v35, %v3445_v58  ;;  %v3545_v46 = vsel %vm379_vm0, %v3440_v14, %v3497_v19  ;;  %v3547_v24 = vsel %vm379_vm0, %v3446_v5, %v3499_v22 }
 0x220   : > { %v3727_v49 = vcombine.high %v3529_v2, %v3529_v2  ;;  %v13565_v54 = vrot.slane %v3529_v2, %v9707_v8  ;;  %v3744_v6 = vcombine.high %v3441_v26, %v3441_v26  ;;  %8940 = vrot.lane.b32.xlu1 %v8939_v61, %s9641_s15  ;;  %v13569_v44 = vrot.slane %v3441_v26, %v9707_v8 }
 0x221   : > { %v3761_v63 = vcombine.high %v3531_v53, %v3531_v53  ;;  %v13572_v13 = vrot.slane %v3531_v53, %v9707_v8  ;;  %v3778_v39 = vcombine.high %v3447_v12, %v3447_v12  ;;  %v13585_v52 = vrot.slane %v3447_v12, %v9707_v8 }
 0x222   : > { %17304 = vst [vmem:[#allocation19_spill] sm:$0xff] %v13565_v54  ;;  %v13575_v32 = vrot.slane %v3727_v49, %v9707_v8  ;;  %v13579_v47 = vcombine.high %v13565_v54, %v13565_v54  ;;  %v13582_v51 = vrot.slane %v3744_v6, %v9707_v8  ;;  %v13589_v30 = vcombine.high %v13569_v44, %v13569_v44 }
 0x223   : > { %17305 = vst [vmem:[#allocation11_spill] sm:$0xff] %v13572_v13  ;;  %v13592_v41 = vrot.slane %v3761_v63, %v9707_v8  ;;  %v13596_v18 = vcombine.high %v13572_v13, %v13572_v13  ;;  %v13599_v43 = vrot.slane %v3778_v39, %v9707_v8  ;;  %v13611_v40 = vcombine.high %v13585_v52, %v13585_v52 }
 0x224   : > { %v13603_v33 = vcombine.high %v13575_v32, %v13575_v32  ;;  %v13607_v42 = vcombine.high %v13582_v51, %v13582_v51  ;;  %v13614_v59 = vrot.slane %v3545_v46, %v9707_v8  ;;  %8950 = vrot.lane.b32.xlu1 %v8949_v37, %s9638_s12  ;;  %v13626_v31 = vrot.slane %v3547_v24, %v9707_v8 }
 0x225   : > { %v13619_v62 = vcombine.high %v13592_v41, %v13592_v41  ;;  %v13623_v28 = vcombine.high %v13599_v43, %v13599_v43  ;;  %v8532_v7 = vrot.slane %v13565_v54, 9  ;;  %v3978_v34 = vrot.slane %v13579_v47, 7 }
 0x226   : > { %v3981_v23 = vrot.slane %v13575_v32, 7  ;;  %v3984_v10 = vrot.slane %v13603_v33, 7  ;;  %v3987_v27 = vrot.slane %v13569_v44, 7  ;;  %v3990_v29 = vrot.slane %v13589_v30, 7 }
 0x227   : > { %v3993_v21 = vrot.slane %v13582_v51, 7  ;;  %v3996_v55 = vrot.slane %v13607_v42, 7  ;;  %v3999_v4 = vrot.slane %v13614_v59, 7  ;;  %v3979_v48 = vsel %vm10635_vm10, %v8532_v7, %v3978_v34 }
 0x228   : > { %v3980_v35 = vrot.slane %v3978_v34, 2  ;;  %v3983_v0 = vrot.slane %v3981_v23, 2  ;;  %v3986_v9 = vrot.slane %v3984_v10, 2  ;;  %v3989_v20 = vrot.slane %v3987_v27, 2 }
 0x229   : > { %v3992_v14 = vrot.slane %v3990_v29, 2  ;;  %v3995_v58 = vrot.slane %v3993_v21, 2  ;;  %v3998_v36 = vrot.slane %v3996_v55, 2  ;;  %v8533_v60 = vrot.slane %v13572_v13, 9 }
 0x22a   : > { %v3982_v3 = vsel %vm10635_vm10, %v3980_v35, %v3981_v23  ;;  %v3985_v5 = vsel %vm10635_vm10, %v3983_v0, %v3984_v10  ;;  %v3988_v19 = vsel %vm10635_vm10, %v3986_v9, %v3987_v27  ;;  %v3991_v16 = vsel %vm10635_vm10, %v3989_v20, %v3990_v29 }
 0x22b   : > { %v3994_v26 = vsel %vm10635_vm10, %v3992_v14, %v3993_v21  ;;  %v3997_v22 = vsel %vm10635_vm10, %v3995_v58, %v3996_v55  ;;  %v13654_v12 = vsel %vm10635_vm10, %v3998_v36, %v3999_v4  ;;  %v4003_v2 = vrot.slane %v13596_v18, 7 }
 0x22c   : > { %v4006_v45 = vrot.slane %v13592_v41, 7  ;;  %v4009_v61 = vrot.slane %v13619_v62, 7  ;;  %v4012_v56 = vrot.slane %v13585_v52, 7  ;;  %v4015_v37 = vrot.slane %v13611_v40, 7 }
 0x22d   : > { %v4018_v53 = vrot.slane %v13599_v43, 7  ;;  %v4021_v46 = vrot.slane %v13623_v28, 7  ;;  %v4024_v24 = vrot.slane %v13626_v31, 7  ;;  %v4004_v49 = vsel %vm10635_vm10, %v8533_v60, %v4003_v2 }
 0x22e   : > { %v4005_v6 = vrot.slane %v4003_v2, 2  ;;  %v4008_v63 = vrot.slane %v4006_v45, 2  ;;  %v4011_v39 = vrot.slane %v4009_v61, 2  ;;  %v4014_v7 = vrot.slane %v4012_v56, 2 }
 0x22f   : > { %v4017_v34 = vrot.slane %v4015_v37, 2  ;;  %v4020_v23 = vrot.slane %v4018_v53, 2  ;;  %v4023_v10 = vrot.slane %v4021_v46, 2  ;;  %v5081_v55 = vrot.slane %v3979_v48, %v9717_v17 }
 0x230   : > { %v4007_v27 = vsel %vm10635_vm10, %v4005_v6, %v4006_v45  ;;  %v4010_v29 = vsel %vm10635_vm10, %v4008_v63, %v4009_v61  ;;  %v4013_v21 = vsel %vm10635_vm10, %v4011_v39, %v4012_v56  ;;  %v4016_v4 = vsel %vm10635_vm10, %v4014_v7, %v4015_v37  ;;  %v8513_v61 = vld [vmem:[%s9700_s30 + $0x190] sm:$0xff]  ;;  %v8514_v37 = vld [vmem:[%s9700_s30 + $0x198] sm:$0xff] }
 0x231   : > { %v4019_v35 = vsel %vm10635_vm10, %v4017_v34, %v4018_v53  ;;  %v4022_v0 = vsel %vm10635_vm10, %v4020_v23, %v4021_v46  ;;  %v4025_v9 = vsel %vm10635_vm10, %v4023_v10, %v4024_v24  ;;  %v5085_v20 = vrot.slane %v3982_v3, %v9717_v17 }
 0x232   : > { %v5089_v14 = vrot.slane %v3985_v5, %v9717_v17  ;;  %v5093_v58 = vrot.slane %v3988_v19, %v9717_v17  ;;  %v5097_v48 = vrot.slane %v3991_v16, %v9717_v17  ;;  %v5101_v36 = vrot.slane %v3994_v26, %v9717_v17 }
 0x233   : > { %v5105_v60 = vrot.slane %v3997_v22, %v9717_v17  ;;  %v5109_v2 = vrot.slane %v13654_v12, %v9717_v17  ;;  %v5113_v45 = vrot.slane %v4004_v49, %v9717_v17  ;;  %v5117_v56 = vrot.slane %v4007_v27, %v9717_v17 }
 0x234   : > { %v5121_v3 = vrot.slane %v4010_v29, %v9717_v17  ;;  %v5125_v5 = vrot.slane %v4013_v21, %v9717_v17  ;;  %v5129_v19 = vrot.slane %v4016_v4, %v9717_v17  ;;  %v5133_v16 = vrot.slane %v4019_v35, %v9717_v17 }
 0x235   : > { %v5137_v26 = vrot.slane %v4022_v0, %v9717_v17  ;;  %v5141_v22 = vrot.slane %v4025_v9, %v9717_v17  ;;  %v5177_v12 = vsel %vm1842_vm1, %v5085_v20, %v5081_v55  ;;  %v5184_v46 = vsel %vm1842_vm1, %v5117_v56, %v5113_v45 }
 0x236   : > { %v5178_v53 = vsel %vm825_vm2, %v5089_v14, %v5177_v12  ;;  %v3367_v24 = vrot.slane %v8513_v61, 1  ;;  %v3433_v49 = vrot.slane %v8513_v61, 7  ;;  %v5185_v63 = vsel %vm825_vm2, %v5121_v3, %v5184_v46 }
 0x237   : > { %v5179_v6 = vsel %vm1845_vm3, %v5093_v58, %v5178_v53  ;;  %v3434_v39 = vrot.slane %v8514_v37, 7  ;;  %v3495_v7 = vrot.slane %v8514_v37, 5  ;;  %v5186_v23 = vsel %vm1845_vm3, %v5125_v5, %v5185_v63 }
 0x238   : > { %v5180_v34 = vsel %vm827_vm4, %v5097_v48, %v5179_v6  ;;  %v3527_v10 = vsel %vm379_vm0, %v3367_v24, %v3433_v49  ;;  %v13709_v27 = vrot.slane %v13579_v47, %v9717_v17  ;;  %v5187_v21 = vsel %vm827_vm4, %v5129_v19, %v5186_v23 }
 0x239   : > { %v5181_v29 = vsel %vm1848_vm5, %v5101_v36, %v5180_v34  ;;  %v3435_v55 = vsel %vm379_vm0, %v3433_v49, %v3434_v39  ;;  %v3543_v4 = vsel %vm379_vm0, %v3434_v39, %v3495_v7  ;;  %v5188_v0 = vsel %vm1848_vm5, %v5133_v16, %v5187_v21 }
 0x23a   : > { %17306 = vst [vmem:[#allocation9_spill] sm:$0xff] %v13709_v27  ;;  %v5182_v35 = vsel %vm829_vm6, %v5105_v60, %v5181_v29  ;;  %v3693_v9 = vcombine.high %v3527_v10, %v3527_v10  ;;  %v13718_v20 = vrot.slane %v3527_v10, %v9707_v8  ;;  %v5189_v47 = vsel %vm829_vm6, %v5137_v26, %v5188_v0 }
 0x23b   : > { %v13721_v14 = vsel %vm1851_vm7, %v5109_v2, %v5182_v35  ;;  %v3710_v58 = vcombine.high %v3435_v55, %v3435_v55  ;;  %v13725_v48 = vrot.slane %v3435_v55, %v9707_v8  ;;  %v13728_v36 = vsel %vm1851_vm7, %v5141_v22, %v5189_v47 }
 0x23c   : > { %17307 = vst [vmem:[#allocation7_spill] sm:$0xff] %v13718_v20  ;;  %17308 = vst [vmem:[#allocation20_spill] sm:$0xff] %v13721_v14  ;;  %v13731_v60 = vrot.slane %v3693_v9, %v9707_v8  ;;  %v13735_v45 = vcombine.high %v13718_v20, %v13718_v20  ;;  %v13738_v61 = vrot.slane %v3543_v4, %v9707_v8  ;;  %v8531_v5 = vrot.slane %v13718_v20, 9 }
 0x23d   : > { %17309 = vst [vmem:[#allocation22_spill] sm:$0xff] %v13728_v36  ;;  %v8959_v2 = vpack.i.bf16 %v13728_v36, %v13721_v14  ;;  %v13743_v56 = vrot.slane %v3710_v58, %v9707_v8  ;;  %v13747_v3 = vcombine.high %v13725_v48, %v13725_v48  ;;  %v3962_v26 = vrot.slane %v13725_v48, 7 }
 0x23e   : > { %v13752_v19 = vcombine.high %v13731_v60, %v13731_v60  ;;  %v3953_v37 = vrot.slane %v13735_v45, 7  ;;  %v3956_v16 = vrot.slane %v13731_v60, 7  ;;  %v3974_v46 = vrot.slane %v13738_v61, 7 }
 0x23f   : > { %8960 = vrot.lane.b32.xlu1 %v8959_v2, %s9639_s13  ;;  %v13760_v22 = vcombine.high %v13743_v56, %v13743_v56  ;;  %v3965_v12 = vrot.slane %v13747_v3, 7  ;;  %v3968_v53 = vrot.slane %v13743_v56, 7  ;;  %v3964_v39 = vrot.slane %v3962_v26, 2 }
 0x240   : > { %v3954_v24 = vsel %vm10635_vm10, %v8531_v5, %v3953_v37  ;;  %v3955_v49 = vrot.slane %v3953_v37, 2  ;;  %v3958_v6 = vrot.slane %v3956_v16, 2  ;;  %v3959_v63 = vrot.slane %v13752_v19, 7 }
 0x241   : > { %v3967_v7 = vrot.slane %v3965_v12, 2  ;;  %v3970_v34 = vrot.slane %v3968_v53, 2  ;;  %v3971_v23 = vrot.slane %v13760_v22, 7  ;;  %v5049_v55 = vrot.slane %v3954_v24, %v9717_v17 }
 0x242   : > { %v3957_v10 = vsel %vm10635_vm10, %v3955_v49, %v3956_v16  ;;  %v3960_v29 = vsel %vm10635_vm10, %v3958_v6, %v3959_v63  ;;  %v3961_v21 = vrot.slane %v3959_v63, 2  ;;  %v3966_v4 = vsel %vm10635_vm10, %v3964_v39, %v3965_v12 }
 0x243   : > { %v3969_v35 = vsel %vm10635_vm10, %v3967_v7, %v3968_v53  ;;  %v3972_v0 = vsel %vm10635_vm10, %v3970_v34, %v3971_v23  ;;  %v3973_v9 = vrot.slane %v3971_v23, 2  ;;  %v5053_v58 = vrot.slane %v3957_v10, %v9717_v17 }
 0x244   : > { %v3963_v47 = vsel %vm10635_vm10, %v3961_v21, %v3962_v26  ;;  %v5057_v2 = vrot.slane %v3960_v29, %v9717_v17  ;;  %v5065_v5 = vrot.slane %v3966_v4, %v9717_v17  ;;  %v5069_v12 = vrot.slane %v3969_v35, %v9717_v17 }
 0x245   : > { %v3975_v37 = vsel %vm10635_vm10, %v3973_v9, %v3974_v46  ;;  %v5061_v16 = vrot.slane %v3963_v47, %v9717_v17  ;;  %v5073_v53 = vrot.slane %v3972_v0, %v9717_v17  ;;  %v5170_v49 = vsel %vm1842_vm1, %v5053_v58, %v5049_v55  ;;  %v8519_v58 = vld [vmem:[%s9700_s30 + $0x1c0] sm:$0xff] }
 0x246   : > { %v5077_v24 = vrot.slane %v3975_v37, %v9717_v17  ;;  %v13794_v26 = vrot.slane %v13575_v32, %v9717_v17  ;;  %v13798_v6 = vrot.slane %v13603_v33, %v9717_v17  ;;  %v5171_v46 = vsel %vm825_vm2, %v5057_v2, %v5170_v49  ;;  %v8523_v37 = vld [vmem:[%s9700_s30 + $0x1e0] sm:$0xff]  ;;  %v9615_v49 = vld [vmem:[%s16446_s1 + $0x8] sm:$0xff]  }
 0x247   : > { %v13803_v63 = vrot.slane %v13569_v44, %v9717_v17  ;;  %v13807_v39 = vrot.slane %v13589_v30, %v9717_v17  ;;  %v13811_v7 = vrot.slane %v13582_v51, %v9717_v17  ;;  %v5172_v32 = vsel %vm1845_vm3, %v5061_v16, %v5171_v46 }
 0x248   : > { %17310 = vst [vmem:[#allocation4_spill] sm:$0xff] %v13794_v26  ;;  %17311 = vst [vmem:[#allocation13_spill] sm:$0xff] %v13798_v6  ;;  %v13816_v33 = vrot.slane %v13607_v42, %v9717_v17  ;;  %v13820_v34 = vrot.slane %v13596_v18, %v9717_v17  ;;  %v13824_v44 = vrot.slane %v13592_v41, %v9717_v17 }
 0x249   : > { %17312 = vst [vmem:[#allocation23_spill] sm:$0xff] %v13803_v63  ;;  %17313 = vst [vmem:[#allocation16_spill] sm:$0xff] %v13807_v39  ;;  %v5173_v30 = vsel %vm827_vm4, %v5065_v5, %v5172_v32  ;;  %v13829_v51 = vrot.slane %v13619_v62, %v9717_v17  ;;  %v13833_v23 = vrot.slane %v13585_v52, %v9717_v17 }
 0x24a   : > { %17314 = vst [vmem:[#allocation14_spill] sm:$0xff] %v13811_v7  ;;  %17315 = vst [vmem:[#allocation24_spill] sm:$0xff] %v13816_v33  ;;  %v13837_v42 = vrot.slane %v13611_v40, %v9717_v17  ;;  %v5174_v18 = vsel %vm1848_vm5, %v5069_v12, %v5173_v30  ;;  %v13842_v41 = vrot.slane %v13599_v43, %v9717_v17  ;;  %v13939_v30 = vld [vmem:[%s9700_s30 + $0x180] sm:$0xff] }
 0x24b   : > { %17316 = vst [vmem:[#allocation79_spill] sm:$0xff] %v13820_v34  ;;  %17317 = vst [vmem:[#allocation78_spill] sm:$0xff] %v13824_v44  ;;  %v13846_v10 = vrot.slane %v13623_v28, %v9717_v17  ;;  %v5235_v62 = vrot.slane %v13614_v59, %v9717_v17  ;;  %v5175_v52 = vsel %vm829_vm6, %v5073_v53, %v5174_v18  ;;  %v13942_v18 = vld [vmem:[%s9700_s30 + $0x1a0] sm:$0xff] }
 0x24c   : > { %17318 = vst [vmem:[#allocation17_spill] sm:$0xff] %v13829_v51  ;;  %17319 = vst [vmem:[#allocation26_spill] sm:$0xff] %v13833_v23  ;;  %v5239_v40 = vrot.slane %v13626_v31, %v9717_v17  ;;  %v5275_v29 = vsel %vm1842_vm1, %v13794_v26, %v13709_v27  ;;  %v5282_v43 = vsel %vm1842_vm1, %v13824_v44, %v13820_v34  ;;  %v3436_v26 = vrot.slane %v13942_v18, 7 }
 0x24d   : > { %17320 = vst [vmem:[#allocation30_spill] sm:$0xff] %v13837_v42  ;;  %17321 = vst [vmem:[#allocation81_spill] sm:$0xff] %v13842_v41  ;;  %v13860_v28 = vsel %vm1851_vm7, %v5077_v24, %v5175_v52  ;;  %v5276_v59 = vsel %vm825_vm2, %v13798_v6, %v5275_v29  ;;  %v5283_v21 = vsel %vm825_vm2, %v13829_v51, %v5282_v43  ;;  %v13921_v24 = vld [vmem:[%s9700_s30 + $0x1e8] sm:$0xff]  ;;  %v3442_v43 = vrot.slane %v8519_v58, 7 }
 0x24e   : > { %17322 = vst [vmem:[#allocation28_spill] sm:$0xff] %v13846_v10  ;;  %17323 = vst [vmem:[#allocation29_spill] sm:$0xff] %v13860_v28  ;;  %v13868_v31 = vrot.slane %v13735_v45, %v9717_v17  ;;  %v8954_v55 = vpack.i.bf16 %v13860_v28, %v13549_v38  ;;  %v5277_v4 = vsel %vm1845_vm3, %v13803_v63, %v5276_v59  ;;  %v3430_v6 = vrot.slane %v13939_v30, 7 }
 0x24f   : > { %v5284_v35 = vsel %vm1845_vm3, %v13833_v23, %v5283_v21  ;;  %v13878_v0 = vrot.slane %v13731_v60, %v9717_v17  ;;  %v5278_v9 = vsel %vm827_vm4, %v13807_v39, %v5277_v4  ;;  %v13886_v38 = vrot.slane %v13752_v19, %v9717_v17  ;;  %v14106_v39 = vld [vmem:[%s9700_s30 + $0x1a8] sm:$0xff] }
 0x250   : > { %17324 = vst [vmem:[#allocation32_spill] sm:$0xff] %v13868_v31  ;;  %v5285_v45 = vsel %vm827_vm4, %v13837_v42, %v5284_v35  ;;  %v13890_v47 = vrot.slane %v13725_v48, %v9717_v17  ;;  %8955 = vrot.lane.b32.xlu0 %v8954_v55, %s9639_s13  ;;  %v5279_v60 = vsel %vm1848_vm5, %v13811_v7, %v5278_v9  ;;  %v13907_v48 = vld [vmem:[%s9700_s30 + $0x1c8] sm:$0xff]  ;;  %v3448_v21 = vrot.slane %v8523_v37, 7 }
 0x251   : > { %17325 = vst [vmem:[#allocation84_spill] sm:$0xff] %v13878_v0  ;;  %17326 = vst [vmem:[#allocation25_spill] sm:$0xff] %v13886_v38  ;;  %v5286_v2 = vsel %vm1848_vm5, %v13842_v41, %v5285_v45  ;;  %v13900_v5 = vrot.slane %v13747_v3, %v9717_v17  ;;  %v13904_v19 = vrot.slane %v13743_v56, %v9717_v17  ;;  %v9614_v56 = vld [vmem:[%s16446_s1] sm:$0xff]   ;;  %v16695_v59 = vrot.slane %v13907_v48, 7 }
 0x252   : > { %17327 = vst [vmem:[#allocation36_spill] sm:$0xff] %v13890_v47  ;;  %v5280_v16 = vsel %vm829_vm6, %v13816_v33, %v5279_v60  ;;  %v5287_v12 = vsel %vm829_vm6, %v13846_v10, %v5286_v2  ;;  %v13916_v53 = vrot.slane %v13760_v22, %v9717_v17  ;;  %v5231_v3 = vrot.slane %v13738_v61, %v9717_v17 }
 0x253   : > { %17328 = vst [vmem:[#allocation94_spill] sm:$0xff] %v13900_v5  ;;  %17329 = vst [vmem:[#allocation89_spill] sm:$0xff] %v13904_v19  ;;  %v13930_v46 = vsel %vm1851_vm7, %v5235_v62, %v5280_v16  ;;  %v13933_v32 = vsel %vm1851_vm7, %v5239_v40, %v5287_v12  ;;  %v5268_v61 = vsel %vm1842_vm1, %v13878_v0, %v13868_v31  ;;  %v3370_v22 = vrot.slane %v8519_v58, 1 }
 0x254   : > { %17330 = vst [vmem:[#allocation98_spill] sm:$0xff] %v13916_v53  ;;  %17331 = vst [vmem:[#allocation95_spill] sm:$0xff] %v13930_v46  ;;  %v8969_v52 = vpack.i.bf16 %v13933_v32, %v13930_v46  ;;  %v5269_v29 = vsel %vm825_vm2, %v13886_v38, %v5268_v61  ;;  %v3372_v62 = vrot.slane %v8523_v37, 1  ;;  %8619 = vmatprep.subr.bf16.mxu0 %v9614_v56  ;;  %v16694_v55 = vrot.slane %v13921_v24, 7 }
 0x255   : > { %17332 = vst [vmem:[#allocation96_spill] sm:$0xff] %v13933_v32  ;;  %v5270_v40 = vsel %vm1845_vm3, %v13890_v47, %v5269_v29  ;;  %8620 = vmatpush3.bf16.msra.mxu0 %v9614_v56  ;;  %v3530_v35 = vsel %vm379_vm0, %v3370_v22, %v3442_v43  ;;  %v3444_v60 = vsel %vm379_vm0, %v3442_v43, %v16695_v59  ;;  %v17347_v47 = vrot.slane %v13939_v30, 1  ;;  %v17442_v1 = vld [vmem:[#allocation29_spill] sm:$0xff] }
 0x256   : > { %8970 = vrot.lane.b32.xlu1 %v8969_v52, %s9636_s10  ;;  %v5271_v4 = vsel %vm827_vm4, %v13900_v5, %v5270_v40  ;;  %8621 = vmatprep.subr.bf16.mxu0 %v9615_v49  ;;  %v3450_v2 = vsel %vm379_vm0, %v3448_v21, %v16694_v55  ;;  %v3532_v37 = vsel %vm379_vm0, %v3372_v62, %v3448_v21  ;;  %v17349_v30 = vrot.slane %v14106_v39, 7 }
 0x257   : > { %v5272_v58 = vsel %vm1848_vm5, %v13904_v19, %v5271_v4  ;;  %v4238_v12 = vcombine.high %v3530_v35, %v3530_v35  ;;  %v13970_v56 = vrot.slane %v3530_v35, %v9707_v8  ;;  %v4255_v61 = vcombine.high %v3444_v60, %v3444_v60 }
 0x258   : > { %v5273_v16 = vsel %vm829_vm6, %v13916_v53, %v5272_v58  ;;  %v13976_v52 = vrot.slane %v3444_v60, %v9707_v8  ;;  %v4272_v29 = vcombine.high %v3532_v37, %v3532_v37  ;;  %v13979_v43 = vrot.slane %v3532_v37, %v9707_v8 }
 0x259   : > { %v13973_v22 = vsel %vm1851_vm7, %v5231_v3, %v5273_v16  ;;  %8622 = vmatpush3.bf16.msra.mxu0 %v9615_v49  ;;  %v13984_v40 = vrot.slane %v4238_v12, %v9707_v8  ;;  %v13988_v21 = vcombine.high %v13970_v56, %v13970_v56  ;;  %v13991_v3 = vrot.slane %v4255_v61, %v9707_v8 }
 0x25a   : > { %17333 = vst [vmem:[#allocation92_spill] sm:$0xff] %v13973_v22  ;;  %v8964_v62 = vpack.i.bf16 %v13973_v22, %v13552_v50  ;;  %v13995_v4 = vcombine.high %v13976_v52, %v13976_v52  ;;  %v13998_v35 = vrot.slane %v4272_v29, %v9707_v8  ;;  %v14002_v50 = vcombine.high %v13979_v43, %v13979_v43  ;;  %v14091_v22 = vld [vmem:[%s9700_s30 + $0x188] sm:$0xff] }
 0x25b   : > { %v4289_v49 = vcombine.high %v3450_v2, %v3450_v2  ;;  %v14007_v58 = vcombine.high %v13984_v40, %v13984_v40  ;;  %v14011_v60 = vcombine.high %v13991_v3, %v13991_v3  ;;  %v14014_v37 = vrot.slane %v3450_v2, %v9707_v8 }
 0x25c   : > { %8965 = vrot.lane.b32.xlu0 %v8964_v62, %s9636_s10  ;;  %v14019_v12 = vcombine.high %v13998_v35, %v13998_v35  ;;  %v5505_v59 = vrot.slane %v13970_v56, %v9717_v17  ;;  %v14035_v16 = vrot.slane %v13988_v21, %v9717_v17  ;;  %v14044_v29 = vrot.slane %v13984_v40, %v9717_v17 }
 0x25d   : > { %v14022_v61 = vrot.slane %v4289_v49, %v9707_v8  ;;  %v14028_v55 = vcombine.high %v14014_v37, %v14014_v37  ;;  %v14048_v2 = vrot.slane %v14007_v58, %v9717_v17  ;;  %v14053_v9 = vrot.slane %v13976_v52, %v9717_v17 }
 0x25e   : > { %17334 = vst [vmem:[#allocation99_spill] sm:$0xff] %v14044_v29  ;;  %v14057_v25 = vrot.slane %v13995_v4, %v9717_v17  ;;  %v14061_v62 = vrot.slane %v13991_v3, %v9717_v17  ;;  %v14066_v11 = vrot.slane %v14011_v60, %v9717_v17  ;;  %v5537_v45 = vrot.slane %v13979_v43, %v9717_v17 }
 0x25f   : > { %v14039_v49 = vcombine.high %v14022_v61, %v14022_v61  ;;  %17335 = vst [vmem:[#allocation97_spill] sm:$0xff] %v14048_v2  ;;  %17336 = vst [vmem:[#allocation2_spill] sm:$0xff] %v14053_v9  ;;  %v14072_v57 = vrot.slane %v14002_v50, %v9717_v17  ;;  %v14076_v32 = vrot.slane %v13998_v35, %v9717_v17 }
 0x260   : > { %17337 = vst [vmem:[#allocation93_spill] sm:$0xff] %v14057_v25  ;;  %17338 = vst [vmem:[#allocation5_spill] sm:$0xff] %v14061_v62  ;;  %v14080_v36 = vrot.slane %v14019_v12, %v9717_v17  ;;  %v14084_v15 = vrot.slane %v14014_v37, %v9717_v17  ;;  %v14088_v46 = vrot.slane %v14028_v55, %v9717_v17 }
 0x261   : > { %17339 = vst [vmem:[#allocation3_spill] sm:$0xff] %v14066_v11  ;;  %17340 = vst [vmem:[#allocation37_spill] sm:$0xff] %v14072_v57  ;;  %v14095_v14 = vrot.slane %v14022_v61, %v9717_v17  ;;  %v14099_v28 = vrot.slane %v14039_v49, %v9717_v17  ;;  %v5608_v33 = vsel %vm1842_vm1, %v14035_v16, %v5505_v59 }
 0x262   : > { %17341 = vst [vmem:[#allocation80_spill] sm:$0xff] %v14076_v32  ;;  %17342 = vst [vmem:[#allocation6_spill] sm:$0xff] %v14080_v36  ;;  %v5615_v7 = vsel %vm1842_vm1, %v14072_v57, %v5537_v45  ;;  %v5609_v53 = vsel %vm825_vm2, %v14044_v29, %v5608_v33  ;;  %v16719_v45 = vrot.slane %v14091_v22, 7  ;;  %v3526_v27 = vsel %vm379_vm0, %v17347_v47, %v3430_v6 }
 0x263   : > { %17343 = vst [vmem:[#allocation27_spill] sm:$0xff] %v14084_v15  ;;  %17344 = vst [vmem:[#allocation88_spill] sm:$0xff] %v14088_v46  ;;  %v5616_v63 = vsel %vm825_vm2, %v14076_v32, %v5615_v7  ;;  %v5610_v5 = vsel %vm1845_vm3, %v14048_v2, %v5609_v53  ;;  %v4170_v0 = vcombine.high %v3526_v27, %v3526_v27  ;;  %v3498_v32 = vrot.slane %v13907_v48, 5 }
 0x264   : > { %17345 = vst [vmem:[#allocation42_spill] sm:$0xff] %v14095_v14  ;;  %17346 = vst [vmem:[#allocation46_spill] sm:$0xff] %v14099_v28  ;;  %v5617_v59 = vsel %vm1845_vm3, %v14080_v36, %v5616_v63  ;;  %v5611_v33 = vsel %vm827_vm4, %v14053_v9, %v5610_v5  ;;  %v3432_v38 = vsel %vm379_vm0, %v3430_v6, %v16719_v45  ;;  %v17348_v5 = vrot.slane %v13942_v18, 1 }
 0x265   : > { %v5618_v7 = vsel %vm827_vm4, %v14084_v15, %v5617_v59  ;;  %v5612_v53 = vsel %vm1848_vm5, %v14057_v25, %v5611_v33  ;;  %v3438_v33 = vsel %vm379_vm0, %v3436_v26, %v17349_v30  ;;  %v14150_v18 = vrot.slane %v3526_v27, %v9707_v8 }
 0x266   : > { %v5619_v63 = vsel %vm1848_vm5, %v14088_v46, %v5618_v7  ;;  %v3528_v59 = vsel %vm379_vm0, %v17348_v5, %v3436_v26  ;;  %v5613_v19 = vsel %vm829_vm6, %v14061_v62, %v5612_v53  ;;  %v4187_v5 = vcombine.high %v3432_v38, %v3432_v38  ;;  %v14158_v26 = vpop.permute.xlu1 %8730 }
 0x267   : > { %v5620_v47 = vsel %vm829_vm6, %v14095_v14, %v5619_v63  ;;  %v5614_v7 = vsel %vm1851_vm7, %v14066_v11, %v5613_v19  ;;  %v14153_v53 = vrot.slane %v4170_v0, %v9707_v8  ;;  %v14156_v63 = vrot.slane %v3432_v38, %v9707_v8  ;;  %17350 = vst [vmem:[#allocation57_spill] sm:$0xff] %v14158_v26 }
 0x268   : > { %v5621_v6 = vsel %vm1851_vm7, %v14099_v28, %v5620_v47  ;;  %v4204_v10 = vcombine.high %v3528_v59, %v3528_v59  ;;  %v14162_v19 = vcombine.high %v14150_v18, %v14150_v18  ;;  %v14165_v47 = vrot.slane %v4187_v5, %v9707_v8  ;;  %v14185_v5 = vpop.permute.xlu0 %8725 }
 0x269   : > { %v8979_v45 = vpack.i.bf16 %v5621_v6, %v5614_v7  ;;  %v14168_v27 = vrot.slane %v3528_v59, %v9707_v8  ;;  %v4221_v30 = vcombine.high %v3438_v33, %v3438_v33  ;;  %v14173_v0 = vcombine.high %v14153_v53, %v14153_v53  ;;  %17351 = vst [vmem:[#allocation55_spill] sm:$0xff] %v14185_v5 }
 0x26a   : > { %v14177_v38 = vcombine.high %v14156_v63, %v14156_v63  ;;  %v14180_v7 = vrot.slane %v4204_v10, %v9707_v8  ;;  %v14183_v6 = vrot.slane %v3438_v33, %v9707_v8  ;;  %v14189_v59 = vcombine.high %v14165_v47, %v14165_v47  ;;  %v14230_v44 = vpop.permute.xlu1 %8740 }
 0x26b   : > { %8980 = vrot.lane.b32.xlu1 %v8979_v45, %s9634_s8  ;;  %v14193_v45 = vcombine.high %v14168_v27, %v14168_v27  ;;  %v14196_v26 = vrot.slane %v4221_v30, %v9707_v8  ;;  %v5441_v54 = vrot.slane %v14150_v18, %v9717_v17  ;;  %v14218_v42 = vrot.slane %v14162_v19, %v9717_v17 }
 0x26c   : > { %v14201_v10 = vcombine.high %v14180_v7, %v14180_v7  ;;  %v14205_v33 = vcombine.high %v14183_v6, %v14183_v6  ;;  %v14224_v5 = vrot.slane %v14153_v53, %v9717_v17  ;;  %v14228_v20 = vrot.slane %v14173_v0, %v9717_v17  ;;  %17354 = vst [vmem:[#allocation47_spill] sm:$0xff] %v14230_v44  ;;  %v14259_v28 = vpop.permute.xlu0 %8735 }
 0x26d   : > { %v14212_v41 = vcombine.high %v14196_v26, %v14196_v26  ;;  %17352 = vst [vmem:[#allocation49_spill] sm:$0xff] %v14218_v42  ;;  %v14235_v30 = vrot.slane %v14156_v63, %v9717_v17  ;;  %v14239_v23 = vrot.slane %v14177_v38, %v9717_v17  ;;  %v14243_v51 = vrot.slane %v14165_v47, %v9717_v17 }
 0x26e   : > { %17353 = vst [vmem:[#allocation45_spill] sm:$0xff] %v14228_v20  ;;  %v14247_v34 = vrot.slane %v14189_v59, %v9717_v17  ;;  %v5473_v44 = vrot.slane %v14168_v27, %v9717_v17  ;;  %v14253_v31 = vrot.slane %v14193_v45, %v9717_v17  ;;  %v14257_v13 = vrot.slane %v14180_v7, %v9717_v17 }
 0x26f   : > { %17357 = vst [vmem:[#allocation43_spill] sm:$0xff] %v14259_v28  ;;  %v14263_v11 = vrot.slane %v14201_v10, %v9717_v17  ;;  %v14267_v14 = vrot.slane %v14183_v6, %v9717_v17  ;;  %v14271_v62 = vrot.slane %v14205_v33, %v9717_v17  ;;  %v14275_v46 = vrot.slane %v14196_v26, %v9717_v17 }
 0x270   : > { %17355 = vst [vmem:[#allocation56_spill] sm:$0xff] %v14253_v31  ;;  %17356 = vst [vmem:[#allocation58_spill] sm:$0xff] %v14257_v13  ;;  %v14279_v25 = vrot.slane %v14212_v41, %v9717_v17  ;;  %v5594_v28 = vsel %vm1842_vm1, %v14218_v42, %v5441_v54  ;;  %v5601_v15 = vsel %vm1842_vm1, %v14253_v31, %v5473_v44  ;;  %v3500_v57 = vrot.slane %v13921_v24, 5  ;;  %v14299_v42 = vpop.permute.xlu1 %8745 }
 0x271   : > { %v5595_v36 = vsel %vm825_vm2, %v14224_v5, %v5594_v28  ;;  %v5602_v2 = vsel %vm825_vm2, %v14257_v13, %v5601_v15  ;;  %v8540_v44 = vrot.slane %v13970_v56, 9  ;;  %v17359_v9 = vrot.slane %v13988_v21, 7  ;;  %17360 = vst [vmem:[#allocation48_spill] sm:$0xff] %v14299_v42 }
 0x272   : > { %17358 = vst [vmem:[#allocation50_spill] sm:$0xff] %v14279_v25  ;;  %v5596_v29 = vsel %vm1845_vm3, %v14228_v20, %v5595_v36  ;;  %v5603_v54 = vsel %vm1845_vm3, %v14263_v11, %v5602_v2  ;;  %v17361_v13 = vrot.slane %v13907_v48, 7  ;;  %v17362_v20 = vrot.slane %v13921_v24, 7 }
 0x273   : > { %v4524_v31 = vrot.slane %v17359_v9, 2  ;;  %v5597_v15 = vsel %vm827_vm4, %v14235_v30, %v5596_v29  ;;  %v5604_v28 = vsel %vm827_vm4, %v14267_v14, %v5603_v54  ;;  %v14321_v54 = vpop.permute.xlu0 %8755  ;;  %v4525_v24 = vrot.slane %v13984_v40, 7 }
 0x274   : > { %v3546_v36 = vsel %vm379_vm0, %v17361_v13, %v3498_v32  ;;  %v3548_v2 = vsel %vm379_vm0, %v17362_v20, %v3500_v57  ;;  %v5598_v56 = vsel %vm1848_vm5, %v14239_v23, %v5597_v15  ;;  %v5605_v9 = vsel %vm1848_vm5, %v14271_v62, %v5604_v28  ;;  %17363 = vst [vmem:[#allocation59_spill] sm:$0xff] %v14321_v54 }
 0x275   : > { %v14316_v42 = vrot.slane %v3546_v36, %v9707_v8  ;;  %v14319_v29 = vrot.slane %v3548_v2, %v9707_v8  ;;  %v5599_v13 = vsel %vm829_vm6, %v14243_v51, %v5598_v56  ;;  %v5606_v57 = vsel %vm829_vm6, %v14275_v46, %v5605_v9 }
 0x276   : > { %v17364_v20 = vrot.slane %v13988_v21, 7  ;;  %v5600_v32 = vsel %vm1851_vm7, %v14247_v34, %v5599_v13  ;;  %v5607_v15 = vsel %vm1851_vm7, %v14279_v25, %v5606_v57  ;;  %v17365_v28 = vrot.slane %v14007_v58, 7 }
 0x277   : > { %v4531_v2 = vrot.slane %v13976_v52, 7  ;;  %v8974_v56 = vpack.i.bf16 %v5607_v15, %v5600_v32  ;;  %v4526_v21 = vsel %vm10635_vm10, %v4524_v31, %v4525_v24  ;;  %v4527_v9 = vrot.slane %v4525_v24, 2 }
 0x278   : > { %v14331_v48 = vsel %vm10635_vm10, %v8540_v44, %v17364_v20  ;;  %v4530_v36 = vrot.slane %v17365_v28, 2  ;;  %v17366_v44 = vrot.slane %v13995_v4, 7  ;;  %v4537_v54 = vrot.slane %v13991_v3, 7  ;;  %v14350_v28 = vpop.permute.xlu1 %8750 }
 0x279   : > { %v4533_v13 = vrot.slane %v4531_v2, 2  ;;  %v17367_v57 = vrot.slane %v14011_v60, 7  ;;  %8975 = vrot.lane.b32.xlu0 %v8974_v56, %s9634_s8  ;;  %v17368_v52 = vrot.slane %v14007_v58, 7  ;;  %v4543_v24 = vrot.slane %v14316_v42, 7 }
 0x27a   : > { %v4536_v20 = vrot.slane %v17366_v44, 2  ;;  %v4532_v40 = vsel %vm10635_vm10, %v4530_v36, %v4531_v2  ;;  %v8541_v32 = vrot.slane %v13979_v43, 9  ;;  %v17369_v15 = vrot.slane %v14002_v50, 7 }
 0x27b   : > { %v4542_v25 = vrot.slane %v17367_v57, 2  ;;  %v4529_v31 = vsel %vm10635_vm10, %v4527_v9, %v17368_v52  ;;  %v17370_v3 = vmov %v17366_v44  ;;  %v4539_v44 = vrot.slane %v4537_v54, 2  ;;  %v14368_v57 = vpop.permute.xlu0 %8765 }
 0x27c   : > { %v4549_v36 = vrot.slane %v17369_v15, 2  ;;  %v4535_v2 = vsel %vm10635_vm10, %v4533_v13, %v17370_v3  ;;  %v4538_v56 = vsel %vm10635_vm10, %v4536_v20, %v4537_v54  ;;  %v4550_v58 = vrot.slane %v13998_v35, 7 }
 0x27d   : > { %v4544_v9 = vsel %vm10635_vm10, %v4542_v25, %v4543_v24  ;;  %v17371_v43 = vmov %v17369_v15  ;;  %v17372_v4 = vrot.slane %v14019_v12, 7  ;;  %v4556_v13 = vrot.slane %v14014_v37, 7 }
 0x27e   : > { %v4548_v52 = vsel %vm10635_vm10, %v8541_v32, %v17371_v43  ;;  %v17373_v20 = vrot.slane %v14011_v60, 7  ;;  %v4551_v54 = vsel %vm10635_vm10, %v4549_v36, %v4550_v58  ;;  %v4552_v3 = vrot.slane %v4550_v58, 2 }
 0x27f   : > { %v4555_v15 = vrot.slane %v17372_v4, 2  ;;  %v17374_v25 = vrot.slane %v14028_v55, 7  ;;  %v4558_v32 = vrot.slane %v4556_v13, 2  ;;  %v4562_v43 = vrot.slane %v14022_v61, 7 }
 0x280   : > { %v4541_v35 = vsel %vm10635_vm10, %v4539_v44, %v17373_v20  ;;  %v17375_v37 = vrot.slane %v14039_v49, 7  ;;  %v17376_v60 = vrot.slane %v14019_v12, 7  ;;  %v4568_v36 = vrot.slane %v14319_v29, 7 }
 0x281   : > { %v4561_v50 = vrot.slane %v17374_v25, 2  ;;  %v4557_v24 = vsel %vm10635_vm10, %v4555_v15, %v4556_v13  ;;  %v5841_v58 = vrot.slane %v14331_v48, %v9717_v17  ;;  %v5845_v20 = vrot.slane %v4526_v21, %v9717_v17  ;;  %v14400_v25 = vpop.permute.xlu1 %8760 }
 0x282   : > { %v4567_v4 = vrot.slane %v17375_v37, 2  ;;  %v4554_v44 = vsel %vm10635_vm10, %v4552_v3, %v17376_v60  ;;  %17377 = vst [vmem:[#allocation51_spill] sm:$0xff] %v14400_v25  ;;  %v17378_v15 = vrot.slane %v14028_v55, 7  ;;  %v4564_v13 = vrot.slane %v4562_v43, 2  ;;  %v14414_v25 = vpop.permute.xlu0 %8770 }
 0x283   : > { %v4563_v12 = vsel %vm10635_vm10, %v4561_v50, %v4562_v43  ;;  %v5849_v3 = vrot.slane %v4529_v31, %v9717_v17  ;;  %v5853_v48 = vrot.slane %v4532_v40, %v9717_v17  ;;  %v5857_v21 = vrot.slane %v4535_v2, %v9717_v17 }
 0x284   : > { %v4560_v61 = vsel %vm10635_vm10, %v4558_v32, %v17378_v15  ;;  %v4569_v37 = vsel %vm10635_vm10, %v4567_v4, %v4568_v36  ;;  %v5861_v60 = vrot.slane %v4538_v56, %v9717_v17  ;;  %v17379_v55 = vrot.slane %v14039_v49, 7 }
 0x285   : > { %v5865_v50 = vrot.slane %v4541_v35, %v9717_v17  ;;  %v5869_v31 = vrot.slane %v4544_v9, %v9717_v17  ;;  %v5873_v43 = vrot.slane %v4548_v52, %v9717_v17  ;;  %v5877_v4 = vrot.slane %v4551_v54, %v9717_v17 }
 0x286   : > { %v4566_v32 = vsel %vm10635_vm10, %v4564_v13, %v17379_v55  ;;  %v5881_v40 = vrot.slane %v4554_v44, %v9717_v17  ;;  %v5885_v2 = vrot.slane %v4557_v24, %v9717_v17  ;;  %v5889_v56 = vrot.slane %v4560_v61, %v9717_v17  ;;  %v14435_v13 = vpop.permute.xlu1 %8785 }
 0x287   : > { %v5893_v36 = vrot.slane %v4563_v12, %v9717_v17  ;;  %v5897_v49 = vrot.slane %v4566_v32, %v9717_v17  ;;  %v5901_v15 = vrot.slane %v4569_v37, %v9717_v17  ;;  %v5944_v35 = vsel %vm1842_vm1, %v5845_v20, %v5841_v58 }
 0x288   : > { %v5945_v9 = vsel %vm825_vm2, %v5849_v3, %v5944_v35  ;;  %v5951_v52 = vsel %vm1842_vm1, %v5877_v4, %v5873_v43  ;;  %v3494_v54 = vrot.slane %v14091_v22, 5  ;;  %v3496_v44 = vrot.slane %v14106_v39, 5 }
 0x289   : > { %v5946_v24 = vsel %vm1845_vm3, %v5853_v48, %v5945_v9  ;;  %v5952_v61 = vsel %vm825_vm2, %v5881_v40, %v5951_v52  ;;  %v8538_v12 = vrot.slane %v14150_v18, 9  ;;  %v17380_v37 = vrot.slane %v14162_v19, 7  ;;  %v14450_v48 = vpop.permute.xlu0 %8775 }
 0x28a   : > { %v5947_v58 = vsel %vm827_vm4, %v5857_v21, %v5946_v24  ;;  %v5953_v20 = vsel %vm1845_vm3, %v5885_v2, %v5952_v61  ;;  %v17381_v3 = vrot.slane %v14091_v22, 7  ;;  %v17382_v43 = vrot.slane %v14106_v39, 7 }
 0x28b   : > { %v4474_v55 = vrot.slane %v17380_v37, 2  ;;  %v5948_v40 = vsel %vm1848_vm5, %v5861_v60, %v5947_v58  ;;  %v5954_v18 = vsel %vm827_vm4, %v5889_v56, %v5953_v20  ;;  %v17383_v39 = vmov %v17380_v37  ;;  %v14479_v37 = vpop.permute.xlu1 %8800 }
 0x28c   : > { %v3542_v32 = vsel %vm379_vm0, %v17381_v3, %v3494_v54  ;;  %v3544_v4 = vsel %vm379_vm0, %v17382_v43, %v3496_v44  ;;  %v5949_v22 = vsel %vm829_vm6, %v5865_v50, %v5948_v40  ;;  %v5955_v2 = vsel %vm1848_vm5, %v5893_v36, %v5954_v18 }
 0x28d   : > { %v14455_v35 = vrot.slane %v3542_v32, %v9707_v8  ;;  %v14458_v21 = vrot.slane %v3544_v4, %v9707_v8  ;;  %v14466_v9 = vsel %vm10635_vm10, %v8538_v12, %v17383_v39  ;;  %v4475_v60 = vrot.slane %v14153_v53, 7  ;;  %v14494_v43 = vpop.permute.xlu0 %8780 }
 0x28e   : > { %v5950_v56 = vsel %vm1851_vm7, %v5869_v31, %v5949_v22  ;;  %v5956_v52 = vsel %vm829_vm6, %v5897_v49, %v5955_v2  ;;  %v17384_v54 = vrot.slane %v14173_v0, 7  ;;  %v4481_v24 = vrot.slane %v14156_v63, 7 }
 0x28f   : > { %v5957_v50 = vsel %vm1851_vm7, %v5901_v15, %v5956_v52  ;;  %v4476_v19 = vsel %vm10635_vm10, %v4474_v55, %v4475_v60  ;;  %v4477_v36 = vrot.slane %v4475_v60, 2  ;;  %v17385_v61 = vrot.slane %v14177_v38, 7 }
 0x290   : > { %v4480_v44 = vrot.slane %v17384_v54, 2  ;;  %v8989_v53 = vpack.i.bf16 %v5957_v50, %v5950_v56  ;;  %v4483_v49 = vrot.slane %v4481_v24, 2  ;;  %v4487_v58 = vrot.slane %v14165_v47, 7 }
 0x291   : > { %v4486_v12 = vrot.slane %v17385_v61, 2  ;;  %v17386_v63 = vmov %v17384_v54  ;;  %v17387_v55 = vrot.slane %v14189_v59, 7  ;;  %v4493_v3 = vrot.slane %v14455_v35, 7  ;;  %v14529_v59 = vpop.permute.xlu1 %8805 }
 0x292   : > { %v14483_v31 = vsel %vm10635_vm10, %v4480_v44, %v4481_v24  ;;  %v4479_v15 = vsel %vm10635_vm10, %v4477_v36, %v17386_v63  ;;  %v8539_v32 = vrot.slane %v14168_v27, 9  ;;  %8990 = vrot.lane.b32.xlu1 %v8989_v53, %s9640_s14  ;;  %v17388_v4 = vmov %v17385_v61 }
 0x293   : > { %v4492_v20 = vrot.slane %v17387_v55, 2  ;;  %v4485_v47 = vsel %vm10635_vm10, %v4483_v49, %v17388_v4  ;;  %v4488_v0 = vsel %vm10635_vm10, %v4486_v12, %v4487_v58  ;;  %v4489_v40 = vrot.slane %v4487_v58, 2  ;;  %v14544_v4 = vpop.permute.xlu0 %8790 }
 0x294   : > { %v17389_v18 = vrot.slane %v14193_v45, 7  ;;  %v4500_v38 = vrot.slane %v14180_v7, 7  ;;  %v17391_v60 = vrot.slane %v14201_v10, 7  ;;  %v17392_v52 = vmov %v17387_v55 }
 0x295   : > { %v14507_v2 = vsel %vm10635_vm10, %v4492_v20, %v4493_v3  ;;  %v4491_v54 = vsel %vm10635_vm10, %v4489_v40, %v17392_v52  ;;  %v4506_v44 = vrot.slane %v14183_v6, 7  ;;  %v17393_v24 = vrot.slane %v14205_v33, 7 }
 0x296   : > { %v4499_v22 = vrot.slane %v17389_v18, 2  ;;  %v17390_v27 = vmov %v17389_v18  ;;  %v4505_v56 = vrot.slane %v17391_v60, 2  ;;  %v4512_v45 = vrot.slane %v14196_v26, 7 }
 0x297   : > { %v4498_v39 = vsel %vm10635_vm10, %v8539_v32, %v17390_v27  ;;  %v4511_v50 = vrot.slane %v17393_v24, 2  ;;  %v4502_v61 = vrot.slane %v4500_v38, 2  ;;  %v17394_v7 = vrot.slane %v14212_v41, 7 }
 0x298   : > { %v4501_v36 = vsel %vm10635_vm10, %v4499_v22, %v4500_v38  ;;  %v4518_v53 = vrot.slane %v14458_v21, 7  ;;  %v4507_v49 = vsel %vm10635_vm10, %v4505_v56, %v4506_v44  ;;  %v4508_v6 = vrot.slane %v4506_v44, 2 }
 0x299   : > { %v4517_v12 = vrot.slane %v17394_v7, 2  ;;  %v4513_v58 = vsel %vm10635_vm10, %v4511_v50, %v4512_v45  ;;  %v4514_v63 = vrot.slane %v4512_v45, 2  ;;  %v17395_v26 = vmov %v17391_v60 }
 0x29a   : > { %v4504_v55 = vsel %vm10635_vm10, %v4502_v61, %v17395_v26  ;;  %v5777_v3 = vrot.slane %v14466_v9, %v9717_v17  ;;  %v5781_v32 = vrot.slane %v4476_v19, %v9717_v17  ;;  %v17396_v40 = vmov %v17393_v24  ;;  %v17398_v61 = vld [vmem:[#allocation99_spill] sm:$0xff]  ;;  %v17402_v26 = vld [vmem:[#allocation6_spill] sm:$0xff] }
 0x29b   : > { %v4519_v20 = vsel %vm10635_vm10, %v4517_v12, %v4518_v53  ;;  %v4510_v18 = vsel %vm10635_vm10, %v4508_v6, %v17396_v40  ;;  %v17397_v10 = vmov %v17394_v7  ;;  %v5785_v27 = vrot.slane %v4479_v15, %v9717_v17  ;;  %v17399_v12 = vld [vmem:[#allocation37_spill] sm:$0xff]  ;;  %v17400_v53 = vld [vmem:[#allocation80_spill] sm:$0xff]  ;;  %v14586_v6 = vpop.permute.xlu0 %8795  ;;  %v17404_v40 = vld [vmem:[#allocation27_spill] sm:$0xff] }
 0x29c   : > { %v4516_v22 = vsel %vm10635_vm10, %v4514_v63, %v17397_v10  ;;  %v5789_v38 = vrot.slane %v14483_v31, %v9717_v17  ;;  %v5793_v9 = vrot.slane %v4485_v47, %v9717_v17  ;;  %v5797_v19 = vrot.slane %v4488_v0, %v9717_v17  ;;  %v17401_v63 = vld [vmem:[#allocation97_spill] sm:$0xff] }
 0x29d   : > { %v5801_v60 = vrot.slane %v4491_v54, %v9717_v17  ;;  %v5805_v33 = vrot.slane %v14507_v2, %v9717_v17  ;;  %v5809_v56 = vrot.slane %v4498_v39, %v9717_v17  ;;  %v5813_v41 = vrot.slane %v4501_v36, %v9717_v17  ;;  %v14570_v54 = vpop.permute.xlu1 %8810 }
 0x29e   : > { %v5817_v52 = vrot.slane %v4504_v55, %v9717_v17  ;;  %v5821_v15 = vrot.slane %v4507_v49, %v9717_v17  ;;  %v5825_v44 = vrot.slane %v4510_v18, %v9717_v17  ;;  %v5829_v31 = vrot.slane %v4513_v58, %v9717_v17 }
 0x29f   : > { %v5833_v47 = vrot.slane %v4516_v22, %v9717_v17  ;;  %v5837_v0 = vrot.slane %v4519_v20, %v9717_v17  ;;  %v5930_v2 = vsel %vm1842_vm1, %v5781_v32, %v5777_v3  ;;  %v5937_v39 = vsel %vm1842_vm1, %v5813_v41, %v5809_v56  ;;  %v17403_v3 = vld [vmem:[#allocation2_spill] sm:$0xff]  ;;  %v17406_v56 = vld [vmem:[#allocation88_spill] sm:$0xff] }
 0x2a0   : > { %v6009_v24 = vrot.slane %v14316_v42, %v9717_v17  ;;  %v6013_v50 = vrot.slane %v14319_v29, %v9717_v17  ;;  %v5931_v45 = vsel %vm825_vm2, %v5785_v27, %v5930_v2  ;;  %v5938_v36 = vsel %vm825_vm2, %v5817_v52, %v5937_v39  ;;  %v17405_v27 = vld [vmem:[#allocation93_spill] sm:$0xff]  ;;  %v17408_v2 = vld [vmem:[#allocation42_spill] sm:$0xff] }
 0x2a1   : > { %v6056_v7 = vsel %vm1842_vm1, %v17398_v61, %v14035_v16  ;;  %v6063_v49 = vsel %vm1842_vm1, %v17400_v53, %v17399_v12  ;;  %v5932_v58 = vsel %vm1845_vm3, %v5789_v38, %v5931_v45  ;;  %v5939_v42 = vsel %vm1845_vm3, %v5821_v15, %v5938_v36  ;;  %v17407_v15 = vld [vmem:[#allocation5_spill] sm:$0xff]  ;;  %v17409_v36 = vld [vmem:[#allocation3_spill] sm:$0xff]  ;;  %v8525_v12 = vld [vmem:[%s9700_s30 + $0x1f0] sm:$0xff] }
 0x2a2   : > { %v6057_v29 = vsel %vm825_vm2, %v17401_v63, %v6056_v7  ;;  %v6064_v55 = vsel %vm825_vm2, %v17402_v26, %v6063_v49  ;;  %v5933_v20 = vsel %vm827_vm4, %v5793_v9, %v5932_v58  ;;  %v5940_v16 = vsel %vm827_vm4, %v5825_v44, %v5939_v42  ;;  %v17410_v7 = vld [vmem:[#allocation46_spill] sm:$0xff]  ;;  %v14624_v58 = vld [vmem:[%s9700_s30 + $0x1f8] sm:$0xff]  ;;  %v14626_v42 = vpop.permute.xlu0 %8815  ;;  %v17412_v26 = vld [vmem:[#allocation56_spill] sm:$0xff] }
 0x2a3   : > { %v6058_v32 = vsel %vm1845_vm3, %v17403_v3, %v6057_v29  ;;  %v6065_v18 = vsel %vm1845_vm3, %v17404_v40, %v6064_v55  ;;  %v5934_v10 = vsel %vm1848_vm5, %v5797_v19, %v5933_v20  ;;  %v5941_v22 = vsel %vm1848_vm5, %v5829_v31, %v5940_v16  ;;  %v14612_v19 = vpop.permute.xlu1 %8820  ;;  %v17413_v55 = vld [vmem:[#allocation58_spill] sm:$0xff] }
 0x2a4   : > { %v6059_v38 = vsel %vm827_vm4, %v17405_v27, %v6058_v32  ;;  %v6066_v9 = vsel %vm827_vm4, %v17406_v56, %v6065_v18  ;;  %v5935_v41 = vsel %vm829_vm6, %v5801_v60, %v5934_v10  ;;  %v5942_v52 = vsel %vm829_vm6, %v5833_v47, %v5941_v22  ;;  %v17415_v27 = vld [vmem:[#allocation11_spill] sm:$0xff] }
 0x2a5   : > { %v6060_v44 = vsel %vm1848_vm5, %v17407_v15, %v6059_v38  ;;  %v6067_v39 = vsel %vm1848_vm5, %v17408_v2, %v6066_v9  ;;  %v5936_v31 = vsel %vm1851_vm7, %v5805_v33, %v5935_v41  ;;  %v5943_v45 = vsel %vm1851_vm7, %v5837_v0, %v5942_v52  ;;  %v17411_v0 = vld [vmem:[#allocation49_spill] sm:$0xff]  ;;  %v17416_v9 = vld [vmem:[#allocation50_spill] sm:$0xff] }
 0x2a6   : > { %v6061_v61 = vsel %vm829_vm6, %v17409_v36, %v6060_v44  ;;  %v6068_v60 = vsel %vm829_vm6, %v17410_v7, %v6067_v39  ;;  %v8984_v47 = vpack.i.bf16 %v5943_v45, %v5936_v31  ;;  %v6001_v33 = vrot.slane %v14455_v35, %v9717_v17  ;;  %v14672_v44 = vpop.permute.xlu0 %8825  ;;  %v17417_v36 = vld [vmem:[#allocation79_spill] sm:$0xff] }
 0x2a7   : > { %v6062_v53 = vsel %vm1851_vm7, %v6009_v24, %v6061_v61  ;;  %v6069_v49 = vsel %vm1851_vm7, %v6013_v50, %v6068_v60  ;;  %v6042_v29 = vsel %vm1842_vm1, %v14224_v5, %v17411_v0  ;;  %v6049_v20 = vsel %vm1842_vm1, %v17413_v55, %v17412_v26  ;;  %v17414_v24 = vld [vmem:[#allocation45_spill] sm:$0xff] }
 0x2a8   : > { %v8999_v63 = vpack.i.bf16 %v6069_v49, %v6062_v53  ;;  %8985 = vrot.lane.b32.xlu0 %v8984_v47, %s9640_s14  ;;  %v6043_v50 = vsel %vm825_vm2, %v17414_v24, %v6042_v29  ;;  %v6050_v16 = vsel %vm825_vm2, %v14263_v11, %v6049_v20  ;;  %v3373_v3 = vrot.slane %v8525_v12, 1  ;;  %v17419_v53 = vld [vmem:[#allocation7_spill] sm:$0xff] }
 0x2a9   : > { %v3451_v32 = vrot.slane %v8525_v12, 7  ;;  %v6005_v35 = vrot.slane %v14458_v21, %v9717_v17  ;;  %v6044_v5 = vsel %vm1845_vm3, %v14235_v30, %v6043_v50  ;;  %v6051_v40 = vsel %vm1845_vm3, %v14267_v14, %v6050_v16  ;;  %v14656_v21 = vpop.permute.xlu1 %8830  ;;  %v17418_v12 = vld [vmem:[#allocation78_spill] sm:$0xff] }
 0x2aa   : > { %9000 = vrot.lane.b32.xlu1 %v8999_v63, %s9637_s11  ;;  %v3452_v18 = vrot.slane %v14624_v58, 7  ;;  %v6045_v10 = vsel %vm827_vm4, %v14239_v23, %v6044_v5  ;;  %v6052_v11 = vsel %vm827_vm4, %v14271_v62, %v6051_v40  ;;  %v4833_v38 = vrot.slane %v17415_v27, %v9717_v17  ;;  %v17421_v50 = vld [vmem:[#allocation26_spill] sm:$0xff] }
 0x2ab   : > { %v3533_v22 = vsel %vm379_vm0, %v3373_v3, %v3451_v32  ;;  %v6046_v30 = vsel %vm1848_vm5, %v14243_v51, %v6045_v10  ;;  %v6053_v14 = vsel %vm1848_vm5, %v14275_v46, %v6052_v11  ;;  %v4769_v49 = vrot.slane %v17419_v53, %v9717_v17  ;;  %v17422_v5 = vld [vmem:[#allocation30_spill] sm:$0xff]  ;;  %v14730_v11 = vpop.permute.xlu0 %8835  ;;  %v17429_v53 = vld [vmem:[#allocation25_spill] sm:$0xff] }
 0x2ac   : > { %v3453_v23 = vsel %vm379_vm0, %v3451_v32, %v3452_v18  ;;  %v4571_v56 = vcombine.high %v3533_v22, %v3533_v22  ;;  %v6047_v62 = vsel %vm829_vm6, %v14247_v34, %v6046_v30  ;;  %v6054_v41 = vsel %vm829_vm6, %v17416_v9, %v6053_v14 }
 0x2ad   : > { %v14670_v52 = vrot.slane %v3533_v22, %v9707_v8  ;;  %v4588_v15 = vcombine.high %v3453_v23, %v3453_v23  ;;  %v6048_v51 = vsel %vm1851_vm7, %v6001_v33, %v6047_v62  ;;  %v6055_v46 = vsel %vm1851_vm7, %v6005_v35, %v6054_v41  ;;  %v17420_v33 = vld [vmem:[#allocation17_spill] sm:$0xff]  ;;  %v14713_v55 = vpop.permute.xlu1 %8840  ;;  %v17424_v62 = vld [vmem:[#allocation19_spill] sm:$0xff]  ;;  %v17425_v41 = vld [vmem:[#allocation32_spill] sm:$0xff] }
 0x2ae   : > { %v14677_v2 = vrot.slane %v4571_v56, %v9707_v8  ;;  %v14680_v39 = vrot.slane %v3453_v23, %v9707_v8  ;;  %v8994_v34 = vpack.i.bf16 %v6055_v46, %v6048_v51  ;;  %v4904_v61 = vsel %vm1842_vm1, %v17417_v36, %v4833_v38  ;;  %v17423_v22 = vld [vmem:[#allocation81_spill] sm:$0xff]  ;;  %v17426_v51 = vld [vmem:[#allocation28_spill] sm:$0xff] }
 0x2af   : > { %v4586_v31 = vcombine.high %v14670_v52, %v14670_v52  ;;  %v14685_v45 = vrot.slane %v4588_v15, %v9707_v8  ;;  %v4905_v47 = vsel %vm825_vm2, %v17418_v12, %v4904_v61  ;;  %v6097_v29 = vrot.slane %v14670_v52, %v9717_v17  ;;  %v17428_v61 = vld [vmem:[#allocation57_spill] sm:$0xff] }
 0x2b0   : > { %v14691_v7 = vcombine.high %v14677_v2, %v14677_v2  ;;  %v14695_v60 = vcombine.high %v14680_v39, %v14680_v39  ;;  %8995 = vrot.lane.b32.xlu0 %v8994_v34, %s9637_s11  ;;  %v4906_v0 = vsel %vm1845_vm3, %v17420_v33, %v4905_v47  ;;  %v14720_v3 = vrot.slane %v14677_v2, %v9717_v17 }
 0x2b1   : > { %v14704_v63 = vcombine.high %v14685_v45, %v14685_v45  ;;  %v14711_v26 = vrot.slane %v4586_v31, %v9717_v17  ;;  %v4615_v20 = vrot.slane %v4586_v31, 7  ;;  %v4907_v16 = vsel %vm827_vm4, %v17421_v50, %v4906_v0  ;;  %v17427_v31 = vld [vmem:[#allocation84_spill] sm:$0xff]  ;;  %v17430_v0 = vld [vmem:[#allocation9_spill] sm:$0xff]  ;;  %v14772_v50 = vpop.permute.xlu1 %8850 }
 0x2b2   : > { %v4621_v24 = vrot.slane %v14691_v7, 7  ;;  %v4627_v32 = vrot.slane %v14695_v60, 7  ;;  %v4908_v40 = vsel %vm1848_vm5, %v17422_v5, %v4907_v16  ;;  %v14728_v10 = vrot.slane %v14691_v7, %v9717_v17  ;;  %v17431_v5 = vld [vmem:[#allocation36_spill] sm:$0xff] }
 0x2b3   : > { %v4633_v35 = vrot.slane %v14704_v63, 7  ;;  %v4909_v27 = vsel %vm829_vm6, %v17423_v22, %v4908_v40  ;;  %v14736_v38 = vrot.slane %v14680_v39, %v9717_v17  ;;  %v14740_v30 = vrot.slane %v14695_v60, %v9717_v17  ;;  %v17432_v22 = vld [vmem:[#allocation4_spill] sm:$0xff] }
 0x2b4   : > { %v14744_v14 = vrot.slane %v14685_v45, %v9717_v17  ;;  %v14748_v23 = vrot.slane %v14704_v63, %v9717_v17  ;;  %v6126_v56 = vsel %vm1842_vm1, %v14711_v26, %v6097_v29  ;;  %v4801_v9 = vrot.slane %v17424_v62, %v9717_v17 }
 0x2b5   : > { %v4890_v15 = vsel %vm1842_vm1, %v17425_v41, %v4769_v49  ;;  %v14758_v46 = vsel %vm1851_vm7, %v17426_v51, %v4909_v27  ;;  %v6127_v34 = vsel %vm825_vm2, %v14720_v3, %v6126_v56  ;;  %v8733_v12 = vunpack.i.h.bf16 %v17428_v61  ;;  %v17433_v56 = vld [vmem:[#allocation55_spill] sm:$0xff]  ;;  %v17435_v51 = vld [vmem:[#allocation13_spill] sm:$0xff] }
 0x2b6   : > { %v4891_v36 = vsel %vm825_vm2, %v17427_v31, %v4890_v15  ;;  %v6128_v47 = vsel %vm1845_vm3, %v14728_v10, %v6127_v34  ;;  %v4897_v49 = vsel %vm1842_vm1, %v17430_v0, %v4801_v9  ;;  %v8732_v29 = vunpack.i.l.bf16 %v17428_v61  ;;  %v17434_v15 = vld [vmem:[#allocation94_spill] sm:$0xff]  ;;  %v17437_v0 = vld [vmem:[#allocation23_spill] sm:$0xff] }
 0x2b7   : > { %v4892_v33 = vsel %vm1845_vm3, %v17429_v53, %v4891_v36  ;;  %v6129_v16 = vsel %vm827_vm4, %v14736_v38, %v6128_v47  ;;  %v4898_v27 = vsel %vm825_vm2, %v17432_v22, %v4897_v49  ;;  %v8728_v62 = vunpack.i.h.bf16 %v17433_v56  ;;  %v14788_v36 = vpop.permute.xlu0 %8845  ;;  %v17436_v53 = vld [vmem:[#allocation89_spill] sm:$0xff] }
 0x2b8   : > { %v4893_v40 = vsel %vm827_vm4, %v17431_v5, %v4892_v33  ;;  %v6130_v41 = vsel %vm1848_vm5, %v14740_v30, %v6129_v16  ;;  %v4899_v34 = vsel %vm1845_vm3, %v17435_v51, %v4898_v27  ;;  %v3501_v31 = vrot.slane %v14624_v58, 5  ;;  %v17439_v27 = vld [vmem:[#allocation16_spill] sm:$0xff]  ;;  %v17440_v51 = vld [vmem:[#allocation14_spill] sm:$0xff] }
 0x2b9   : > { %v4894_v9 = vsel %vm1848_vm5, %v17434_v15, %v4893_v40  ;;  %v6131_v47 = vsel %vm829_vm6, %v14744_v14, %v6130_v41  ;;  %v4900_v49 = vsel %vm827_vm4, %v17437_v0, %v4899_v34  ;;  %v8542_v16 = vrot.slane %v14670_v52, 9  ;;  %v17438_v40 = vld [vmem:[#allocation98_spill] sm:$0xff] }
 0x2ba   : > { %v4895_v33 = vsel %vm829_vm6, %v17436_v53, %v4894_v9  ;;  %v6132_v5 = vsel %vm1851_vm7, %v14748_v23, %v6131_v47  ;;  %v4901_v15 = vsel %vm1848_vm5, %v17439_v27, %v4900_v49  ;;  %v3549_v41 = vsel %vm379_vm0, %v3452_v18, %v3501_v31  ;;  %v17441_v53 = vld [vmem:[#allocation24_spill] sm:$0xff]  ;;  %v14823_v31 = vpop.permute.xlu1 %8860 }
 0x2bb   : > { %v14801_v22 = vsel %vm1851_vm7, %v17438_v40, %v4895_v33  ;;  %v9009_v9 = vpack.i.bf16 %v6132_v5, %v14758_v46  ;;  %v4902_v34 = vsel %vm829_vm6, %v17440_v51, %v4901_v15  ;;  %v14812_v52 = vrot.slane %v3549_v41, %v9707_v8  ;;  %v14837_v15 = vpop.permute.xlu0 %8855 }
 0x2bc   : > { %v4616_v47 = vsel %vm10635_vm10, %v8542_v16, %v4615_v20  ;;  %v14818_v33 = vsel %vm1851_vm7, %v17441_v53, %v4902_v34  ;;  %v4617_v0 = vrot.slane %v4615_v20, 2  ;;  %v4618_v58 = vrot.slane %v14677_v2, 7 }
 0x2bd   : > { %v4623_v18 = vrot.slane %v4621_v24, 2  ;;  %9010 = vrot.lane.b32.xlu1 %v9009_v9, %s9635_s9  ;;  %v9004_v8 = vpack.i.bf16 %v14818_v33, %v14801_v22  ;;  %v4624_v49 = vrot.slane %v14680_v39, 7  ;;  %v4629_v16 = vrot.slane %v4627_v32, 2 }
 0x2be   : > { %v4630_v5 = vrot.slane %v14685_v45, 7  ;;  %v4619_v2 = vsel %vm10635_vm10, %v4617_v0, %v4618_v58  ;;  %v4620_v20 = vrot.slane %v4618_v58, 2  ;;  %v4635_v40 = vrot.slane %v4633_v35, 2 }
 0x2bf   : > { %v4636_v27 = vrot.slane %v14812_v52, 7  ;;  %9005 = vrot.lane.b32.xlu0 %v9004_v8, %s9635_s9  ;;  %v4625_v39 = vsel %vm10635_vm10, %v4623_v18, %v4624_v49  ;;  %v4626_v41 = vrot.slane %v4624_v49, 2  ;;  %v6160_v53 = vrot.slane %v4616_v47, %v9717_v17 }
 0x2c0   : > { %v4631_v45 = vsel %vm10635_vm10, %v4629_v16, %v4630_v5  ;;  %v4632_v9 = vrot.slane %v4630_v5, 2  ;;  %v4622_v51 = vsel %vm10635_vm10, %v4620_v20, %v4621_v24  ;;  %v6164_v0 = vrot.slane %v4619_v2, %v9717_v17  ;;  %v14866_v16 = vpop.permute.xlu1 %8870  ;;  %v17444_v2 = vld [vmem:[#allocation47_spill] sm:$0xff] }
 0x2c1   : > { %v4637_v34 = vsel %vm10635_vm10, %v4635_v40, %v4636_v27  ;;  %v4628_v58 = vsel %vm10635_vm10, %v4626_v41, %v4627_v32  ;;  %v6168_v18 = vrot.slane %v4622_v51, %v9717_v17  ;;  %v6172_v24 = vrot.slane %v4625_v39, %v9717_v17  ;;  %v17445_v39 = vld [vmem:[#allocation43_spill] sm:$0xff] }
 0x2c2   : > { %v4634_v7 = vsel %vm10635_vm10, %v4632_v9, %v4633_v35  ;;  %v8727_v8 = vunpack.i.l.bf16 %v17433_v56  ;;  %v6176_v47 = vrot.slane %v4628_v58, %v9717_v17  ;;  %v6180_v49 = vrot.slane %v4631_v45, %v9717_v17  ;;  %v17443_v35 = vld [vmem:[#allocation20_spill] sm:$0xff]  ;;  %v14877_v9 = vpop.permute.xlu0 %8865  ;;  %v17447_v58 = vld [vmem:[#allocation95_spill] sm:$0xff] }
 0x2c3   : > { %v6184_v60 = vrot.slane %v4634_v7, %v9717_v17  ;;  %v6188_v32 = vrot.slane %v4637_v34, %v9717_v17  ;;  %v6189_v63 = vsel %vm1842_vm1, %v6164_v0, %v6160_v53  ;;  %v9014_v5 = vpack.i.bf16 %v17443_v35, %v17442_v1  ;;  %v17446_v0 = vld [vmem:[#allocation92_spill] sm:$0xff] }
 0x2c4   : > { %v8743_v20 = vunpack.i.h.bf16 %v17444_v2  ;;  %v6190_v40 = vsel %vm825_vm2, %v6168_v18, %v6189_v63  ;;  %v8742_v27 = vunpack.i.l.bf16 %v17444_v2  ;;  %v8738_v41 = vunpack.i.h.bf16 %v17445_v39  ;;  %v17448_v1 = vld [vmem:[#allocation48_spill] sm:$0xff] }
 0x2c5   : > { %v8737_v45 = vunpack.i.l.bf16 %v17445_v39  ;;  %v6191_v51 = vsel %vm1845_vm3, %v6172_v24, %v6190_v40  ;;  %9015 = vrot.lane.b32.xlu0 %v9014_v5, %s9641_s15  ;;  %v6223_v34 = vrot.slane %v14812_v52, %v9717_v17  ;;  %v6224_v53 = vsel %vm1842_vm1, %v14720_v3, %v14711_v26  ;;  %v17449_v52 = vld [vmem:[#allocation59_spill] sm:$0xff] }
 0x2c6   : > { %v9024_v7 = vpack.i.bf16 %v17447_v58, %v17446_v0  ;;  %v6192_v18 = vsel %vm827_vm4, %v6176_v47, %v6191_v51  ;;  %v6225_v63 = vsel %vm825_vm2, %v14728_v10, %v6224_v53  ;;  %v8748_v35 = vunpack.i.h.bf16 %v17448_v1  ;;  %v14903_v53 = vpop.permute.xlu1 %8880  ;;  %v17450_v58 = vld [vmem:[#allocation22_spill] sm:$0xff] }
 0x2c7   : > { %v8747_v24 = vunpack.i.l.bf16 %v17448_v1  ;;  %v6193_v5 = vsel %vm1848_vm5, %v6180_v49, %v6192_v18  ;;  %v6226_v17 = vsel %vm1845_vm3, %v14736_v38, %v6225_v63  ;;  %v8758_v40 = vunpack.i.h.bf16 %v17449_v52  ;;  %v17451_v63 = vld [vmem:[#allocation51_spill] sm:$0xff] }
 0x2c8   : > { %v8757_v26 = vunpack.i.l.bf16 %v17449_v52  ;;  %v6194_v3 = vsel %vm829_vm6, %v6184_v60, %v6193_v5  ;;  %v6227_v47 = vsel %vm827_vm4, %v14740_v30, %v6226_v17  ;;  %v8753_v10 = vunpack.i.h.bf16 %v14350_v28  ;;  %v14915_v5 = vpop.permute.xlu0 %8875  ;;  %v17452_v17 = vld [vmem:[#allocation96_spill] sm:$0xff] }
 0x2c9   : > { %v8752_v51 = vunpack.i.l.bf16 %v14350_v28  ;;  %v6195_v49 = vsel %vm1851_vm7, %v6188_v32, %v6194_v3  ;;  %v6228_v38 = vsel %vm1848_vm5, %v14744_v14, %v6227_v47  ;;  %9025 = vrot.lane.b32.xlu0 %v9024_v7, %s9638_s12  ;;  %v8768_v0 = vunpack.i.h.bf16 %v14368_v57 }
 0x2ca   : > { %v8767_v60 = vunpack.i.l.bf16 %v14368_v57  ;;  %v9019_v18 = vpack.i.bf16 %v6195_v49, %v17450_v58  ;;  %v6229_v30 = vsel %vm829_vm6, %v14748_v23, %v6228_v38  ;;  %v8763_v1 = vunpack.i.h.bf16 %v17451_v63  ;;  %v17453_v23 = vld [vmem:[#allocation101_spill] sm:$0xff]  ;;  %v17454_v38 = vld [vmem:[#allocation100_spill] sm:$0xff] }
 0x2cb   : > { %v6230_v32 = vsel %vm1851_vm7, %v6223_v34, %v6229_v30  ;;  %v8773_v14 = vunpack.i.h.bf16 %v14414_v25  ;;  %v8772_v7 = vunpack.i.l.bf16 %v14414_v25  ;;  %v8762_v47 = vunpack.i.l.bf16 %v17451_v63  ;;  %v14932_v63 = vpop.permute.xlu1 %8890 }
 0x2cc   : > { %9020 = vrot.lane.b32.xlu1 %v9019_v18, %s9641_s15  ;;  %v9029_v3 = vpack.i.bf16 %v6230_v32, %v17452_v17  ;;  %v8787_v34 = vunpack.i.l.bf16 %v14435_v13  ;;  %v8778_v18 = vunpack.i.h.bf16 %v14450_v48  ;;  %v8777_v32 = vunpack.i.l.bf16 %v14450_v48 }
 0x2cd   : > { %v3241_v49 = vsel %vm3239_vm11, %v17453_v23, %v8773_v14  ;;  %v3240_v58 = vsel %vm3239_vm11, %v17454_v38, %v8772_v7  ;;  %v8788_v17 = vunpack.i.h.bf16 %v14435_v13  ;;  %vm3282_vm1 = vcmask 195584   ;;  %v17455_v7 = vld [vmem:[#allocation82_spill] sm:$0xff]  ;;  %v17456_v38 = vld [vmem:[#allocation83_spill] sm:$0xff] }
 0x2ce   : > { %v3249_v30 = vsel %vm3247_vm12, %v3241_v49, %v8748_v35  ;;  %v3248_v25 = vsel %vm3247_vm12, %v3240_v58, %v8747_v24  ;;  %vm3291_vm2 = vcmask 228352   ;;  %v3242_v24 = vsel %vm3239_vm11, %v17455_v7, %v8777_v32  ;;  %v14944_v49 = vpop.permute.xlu0 %8885 }
 0x2cf   : > { %v3258_v14 = vsel %vm3255_vm13, %v3249_v30, %v8732_v29  ;;  %v8803_v23 = vunpack.i.h.bf16 %v14479_v37  ;;  %v8802_v48 = vunpack.i.l.bf16 %v14479_v37  ;;  %v3243_v29 = vsel %vm3239_vm11, %v17456_v38, %v8778_v18 }
 0x2d0   : > { %9030 = vrot.lane.b32.xlu1 %v9029_v3, %s9638_s12  ;;  %v3267_v35 = vsel %vm3264_vm14, %v3258_v14, %v8787_v34  ;;  %v3250_v58 = vsel %vm3247_vm12, %v3242_v24, %v8752_v51  ;;  %v3256_v3 = vsel %vm3255_vm13, %v3248_v25, %v8727_v8  ;;  %v8783_v30 = vunpack.i.h.bf16 %v14494_v43 }
 0x2d1   : > { %v3276_v13 = vsel %vm3273_vm15, %v3267_v35, %v8762_v47  ;;  %v3259_v34 = vsel %vm3255_vm13, %v3250_v58, %v8733_v12  ;;  %v8782_v47 = vunpack.i.l.bf16 %v14494_v43  ;;  %v3257_v51 = vsel %vm3255_vm13, %v3248_v25, %v8728_v62  ;;  %v9616_v43 = vld [vmem:[%s16446_s1 + $0x10] ss:$0 sps:$4 sm:$0x33]   ;;  %v17457_v62 = vld [vmem:[#allocation65_spill] sm:$0xff] }
 0x2d2   : > { %v3285_v37 = vsel %vm3282_vm1, %v3276_v13, %v8742_v27  ;;  %v3268_v18 = vsel %vm3264_vm14, %v3259_v34, %v8788_v17  ;;  %v8808_v8 = vunpack.i.h.bf16 %v14529_v59  ;;  %v8807_v61 = vunpack.i.l.bf16 %v14529_v59  ;;  %v14974_v17 = vpop.permute.xlu1 %8900  ;;  %v14988_v38 = vpop.permute.xlu0 %8895 }
 0x2d3   : > { %v3277_v12 = vsel %vm3273_vm15, %v3268_v18, %v8763_v1  ;;  %v3294_v32 = vsel %vm3291_vm2, %v3285_v37, %v8802_v48  ;;  %v3266_v27 = vsel %vm3264_vm14, %v3257_v51, %v8783_v30  ;;  %v3265_v14 = vsel %vm3264_vm14, %v3256_v3, %v8782_v47  ;;  %v17458_v1 = vld [vmem:[#allocation66_spill] sm:$0xff]  ;;  %v17459_v3 = vld [vmem:[#allocation8_spill] sm:$0xff] }
 0x2d4   : > { %v3286_v56 = vsel %vm3282_vm1, %v3277_v12, %v8743_v20  ;;  %v3245_v59 = vsel %vm3239_vm11, %v17457_v62, %v8808_v8  ;;  %v3244_v25 = vsel %vm3239_vm11, %v17458_v1, %v8807_v61  ;;  %v8793_v35 = vunpack.i.h.bf16 %v14544_v4  ;;  %v17460_v30 = vld [vmem:[#allocation62_spill] sm:$0xff] }
 0x2d5   : > { %v3295_v7 = vsel %vm3291_vm2, %v3286_v56, %v8803_v23  ;;  %v8792_v24 = vunpack.i.l.bf16 %v14544_v4  ;;  %v8813_v48 = vunpack.i.h.bf16 %v14570_v54  ;;  %v8812_v13 = vunpack.i.l.bf16 %v14570_v54 }
 0x2d6   : > { %v8798_v2 = vunpack.i.h.bf16 %v14586_v6  ;;  %v8797_v20 = vunpack.i.l.bf16 %v14586_v6  ;;  %vm6377_vm3 = vcmask 1041408   ;;  %v3274_v58 = vsel %vm3273_vm15, %v3265_v14, %v8757_v26  ;;  %v15016_v18 = vpop.permute.xlu1 %8910 }
 0x2d7   : > { %v14997_v23 = vsel %vm3239_vm11, %v17459_v3, %v8813_v48  ;;  %vm3300_vm4 = vcmask 261120   ;;  %8699 = vmatprep.subr.msk.bf16.mxu0 %vm6377_vm3, %v9616_v43  ;;  %v6379_v4 = vsel %vm6377_vm3, %v9616_v43, 0  ;;  %v3275_v54 = vsel %vm3273_vm15, %v3266_v27, %v8758_v40  ;;  %v15028_v27 = vpop.permute.xlu0 %8905 }
 0x2d8   : > { %v3304_v6 = vsel %vm3300_vm4, %v3295_v7, %v8798_v2  ;;  %v3303_v34 = vsel %vm3300_vm4, %v3294_v32, %v8797_v20  ;;  %8624 = vmatpush3.bf16.msra.mxu0 %v6379_v4  ;;  %v3283_v26 = vsel %vm3282_vm1, %v3274_v58, %v8737_v45  ;;  %v3284_v37 = vsel %vm3282_vm1, %v3275_v54, %v8738_v41 }
 0x2d9   : > { %v3246_v47 = vsel %vm3239_vm11, %v17460_v30, %v8812_v13  ;;  %v3292_v52 = vsel %vm3291_vm2, %v3283_v26, %v8792_v24  ;;  %v3293_v40 = vsel %vm3291_vm2, %v3284_v37, %v8793_v35  ;;  %vm6352_vm5 = vcmask 293888  }
 0x2da   : > { %v3301_v51 = vsel %vm3300_vm4, %v3292_v52, %v8767_v60  ;;  %v3302_v39 = vsel %vm3300_vm4, %v3293_v40, %v8768_v0  ;;  %v8822_v41 = vunpack.i.l.bf16 %v14612_v19  ;;  %v8818_v45 = vunpack.i.h.bf16 %v14626_v42  ;;  %v15050_v7 = vpop.permute.xlu1 %8920 }
 0x2db   : > { %v6317_v8 = vpack.c.bf16 %v3302_v39, %v3301_v51  ;;  %v8823_v61 = vunpack.i.h.bf16 %v14612_v19  ;;  %v8817_v12 = vunpack.i.l.bf16 %v14626_v42  ;;  %v6318_v32 = vpack.c.bf16 %v3304_v6, %v3303_v34  ;;  %v15060_v3 = vpop.permute.xlu0 %8915 }
 0x2dc   : > { %v3254_v14 = vsel %vm3247_vm12, %v3246_v47, %v8822_v41  ;;  %v3253_v60 = vsel %vm3247_vm12, %v3245_v59, %v8818_v45  ;;  %v8833_v57 = vunpack.i.h.bf16 %v14656_v21  ;;  %v8832_v0 = vunpack.i.l.bf16 %v14656_v21 }
 0x2dd   : > { %8625 = vmatprep.mubr.msk.bf16.mxu0 %vm6352_vm5, %v6317_v8  ;;  %v3252_v43 = vsel %vm3247_vm12, %v3244_v25, %v8817_v12  ;;  %v3251_v56 = vsel %vm3247_vm12, %v3243_v29, %v8753_v10  ;;  %v8828_v42 = vunpack.i.h.bf16 %v14672_v44  ;;  %v8827_v62 = vunpack.i.l.bf16 %v14672_v44 }
 0x2de   : > { %8626 = vmatmul.mubr.msk.bf16.vlgmr.msra.gmra.mrb[0].mxu0 %vm6352_vm5, %v6318_v32  ;;  %v3262_v59 = vsel %vm3255_vm13, %v3253_v60, %v8832_v0  ;;  %v3263_v1 = vsel %vm3255_vm13, %v3254_v14, %v8833_v57  ;;  %v8843_v21 = vunpack.i.h.bf16 %v14713_v55  ;;  %v8842_v35 = vunpack.i.l.bf16 %v14713_v55  ;;  %v15078_v41 = vpop.permute.xlu1 %8930 }
 0x2df   : > { %v3260_v25 = vsel %vm3255_vm13, %v3251_v56, %v8827_v62  ;;  %v3261_v28 = vsel %vm3255_vm13, %v3252_v43, %v8828_v42  ;;  %v8838_v10 = vunpack.i.h.bf16 %v14730_v11  ;;  %v8837_v29 = vunpack.i.l.bf16 %v14730_v11  ;;  %v8926_v57 = vpop.permute.xlu0 %8925 }
 0x2e0   : > { %v3271_v44 = vsel %vm3264_vm14, %v3262_v59, %v8842_v35  ;;  %v3272_v24 = vsel %vm3264_vm14, %v3263_v1, %v8843_v21  ;;  %v8853_v48 = vunpack.i.h.bf16 %v14772_v50  ;;  %v8852_v13 = vunpack.i.l.bf16 %v14772_v50 }
 0x2e1   : > { %v3269_v55 = vsel %vm3264_vm14, %v3260_v25, %v8837_v29  ;;  %v3270_v2 = vsel %vm3264_vm14, %v3261_v28, %v8838_v10  ;;  %v8848_v20 = vunpack.i.h.bf16 %v14788_v36  ;;  %v8847_v58 = vunpack.i.l.bf16 %v14788_v36  ;;  %v17461_v25 = vld [vmem:[#allocation15_spill] sm:$0xff]  ;;  %v17462_v10 = vld [vmem:[#allocation21_spill] sm:$0xff] }
 0x2e2   : > { %v3280_v11 = vsel %vm3273_vm15, %v3271_v44, %v8852_v13  ;;  %v3281_v4 = vsel %vm3273_vm15, %v3272_v24, %v8853_v48  ;;  %v8863_v54 = vunpack.i.h.bf16 %v14823_v31  ;;  %v8862_v6 = vunpack.i.l.bf16 %v14823_v31  ;;  %v8941_v24 = vpop.permute.xlu1 %8940 }
 0x2e3   : > { %v3278_v50 = vsel %vm3273_vm15, %v3269_v55, %v8847_v58  ;;  %v3279_v34 = vsel %vm3273_vm15, %v3270_v2, %v8848_v20  ;;  %v8858_v26 = vunpack.i.h.bf16 %v14837_v15  ;;  %v8857_v37 = vunpack.i.l.bf16 %v14837_v15  ;;  %v8936_v20 = vpop.permute.xlu0 %8935 }
 0x2e4   : > { %v3289_v36 = vsel %vm3282_vm1, %v3280_v11, %v8862_v6  ;;  %v3290_v30 = vsel %vm3282_vm1, %v3281_v4, %v8863_v54  ;;  %v8873_v47 = vunpack.i.h.bf16 %v14866_v16  ;;  %v8872_v52 = vunpack.i.l.bf16 %v14866_v16 }
 0x2e5   : > { %v3287_v40 = vsel %vm3282_vm1, %v3278_v50, %v8857_v37  ;;  %v3288_v31 = vsel %vm3282_vm1, %v3279_v34, %v8858_v26  ;;  %v8868_v51 = vunpack.i.h.bf16 %v14877_v9  ;;  %v8867_v39 = vunpack.i.l.bf16 %v14877_v9 }
 0x2e6   : > { %v3298_v15 = vsel %vm3291_vm2, %v3289_v36, %v8872_v52  ;;  %v3299_v45 = vsel %vm3291_vm2, %v3290_v30, %v8873_v47  ;;  %v8883_v8 = vunpack.i.h.bf16 %v14903_v53  ;;  %v8882_v12 = vunpack.i.l.bf16 %v14903_v53  ;;  %v8951_v30 = vpop.permute.xlu1 %8950 }
 0x2e7   : > { %v3296_v16 = vsel %vm3291_vm2, %v3287_v40, %v8867_v39  ;;  %v3297_v32 = vsel %vm3291_vm2, %v3288_v31, %v8868_v51  ;;  %v8878_v14 = vunpack.i.h.bf16 %v14915_v5  ;;  %v8877_v60 = vunpack.i.l.bf16 %v14915_v5 }
 0x2e8   : > { %v3307_v9 = vsel %vm3300_vm4, %v3298_v15, %v8882_v12  ;;  %v3308_v0 = vsel %vm3300_vm4, %v3299_v45, %v8883_v8  ;;  %v8893_v43 = vunpack.i.h.bf16 %v14932_v63  ;;  %v8892_v56 = vunpack.i.l.bf16 %v14932_v63 }
 0x2e9   : > { %v3305_v42 = vsel %vm3300_vm4, %v3296_v16, %v8877_v60  ;;  %v3306_v53 = vsel %vm3300_vm4, %v3297_v32, %v8878_v14  ;;  %v8888_v62 = vunpack.i.h.bf16 %v14944_v49  ;;  %v8887_v59 = vunpack.i.l.bf16 %v14944_v49 }
 0x2ea   : > { %v6319_v1 = vpack.c.bf16 %v3306_v53, %v3305_v42  ;;  %v6320_v21 = vpack.c.bf16 %v3308_v0, %v3307_v9  ;;  %v8903_v5 = vunpack.i.h.bf16 %v14974_v17  ;;  %v8902_v35 = vunpack.i.l.bf16 %v14974_v17 }
 0x2eb   : > { %v6257_v28 = vsel %vm3239_vm11, %v17461_v25, %v8888_v62  ;;  %v6256_v63 = vsel %vm3239_vm11, %v17462_v10, %v8887_v59  ;;  %v8898_v29 = vunpack.i.h.bf16 %v14988_v38  ;;  %v8897_v44 = vunpack.i.l.bf16 %v14988_v38  ;;  %v8961_v25 = vpop.permute.xlu1 %8960 }
 0x2ec   : > { %8629 = vmatprep.mubr.msk.bf16.mxu0 %vm6352_vm5, %v6319_v1  ;;  %v6263_v49 = vsel %vm3247_vm12, %v6256_v63, %v8892_v56  ;;  %v6264_v48 = vsel %vm3247_vm12, %v6257_v28, %v8893_v43  ;;  %v8913_v13 = vunpack.i.h.bf16 %v15016_v18  ;;  %v8912_v17 = vunpack.i.l.bf16 %v15016_v18 }
 0x2ed   : > { %v6262_v55 = vsel %vm3247_vm12, %v14997_v23, %v8823_v61  ;;  %8630 = vmatmul.mubr.msk.bf16.gmra.mrb[4].mxu0 %vm6352_vm5, %v6320_v21  ;;  %v6271_v38 = vsel %vm3255_vm13, %v6263_v49, %v8902_v35  ;;  %v6272_v2 = vsel %vm3255_vm13, %v6264_v48, %v8903_v5  ;;  %v8908_v4 = vunpack.i.h.bf16 %v15028_v27 }
 0x2ee   : > { %v6270_v58 = vsel %vm3255_vm13, %v6262_v55, %v8898_v29  ;;  %v6269_v11 = vsel %vm3255_vm13, %v6262_v55, %v8897_v44  ;;  %v8907_v18 = vunpack.i.l.bf16 %v15028_v27  ;;  %v8923_v19 = vunpack.i.h.bf16 %v15050_v7 }
 0x2ef   : > { %v8922_v54 = vunpack.i.l.bf16 %v15050_v7  ;;  %v8918_v23 = vunpack.i.h.bf16 %v15060_v3  ;;  %v8917_v61 = vunpack.i.l.bf16 %v15060_v3  ;;  %v6279_v6 = vsel %vm3264_vm14, %v6271_v38, %v8912_v17  ;;  %v8971_v10 = vpop.permute.xlu1 %8970 }
 0x2f0   : > { %v6280_v50 = vsel %vm3264_vm14, %v6272_v2, %v8913_v13  ;;  %v8933_v34 = vunpack.i.h.bf16 %v15078_v41  ;;  %v8932_v26 = vunpack.i.l.bf16 %v15078_v41  ;;  %v6277_v37 = vsel %vm3264_vm14, %v6269_v11, %v8907_v18  ;;  %v8946_v41 = vpop.permute.xlu0 %8945  ;;  %v17463_v11 = vld [vmem:[#allocation10_spill] sm:$0xff] }
 0x2f1   : > { %v6278_v27 = vsel %vm3264_vm14, %v6270_v58, %v8908_v4  ;;  %v6287_v36 = vsel %vm3273_vm15, %v6279_v6, %v8922_v54  ;;  %v6288_v7 = vsel %vm3273_vm15, %v6280_v50, %v8923_v19  ;;  %v6285_v47 = vsel %vm3273_vm15, %v6277_v37, %v8917_v61 }
 0x2f2   : > { %v6286_v3 = vsel %vm3273_vm15, %v6278_v27, %v8918_v23  ;;  %v8928_v52 = vunpack.i.h.bf16 %v8926_v57  ;;  %v8927_v40 = vunpack.i.l.bf16 %v8926_v57  ;;  %v8943_v31 = vunpack.i.h.bf16 %v8941_v24 }
 0x2f3   : > { %v8942_v51 = vunpack.i.l.bf16 %v8941_v24  ;;  %v8938_v39 = vunpack.i.h.bf16 %v8936_v20  ;;  %v8937_v15 = vunpack.i.l.bf16 %v8936_v20  ;;  %v6295_v45 = vsel %vm3282_vm1, %v6287_v36, %v8932_v26  ;;  %v8981_v29 = vpop.permute.xlu1 %8980 }
 0x2f4   : > { %v6296_v8 = vsel %vm3282_vm1, %v6288_v7, %v8933_v34  ;;  %v8953_v12 = vunpack.i.h.bf16 %v8951_v30  ;;  %v8952_v16 = vunpack.i.l.bf16 %v8951_v30  ;;  %v6293_v32 = vsel %vm3282_vm1, %v6285_v47, %v8927_v40  ;;  %v8956_v5 = vpop.permute.xlu0 %8955 }
 0x2f5   : > { %v6294_v14 = vsel %vm3282_vm1, %v6286_v3, %v8928_v52  ;;  %v6303_v60 = vsel %vm3291_vm2, %v6295_v45, %v8942_v51  ;;  %v6304_v9 = vsel %vm3291_vm2, %v6296_v8, %v8943_v31  ;;  %v8948_v43 = vunpack.i.h.bf16 %v8946_v41 }
 0x2f6   : > { %v6311_v57 = vsel %vm3300_vm4, %v6303_v60, %v8952_v16  ;;  %v6312_v0 = vsel %vm3300_vm4, %v6304_v9, %v8953_v12  ;;  %v8947_v56 = vunpack.i.l.bf16 %v8946_v41  ;;  %v6301_v42 = vsel %vm3291_vm2, %v6293_v32, %v8937_v15 }
 0x2f7   : > { %v6302_v53 = vsel %vm3291_vm2, %v6294_v14, %v8938_v39  ;;  %v6322_v1 = vpack.c.bf16 %v6312_v0, %v6311_v57  ;;  %v8958_v49 = vunpack.i.h.bf16 %v8956_v5  ;;  %v8957_v48 = vunpack.i.l.bf16 %v8956_v5 }
 0x2f8   : > { %v6309_v62 = vsel %vm3300_vm4, %v6301_v42, %v8947_v56  ;;  %v6310_v59 = vsel %vm3300_vm4, %v6302_v53, %v8948_v43  ;;  %v8966_v35 = vpop.permute.xlu0 %8965  ;;  %v8963_v17 = vunpack.i.h.bf16 %v8961_v25  ;;  %v8962_v38 = vunpack.i.l.bf16 %v8961_v25 }
 0x2f9   : > { %v6321_v21 = vpack.c.bf16 %v6310_v59, %v6309_v62  ;;  %v8968_v2 = vunpack.i.h.bf16 %v8966_v35  ;;  %v8967_v20 = vunpack.i.l.bf16 %v8966_v35  ;;  %v6259_v58 = vsel %vm3239_vm11, %v14801_v22, %v8958_v49 }
 0x2fa   : > { %v6258_v4 = vsel %vm3239_vm11, %v17463_v11, %v8957_v48  ;;  %v6261_v54 = vsel %vm3239_vm11, %v14758_v46, %v8963_v17  ;;  %v8973_v23 = vunpack.i.h.bf16 %v8971_v10  ;;  %v6260_v50 = vsel %vm3239_vm11, %v14818_v33, %v8962_v38 }
 0x2fb   : > { %8633 = vmatprep.mubr.msk.bf16.mxu0 %vm6352_vm5, %v6321_v21  ;;  %v8972_v34 = vunpack.i.l.bf16 %v8971_v10  ;;  %v6265_v22 = vsel %vm3247_vm12, %v6258_v4, %v8967_v20  ;;  %v6266_v36 = vsel %vm3247_vm12, %v6259_v58, %v8968_v2  ;;  %v8983_v33 = vunpack.i.h.bf16 %v8981_v29  ;;  %v15193_v4 = vld [vmem:[%s16447_s2] ss:$0 sm:$0xff] }
 0x2fc   : > { %8634 = vmatmul.mubr.msk.bf16.gmra.mrb[8].mxu0 %vm6352_vm5, %v6322_v1  ;;  %v8976_v28 = vpop.permute.xlu0 %8975  ;;  %v6268_v31 = vsel %vm3247_vm12, %v6261_v54, %v8973_v23  ;;  %v8982_v41 = vunpack.i.l.bf16 %v8981_v29  ;;  %vm6580_vm6 = vcmask 1046528   ;;  %vm6623_vm7 = vcmask 1045504  }
 0x2fd   : > { %v8978_v18 = vunpack.i.h.bf16 %v8976_v28  ;;  %v8977_v19 = vunpack.i.l.bf16 %v8976_v28  ;;  %v6267_v15 = vsel %vm3247_vm12, %v6260_v50, %v8972_v34  ;;  %v6276_v25 = vsel %vm3255_vm13, %v6268_v31, %v8983_v33 }
 0x2fe   : > { %v6275_v35 = vsel %vm3255_vm13, %v6267_v15, %v8982_v41  ;;  %vm7782_vm10 = vcmask 457728  }
 0x2ff   : > { %v6273_v3 = vsel %vm3255_vm13, %v6265_v22, %v8977_v19  ;;  %v6274_v46 = vsel %vm3255_vm13, %v6266_v36, %v8978_v18 }
 0x304   : > { %v15148_v24 = vpop.permute.xlu1 %8990 }
 0x305   : > { %v8993_v9 = vunpack.i.h.bf16 %v15148_v24  ;;  %v8992_v57 = vunpack.i.l.bf16 %v15148_v24 }
 0x307   : > { %v6284_v29 = vsel %vm3264_vm14, %v6276_v25, %v8993_v9 }
 0x31a   : > { %v8986_v63 = vpop.permute.xlu0 %8985 }
 0x31b   : > { %v8988_v61 = vunpack.i.h.bf16 %v8986_v63  ;;  %v8987_v6 = vunpack.i.l.bf16 %v8986_v63  ;;  %v6283_v63 = vsel %vm3264_vm14, %v6275_v35, %v8992_v57 }
 0x31c   : > { %v9001_v55 = vpop.permute.xlu1 %9000 }
 0x31d   : > { %v6281_v51 = vsel %vm3264_vm14, %v6273_v3, %v8987_v6  ;;  %v6282_v39 = vsel %vm3264_vm14, %v6274_v46, %v8988_v61  ;;  %v9003_v56 = vunpack.i.h.bf16 %v9001_v55  ;;  %v9002_v42 = vunpack.i.l.bf16 %v9001_v55 }
 0x31f   : > { %v6292_v24 = vsel %vm3273_vm15, %v6284_v29, %v9003_v56 }
 0x322   : > { %v8996_v44 = vpop.permute.xlu0 %8995 }
 0x323   : > { %v8998_v26 = vunpack.i.h.bf16 %v8996_v44  ;;  %v8997_v37 = vunpack.i.l.bf16 %v8996_v44  ;;  %v6291_v44 = vsel %vm3273_vm15, %v6283_v63, %v9002_v42 }
 0x325   : > { %v6289_v45 = vsel %vm3273_vm15, %v6281_v51, %v8997_v37  ;;  %v6290_v8 = vsel %vm3273_vm15, %v6282_v39, %v8998_v26 }
 0x32f   : > { %v9011_v7 = vpop.permute.xlu1 %9010 }
 0x330   : > { %v9013_v1 = vunpack.i.h.bf16 %v9011_v7  ;;  %v9012_v21 = vunpack.i.l.bf16 %v9011_v7 }
 0x331   : > { %v9006_v13 = vpop.permute.xlu0 %9005 }
 0x332   : > { %v9008_v30 = vunpack.i.h.bf16 %v9006_v13  ;;  %v9007_v47 = vunpack.i.l.bf16 %v9006_v13  ;;  %v6299_v48 = vsel %vm3282_vm1, %v6291_v44, %v9012_v21  ;;  %v6300_v13 = vsel %vm3282_vm1, %v6292_v24, %v9013_v1 }
 0x334   : > { %v6297_v16 = vsel %vm3282_vm1, %v6289_v45, %v9007_v47  ;;  %v6298_v32 = vsel %vm3282_vm1, %v6290_v8, %v9008_v30 }
 0x337   : > { %v9016_v27 = vpop.permute.xlu0 %9015 }
 0x338   : > { %v9018_v52 = vunpack.i.h.bf16 %v9016_v27  ;;  %v9017_v40 = vunpack.i.l.bf16 %v9016_v27 }
 0x33a   : > { %v6305_v0 = vsel %vm3291_vm2, %v6297_v16, %v9017_v40  ;;  %v6306_v43 = vsel %vm3291_vm2, %v6298_v32, %v9018_v52 }
 0x33b   : > { %v9026_v12 = vpop.permute.xlu0 %9025 }
 0x33c   : > { %v9028_v14 = vunpack.i.h.bf16 %v9026_v12  ;;  %v9027_v60 = vunpack.i.l.bf16 %v9026_v12 }
 0x33e   : > { %v9021_v53 = vpop.permute.xlu1 %9020  ;;  %v6313_v62 = vsel %vm3300_vm4, %v6305_v0, %v9027_v60  ;;  %v6314_v59 = vsel %vm3300_vm4, %v6306_v43, %v9028_v14 }
 0x33f   : > { %v6323_v5 = vpack.c.bf16 %v6314_v59, %v6313_v62  ;;  %v9023_v28 = vunpack.i.h.bf16 %v9021_v53  ;;  %v9022_v10 = vunpack.i.l.bf16 %v9021_v53 }
 0x341   : > { %8637 = vmatprep.mubr.msk.bf16.mxu0 %vm6352_vm5, %v6323_v5  ;;  %v6307_v38 = vsel %vm3291_vm2, %v6299_v48, %v9022_v10  ;;  %v6308_v2 = vsel %vm3291_vm2, %v6300_v13, %v9023_v28 }
 0x342   : > { %v9031_v49 = vpop.permute.xlu1 %9030 }
 0x343   : > { %v9033_v17 = vunpack.i.h.bf16 %v9031_v49  ;;  %v9032_v55 = vunpack.i.l.bf16 %v9031_v49 }
 0x345   : > { %v6315_v20 = vsel %vm3300_vm4, %v6307_v38, %v9032_v55  ;;  %v6316_v58 = vsel %vm3300_vm4, %v6308_v2, %v9033_v17 }
 0x346   : > { %v6324_v11 = vpack.c.bf16 %v6316_v58, %v6315_v20 }
 0x348   : > { %8638 = vmatmul.mubr.msk.bf16.gmra.mrb[12].mxu0 %vm6352_vm5, %v6324_v11 }
 0x3b1   : > { %v8627_v18 = vpop.f32.mrb[0].mxu0 }
 0x3b2   : > { %v6424_v19 = vadd.f32 %v8627_v18, %v15193_v4  ;;  %v6415_v54 = vpop.f32.mrb[1].mxu0 }
 0x3b3   : > { %v6416_v23 = vadd.f32 %v15193_v4, %v6415_v54  ;;  %v8628_v61 = vpop.f32.mrb[2].mxu0 }
 0x3b4   : > { %v6480_v6 = vmax.f32 %v6424_v19, 0.0  ;;  %v6427_v50 = vadd.f32 %v8628_v61, %v15193_v4  ;;  %v6418_v34 = vpop.f32.mrb[3].mxu0 }
 0x3b5   : > { %v6478_v26 = vmax.f32 %v6416_v23, 0.0  ;;  %v6419_v37 = vadd.f32 %v15193_v4, %v6418_v34 }
 0x3b6   : > { %v6504_v27 = vrot.slane %v6480_v6, 1  ;;  %v6520_v22 = vrot.slane %v6480_v6, 7  ;;  %v6536_v36 = vrot.slane %v6480_v6, 5  ;;  %v6481_v7 = vmax.f32 %v6427_v50, 0.0 }
 0x3b7   : > { %v6503_v30 = vrot.slane %v6478_v26, 1  ;;  %v6519_v47 = vrot.slane %v6478_v26, 7  ;;  %v6535_v3 = vrot.slane %v6478_v26, 5  ;;  %v6479_v46 = vmax.f32 %v6419_v37, 0.0 }
 0x3b8   : > { %v15200_v52 = vsel %vm379_vm0, %v6504_v27, %v6520_v22  ;;  %v6560_v40 = vsel %vm379_vm0, %v6520_v22, %v6536_v36  ;;  %v6505_v31 = vrot.slane %v6481_v7, 1  ;;  %v6521_v33 = vrot.slane %v6481_v7, 7 }
 0x3b9   : > { %v6559_v51 = vsel %vm379_vm0, %v6519_v47, %v6535_v3  ;;  %v6537_v39 = vrot.slane %v6481_v7, 5  ;;  %v6502_v15 = vrot.slane %v6479_v46, 1  ;;  %v6518_v41 = vrot.slane %v6479_v46, 7 }
 0x3ba   : > { %v15205_v45 = vsel %vm379_vm0, %v6505_v31, %v6521_v33  ;;  %v6534_v8 = vrot.slane %v6479_v46, 5  ;;  %v15208_v12 = vsel %vm379_vm0, %v6503_v30, %v6519_v47  ;;  %v6587_v16 = vrot.slane %v15200_v52, 1 }
 0x3bb   : > { %v6561_v32 = vsel %vm379_vm0, %v6521_v33, %v6537_v39  ;;  %v15213_v14 = vsel %vm379_vm0, %v6502_v15, %v6518_v41  ;;  %v9034_v60 = vpack.i.bf16 %v15205_v45, %v15200_v52  ;;  %v6588_v9 = vrot.slane %v6560_v40, 1 }
 0x3bc   : > { %v6558_v57 = vsel %vm379_vm0, %v6518_v41, %v6534_v8  ;;  %v9039_v0 = vpack.i.bf16 %v15213_v14, %v15208_v12  ;;  %v6590_v43 = vrot.slane %v15205_v45, 1  ;;  %v6591_v56 = vrot.slane %v6561_v32, 1 }
 0x3bd   : > { %9035 = vrot.lane.b32.xlu1 %v9034_v60, %s9634_s8  ;;  %v15223_v42 = vsel %vm6580_vm6, %v6587_v16, %v6588_v9  ;;  %v9044_v53 = vpack.i.bf16 %v15200_v52, %v15213_v14  ;;  %v6630_v62 = vrot.slane %v15200_v52, 2  ;;  %v6631_v59 = vrot.slane %v6560_v40, 2 }
 0x3be   : > { %9040 = vrot.lane.b32.xlu0 %v9039_v0, %s9634_s8  ;;  %v15230_v1 = vsel %vm6580_vm6, %v6590_v43, %v6591_v56  ;;  %v6633_v21 = vrot.slane %v15205_v45, 2  ;;  %v6634_v5 = vrot.slane %v6561_v32, 2  ;;  %v6581_v35 = vrot.slane %v15213_v14, 1 }
 0x3bf   : > { %v9049_v25 = vpack.i.bf16 %v15230_v1, %v15223_v42  ;;  %v15237_v28 = vsel %vm6623_vm7, %v6630_v62, %v6631_v59  ;;  %v6582_v10 = vrot.slane %v6558_v57, 1  ;;  %v6584_v63 = vrot.slane %v15208_v12, 1 }
 0x3c0   : > { %v15241_v29 = vsel %vm6623_vm7, %v6633_v21, %v6634_v5  ;;  %v6585_v44 = vrot.slane %v6559_v51, 1  ;;  %v6624_v24 = vrot.slane %v15213_v14, 2  ;;  %v8631_v49 = vpop.f32.mrb[4].mxu0  ;;  %v6625_v17 = vrot.slane %v6558_v57, 2 }
 0x3c1   : > { %9050 = vrot.lane.b32.xlu1 %v9049_v25, %s9639_s13  ;;  %v9054_v48 = vpack.i.bf16 %v15241_v29, %v15237_v28  ;;  %v15248_v13 = vsel %vm6580_vm6, %v6581_v35, %v6582_v10  ;;  %v6627_v55 = vrot.slane %v15208_v12, 2  ;;  %v6431_v38 = vpop.f32.mrb[5].mxu0  ;;  %v6628_v20 = vrot.slane %v6559_v51, 2 }
 0x3c2   : > { %9045 = vrot.lane.b32.xlu0 %v9044_v53, %s9635_s9  ;;  %v6586_v2 = vsel %vm6580_vm6, %v6584_v63, %v6585_v44  ;;  %v6440_v58 = vadd.f32 %v8631_v49, %v15193_v4  ;;  %v8632_v11 = vpop.f32.mrb[6].mxu0  ;;  %v15256_v19 = vsel %vm6623_vm7, %v6624_v24, %v6625_v17  ;;  %v6432_v23 = vadd.f32 %v15193_v4, %v6431_v38 }
 0x3c3   : > { %v9069_v18 = vpack.i.bf16 %v6586_v2, %v15248_v13  ;;  %v9079_v54 = vpack.i.bf16 %v15248_v13, %v6586_v2  ;;  %v6434_v61 = vpop.f32.mrb[7].mxu0  ;;  %v15261_v6 = vsel %vm6623_vm7, %v6627_v55, %v6628_v20  ;;  %v6443_v34 = vadd.f32 %v8632_v11, %v15193_v4 }
 0x3c4   : > { %v6484_v50 = vmax.f32 %v6440_v58, 0.0  ;;  %v6435_v26 = vadd.f32 %v15193_v4, %v6434_v61  ;;  %v9074_v37 = vpack.i.bf16 %v15261_v6, %v15256_v19  ;;  %v6482_v27 = vmax.f32 %v6432_v23, 0.0 }
 0x3c5   : > { %9055 = vrot.lane.b32.xlu1 %v9054_v48, %s9636_s10  ;;  %v9084_v22 = vpack.i.bf16 %v15256_v19, %v15261_v6  ;;  %v9089_v36 = vpack.i.bf16 %v15223_v42, %v15248_v13  ;;  %v6485_v3 = vmax.f32 %v6443_v34, 0.0  ;;  %v9094_v0 = vpack.i.bf16 %v15237_v28, %v15256_v19  ;;  %v9619_v28 = vld [vmem:[%s16448_s3 + $0x10] ss:$0 sps:$4 sm:$0x33]  }
 0x3c6   : > { %9070 = vrot.lane.b32.xlu0 %v9069_v18, %s9639_s13  ;;  %v6508_v7 = vrot.slane %v6484_v50, 1  ;;  %v6524_v30 = vrot.slane %v6484_v50, 7  ;;  %v6540_v47 = vrot.slane %v6484_v50, 5  ;;  %v6506_v46 = vrot.slane %v6482_v27, 1 }
 0x3c7   : > { %v6522_v40 = vrot.slane %v6482_v27, 7  ;;  %v6538_v31 = vrot.slane %v6482_v27, 5  ;;  %v6483_v33 = vmax.f32 %v6435_v26, 0.0  ;;  %v6509_v39 = vrot.slane %v6485_v3, 1 }
 0x3c8   : > { %v15274_v51 = vsel %vm379_vm0, %v6508_v7, %v6524_v30  ;;  %v6525_v15 = vrot.slane %v6485_v3, 7  ;;  %v6541_v16 = vrot.slane %v6485_v3, 5  ;;  %v6564_v60 = vsel %vm379_vm0, %v6524_v30, %v6540_v47 }
 0x3c9   : > { %9060 = vrot.lane.b32.xlu1 %v9049_v25, %s9640_s14  ;;  %v15278_v41 = vsel %vm379_vm0, %v6506_v46, %v6522_v40  ;;  %v6562_v8 = vsel %vm379_vm0, %v6522_v40, %v6538_v31  ;;  %v6507_v32 = vrot.slane %v6483_v33, 1  ;;  %v6523_v9 = vrot.slane %v6483_v33, 7 }
 0x3ca   : > { %9075 = vrot.lane.b32.xlu0 %v9074_v37, %s9636_s10  ;;  %v6539_v57 = vrot.slane %v6483_v33, 5  ;;  %v6565_v43 = vsel %vm379_vm0, %v6525_v15, %v6541_v16  ;;  %v15287_v56 = vsel %vm379_vm0, %v6509_v39, %v6525_v15  ;;  %v6593_v53 = vrot.slane %v15278_v41, 1 }
 0x3cb   : > { %v6594_v62 = vrot.slane %v6562_v8, 1  ;;  %v15291_v59 = vsel %vm379_vm0, %v6507_v32, %v6523_v9  ;;  %v9099_v21 = vpack.i.bf16 %v15278_v41, %v15205_v45  ;;  %v6599_v5 = vrot.slane %v15274_v51, 1 }
 0x3cc   : > { %v6563_v35 = vsel %vm379_vm0, %v6523_v9, %v6539_v57  ;;  %v9104_v25 = vpack.i.bf16 %v15287_v56, %v15274_v51  ;;  %v6600_v63 = vrot.slane %v6564_v60, 1  ;;  %v6692_v24 = vrot.slane %v15287_v56, 1 }
 0x3cd   : > { %9065 = vrot.lane.b32.xlu1 %v9054_v48, %s9637_s11  ;;  %v15301_v10 = vsel %vm6580_vm6, %v6593_v53, %v6594_v62  ;;  %v6693_v49 = vrot.slane %v6565_v43, 1  ;;  %v6636_v17 = vrot.slane %v15278_v41, 2  ;;  %v6637_v55 = vrot.slane %v6562_v8, 2 }
 0x3ce   : > { %9080 = vrot.lane.b32.xlu0 %v9079_v54, %s9640_s14  ;;  %v9119_v44 = vpack.i.bf16 %v15301_v10, %v15230_v1  ;;  %v15309_v48 = vsel %vm6580_vm6, %v6599_v5, %v6600_v63  ;;  %v6642_v38 = vrot.slane %v15274_v51, 2  ;;  %v6643_v2 = vrot.slane %v6564_v60, 2  ;;  %v9618_v60 = vld [vmem:[%s16448_s3 + $0x8] sm:$0xff]  }
 0x3cf   : > { %v15313_v20 = vsel %vm6580_vm6, %v6692_v24, %v6693_v49  ;;  %v6719_v58 = vrot.slane %v15287_v56, 2  ;;  %v6720_v11 = vrot.slane %v6565_v43, 2  ;;  %v8635_v18 = vpop.f32.mrb[8].mxu0  ;;  %v6639_v1 = vrot.slane %v15291_v59, 2 }
 0x3d0   : > { %v9129_v54 = vpack.i.bf16 %v15313_v20, %v15309_v48  ;;  %v15321_v23 = vsel %vm6623_vm7, %v6636_v17, %v6637_v55  ;;  %v15324_v61 = vsel %vm6623_vm7, %v6642_v38, %v6643_v2  ;;  %v6456_v6 = vadd.f32 %v8635_v18, %v15193_v4  ;;  %v6447_v50 = vpop.f32.mrb[9].mxu0 }
 0x3d1   : > { %9100 = vrot.lane.b32.xlu1 %v9099_v21, %s9635_s9  ;;  %v9124_v34 = vpack.i.bf16 %v15321_v23, %v15241_v29  ;;  %v15331_v26 = vsel %vm6623_vm7, %v6719_v58, %v6720_v11  ;;  %v6640_v37 = vrot.slane %v6563_v35, 2  ;;  %v6448_v27 = vadd.f32 %v15193_v4, %v6447_v50  ;;  %v8636_v7 = vpop.f32.mrb[10].mxu0 }
 0x3d2   : > { %9085 = vrot.lane.b32.xlu0 %v9084_v22, %s9637_s11  ;;  %v9134_v30 = vpack.i.bf16 %v15331_v26, %v15324_v61  ;;  %v6488_v47 = vmax.f32 %v6456_v6, 0.0  ;;  %v6459_v3 = vadd.f32 %v8636_v7, %v15193_v4  ;;  %v6450_v46 = vpop.f32.mrb[11].mxu0  ;;  %v6596_v40 = vrot.slane %v15291_v59, 1  ;;  %v9617_v22 = vld [vmem:[%s16448_s3] sm:$0xff]  }
 0x3d3   : > { %v15342_v31 = vsel %vm6623_vm7, %v6639_v1, %v6640_v37  ;;  %v6486_v33 = vmax.f32 %v6448_v27, 0.0  ;;  %v6451_v39 = vadd.f32 %v15193_v4, %v6450_v46  ;;  %v6597_v15 = vrot.slane %v6563_v35, 1  ;;  %8641 = vmatprep.subr.bf16.mxu1 %v9617_v22 }
 0x3d4   : > { %v6881_v8 = vrot.slane %v6488_v47, 1  ;;  %v6897_v16 = vrot.slane %v6488_v47, 7  ;;  %v15348_v32 = vpack.i.bf16 %v15342_v31, %v15321_v23  ;;  %v6489_v53 = vmax.f32 %v6459_v3, 0.0  ;;  %8642 = vmatpush3.bf16.msra.mxu1 %v9617_v22 }
 0x3d5   : > { %9105 = vrot.lane.b32.xlu1 %v9104_v25, %s9634_s8  ;;  %v6880_v9 = vrot.slane %v6486_v33, 1  ;;  %v6896_v57 = vrot.slane %v6486_v33, 7  ;;  %v6912_v43 = vrot.slane %v6486_v33, 5  ;;  %v9109_v62 = vpack.i.bf16 %v15291_v59, %v15278_v41  ;;  %8643 = vmatprep.subr.bf16.mxu1 %v9618_v60 }
 0x3d6   : > { %9090 = vrot.lane.b32.xlu0 %v9089_v36, %s9641_s15  ;;  %v6913_v21 = vrot.slane %v6488_v47, 5  ;;  %v6487_v5 = vmax.f32 %v6451_v39, 0.0  ;;  %v15360_v35 = vsel %vm6580_vm6, %v6596_v40, %v6597_v15  ;;  %v9114_v25 = vpack.i.bf16 %v15274_v51, %v15291_v59 }
 0x3d7   : > { %v15365_v42 = vsel %vm379_vm0, %v6881_v8, %v6897_v16  ;;  %v6882_v13 = vrot.slane %v6489_v53, 1  ;;  %v6898_v36 = vrot.slane %v6489_v53, 7  ;;  %v15369_v63 = vsel %vm379_vm0, %v6880_v9, %v6896_v57 }
 0x3d8   : > { %v6914_v24 = vrot.slane %v6489_v53, 5  ;;  %v6879_v49 = vrot.slane %v6487_v5, 1  ;;  %v6895_v17 = vrot.slane %v6487_v5, 7  ;;  %v6936_v55 = vsel %vm379_vm0, %v6896_v57, %v6912_v43  ;;  %8644 = vmatpush3.bf16.msra.mxu1 %v9618_v60 }
 0x3d9   : > { %9120 = vrot.lane.b32.xlu1 %v9119_v44, %s9641_s15  ;;  %v6911_v38 = vrot.slane %v6487_v5, 5  ;;  %v9139_v2 = vpack.i.bf16 %v15360_v35, %v15301_v10  ;;  %v6937_v44 = vsel %vm379_vm0, %v6897_v16, %v6913_v21  ;;  %v15380_v58 = vsel %vm379_vm0, %v6882_v13, %v6898_v36  ;;  %8700 = vmatprep.subr.msk.bf16.mxu1 %vm6377_vm3, %v9619_v28 }
 0x3da   : > { %9095 = vrot.lane.b32.xlu0 %v9094_v0, %s9638_s12  ;;  %v15383_v11 = vsel %vm379_vm0, %v6879_v49, %v6895_v17  ;;  %v6938_v19 = vsel %vm379_vm0, %v6898_v36, %v6914_v24  ;;  %v9159_v10 = vpack.i.bf16 %v15309_v48, %v15360_v35  ;;  %v9164_v18 = vpack.i.bf16 %v15324_v61, %v15342_v31 }
 0x3db   : > { %v6935_v0 = vsel %vm379_vm0, %v6895_v17, %v6911_v38  ;;  %v6999_v6 = vrot.slane %v15383_v11, 2  ;;  %v7002_v50 = vrot.slane %v15369_v63, 2  ;;  %v7003_v37 = vrot.slane %v6936_v55, 2 }
 0x3dc   : > { %v7000_v1 = vrot.slane %v6935_v0, 2  ;;  %v6961_v27 = vrot.slane %v6936_v55, 1  ;;  %v7005_v7 = vrot.slane %v15365_v42, 2  ;;  %v7006_v47 = vrot.slane %v6937_v44, 2 }
 0x3dd   : > { %9130 = vrot.lane.b32.xlu1 %v9129_v54, %s9640_s14  ;;  %v6963_v3 = vrot.slane %v15365_v42, 1  ;;  %v7004_v54 = vsel %vm6623_vm7, %v7002_v50, %v7003_v37  ;;  %v6964_v40 = vrot.slane %v6937_v44, 1  ;;  %v6966_v22 = vrot.slane %v15380_v58, 1 }
 0x3de   : > { %9110 = vrot.lane.b32.xlu0 %v9109_v62, %s9634_s8  ;;  %v7001_v46 = vsel %vm6623_vm7, %v6999_v6, %v7000_v1  ;;  %v9169_v31 = vpack.i.bf16 %v15380_v58, %v15365_v42  ;;  %v7007_v33 = vsel %vm6623_vm7, %v7005_v7, %v7006_v47  ;;  %v6967_v15 = vrot.slane %v6938_v19, 1 }
 0x3df   : > { %v9244_v39 = vpack.i.bf16 %v7001_v46, %v7004_v54  ;;  %v9194_v8 = vpack.i.bf16 %v7007_v33, %v7004_v54  ;;  %v6965_v16 = vsel %vm6580_vm6, %v6963_v3, %v6964_v40  ;;  %v7008_v60 = vrot.slane %v15380_v58, 2 }
 0x3e0   : > { %v7009_v9 = vrot.slane %v6938_v19, 2  ;;  %v15415_v57 = vsel %vm6580_vm6, %v6966_v22, %v6967_v15  ;;  %v6960_v43 = vrot.slane %v15369_v63, 1  ;;  %v6957_v53 = vrot.slane %v15383_v11, 1 }
 0x3e1   : > { %9135 = vrot.lane.b32.xlu1 %v9134_v30, %s9637_s11  ;;  %v6958_v62 = vrot.slane %v6935_v0, 1  ;;  %v9199_v21 = vpack.i.bf16 %v15415_v57, %v6965_v16  ;;  %v9224_v5 = vpack.i.bf16 %v7001_v46, %v15324_v61  ;;  %v9234_v61 = vpack.i.bf16 %v7001_v46, %v15331_v26 }
 0x3e2   : > { %9115 = vrot.lane.b32.xlu0 %v9114_v25, %s9635_s9  ;;  %v15421_v30 = vsel %vm6623_vm7, %v7008_v60, %v7009_v9  ;;  %v6962_v13 = vsel %vm6580_vm6, %v6960_v43, %v6961_v27  ;;  %v7306_v55 = vsel %vm6377_vm3, %v9619_v28, 0  ;;  %v9184_v29 = vpack.i.bf16 %v15383_v11, %v15369_v63 }
 0x3e3   : > { %v9204_v35 = vpack.i.bf16 %v15421_v30, %v7007_v33  ;;  %v6959_v25 = vsel %vm6580_vm6, %v6957_v53, %v6958_v62  ;;  %v9189_v36 = vpack.i.bf16 %v6965_v16, %v6962_v13  ;;  %8646 = vmatpush3.bf16.msra.mxu1 %v7306_v55 }
 0x3e4   : > { %v9219_v24 = vpack.i.bf16 %v6959_v25, %v15309_v48  ;;  %v9229_v49 = vpack.i.bf16 %v6959_v25, %v15313_v20  ;;  %v9239_v17 = vpack.i.bf16 %v6959_v25, %v6962_v13  ;;  %v9179_v48 = vpack.i.bf16 %v15383_v11, %v15287_v56 }
 0x3e5   : > { %9140 = vrot.lane.b32.xlu1 %v9139_v2, %s9639_s13 }
 0x3e6   : > { %9125 = vrot.lane.b32.xlu0 %v9124_v34, %s9638_s12 }
 0x3e9   : > { %9170 = vrot.lane.b32.xlu1 %v9169_v31, %s9634_s8 }
 0x3ea   : > { %9145 = vrot.lane.b32.xlu0 %v15348_v32, %s9636_s10 }
 0x3ed   : > { %9180 = vrot.lane.b32.xlu1 %v9179_v48, %s9635_s9 }
 0x3ee   : > { %9150 = vrot.lane.b32.xlu0 %v9139_v2, %s9640_s14 }
 0x3f1   : > { %9195 = vrot.lane.b32.xlu1 %v9194_v8, %s9636_s10 }
 0x3f2   : > { %9155 = vrot.lane.b32.xlu0 %v15348_v32, %s9637_s11 }
 0x3f5   : > { %9200 = vrot.lane.b32.xlu1 %v9199_v21, %s9640_s14 }
 0x3f6   : > { %9160 = vrot.lane.b32.xlu0 %v9159_v10, %s9641_s15 }
 0x3f9   : > { %9205 = vrot.lane.b32.xlu1 %v9204_v35, %s9637_s11 }
 0x3fa   : > { %9165 = vrot.lane.b32.xlu0 %v9164_v18, %s9638_s12 }
 0x3fd   : > { %9220 = vrot.lane.b32.xlu1 %v9219_v24, %s9639_s13 }
 0x3fe   : > { %9175 = vrot.lane.b32.xlu0 %v9169_v31, %s9635_s9 }
 0x401   : > { %9225 = vrot.lane.b32.xlu1 %v9224_v5, %s9636_s10 }
 0x402   : > { %9185 = vrot.lane.b32.xlu0 %v9184_v29, %s9634_s8 }
 0x405   : > { %9230 = vrot.lane.b32.xlu1 %v9229_v49, %s9641_s15 }
 0x406   : > { %9190 = vrot.lane.b32.xlu0 %v9189_v36, %s9639_s13 }
 0x409   : > { %9235 = vrot.lane.b32.xlu1 %v9234_v61, %s9638_s12 }
 0x40a   : > { %9210 = vrot.lane.b32.xlu0 %v9199_v21, %s9641_s15 }
 0x40e   : > { %9215 = vrot.lane.b32.xlu0 %v9204_v35, %s9638_s12 }
 0x412   : > { %9240 = vrot.lane.b32.xlu0 %v9239_v17, %s9640_s14 }
 0x416   : > { %9245 = vrot.lane.b32.xlu0 %v9244_v39, %s9637_s11 }
 0x41b   : > { %v8639_v56 = vpop.f32.mrb[12].mxu0 }
 0x41c   : > { %v6472_v20 = vadd.f32 %v8639_v56, %v15193_v4  ;;  %v6463_v23 = vpop.f32.mrb[13].mxu0 }
 0x41d   : > { %v6464_v34 = vadd.f32 %v15193_v4, %v6463_v23  ;;  %v8640_v26 = vpop.f32.mrb[14].mxu0 }
 0x41e   : > { %v6492_v32 = vmax.f32 %v6472_v20, 0.0  ;;  %v6475_v38 = vadd.f32 %v8640_v26, %v15193_v4  ;;  %v6466_v2 = vpop.f32.mrb[15].mxu0 }
 0x41f   : > { %v6490_v44 = vmax.f32 %v6464_v34, 0.0  ;;  %v6467_v28 = vadd.f32 %v15193_v4, %v6466_v2 }
 0x420   : > { %v6885_v19 = vrot.slane %v6492_v32, 1  ;;  %v6901_v0 = vrot.slane %v6492_v32, 7  ;;  %v6917_v10 = vrot.slane %v6492_v32, 5  ;;  %v6493_v18 = vmax.f32 %v6475_v38, 0.0 }
 0x421   : > { %v6883_v1 = vrot.slane %v6490_v44, 1  ;;  %v6899_v6 = vrot.slane %v6490_v44, 7  ;;  %v6915_v50 = vrot.slane %v6490_v44, 5  ;;  %v6491_v37 = vmax.f32 %v6467_v28, 0.0 }
 0x422   : > { %v15468_v27 = vsel %vm379_vm0, %v6885_v19, %v6901_v0  ;;  %v6941_v7 = vsel %vm379_vm0, %v6901_v0, %v6917_v10  ;;  %v6886_v47 = vrot.slane %v6493_v18, 1  ;;  %v6902_v3 = vrot.slane %v6493_v18, 7 }
 0x423   : > { %v6976_v46 = vrot.slane %v6941_v7, 1  ;;  %v7018_v54 = vrot.slane %v6941_v7, 2  ;;  %v15472_v40 = vsel %vm379_vm0, %v6883_v1, %v6899_v6  ;;  %v6918_v4 = vrot.slane %v6493_v18, 5 }
 0x424   : > { %v6934_v22 = vsel %vm379_vm0, %v6886_v47, %v6902_v3  ;;  %v6884_v31 = vrot.slane %v6491_v37, 1  ;;  %v6900_v33 = vrot.slane %v6491_v37, 7  ;;  %v6916_v39 = vrot.slane %v6491_v37, 5 }
 0x425   : > { %v6942_v15 = vsel %vm379_vm0, %v6902_v3, %v6918_v4  ;;  %v9249_v8 = vpack.i.bf16 %v6934_v22, %v15468_v27  ;;  %v6939_v16 = vsel %vm379_vm0, %v6899_v6, %v6915_v50  ;;  %v7011_v13 = vrot.slane %v15472_v40, 2 }
 0x426   : > { %v7068_v60 = vrot.slane %v6942_v15, 1  ;;  %v7095_v9 = vrot.slane %v6942_v15, 2  ;;  %v15479_v43 = vsel %vm379_vm0, %v6884_v31, %v6900_v33  ;;  %v6940_v53 = vsel %vm379_vm0, %v6900_v33, %v6916_v39 }
 0x427   : > { %v6973_v62 = vrot.slane %v6940_v53, 1  ;;  %v7015_v21 = vrot.slane %v6940_v53, 2  ;;  %9250 = vrot.lane.b32.xlu1 %v9249_v8, %s9634_s8  ;;  %9255 = vrot.lane.b32.xlu0 %v9249_v8, %s9635_s9  ;;  %v9259_v5 = vpack.i.bf16 %v15479_v43, %v15472_v40  ;;  %v6970_v35 = vrot.slane %v6939_v16, 1 }
 0x428   : > { %v7012_v25 = vrot.slane %v6939_v16, 2  ;;  %v7014_v36 = vrot.slane %v15479_v43, 2  ;;  %v6969_v24 = vrot.slane %v15472_v40, 1  ;;  %v6975_v49 = vrot.slane %v15468_v27, 1 }
 0x429   : > { %v7067_v17 = vrot.slane %v6934_v22, 1  ;;  %v7017_v61 = vrot.slane %v15468_v27, 2  ;;  %v7094_v29 = vrot.slane %v6934_v22, 2  ;;  %v6972_v56 = vrot.slane %v15479_v43, 1 }
 0x42a   : > { %v7013_v55 = vsel %vm6623_vm7, %v7011_v13, %v7012_v25  ;;  %v7016_v48 = vsel %vm6623_vm7, %v7014_v36, %v7015_v21  ;;  %v6971_v34 = vsel %vm6580_vm6, %v6969_v24, %v6970_v35  ;;  %v6977_v32 = vsel %vm6580_vm6, %v6975_v49, %v6976_v46 }
 0x42b   : > { %9260 = vrot.lane.b32.xlu1 %v9259_v5, %s9635_s9  ;;  %9265 = vrot.lane.b32.xlu0 %v9259_v5, %s9634_s8  ;;  %v9314_v20 = vpack.i.bf16 %v7016_v48, %v7013_v55  ;;  %v9274_v23 = vpack.i.bf16 %v7013_v55, %v15421_v30  ;;  %v9269_v26 = vpack.i.bf16 %v6971_v34, %v15415_v57 }
 0x42c   : > { %v7069_v38 = vsel %vm6580_vm6, %v7067_v17, %v7068_v60  ;;  %v7019_v2 = vsel %vm6623_vm7, %v7017_v61, %v7018_v54  ;;  %v7096_v28 = vsel %vm6623_vm7, %v7094_v29, %v7095_v9  ;;  %v6974_v19 = vsel %vm6580_vm6, %v6972_v56, %v6973_v62 }
 0x42d   : > { %v9279_v44 = vpack.i.bf16 %v7069_v38, %v6977_v32  ;;  %v9319_v0 = vpack.i.bf16 %v7019_v2, %v7016_v48  ;;  %v9284_v10 = vpack.i.bf16 %v7096_v28, %v7019_v2  ;;  %v9309_v18 = vpack.i.bf16 %v6974_v19, %v6971_v34 }
 0x42e   : > { %v9294_v1 = vpack.i.bf16 %v6977_v32, %v6974_v19 }
 0x42f   : > { %7169 = vrot.lane.b32.xlu1 %v7013_v55, %s9638_s12  ;;  %9270 = vrot.lane.b32.xlu0 %v9269_v26, %s9639_s13  ;;  %v15506_v57 = vpop.permute.xlu1 %9035 }
 0x430   : > { %v9041_v30 = vpop.permute.xlu0 %9040 }
 0x431   : > { %v9043_v21 = vunpack.i.h.bf16 %v9041_v30  ;;  %v9042_v5 = vunpack.i.l.bf16 %v9041_v30 }
 0x433   : > { %9280 = vrot.lane.b32.xlu1 %v9279_v44, %s9640_s14  ;;  %9275 = vrot.lane.b32.xlu0 %v9274_v23, %s9636_s10  ;;  %v15510_v6 = vpop.permute.xlu1 %9050 }
 0x434   : > { %v9046_v50 = vpop.permute.xlu0 %9045  ;;  %v9052_v2 = vunpack.i.l.bf16 %v15510_v6 }
 0x435   : > { %v9048_v29 = vunpack.i.h.bf16 %v9046_v50  ;;  %v9047_v56 = vunpack.i.l.bf16 %v9046_v50 }
 0x437   : > { %9285 = vrot.lane.b32.xlu1 %v9284_v10, %s9637_s11  ;;  %9310 = vrot.lane.b32.xlu0 %v9309_v18, %s9640_s14  ;;  %v15514_v37 = vpop.permute.xlu1 %9055 }
 0x438   : > { %v9071_v7 = vpop.permute.xlu0 %9070  ;;  %v9057_v19 = vunpack.i.l.bf16 %v15514_v37 }
 0x439   : > { %v9073_v54 = vunpack.i.h.bf16 %v9071_v7  ;;  %v9072_v4 = vunpack.i.l.bf16 %v9071_v7  ;;  %v6811_v7 = vsel %vm3239_vm11, %v15200_v52, %v9052_v2  ;;  %v9058_v2 = vunpack.i.h.bf16 %v15514_v37 }
 0x43b   : > { %9290 = vrot.lane.b32.xlu1 %v9309_v18, %s9641_s15  ;;  %9315 = vrot.lane.b32.xlu0 %v9314_v20, %s9637_s11  ;;  %v15518_v47 = vpop.permute.xlu1 %9060  ;;  %v6810_v15 = vsel %vm3239_vm11, %v15208_v12, %v9073_v54  ;;  %v6809_v8 = vsel %vm3239_vm11, %v15213_v14, %v9072_v4  ;;  %v6818_v54 = vsel %vm3247_vm12, %v6811_v7, %v9057_v19 }
 0x43c   : > { %v9076_v3 = vpop.permute.xlu0 %9075  ;;  %v9063_v4 = vunpack.i.h.bf16 %v15518_v47 }
 0x43d   : > { %v9078_v31 = vunpack.i.h.bf16 %v9076_v3  ;;  %v9077_v33 = vunpack.i.l.bf16 %v9076_v3 }
 0x43f   : > { %9295 = vrot.lane.b32.xlu1 %v9294_v1, %s9639_s13  ;;  %9320 = vrot.lane.b32.xlu0 %v9319_v0, %s9638_s12  ;;  %v15522_v46 = vpop.permute.xlu1 %9065  ;;  %v6816_v60 = vsel %vm3247_vm12, %v6809_v8, %v9077_v33  ;;  %v6817_v9 = vsel %vm3247_vm12, %v6810_v15, %v9078_v31  ;;  %v9037_v1 = vunpack.i.l.bf16 %v15506_v57  ;;  %v9038_v33 = vunpack.i.h.bf16 %v15506_v57  ;;  %s9642_s13 = smov 48  }
 0x440   : > { %v9081_v22 = vpop.permute.xlu0 %9080  ;;  %v6823_v12 = vsel %vm3255_vm13, %v6816_v60, %v9042_v5  ;;  %v6824_v36 = vsel %vm3255_vm13, %v6817_v9, %v9043_v21  ;;  %v9068_v15 = vunpack.i.h.bf16 %v15522_v46  ;;  %v9067_v8 = vunpack.i.l.bf16 %v15522_v46 }
 0x441   : > { %v9083_v53 = vunpack.i.h.bf16 %v9081_v22  ;;  %v9082_v62 = vunpack.i.l.bf16 %v9081_v22  ;;  %v6825_v3 = vsel %vm3255_vm13, %v6816_v60, %v9037_v1  ;;  %v9062_v22 = vunpack.i.l.bf16 %v15518_v47 }
 0x443   : > { %9300 = vrot.lane.b32.xlu1 %v9319_v0, %s9636_s10  ;;  %v15525_v39 = vpop.permute.xlu1 %9100  ;;  %v6831_v24 = vsel %vm3264_vm14, %v6823_v12, %v9082_v62  ;;  %v6832_v49 = vsel %vm3264_vm14, %v6824_v36, %v9083_v53  ;;  %v6833_v52 = vsel %vm3264_vm14, %v6825_v3, %v9062_v22  ;;  %v6826_v53 = vsel %vm3255_vm13, %v6818_v54, %v9038_v33 }
 0x444   : > { %v9086_v16 = vpop.permute.xlu0 %9085  ;;  %v9103_v60 = vunpack.i.h.bf16 %v15525_v39  ;;  %v9102_v9 = vunpack.i.l.bf16 %v15525_v39  ;;  %v6834_v21 = vsel %vm3264_vm14, %v6826_v53, %v9063_v4  ;;  %v6841_v57 = vsel %vm3273_vm15, %v6833_v52, %v9067_v8 }
 0x445   : > { %v9088_v35 = vunpack.i.h.bf16 %v9086_v16  ;;  %v9087_v13 = vunpack.i.l.bf16 %v9086_v16 }
 0x446   : > { %v6849_v12 = vsel %vm3282_vm1, %v6841_v57, %v9102_v9 }
 0x447   : > { %9305 = vrot.lane.b32.xlu1 %v9279_v44, %s9641_s15  ;;  %v15534_v25 = vpop.permute.xlu1 %9105  ;;  %v6839_v17 = vsel %vm3273_vm15, %v6831_v24, %v9087_v13  ;;  %v6840_v61 = vsel %vm3273_vm15, %v6832_v49, %v9088_v35  ;;  %v6842_v35 = vsel %vm3273_vm15, %v6834_v21, %v9068_v15  ;;  %s9643_s15 = smov 40  }
 0x448   : > { %v9091_v14 = vpop.permute.xlu0 %9090  ;;  %v6847_v32 = vsel %vm3282_vm1, %v6839_v17, %v9047_v56  ;;  %v6848_v38 = vsel %vm3282_vm1, %v6840_v61, %v9048_v29  ;;  %v6850_v13 = vsel %vm3282_vm1, %v6842_v35, %v9103_v60 }
 0x449   : > { %v9093_v55 = vunpack.i.h.bf16 %v9091_v14  ;;  %v9092_v48 = vunpack.i.l.bf16 %v9091_v14 }
 0x44b   : > { %7175 = vrot.lane.b32.xlu1 %v7096_v28, %s9638_s12  ;;  %v9121_v20 = vpop.permute.xlu1 %9120  ;;  %v6855_v44 = vsel %vm3291_vm2, %v6847_v32, %v9092_v48  ;;  %v6856_v28 = vsel %vm3291_vm2, %v6848_v38, %v9093_v55  ;;  %v9053_v32 = vunpack.i.h.bf16 %v15510_v6 }
 0x44c   : > { %v9096_v23 = vpop.permute.xlu0 %9095  ;;  %v9123_v62 = vunpack.i.h.bf16 %v9121_v20  ;;  %v9122_v47 = vunpack.i.l.bf16 %v9121_v20 }
 0x44d   : > { %v9098_v34 = vunpack.i.h.bf16 %v9096_v23  ;;  %v9097_v26 = vunpack.i.l.bf16 %v9096_v23 }
 0x44e   : > { %v6858_v39 = vsel %vm3291_vm2, %v6850_v13, %v9123_v62  ;;  %v6857_v24 = vsel %vm3291_vm2, %v6849_v12, %v9122_v47 }
 0x44f   : > { %v6863_v0 = vsel %vm3300_vm4, %v6855_v44, %v9097_v26  ;;  %v6864_v10 = vsel %vm3300_vm4, %v6856_v28, %v9098_v34  ;;  %v15551_v18 = vpop.permute.xlu1 %9130 }
 0x450   : > { %v9111_v30 = vpop.permute.xlu0 %9110  ;;  %v7246_v50 = vpack.c.bf16 %v6864_v10, %v6863_v0 }
 0x451   : > { %v9113_v38 = vunpack.i.h.bf16 %v9111_v30  ;;  %v9112_v28 = vunpack.i.l.bf16 %v9111_v30 }
 0x452   : > { %8647 = vmatprep.mubr.msk.bf16.mxu1 %vm6352_vm5, %v7246_v50 }
 0x453   : > { %v15561_v31 = vpop.permute.xlu1 %9135 }
 0x454   : > { %v15566_v16 = vpop.permute.xlu0 %9115 }
 0x455   : > { %v9118_v8 = vunpack.i.h.bf16 %v15566_v16  ;;  %v9117_v52 = vunpack.i.l.bf16 %v15566_v16 }
 0x457   : > { %v9141_v5 = vpop.permute.xlu1 %9140 }
 0x458   : > { %v9126_v46 = vpop.permute.xlu0 %9125  ;;  %v9142_v49 = vunpack.i.l.bf16 %v9141_v5  ;;  %v9143_v60 = vunpack.i.h.bf16 %v9141_v5 }
 0x459   : > { %v9128_v36 = vunpack.i.h.bf16 %v9126_v46  ;;  %v9127_v14 = vunpack.i.l.bf16 %v9126_v46 }
 0x45a   : > { %v6813_v56 = vsel %vm3239_vm11, %v15278_v41, %v9142_v49  ;;  %v6812_v41 = vsel %vm3239_vm11, %v15205_v45, %v9053_v32  ;;  %v6814_v16 = vsel %vm3239_vm11, %v15291_v59, %v9143_v60 }
 0x45b   : > { %v6866_v17 = vsel %vm3300_vm4, %v6858_v39, %v9128_v36  ;;  %v6865_v61 = vsel %vm3300_vm4, %v6857_v24, %v9127_v14  ;;  %v15581_v55 = vpop.permute.xlu1 %9170  ;;  %v6819_v3 = vsel %vm3247_vm12, %v6812_v41, %v9058_v2 }
 0x45c   : > { %v9146_v48 = vpop.permute.xlu0 %9145  ;;  %v7247_v29 = vpack.c.bf16 %v6866_v17, %v6865_v61  ;;  %v6827_v37 = vsel %vm3255_vm13, %v6819_v3, %v9112_v28  ;;  %v9108_v61 = vunpack.i.h.bf16 %v15534_v25 }
 0x45d   : > { %v9147_v20 = vunpack.i.l.bf16 %v9146_v48  ;;  %v9148_v36 = vunpack.i.h.bf16 %v9146_v48 }
 0x45e   : > { %8648 = vmatmul.mubr.msk.bf16.vlgmr.msra.gmra.mrb[0].mxu1 %vm6352_vm5, %v7247_v29  ;;  %v9107_v29 = vunpack.i.l.bf16 %v15534_v25  ;;  %v9138_v25 = vunpack.i.h.bf16 %v15561_v31 }
 0x45f   : > { %v15586_v23 = vpop.permute.xlu1 %9180  ;;  %v6820_v26 = vsel %vm3247_vm12, %v6813_v56, %v9147_v20  ;;  %v6821_v17 = vsel %vm3247_vm12, %v6814_v16, %v9148_v36  ;;  %v9133_v56 = vunpack.i.h.bf16 %v15551_v18  ;;  %v9132_v20 = vunpack.i.l.bf16 %v15551_v18 }
 0x460   : > { %v9151_v34 = vpop.permute.xlu0 %9150  ;;  %v6828_v19 = vsel %vm3255_vm13, %v6820_v26, %v9113_v38  ;;  %v6829_v32 = vsel %vm3255_vm13, %v6821_v17, %v9107_v29  ;;  %v9172_v38 = vunpack.i.l.bf16 %v15581_v55 }
 0x461   : > { %v9153_v10 = vunpack.i.h.bf16 %v9151_v34  ;;  %v9152_v1 = vunpack.i.l.bf16 %v9151_v34 }
 0x463   : > { %v15591_v44 = vpop.permute.xlu1 %9195  ;;  %v6836_v6 = vsel %vm3264_vm14, %v6828_v19, %v9153_v10  ;;  %v6835_v30 = vsel %vm3264_vm14, %v6827_v37, %v9152_v1  ;;  %v9137_v10 = vunpack.i.l.bf16 %v15561_v31 }
 0x464   : > { %v9156_v0 = vpop.permute.xlu0 %9155 }
 0x465   : > { %v9158_v50 = vunpack.i.h.bf16 %v9156_v0  ;;  %v9157_v7 = vunpack.i.l.bf16 %v9156_v0 }
 0x467   : > { %v15598_v54 = vpop.permute.xlu1 %9200  ;;  %v6843_v22 = vsel %vm3273_vm15, %v6835_v30, %v9157_v7  ;;  %v6844_v33 = vsel %vm3273_vm15, %v6836_v6, %v9158_v50  ;;  %v9182_v7 = vunpack.i.l.bf16 %v15586_v23 }
 0x468   : > { %v15601_v4 = vpop.permute.xlu0 %9160  ;;  %v6851_v62 = vsel %vm3282_vm1, %v6843_v22, %v9117_v52  ;;  %v6852_v47 = vsel %vm3282_vm1, %v6844_v33, %v9118_v8  ;;  %v9202_v19 = vunpack.i.l.bf16 %v15598_v54  ;;  %v9198_v33 = vunpack.i.h.bf16 %v15591_v44 }
 0x469   : > { %v9163_v45 = vunpack.i.h.bf16 %v15601_v4  ;;  %v9162_v15 = vunpack.i.l.bf16 %v15601_v4  ;;  %v9173_v52 = vunpack.i.h.bf16 %v15581_v55 }
 0x46b   : > { %v15610_v9 = vpop.permute.xlu1 %9205  ;;  %v6859_v35 = vsel %vm3291_vm2, %v6851_v62, %v9162_v15  ;;  %v6860_v46 = vsel %vm3291_vm2, %v6852_v47, %v9163_v45 }
 0x46c   : > { %v15612_v53 = vpop.permute.xlu0 %9165  ;;  %v9207_v1 = vunpack.i.l.bf16 %v15610_v9 }
 0x46d   : > { %v9168_v21 = vunpack.i.h.bf16 %v15612_v53  ;;  %v9167_v57 = vunpack.i.l.bf16 %v15612_v53 }
 0x46f   : > { %v6867_v5 = vsel %vm3300_vm4, %v6859_v35, %v9167_v57  ;;  %v6868_v13 = vsel %vm3300_vm4, %v6860_v46, %v9168_v21  ;;  %v9221_v12 = vpop.permute.xlu1 %9220  ;;  %v9203_v35 = vunpack.i.h.bf16 %v15598_v54 }
 0x470   : > { %v7248_v14 = vpack.c.bf16 %v6868_v13, %v6867_v5  ;;  %v15624_v39 = vpop.permute.xlu0 %9175  ;;  %v9223_v24 = vunpack.i.h.bf16 %v9221_v12  ;;  %v9222_v49 = vunpack.i.l.bf16 %v9221_v12 }
 0x472   : > { %8651 = vmatprep.mubr.msk.bf16.mxu1 %vm6352_vm5, %v7248_v14  ;;  %v7184_v2 = vsel %vm3239_vm11, %v15383_v11, %v9223_v24  ;;  %v6815_v28 = vsel %vm3239_vm11, %v15274_v51, %v9222_v49  ;;  %v6837_v51 = vsel %vm3264_vm14, %v6829_v32, %v9132_v20  ;;  %v9197_v49 = vunpack.i.l.bf16 %v15591_v44 }
 0x473   : > { %v9226_v59 = vpop.permute.xlu1 %9225  ;;  %v6845_v60 = vsel %vm3273_vm15, %v6837_v51, %v9137_v10 }
 0x474   : > { %v9186_v34 = vpop.permute.xlu0 %9185  ;;  %v9228_v48 = vunpack.i.h.bf16 %v9226_v59  ;;  %v9227_v26 = vunpack.i.l.bf16 %v9226_v59  ;;  %v6853_v57 = vsel %vm3282_vm1, %v6845_v60, %v9182_v7 }
 0x475   : > { %v9188_v59 = vunpack.i.h.bf16 %v9186_v34 }
 0x476   : > { %v6822_v0 = vsel %vm3247_vm12, %v6815_v28, %v9227_v26  ;;  %v7191_v18 = vsel %vm3247_vm12, %v7184_v2, %v9228_v48  ;;  %v9183_v2 = vunpack.i.h.bf16 %v15586_v23 }
 0x477   : > { %v6830_v41 = vsel %vm3255_vm13, %v6822_v0, %v9108_v61  ;;  %v7200_v50 = vsel %vm3255_vm13, %v7191_v18, %v9172_v38  ;;  %v9231_v11 = vpop.permute.xlu1 %9230 }
 0x478   : > { %v9191_v3 = vpop.permute.xlu0 %9190  ;;  %v6838_v6 = vsel %vm3264_vm14, %v6830_v41, %v9133_v56  ;;  %v7208_v37 = vsel %vm3264_vm14, %v7200_v50, %v9202_v19  ;;  %v9232_v22 = vunpack.i.l.bf16 %v9231_v11  ;;  %v9187_v56 = vunpack.i.l.bf16 %v9186_v34 }
 0x479   : > { %v9193_v4 = vunpack.i.h.bf16 %v9191_v3  ;;  %v6846_v30 = vsel %vm3273_vm15, %v6838_v6, %v9138_v25  ;;  %v15652_v31 = vsel %vm3273_vm15, %v7208_v37, %v9207_v1  ;;  %v9192_v36 = vunpack.i.l.bf16 %v9191_v3 }
 0x47a   : > { %v6854_v15 = vsel %vm3282_vm1, %v6846_v30, %v9118_v8  ;;  %v9208_v8 = vunpack.i.h.bf16 %v15610_v9  ;;  %v6861_v13 = vsel %vm3291_vm2, %v6853_v57, %v9232_v22  ;;  %v7198_v48 = vsel %vm3255_vm13, %v7191_v18, %v9187_v56 }
 0x47b   : > { %v7186_v53 = vsel %vm3239_vm11, %v15365_v42, %v9193_v4  ;;  %v9236_v62 = vpop.permute.xlu1 %9235  ;;  %v6862_v47 = vsel %vm3291_vm2, %v6854_v15, %v9163_v45  ;;  %v7185_v9 = vsel %vm3239_vm11, %v15369_v63, %v9192_v36  ;;  %v9177_v63 = vunpack.i.l.bf16 %v15624_v39 }
 0x47c   : > { %v7193_v46 = vsel %vm3247_vm12, %v7186_v53, %v9198_v33  ;;  %v15664_v16 = vpop.permute.xlu0 %9210  ;;  %v9237_v5 = vunpack.i.l.bf16 %v9236_v62  ;;  %v6870_v12 = vsel %vm3300_vm4, %v6862_v47, %v9168_v21  ;;  %v7192_v61 = vsel %vm3247_vm12, %v7185_v9, %v9197_v49 }
 0x47d   : > { %v7201_v55 = vsel %vm3255_vm13, %v7193_v46, %v9173_v52  ;;  %v7199_v26 = vsel %vm3255_vm13, %v7192_v61, %v9188_v59  ;;  %v9212_v25 = vunpack.i.l.bf16 %v15664_v16  ;;  %v9233_v19 = vunpack.i.h.bf16 %v9231_v11 }
 0x47e   : > { %v6869_v42 = vsel %vm3300_vm4, %v6861_v13, %v9237_v5  ;;  %v7209_v45 = vsel %vm3264_vm14, %v7201_v55, %v9203_v35  ;;  %v9238_v10 = vunpack.i.h.bf16 %v9236_v62  ;;  %v9178_v52 = vunpack.i.h.bf16 %v15624_v39 }
 0x47f   : > { %v7249_v14 = vpack.c.bf16 %v6870_v12, %v6869_v42  ;;  %v7217_v54 = vsel %vm3273_vm15, %v7209_v45, %v9208_v8  ;;  %v9213_v35 = vunpack.i.h.bf16 %v15664_v16 }
 0x480   : > { %v15673_v24 = vpop.permute.xlu0 %9215  ;;  %v7224_v47 = vsel %vm3282_vm1, %v15652_v31, %v9178_v52 }
 0x481   : > { %8652 = vmatmul.mubr.msk.bf16.gmra.mrb[4].mxu1 %vm6352_vm5, %v7249_v14  ;;  %v9217_v18 = vunpack.i.l.bf16 %v15673_v24  ;;  %v9218_v5 = vunpack.i.h.bf16 %v15673_v24  ;;  %v7232_v8 = vsel %vm3291_vm2, %v7224_v47, %v9213_v35 }
 0x483   : > { %v7240_v49 = vsel %vm3300_vm4, %v7232_v8, %v9218_v5 }
 0x484   : > { %v9241_v17 = vpop.permute.xlu0 %9240 }
 0x485   : > { %v9243_v29 = vunpack.i.h.bf16 %v9241_v17  ;;  %v9242_v21 = vunpack.i.l.bf16 %v9241_v17 }
 0x487   : > { %v7206_v44 = vsel %vm3264_vm14, %v7198_v48, %v9242_v21  ;;  %v7207_v28 = vsel %vm3264_vm14, %v7199_v26, %v9243_v29 }
 0x488   : > { %v9246_v20 = vpop.permute.xlu0 %9245 }
 0x489   : > { %v9248_v32 = vunpack.i.h.bf16 %v9246_v20  ;;  %v9247_v38 = vunpack.i.l.bf16 %v9246_v20 }
 0x48b   : > { %v7214_v34 = vsel %vm3273_vm15, %v7206_v44, %v9247_v38  ;;  %v7215_v0 = vsel %vm3273_vm15, %v7207_v28, %v9248_v32 }
 0x48c   : > { %v7222_v1 = vsel %vm3282_vm1, %v7214_v34, %v9183_v2  ;;  %v7223_v23 = vsel %vm3282_vm1, %v7215_v0, %v9177_v63 }
 0x48d   : > { %v7230_v41 = vsel %vm3291_vm2, %v7222_v1, %v9233_v19  ;;  %v7231_v50 = vsel %vm3291_vm2, %v7223_v23, %v9212_v25 }
 0x48e   : > { %v7238_v7 = vsel %vm3300_vm4, %v7230_v41, %v9238_v10  ;;  %v7239_v51 = vsel %vm3300_vm4, %v7231_v50, %v9217_v18 }
 0x48f   : > { %v7250_v11 = vpack.c.bf16 %v7239_v51, %v7238_v7 }
 0x491   : > { %8655 = vmatprep.mubr.msk.bf16.mxu1 %vm6352_vm5, %v7250_v11 }
 0x499   : > { %v15697_v3 = vpop.permute.xlu1 %9250  ;;  %v15699_v6 = vpop.permute.xlu0 %9255 }
 0x49a   : > { %v9253_v17 = vunpack.i.h.bf16 %v15697_v3  ;;  %v9252_v2 = vunpack.i.l.bf16 %v15697_v3  ;;  %v9257_v28 = vunpack.i.l.bf16 %v15699_v6 }
 0x49d   : > { %v9261_v37 = vpop.permute.xlu1 %9260  ;;  %v9266_v4 = vpop.permute.xlu0 %9265 }
 0x49e   : > { %v9262_v46 = vunpack.i.l.bf16 %v9261_v37  ;;  %v9267_v9 = vunpack.i.l.bf16 %v9266_v4  ;;  %v9268_v59 = vunpack.i.h.bf16 %v9266_v4  ;;  %v9263_v63 = vunpack.i.h.bf16 %v9261_v37 }
 0x4a0   : > { %v7225_v31 = vsel %vm3282_vm1, %v7217_v54, %v9262_v46 }
 0x4a1   : > { %v7170_v30 = vpop.permute.xlu1 %7169  ;;  %v9271_v22 = vpop.permute.xlu0 %9270 }
 0x4a2   : > { %v9272_v60 = vunpack.i.l.bf16 %v9271_v22  ;;  %v9273_v55 = vunpack.i.h.bf16 %v9271_v22 }
 0x4a4   : > { %v7187_v13 = vsel %vm3239_vm11, %v15380_v58, %v9272_v60  ;;  %v7188_v58 = vsel %vm3239_vm11, %v15472_v40, %v9273_v55  ;;  %v9258_v40 = vunpack.i.h.bf16 %v15699_v6 }
 0x4a5   : > { %v15701_v33 = vpop.permute.xlu1 %9280  ;;  %v9276_v15 = vpop.permute.xlu0 %9275 }
 0x4a6   : > { %v9277_v57 = vunpack.i.l.bf16 %v9276_v15  ;;  %v9278_v12 = vunpack.i.h.bf16 %v9276_v15  ;;  %v9283_v25 = vunpack.i.h.bf16 %v15701_v33  ;;  %v9282_v19 = vunpack.i.l.bf16 %v15701_v33 }
 0x4a8   : > { %v7194_v45 = vsel %vm3247_vm12, %v7187_v13, %v9277_v57  ;;  %v7195_v56 = vsel %vm3247_vm12, %v7188_v58, %v9278_v12 }
 0x4a9   : > { %v15704_v53 = vpop.permute.xlu1 %9285  ;;  %v9311_v62 = vpop.permute.xlu0 %9310  ;;  %v7202_v61 = vsel %vm3255_vm13, %v7194_v45, %v9267_v9  ;;  %v7203_v34 = vsel %vm3255_vm13, %v7195_v56, %v9268_v59  ;;  %v15765_v9 = vld [vmem:[%s16449_s4] ss:$0 sm:$0xff] }
 0x4aa   : > { %v9312_v36 = vunpack.i.l.bf16 %v9311_v62  ;;  %v9313_v54 = vunpack.i.h.bf16 %v9311_v62  ;;  %v9288_v18 = vunpack.i.h.bf16 %v15704_v53  ;;  %v9287_v3 = vunpack.i.l.bf16 %v15704_v53 }
 0x4ac   : > { %v7210_v20 = vsel %vm3264_vm14, %v7202_v61, %v9312_v36  ;;  %v7211_v50 = vsel %vm3264_vm14, %v7203_v34, %v9313_v54 }
 0x4ad   : > { %v9291_v39 = vpop.permute.xlu1 %9290  ;;  %v9316_v42 = vpop.permute.xlu0 %9315 }
 0x4ae   : > { %v9292_v14 = vunpack.i.l.bf16 %v9291_v39  ;;  %v9317_v16 = vunpack.i.l.bf16 %v9316_v42  ;;  %v9318_v44 = vunpack.i.h.bf16 %v9316_v42  ;;  %v9293_v7 = vunpack.i.h.bf16 %v9291_v39 }
 0x4b0   : > { %v7233_v24 = vsel %vm3291_vm2, %v7225_v31, %v9292_v14  ;;  %v7218_v48 = vsel %vm3273_vm15, %v7210_v20, %v9317_v16  ;;  %v7219_v6 = vsel %vm3273_vm15, %v7211_v50, %v9318_v44 }
 0x4b1   : > { %v9296_v29 = vpop.permute.xlu1 %9295  ;;  %v7241_v21 = vsel %vm3300_vm4, %v7233_v24, %v7170_v30  ;;  %v7226_v10 = vsel %vm3282_vm1, %v7218_v48, %v9263_v63  ;;  %v9321_v1 = vpop.permute.xlu0 %9320  ;;  %v7227_v47 = vsel %vm3282_vm1, %v7219_v6, %v9257_v28 }
 0x4b2   : > { %v9298_v26 = vunpack.i.h.bf16 %v9296_v29  ;;  %v9297_v32 = vunpack.i.l.bf16 %v9296_v29  ;;  %v7251_v38 = vpack.c.bf16 %v7241_v21, %v7240_v49  ;;  %v9322_v30 = vunpack.i.l.bf16 %v9321_v1 }
 0x4b3   : > { %v7234_v22 = vsel %vm3291_vm2, %v7226_v10, %v9293_v7  ;;  %v9323_v62 = vunpack.i.h.bf16 %v9321_v1 }
 0x4b4   : > { %8656 = vmatmul.mubr.msk.bf16.gmra.mrb[8].mxu1 %vm6352_vm5, %v7251_v38  ;;  %v7190_v51 = vsel %vm3239_vm11, %v15468_v27, %v9298_v26  ;;  %v7189_v11 = vsel %vm3239_vm11, %v15479_v43, %v9297_v32  ;;  %v7242_v55 = vsel %vm3300_vm4, %v7234_v22, %v9322_v30  ;;  %vm7791_vm11 = vcmask 523264  }
 0x4b5   : > { %v9301_v0 = vpop.permute.xlu1 %9300 }
 0x4b6   : > { %v9303_v23 = vunpack.i.h.bf16 %v9301_v0  ;;  %v9302_v41 = vunpack.i.l.bf16 %v9301_v0 }
 0x4b8   : > { %v7196_v37 = vsel %vm3247_vm12, %v7189_v11, %v9302_v41  ;;  %v7197_v4 = vsel %vm3247_vm12, %v7190_v51, %v9303_v23 }
 0x4b9   : > { %v7204_v33 = vsel %vm3255_vm13, %v7196_v37, %v9252_v2  ;;  %v7205_v15 = vsel %vm3255_vm13, %v7197_v4, %v9253_v17  ;;  %v9306_v52 = vpop.permute.xlu1 %9305  ;;  %vm8226_vm13 = vcmask 588800  }
 0x4ba   : > { %v7213_v27 = vsel %vm3264_vm14, %v7205_v15, %v9283_v25  ;;  %v9308_v60 = vunpack.i.h.bf16 %v9306_v52  ;;  %v9307_v43 = vunpack.i.l.bf16 %v9306_v52  ;;  %v7212_v53 = vsel %vm3264_vm14, %v7204_v33, %v9282_v19 }
 0x4bb   : > { %v7220_v57 = vsel %vm3273_vm15, %v7212_v53, %v9287_v3  ;;  %v7221_v35 = vsel %vm3273_vm15, %v7213_v27, %v9288_v18 }
 0x4bc   : > { %v7235_v46 = vsel %vm3291_vm2, %v7227_v47, %v9307_v43  ;;  %v7228_v5 = vsel %vm3282_vm1, %v7220_v57, %v9258_v40  ;;  %v7229_v8 = vsel %vm3282_vm1, %v7221_v35, %v9257_v28 }
 0x4bd   : > { %v7176_v13 = vpop.permute.xlu1 %7175  ;;  %v7236_v39 = vsel %vm3291_vm2, %v7228_v5, %v9308_v60  ;;  %v7237_v42 = vsel %vm3291_vm2, %v7229_v8, %v9307_v43  ;;  %v7243_v12 = vsel %vm3300_vm4, %v7235_v46, %v9323_v62 }
 0x4be   : > { %v7244_v45 = vsel %vm3300_vm4, %v7236_v39, %v7176_v13  ;;  %v7245_v36 = vsel %vm3300_vm4, %v7237_v42, %v9323_v62  ;;  %v7252_v14 = vpack.c.bf16 %v7243_v12, %v7242_v55 }
 0x4bf   : > { %v7253_v31 = vpack.c.bf16 %v7245_v36, %v7244_v45 }
 0x4c0   : > { %8659 = vmatprep.mubr.msk.bf16.mxu1 %vm6352_vm5, %v7252_v14 }
 0x4c1   : > { %8660 = vmatmul.mubr.msk.bf16.gmra.mrb[12].mxu1 %vm6352_vm5, %v7253_v31 }
 0x531   : > { %v8649_v16 = vpop.f32.mrb[0].mxu1 }
 0x532   : > { %v7351_v49 = vadd.f32 %v8649_v16, %v15765_v9  ;;  %v7342_v24 = vpop.f32.mrb[1].mxu1 }
 0x533   : > { %v7343_v17 = vadd.f32 %v15765_v9, %v7342_v24  ;;  %v8650_v58 = vpop.f32.mrb[2].mxu1 }
 0x534   : > { %v15769_v61 = vmax.f32 %v7351_v49, 0.0  ;;  %v7354_v29 = vadd.f32 %v8650_v58, %v15765_v9  ;;  %v7345_v21 = vpop.f32.mrb[3].mxu1 }
 0x535   : > { %v15772_v59 = vmax.f32 %v7343_v17, 0.0  ;;  %v7346_v56 = vadd.f32 %v15765_v9, %v7345_v21 }
 0x536   : > { %v7431_v54 = vrot.slane %v15769_v61, 1  ;;  %v7447_v20 = vrot.slane %v15769_v61, 7  ;;  %v7463_v48 = vrot.slane %v15769_v61, 5  ;;  %v15778_v26 = vmax.f32 %v7354_v29, 0.0 }
 0x537   : > { %v7430_v32 = vrot.slane %v15772_v59, 1  ;;  %v7446_v38 = vrot.slane %v15772_v59, 7  ;;  %v15782_v2 = vmax.f32 %v7346_v56, 0.0  ;;  %v7462_v25 = vrot.slane %v15772_v59, 5 }
 0x538   : > { %v15785_v40 = vsel %vm379_vm0, %v7431_v54, %v7447_v20  ;;  %v7487_v63 = vsel %vm379_vm0, %v7447_v20, %v7463_v48  ;;  %v7432_v44 = vrot.slane %v15778_v26, 1  ;;  %v7448_v28 = vrot.slane %v15778_v26, 7 }
 0x539   : > { %v7464_v19 = vrot.slane %v15778_v26, 5  ;;  %v7429_v34 = vrot.slane %v15782_v2, 1  ;;  %v7445_v0 = vrot.slane %v15782_v2, 7  ;;  %v7461_v10 = vrot.slane %v15782_v2, 5 }
 0x53a   : > { %v15795_v18 = vsel %vm379_vm0, %v7432_v44, %v7448_v28  ;;  %v15799_v1 = vsel %vm379_vm0, %v7430_v32, %v7446_v38  ;;  %v7513_v23 = vrot.slane %v15785_v40, 1  ;;  %v7514_v51 = vrot.slane %v7487_v63, 1 }
 0x53b   : > { %v7488_v41 = vsel %vm379_vm0, %v7448_v28, %v7464_v19  ;;  %v15804_v50 = vsel %vm379_vm0, %v7429_v34, %v7445_v0  ;;  %v9324_v7 = vpack.i.bf16 %v15795_v18, %v15785_v40  ;;  %v7485_v11 = vsel %vm379_vm0, %v7445_v0, %v7461_v10 }
 0x53c   : > { %v9329_v3 = vpack.i.bf16 %v15804_v50, %v15799_v1  ;;  %v7516_v6 = vrot.slane %v15795_v18, 1  ;;  %v7517_v37 = vrot.slane %v7488_v41, 1  ;;  %v7486_v4 = vsel %vm379_vm0, %v7446_v38, %v7462_v25 }
 0x53d   : > { %9325 = vrot.lane.b32.xlu1 %v9324_v7, %s9635_s9  ;;  %v7515_v30 = vsel %vm6580_vm6, %v7513_v23, %v7514_v51  ;;  %v7555_v22 = vrot.slane %v15785_v40, 2  ;;  %v7556_v33 = vrot.slane %v7487_v63, 2  ;;  %v7558_v52 = vrot.slane %v15795_v18, 2  ;;  %v9620_v7 = vld [vmem:[%s16450_s5] sm:$0xff]   ;;  %v9621_v51 = vld [vmem:[%s16450_s5 + $0x8] sm:$0xff]  }
 0x53e   : > { %9330 = vrot.lane.b32.xlu0 %v9329_v3, %s9635_s9  ;;  %v15818_v15 = vsel %vm6580_vm6, %v7516_v6, %v7517_v37  ;;  %v7559_v27 = vrot.slane %v7488_v41, 2  ;;  %v7507_v60 = vrot.slane %v15804_v50, 1  ;;  %v7508_v53 = vrot.slane %v7485_v11, 1  ;;  %8663 = vmatprep.subr.bf16.mxu0 %v9620_v7 }
 0x53f   : > { %v9339_v43 = vpack.i.bf16 %v15818_v15, %v7515_v30  ;;  %v7510_v62 = vrot.slane %v15799_v1, 1  ;;  %v9334_v47 = vpack.i.bf16 %v15785_v40, %v15804_v50  ;;  %v7511_v35 = vrot.slane %v7486_v4, 1  ;;  %8689 = vmatprep.subr.bf16.mxu1 %v9620_v7  ;;  %8664 = vmatpush3.bf16.msra.mxu0 %v9620_v7 }
 0x540   : > { %v15827_v57 = vsel %vm6623_vm7, %v7558_v52, %v7559_v27  ;;  %v7509_v46 = vsel %vm6580_vm6, %v7507_v60, %v7508_v53  ;;  %v7549_v5 = vrot.slane %v15804_v50, 2  ;;  %v7550_v8 = vrot.slane %v7485_v11, 2  ;;  %8694 = vmatpush3.bf16.msra.mxu1 %v9620_v7  ;;  %8665 = vmatprep.subr.bf16.mxu0 %v9621_v51 }
 0x541   : > { %9340 = vrot.lane.b32.xlu1 %v9339_v43, %s9636_s10  ;;  %v7557_v55 = vsel %vm6623_vm7, %v7555_v22, %v7556_v33  ;;  %v7512_v39 = vsel %vm6580_vm6, %v7510_v62, %v7511_v35  ;;  %v7552_v42 = vrot.slane %v15799_v1, 2  ;;  %v7553_v12 = vrot.slane %v7486_v4, 2  ;;  %v9622_v62 = vld [vmem:[%s16450_s5 + $0x10] sm:$0xff]   ;;  %8690 = vmatprep.subr.bf16.mxu1 %v9621_v51 }
 0x542   : > { %9335 = vrot.lane.b32.xlu0 %v9334_v47, %s9642_s13  ;;  %v9344_v13 = vpack.i.bf16 %v15827_v57, %v7557_v55  ;;  %v9359_v45 = vpack.i.bf16 %v7512_v39, %v7509_v46  ;;  %v7551_v36 = vsel %vm6623_vm7, %v7549_v5, %v7550_v8  ;;  %v9369_v16 = vpack.i.bf16 %v7509_v46, %v7512_v39 }
 0x543   : > { %v7554_v14 = vsel %vm6623_vm7, %v7552_v42, %v7553_v12  ;;  %v9379_v24 = vpack.i.bf16 %v7515_v30, %v7509_v46  ;;  %v9384_v32 = vpack.i.bf16 %v7557_v55, %v7551_v36  ;;  %8666 = vmatpush3.bf16.msra.mxu0 %v9621_v51 }
 0x544   : > { %v9364_v31 = vpack.i.bf16 %v7554_v14, %v7551_v36  ;;  %v9374_v49 = vpack.i.bf16 %v7551_v36, %v7554_v14  ;;  %8667 = vmatprep.subr.bf16.mxu0 %v9622_v62  ;;  %8695 = vmatpush3.bf16.msra.mxu1 %v9621_v51 }
 0x545   : > { %9345 = vrot.lane.b32.xlu1 %v9344_v13, %s9640_s14  ;;  %8691 = vmatprep.subr.bf16.mxu1 %v9622_v62 }
 0x546   : > { %9360 = vrot.lane.b32.xlu0 %v9359_v45, %s9636_s10  ;;  %v9623_v45 = vld [vmem:[%s16450_s5 + $0x18] sm:$0xff]  }
 0x547   : > { %8668 = vmatpush3.bf16.msra.mxu0 %v9622_v62 }
 0x548   : > { %8669 = vmatprep.subr.bf16.mxu0 %v9623_v45  ;;  %8696 = vmatpush3.bf16.msra.mxu1 %v9622_v62 }
 0x549   : > { %9350 = vrot.lane.b32.xlu1 %v9339_v43, %s9638_s12  ;;  %8692 = vmatprep.subr.bf16.mxu1 %v9623_v45 }
 0x54a   : > { %9365 = vrot.lane.b32.xlu0 %v9364_v31, %s9640_s14 }
 0x54b   : > { %8670 = vmatpush3.bf16.msra.mxu0 %v9623_v45 }
 0x54c   : > { %8697 = vmatpush3.bf16.msra.mxu1 %v9623_v45 }
 0x54d   : > { %9355 = vrot.lane.b32.xlu1 %v9344_v13, %s9643_s15 }
 0x54e   : > { %9370 = vrot.lane.b32.xlu0 %v9369_v16, %s9638_s12 }
 0x552   : > { %9375 = vrot.lane.b32.xlu0 %v9374_v49, %s9643_s15 }
 0x554   : > { %v8653_v17 = vpop.f32.mrb[4].mxu1 }
 0x555   : > { %v7367_v58 = vadd.f32 %v8653_v17, %v15765_v9  ;;  %v7358_v29 = vpop.f32.mrb[5].mxu1 }
 0x556   : > { %9380 = vrot.lane.b32.xlu0 %v9379_v24, %s9644_s17  ;;  %v7359_v21 = vadd.f32 %v15765_v9, %v7358_v29  ;;  %v8654_v56 = vpop.f32.mrb[6].mxu1 }
 0x557   : > { %v15849_v54 = vmax.f32 %v7367_v58, 0.0  ;;  %v7370_v20 = vadd.f32 %v8654_v56, %v15765_v9  ;;  %v7361_v48 = vpop.f32.mrb[7].mxu1 }
 0x558   : > { %v15852_v38 = vmax.f32 %v7359_v21, 0.0  ;;  %v7362_v63 = vadd.f32 %v15765_v9, %v7361_v48 }
 0x559   : > { %v15855_v44 = vmax.f32 %v7370_v20, 0.0  ;;  %v7435_v0 = vrot.slane %v15849_v54, 1  ;;  %v7451_v10 = vrot.slane %v15849_v54, 7  ;;  %v7467_v4 = vrot.slane %v15849_v54, 5 }
 0x55a   : > { %9385 = vrot.lane.b32.xlu0 %v9384_v32, %s9645_s18  ;;  %v7433_v28 = vrot.slane %v15852_v38, 1  ;;  %v7449_v25 = vrot.slane %v15852_v38, 7  ;;  %v7465_v19 = vrot.slane %v15852_v38, 5  ;;  %v15861_v34 = vmax.f32 %v7362_v63, 0.0 }
 0x55b   : > { %v7436_v23 = vrot.slane %v15855_v44, 1  ;;  %v7452_v41 = vrot.slane %v15855_v44, 7  ;;  %v7468_v6 = vrot.slane %v15855_v44, 5  ;;  %v15897_v47 = vsel %vm379_vm0, %v7435_v0, %v7451_v10 }
 0x55c   : > { %v15874_v11 = vsel %vm379_vm0, %v7433_v28, %v7449_v25  ;;  %v7489_v3 = vsel %vm379_vm0, %v7449_v25, %v7465_v19  ;;  %v7434_v37 = vrot.slane %v15861_v34, 1  ;;  %v7450_v30 = vrot.slane %v15861_v34, 7 }
 0x55d   : > { %v9389_v22 = vpack.i.bf16 %v15874_v11, %v15795_v18  ;;  %v7466_v33 = vrot.slane %v15861_v34, 5  ;;  %v15885_v52 = vsel %vm379_vm0, %v7436_v23, %v7452_v41  ;;  %v7519_v27 = vrot.slane %v15874_v11, 1 }
 0x55e   : > { %v7520_v60 = vrot.slane %v7489_v3, 1  ;;  %v7492_v43 = vsel %vm379_vm0, %v7452_v41, %v7468_v6  ;;  %v15890_v53 = vsel %vm379_vm0, %v7434_v37, %v7450_v30  ;;  %v7561_v46 = vrot.slane %v15874_v11, 2 }
 0x55f   : > { %9390 = vrot.lane.b32.xlu1 %v9389_v22, %s9642_s13  ;;  %v9399_v35 = vpack.i.bf16 %v15890_v53, %v15874_v11  ;;  %v7562_v5 = vrot.slane %v7489_v3, 2  ;;  %v7491_v8 = vsel %vm379_vm0, %v7451_v10, %v7467_v4  ;;  %v9394_v55 = vpack.i.bf16 %v15885_v52, %v15897_v47 }
 0x560   : > { %v7490_v13 = vsel %vm379_vm0, %v7450_v30, %v7466_v33  ;;  %v7521_v39 = vsel %vm6580_vm6, %v7519_v27, %v7520_v60  ;;  %v7617_v42 = vrot.slane %v15885_v52, 1  ;;  %v7618_v12 = vrot.slane %v7492_v43, 1 }
 0x561   : > { %9400 = vrot.lane.b32.xlu0 %v9399_v35, %s9635_s9  ;;  %v9404_v36 = vpack.i.bf16 %v15897_v47, %v15890_v53  ;;  %v7563_v14 = vsel %vm6623_vm7, %v7561_v46, %v7562_v5  ;;  %v7525_v31 = vrot.slane %v15897_v47, 1  ;;  %v7526_v16 = vrot.slane %v7491_v8, 1 }
 0x562   : > { %v9409_v49 = vpack.i.bf16 %v7521_v39, %v15818_v15  ;;  %v7564_v24 = vrot.slane %v15890_v53, 2  ;;  %v7565_v17 = vrot.slane %v7490_v13, 2  ;;  %v15921_v58 = vsel %vm6580_vm6, %v7617_v42, %v7618_v12  ;;  %v9624_v15 = vld [vmem:[%s16450_s5 + $0x20] ss:$0 sps:$4 sm:$0xff]  }
 0x563   : > { %9395 = vrot.lane.b32.xlu1 %v9394_v55, %s9635_s9  ;;  %v7644_v29 = vrot.slane %v15885_v52, 2  ;;  %v7645_v21 = vrot.slane %v7492_v43, 2  ;;  %v9414_v56 = vpack.i.bf16 %v7563_v14, %v15827_v57  ;;  %v15930_v20 = vsel %vm6580_vm6, %v7525_v31, %v7526_v16  ;;  %8701 = vmatprep.subr.msk.bf16.mxu0 %vm8251_vm8, %v9624_v15 }
 0x564   : > { %v7567_v48 = vrot.slane %v15897_v47, 2  ;;  %v7568_v32 = vrot.slane %v7491_v8, 2  ;;  %v9419_v63 = vpack.i.bf16 %v15921_v58, %v15930_v20  ;;  %v7566_v28 = vsel %vm6623_vm7, %v7564_v24, %v7565_v17  ;;  %8702 = vmatprep.subr.msk.bf16.mxu1 %vm8251_vm8, %v9624_v15 }
 0x565   : > { %9405 = vrot.lane.b32.xlu0 %v9404_v36, %s9642_s13  ;;  %v7522_v57 = vrot.slane %v15890_v53, 1  ;;  %v7523_v25 = vrot.slane %v7490_v13, 1  ;;  %v15939_v19 = vsel %vm6623_vm7, %v7644_v29, %v7645_v21  ;;  %v8253_v0 = vsel %vm8251_vm8, %v9624_v15, 0 }
 0x566   : > { %v9434_v10 = vpack.i.bf16 %v7566_v28, %v7563_v14  ;;  %v15945_v23 = vsel %vm6623_vm7, %v7567_v48, %v7568_v32  ;;  %8672 = vmatpush3.bf16.msra.mxu0 %v8253_v0  ;;  %8698 = vmatpush3.bf16.msra.mxu1 %v8253_v0 }
 0x567   : > { %9410 = vrot.lane.b32.xlu1 %v9409_v49, %s9644_s17  ;;  %v9424_v41 = vpack.i.bf16 %v15939_v19, %v15945_v23  ;;  %v7524_v7 = vsel %vm6580_vm6, %v7522_v57, %v7523_v25  ;;  %v9454_v6 = vpack.i.bf16 %v15945_v23, %v7566_v28 }
 0x568   : > { %v9439_v51 = vpack.i.bf16 %v7524_v7, %v7521_v39  ;;  %v9449_v3 = vpack.i.bf16 %v15930_v20, %v7524_v7 }
 0x569   : > { %9415 = vrot.lane.b32.xlu0 %v9414_v56, %s9645_s18 }
 0x56b   : > { %9420 = vrot.lane.b32.xlu1 %v9419_v63, %s9638_s12 }
 0x56d   : > { %9435 = vrot.lane.b32.xlu0 %v9434_v10, %s9640_s14 }
 0x56f   : > { %9425 = vrot.lane.b32.xlu1 %v9424_v41, %s9643_s15 }
 0x571   : > { %9440 = vrot.lane.b32.xlu0 %v9439_v51, %s9638_s12 }
 0x573   : > { %9430 = vrot.lane.b32.xlu1 %v9439_v51, %s9636_s10 }
 0x575   : > { %9445 = vrot.lane.b32.xlu0 %v9434_v10, %s9643_s15 }
 0x579   : > { %9450 = vrot.lane.b32.xlu0 %v9449_v3, %s9644_s17 }
 0x57d   : > { %9455 = vrot.lane.b32.xlu0 %v9454_v6, %s9645_s18 }
 0x587   : > { %v8657_v37 = vpop.f32.mrb[8].mxu1 }
 0x588   : > { %v7383_v4 = vadd.f32 %v8657_v37, %v15765_v9  ;;  %v7374_v30 = vpop.f32.mrb[9].mxu1 }
 0x589   : > { %v7375_v22 = vadd.f32 %v15765_v9, %v7374_v30  ;;  %v8658_v33 = vpop.f32.mrb[10].mxu1 }
 0x58a   : > { %v15962_v27 = vmax.f32 %v7383_v4, 0.0  ;;  %v7386_v60 = vadd.f32 %v8658_v33, %v15765_v9  ;;  %v7377_v43 = vpop.f32.mrb[11].mxu1 }
 0x58b   : > { %v15965_v62 = vmax.f32 %v7375_v22, 0.0  ;;  %v7378_v35 = vadd.f32 %v15765_v9, %v7377_v43 }
 0x58c   : > { %v7810_v46 = vrot.slane %v15962_v27, 1  ;;  %v7826_v5 = vrot.slane %v15962_v27, 7  ;;  %v7842_v8 = vrot.slane %v15962_v27, 5  ;;  %v15971_v55 = vmax.f32 %v7386_v60, 0.0 }
 0x58d   : > { %v7809_v13 = vrot.slane %v15965_v62, 1  ;;  %v7825_v39 = vrot.slane %v15965_v62, 7  ;;  %v7841_v42 = vrot.slane %v15965_v62, 5  ;;  %v15976_v12 = vmax.f32 %v7378_v35, 0.0 }
 0x58e   : > { %v15979_v45 = vsel %vm379_vm0, %v7810_v46, %v7826_v5  ;;  %v7866_v36 = vsel %vm379_vm0, %v7826_v5, %v7842_v8  ;;  %v7811_v14 = vrot.slane %v15971_v55, 1  ;;  %v7827_v31 = vrot.slane %v15971_v55, 7 }
 0x58f   : > { %v15985_v16 = vsel %vm379_vm0, %v7809_v13, %v7825_v39  ;;  %v7865_v49 = vsel %vm379_vm0, %v7825_v39, %v7841_v42  ;;  %v7843_v24 = vrot.slane %v15971_v55, 5  ;;  %v7808_v17 = vrot.slane %v15976_v12, 1 }
 0x590   : > { %v15991_v29 = vsel %vm379_vm0, %v7811_v14, %v7827_v31  ;;  %v7824_v21 = vrot.slane %v15976_v12, 7  ;;  %v7931_v15 = vrot.slane %v15985_v16, 2  ;;  %v7932_v48 = vrot.slane %v7865_v49, 2 }
 0x591   : > { %v9459_v56 = vpack.i.bf16 %v15991_v29, %v15979_v45  ;;  %v7934_v63 = vrot.slane %v15979_v45, 2  ;;  %v7935_v28 = vrot.slane %v7866_v36, 2  ;;  %v7867_v57 = vsel %vm379_vm0, %v7827_v31, %v7843_v24 }
 0x592   : > { %v15998_v32 = vsel %vm379_vm0, %v7808_v17, %v7824_v21  ;;  %v16007_v7 = vsel %vm6623_vm7, %v7931_v15, %v7932_v48  ;;  %v7895_v6 = vrot.slane %v15991_v29, 1  ;;  %v7896_v37 = vrot.slane %v7867_v57, 1 }
 0x593   : > { %9460 = vrot.lane.b32.xlu1 %v9459_v56, %s9635_s9  ;;  %9465 = vrot.lane.b32.xlu0 %v9459_v56, %s9642_s13  ;;  %v9469_v41 = vpack.i.bf16 %v15998_v32, %v15885_v52  ;;  %v7936_v3 = vsel %vm6623_vm7, %v7934_v63, %v7935_v28  ;;  %v9474_v4 = vpack.i.bf16 %v15998_v32, %v15985_v16  ;;  %v7840_v30 = vrot.slane %v15976_v12, 5 }
 0x594   : > { %v8661_v25 = vpop.f32.mrb[12].mxu1  ;;  %v7892_v22 = vrot.slane %v15979_v45, 1  ;;  %v7893_v33 = vrot.slane %v7866_v36, 1  ;;  %v9484_v52 = vpack.i.bf16 %v7936_v3, %v16007_v7  ;;  %v16019_v60 = vsel %vm6580_vm6, %v7895_v6, %v7896_v37 }
 0x595   : > { %v7390_v0 = vpop.f32.mrb[13].mxu1  ;;  %v7937_v43 = vrot.slane %v15991_v29, 2  ;;  %v7938_v35 = vrot.slane %v7867_v57, 2  ;;  %v7864_v46 = vsel %vm379_vm0, %v7824_v21, %v7840_v30  ;;  %v7889_v8 = vrot.slane %v15985_v16, 1 }
 0x596   : > { %v8662_v10 = vpop.f32.mrb[14].mxu1  ;;  %v7894_v5 = vsel %vm6580_vm6, %v7892_v22, %v7893_v33  ;;  %v7890_v39 = vrot.slane %v7865_v49, 1  ;;  %v7886_v36 = vrot.slane %v15998_v32, 1  ;;  %v7887_v14 = vrot.slane %v7864_v46, 1 }
 0x597   : > { %v7393_v51 = vpop.f32.mrb[15].mxu1  ;;  %9470 = vrot.lane.b32.xlu1 %v9469_v41, %s9642_s13  ;;  %9475 = vrot.lane.b32.xlu0 %v9474_v4, %s9635_s9  ;;  %v9489_v13 = vpack.i.bf16 %v16019_v60, %v7894_v5  ;;  %v16028_v42 = vsel %vm6623_vm7, %v7937_v43, %v7938_v35  ;;  %v7928_v56 = vrot.slane %v15998_v32, 2  ;;  %v7929_v49 = vrot.slane %v7864_v46, 2 }
 0x598   : > { %v7891_v31 = vsel %vm6580_vm6, %v7889_v8, %v7890_v39  ;;  %v9494_v17 = vpack.i.bf16 %v16028_v42, %v7936_v3  ;;  %v7888_v21 = vsel %vm6580_vm6, %v7886_v36, %v7887_v14  ;;  %v7402_v15 = vadd.f32 %v8662_v10, %v15765_v9 }
 0x599   : > { %v9479_v24 = vpack.i.bf16 %v7894_v5, %v7891_v31  ;;  %v9509_v48 = vpack.i.bf16 %v7888_v21, %v15930_v20  ;;  %v7391_v63 = vadd.f32 %v15765_v9, %v7390_v0  ;;  %v7930_v28 = vsel %vm6623_vm7, %v7928_v56, %v7929_v49 }
 0x59a   : > { %v7399_v57 = vadd.f32 %v8661_v25, %v15765_v9  ;;  %v7394_v41 = vadd.f32 %v15765_v9, %v7393_v51  ;;  %v16046_v3 = vmax.f32 %v7402_v15, 0.0  ;;  %v9514_v6 = vpack.i.bf16 %v7930_v28, %v15945_v23 }
 0x59b   : > { %9485 = vrot.lane.b32.xlu1 %v9484_v52, %s9640_s14  ;;  %9480 = vrot.lane.b32.xlu0 %v9479_v24, %s9636_s10  ;;  %v16049_v37 = vmax.f32 %v7391_v63, 0.0  ;;  %v9529_v10 = vpack.i.bf16 %v7888_v21, %v7891_v31  ;;  %v9519_v9 = vpack.i.bf16 %v7888_v21, %v15921_v58  ;;  %v9534_v58 = vpack.i.bf16 %v7930_v28, %v16007_v7 }
 0x59c   : > { %v16052_v20 = vmax.f32 %v7399_v57, 0.0  ;;  %v16055_v0 = vmax.f32 %v7394_v41, 0.0  ;;  %v7815_v25 = vrot.slane %v16046_v3, 1  ;;  %v7831_v4 = vrot.slane %v16046_v3, 7 }
 0x59d   : > { %v7812_v51 = vrot.slane %v16049_v37, 1  ;;  %v7828_v23 = vrot.slane %v16049_v37, 7  ;;  %v7844_v30 = vrot.slane %v16049_v37, 5  ;;  %v7847_v46 = vrot.slane %v16046_v3, 5 }
 0x59e   : > { %v7814_v22 = vrot.slane %v16052_v20, 1  ;;  %v7830_v33 = vrot.slane %v16052_v20, 7  ;;  %v7813_v52 = vrot.slane %v16055_v0, 1  ;;  %v7829_v43 = vrot.slane %v16055_v0, 7 }
 0x59f   : > { %9490 = vrot.lane.b32.xlu1 %v9489_v13, %s9638_s12  ;;  %9500 = vrot.lane.b32.xlu0 %v9489_v13, %s9644_s17  ;;  %v9524_v5 = vpack.i.bf16 %v7930_v28, %v15939_v19  ;;  %v7863_v8 = vsel %vm379_vm0, %v7815_v25, %v7831_v4  ;;  %v16076_v13 = vsel %vm379_vm0, %v7812_v51, %v7828_v23  ;;  %v7846_v36 = vrot.slane %v16052_v20, 5 }
 0x5a0   : > { %v7868_v39 = vsel %vm379_vm0, %v7828_v23, %v7844_v30  ;;  %v16082_v14 = vsel %vm379_vm0, %v7814_v22, %v7830_v33  ;;  %v16086_v7 = vsel %vm379_vm0, %v7813_v52, %v7829_v43  ;;  %v7871_v24 = vsel %vm379_vm0, %v7831_v4, %v7847_v46 }
 0x5a1   : > { %v9544_v19 = vpack.i.bf16 %v7863_v8, %v16082_v14  ;;  %v7898_v21 = vrot.slane %v16076_v13, 1  ;;  %v7899_v56 = vrot.slane %v7868_v39, 1  ;;  %v7845_v49 = vrot.slane %v16055_v0, 5 }
 0x5a2   : > { %v7870_v15 = vsel %vm379_vm0, %v7830_v33, %v7846_v36  ;;  %v7940_v63 = vrot.slane %v16076_v13, 2  ;;  %v7941_v28 = vrot.slane %v7868_v39, 2  ;;  %v7996_v57 = vrot.slane %v7863_v8, 1 }
 0x5a3   : > { %9495 = vrot.lane.b32.xlu1 %v9494_v17, %s9643_s15  ;;  %9505 = vrot.lane.b32.xlu0 %v9494_v17, %s9645_s18  ;;  %v7997_v41 = vrot.slane %v7871_v24, 1  ;;  %v7869_v25 = vsel %vm379_vm0, %v7829_v43, %v7845_v49  ;;  %v7905_v51 = vrot.slane %v7870_v15, 1  ;;  %v8023_v52 = vrot.slane %v7863_v8, 2 }
 0x5a4   : > { %v7942_v30 = vsel %vm6623_vm7, %v7940_v63, %v7941_v28  ;;  %v7901_v46 = vrot.slane %v16086_v7, 1  ;;  %v7943_v43 = vrot.slane %v16086_v7, 2  ;;  %v7944_v39 = vrot.slane %v7869_v25, 2 }
 0x5a5   : > { %v7998_v22 = vsel %vm6580_vm6, %v7996_v57, %v7997_v41  ;;  %vm7764_vm0 = vcmask 326656  }
 0x5a7   : > { %9510 = vrot.lane.b32.xlu1 %v9509_v48, %s9636_s10  ;;  %9530 = vrot.lane.b32.xlu0 %v9529_v10, %s9638_s12  ;;  %v9554_v48 = vpack.i.bf16 %v16086_v7, %v16076_v13  ;;  %v7900_v10 = vsel %vm6580_vm6, %v7898_v21, %v7899_v56  ;;  %v9564_v21 = vpack.i.bf16 %v7942_v30, %v16028_v42 }
 0x5a8   : > { %v9559_v23 = vpack.i.bf16 %v7900_v10, %v16019_v60  ;;  %v7946_v60 = vrot.slane %v16082_v14, 2 }
 0x5ab   : > { %9515 = vrot.lane.b32.xlu1 %v9514_v6, %s9640_s14  ;;  %9535 = vrot.lane.b32.xlu0 %v9534_v58, %s9643_s15  ;;  %v8024_v58 = vrot.slane %v7871_v24, 2 }
 0x5ad   : > { %v16127_v63 = vsel %vm6623_vm7, %v8023_v52, %v8024_v58 }
 0x5af   : > { %9520 = vrot.lane.b32.xlu1 %v9519_v9, %s9644_s17  ;;  %v16092_v17 = vpop.permute.xlu1 %9325  ;;  %9545 = vrot.lane.b32.xlu0 %v9544_v19, %s9642_s13  ;;  %v7904_v9 = vrot.slane %v16082_v14, 1 }
 0x5b0   : > { %v16070_v35 = vpop.permute.xlu0 %9330 }
 0x5b1   : > { %v16117_v36 = vsel %vm6580_vm6, %v7904_v9, %v7905_v51 }
 0x5b2   : > { %v16122_v8 = vpack.i.bf16 %v7998_v22, %v16117_v36 }
 0x5b3   : > { %9525 = vrot.lane.b32.xlu1 %v9524_v5, %s9645_s18  ;;  %9555 = vrot.lane.b32.xlu0 %v9554_v48, %s9635_s9  ;;  %v16106_v4 = vpop.permute.xlu1 %9340  ;;  %v7902_v5 = vrot.slane %v7869_v25, 1 }
 0x5b4   : > { %v16089_v31 = vpop.permute.xlu0 %9335 }
 0x5b5   : > { %v7903_v28 = vsel %vm6580_vm6, %v7901_v46, %v7902_v5  ;;  %v9333_v46 = vunpack.i.h.bf16 %v16070_v35  ;;  %v9332_v5 = vunpack.i.l.bf16 %v16070_v35 }
 0x5b6   : > { %v9599_v51 = vpack.i.bf16 %v7903_v28, %v7900_v10 }
 0x5b7   : > { %9540 = vrot.lane.b32.xlu1 %v9544_v19, %s9635_s9  ;;  %8098 = vrot.lane.b32.xlu0 %v7942_v30, %s9645_s18  ;;  %v7947_v19 = vrot.slane %v7870_v15, 2  ;;  %v7945_v15 = vsel %vm6623_vm7, %v7943_v43, %v7944_v39 }
 0x5b8   : > { %v9361_v6 = vpop.permute.xlu0 %9360  ;;  %v9604_v39 = vpack.i.bf16 %v7945_v15, %v7942_v30  ;;  %v9338_v30 = vunpack.i.h.bf16 %v16089_v31 }
 0x5b9   : > { %v9363_v24 = vunpack.i.h.bf16 %v9361_v6  ;;  %v9362_v56 = vunpack.i.l.bf16 %v9361_v6  ;;  %v7948_v42 = vsel %vm6623_vm7, %v7946_v60, %v7947_v19 }
 0x5ba   : > { %v9574_v9 = vpack.i.bf16 %v16127_v63, %v7948_v42 }
 0x5bb   : > { %9550 = vrot.lane.b32.xlu1 %v9554_v48, %s9642_s13  ;;  %v16124_v48 = vpop.permute.xlu1 %9345  ;;  %9565 = vrot.lane.b32.xlu0 %v9564_v21, %s9640_s14  ;;  %v7735_v6 = vsel %vm3247_vm12, %v15799_v1, %v9363_v24  ;;  %v7734_v25 = vsel %vm3247_vm12, %v15804_v50, %v9362_v56 }
 0x5bc   : > { %v9366_v33 = vpop.permute.xlu0 %9365 }
 0x5bd   : > { %v9368_v57 = vunpack.i.h.bf16 %v9366_v33  ;;  %v9367_v41 = vunpack.i.l.bf16 %v9366_v33 }
 0x5bf   : > { %9560 = vrot.lane.b32.xlu1 %v9559_v23, %s9636_s10  ;;  %v7741_v22 = vsel %vm3264_vm14, %v7734_v25, %v9367_v41  ;;  %v7742_v33 = vsel %vm3264_vm14, %v7735_v6, %v9368_v57  ;;  %9600 = vrot.lane.b32.xlu0 %v9599_v51, %s9638_s12  ;;  %v9351_v50 = vpop.permute.xlu1 %9350  ;;  %v9337_v41 = vunpack.i.l.bf16 %v16089_v31  ;;  %v9584_v6 = vpack.i.bf16 %v16117_v36, %v7903_v28 }
 0x5c0   : > { %v9371_v49 = vpop.permute.xlu0 %9370  ;;  %v7748_v10 = vsel %vm3282_vm1, %v7741_v22, %v9332_v5  ;;  %v7749_v60 = vsel %vm3282_vm1, %v7742_v33, %v9333_v46  ;;  %v9609_v25 = vpack.i.bf16 %v7948_v42, %v7945_v15  ;;  %v9342_v15 = vunpack.i.l.bf16 %v16106_v4 }
 0x5c1   : > { %v9373_v52 = vunpack.i.h.bf16 %v9371_v49  ;;  %v9372_v58 = vunpack.i.l.bf16 %v9371_v49 }
 0x5c3   : > { %9570 = vrot.lane.b32.xlu1 %v16122_v8, %s9638_s12  ;;  %v7756_v21 = vsel %vm3300_vm4, %v7748_v10, %v9372_v58  ;;  %v7757_v24 = vsel %vm3300_vm4, %v7749_v60, %v9373_v52  ;;  %9605 = vrot.lane.b32.xlu0 %v9604_v39, %s9643_s15  ;;  %v7736_v39 = vsel %vm3247_vm12, %v15785_v40, %v9342_v15  ;;  %s8478_s12 = sshll.u32 %s17467_s25, 3 }
 0x5c4   : > { %v9376_v23 = vpop.permute.xlu0 %9375  ;;  %s281_s8 = scalar_lea.vmem %s16452_s7, %s8478_s12 }
 0x5c5   : > { %v9378_v1 = vunpack.i.h.bf16 %v9376_v23  ;;  %v9377_v43 = vunpack.i.l.bf16 %v9376_v23  ;;  %v9356_v23 = vpop.permute.xlu1 %9355 }
 0x5c7   : > { %9575 = vrot.lane.b32.xlu1 %v9574_v9, %s9643_s15  ;;  %v7765_v35 = vsel %vm7764_vm0, %v7756_v21, %v9377_v43  ;;  %v7766_v56 = vsel %vm7764_vm0, %v7757_v24, %v9378_v1  ;;  %9610 = vrot.lane.b32.xlu0 %v9609_v25, %s9645_s18  ;;  %v9327_v43 = vunpack.i.l.bf16 %v16092_v17  ;;  %v9353_v21 = vunpack.i.h.bf16 %v9351_v50 }
 0x5c8   : > { %v9381_v19 = vpop.permute.xlu0 %9380  ;;  %v7774_v33 = vsel %vm7773_vm9, %v7765_v35, %v9337_v41  ;;  %v7775_v52 = vsel %vm7773_vm9, %v7766_v56, %v9338_v30  ;;  %v9352_v24 = vunpack.i.l.bf16 %v9351_v50  ;;  %v9328_v56 = vunpack.i.h.bf16 %v16092_v17 }
 0x5c9   : > { %v9383_v49 = vunpack.i.h.bf16 %v9381_v19  ;;  %v9382_v57 = vunpack.i.l.bf16 %v9381_v19  ;;  %v7750_v10 = vsel %vm3282_vm1, %v7741_v22, %v9327_v43  ;;  %v9343_v43 = vunpack.i.h.bf16 %v16106_v4 }
 0x5ca   : > { %v7758_v30 = vsel %vm3300_vm4, %v7750_v10, %v9352_v24 }
 0x5cb   : > { %9580 = vrot.lane.b32.xlu1 %v9599_v51, %s9644_s17  ;;  %v7783_v5 = vsel %vm7782_vm10, %v7774_v33, %v9382_v57  ;;  %v7784_v31 = vsel %vm7782_vm10, %v7775_v52, %v9383_v49  ;;  %v9347_v51 = vunpack.i.l.bf16 %v16124_v48  ;;  %v9358_v49 = vunpack.i.h.bf16 %v9356_v23 }
 0x5cc   : > { %v9386_v9 = vpop.permute.xlu0 %9385  ;;  %v9357_v57 = vunpack.i.l.bf16 %v9356_v23 }
 0x5cd   : > { %v9388_v58 = vunpack.i.h.bf16 %v9386_v9  ;;  %v9387_v46 = vunpack.i.l.bf16 %v9386_v9  ;;  %v7743_v19 = vsel %vm3264_vm14, %v7736_v39, %v9347_v51 }
 0x5ce   : > { %v7751_v22 = vsel %vm3282_vm1, %v7743_v19, %v9328_v56  ;;  %v7767_v9 = vsel %vm7764_vm0, %v7758_v30, %v9357_v57  ;;  %v7737_v19 = vsel %vm3247_vm12, %v15795_v18, %v9343_v43 }
 0x5cf   : > { %9585 = vrot.lane.b32.xlu1 %v9584_v6, %s9636_s10  ;;  %v7792_v36 = vsel %vm7791_vm11, %v7783_v5, %v9387_v46  ;;  %v7793_v28 = vsel %vm7791_vm11, %v7784_v31, %v9388_v58 }
 0x5d0   : > { %v8175_v42 = vpack.c.bf16 %v7793_v28, %v7792_v36 }
 0x5d1   : > { %v9391_v1 = vpop.permute.xlu1 %9390 }
 0x5d2   : > { %8673 = vmatprep.mubr.msk.bf16.mxu0 %vm8226_vm13, %v8175_v42  ;;  %v9393_v40 = vunpack.i.h.bf16 %v9391_v1  ;;  %v9392_v41 = vunpack.i.l.bf16 %v9391_v1 }
 0x5d3   : > { %9590 = vrot.lane.b32.xlu1 %v9609_v25, %s9640_s14  ;;  %v16173_v60 = vpop.permute.xlu0 %9400  ;;  %v7759_v25 = vsel %vm3300_vm4, %v7751_v22, %v9353_v21  ;;  %v9348_v21 = vunpack.i.h.bf16 %v16124_v48 }
 0x5d4   : > { %v7768_v17 = vsel %vm7764_vm0, %v7759_v25, %v9358_v49  ;;  %v7776_v52 = vsel %vm7773_vm9, %v7767_v9, %v9392_v41  ;;  %v9403_v49 = vunpack.i.h.bf16 %v16173_v60  ;;  %v9402_v57 = vunpack.i.l.bf16 %v16173_v60 }
 0x5d5   : > { %v16176_v35 = vpop.permute.xlu1 %9395 }
 0x5d6   : > { %v9397_v41 = vunpack.i.l.bf16 %v16176_v35 }
 0x5d7   : > { %9595 = vrot.lane.b32.xlu1 %v16122_v8, %s9644_s17  ;;  %v16183_v6 = vpop.permute.xlu0 %9405  ;;  %v7777_v8 = vsel %vm7773_vm9, %v7768_v17, %v9393_v40 }
 0x5d9   : > { %v9411_v50 = vpop.permute.xlu1 %9410 }
 0x5da   : > { %v9413_v33 = vunpack.i.h.bf16 %v9411_v50  ;;  %v9412_v23 = vunpack.i.l.bf16 %v9411_v50 }
 0x5db   : > { %8104 = vrot.lane.b32.xlu1 %v16127_v63, %s9645_s18  ;;  %v9416_v5 = vpop.permute.xlu0 %9415 }
 0x5dc   : > { %v7786_v58 = vsel %vm7782_vm10, %v7777_v8, %v9413_v33  ;;  %v7785_v46 = vsel %vm7782_vm10, %v7776_v52, %v9412_v23  ;;  %v9418_v31 = vunpack.i.h.bf16 %v9416_v5  ;;  %v9417_v36 = vunpack.i.l.bf16 %v9416_v5 }
 0x5dd   : > { %v16194_v28 = vpop.permute.xlu1 %9420  ;;  %v7744_v52 = vsel %vm3264_vm14, %v7737_v19, %v9348_v21 }
 0x5de   : > { %v7795_v15 = vsel %vm7791_vm11, %v7786_v58, %v9418_v31  ;;  %v7794_v42 = vsel %vm7791_vm11, %v7785_v46, %v9417_v36  ;;  %v9422_v4 = vunpack.i.l.bf16 %v16194_v28  ;;  %v9408_v31 = vunpack.i.h.bf16 %v16183_v6 }
 0x5df   : > { %v8176_v51 = vpack.c.bf16 %v7795_v15, %v7794_v42  ;;  %v9436_v1 = vpop.permute.xlu0 %9435 }
 0x5e0   : > { %v9438_v30 = vunpack.i.h.bf16 %v9436_v1  ;;  %v9437_v40 = vunpack.i.l.bf16 %v9436_v1  ;;  %v9407_v1 = vunpack.i.l.bf16 %v16183_v6 }
 0x5e1   : > { %v16198_v63 = vpop.permute.xlu1 %9425  ;;  %8674 = vmatmul.mubr.msk.bf16.vlgmr.msra.gmra.mrb[16].mxu0 %vm8226_vm13, %v8176_v51 }
 0x5e3   : > { %v9441_v39 = vpop.permute.xlu0 %9440 }
 0x5e4   : > { %v9443_v48 = vunpack.i.h.bf16 %v9441_v39  ;;  %v9442_v50 = vunpack.i.l.bf16 %v9441_v39 }
 0x5e5   : > { %v9431_v10 = vpop.permute.xlu1 %9430 }
 0x5e6   : > { %v9433_v24 = vunpack.i.h.bf16 %v9431_v10  ;;  %v9432_v56 = vunpack.i.l.bf16 %v9431_v10 }
 0x5e7   : > { %v9446_v25 = vpop.permute.xlu0 %9445 }
 0x5e8   : > { %v7739_v22 = vsel %vm3247_vm12, %v15890_v53, %v9433_v24  ;;  %v7738_v18 = vsel %vm3247_vm12, %v15874_v11, %v9432_v56  ;;  %v9448_v33 = vunpack.i.h.bf16 %v9446_v25  ;;  %v9447_v23 = vunpack.i.l.bf16 %v9446_v25 }
 0x5e9   : > { %v7745_v9 = vsel %vm3264_vm14, %v7738_v18, %v9437_v40  ;;  %v7746_v17 = vsel %vm3264_vm14, %v7739_v22, %v9438_v30  ;;  %v7752_v11 = vsel %vm3282_vm1, %v7744_v52, %v9402_v57 }
 0x5ea   : > { %v7754_v60 = vsel %vm3282_vm1, %v7746_v17, %v9397_v41  ;;  %v7753_v8 = vsel %vm3282_vm1, %v7745_v9, %v9403_v49  ;;  %v7760_v36 = vsel %vm3300_vm4, %v7752_v11, %v9442_v50  ;;  %v9427_v11 = vunpack.i.l.bf16 %v16198_v63 }
 0x5eb   : > { %v7761_v53 = vsel %vm3300_vm4, %v7753_v8, %v9443_v48  ;;  %v7762_v58 = vsel %vm3300_vm4, %v7754_v60, %v9422_v4  ;;  %v16222_v5 = vpop.permute.xlu0 %9450  ;;  %v7769_v15 = vsel %vm7764_vm0, %v7760_v36, %v9447_v23  ;;  %v9398_v8 = vunpack.i.h.bf16 %v16176_v35 }
 0x5ec   : > { %v7770_v46 = vsel %vm7764_vm0, %v7761_v53, %v9448_v33  ;;  %v9453_v42 = vunpack.i.h.bf16 %v16222_v5  ;;  %v9452_v51 = vunpack.i.l.bf16 %v16222_v5  ;;  %v7778_v10 = vsel %vm7773_vm9, %v7769_v15, %v9407_v1 }
 0x5ed   : > { %v7779_v43 = vsel %vm7773_vm9, %v7770_v46, %v9408_v31  ;;  %v9428_v1 = vunpack.i.h.bf16 %v16198_v63  ;;  %v7771_v35 = vsel %vm7764_vm0, %v7762_v58, %v9427_v11 }
 0x5ee   : > { %v7787_v24 = vsel %vm7782_vm10, %v7778_v10, %v9452_v51  ;;  %v7788_v56 = vsel %vm7782_vm10, %v7779_v43, %v9453_v42  ;;  %v9423_v51 = vunpack.i.h.bf16 %v16194_v28 }
 0x5ef   : > { %v16233_v39 = vpop.permute.xlu0 %9455 }
 0x5f0   : > { %v9458_v19 = vunpack.i.h.bf16 %v16233_v39  ;;  %v9457_v21 = vunpack.i.l.bf16 %v16233_v39 }
 0x5f2   : > { %v7796_v49 = vsel %vm7791_vm11, %v7787_v24, %v9457_v21  ;;  %v7797_v57 = vsel %vm7791_vm11, %v7788_v56, %v9458_v19 }
 0x5f3   : > { %v8177_v30 = vpack.c.bf16 %v7797_v57, %v7796_v49 }
 0x5f5   : > { %8677 = vmatprep.mubr.msk.bf16.mxu0 %vm8226_vm13, %v8177_v30 }
 0x605   : > { %v16247_v40 = vpop.permute.xlu1 %9460  ;;  %v16249_v41 = vpop.permute.xlu0 %9465 }
 0x606   : > { %v9467_v24 = vunpack.i.l.bf16 %v16249_v41 }
 0x609   : > { %v9471_v4 = vpop.permute.xlu1 %9470  ;;  %v9476_v18 = vpop.permute.xlu0 %9475 }
 0x60a   : > { %v9472_v21 = vunpack.i.l.bf16 %v9471_v4 }
 0x60d   : > { %v16251_v22 = vpop.permute.xlu1 %9485  ;;  %v16255_v48 = vpop.permute.xlu0 %9480 }
 0x60e   : > { %v9482_v60 = vunpack.i.l.bf16 %v16255_v48  ;;  %v9487_v43 = vunpack.i.l.bf16 %v16251_v22 }
 0x610   : > { %v8114_v46 = vsel %vm3247_vm12, %v15985_v16, %v9482_v60  ;;  %v9478_v16 = vunpack.i.h.bf16 %v9476_v18 }
 0x611   : > { %v16253_v25 = vpop.permute.xlu1 %9490  ;;  %v16259_v9 = vpop.permute.xlu0 %9500  ;;  %v8121_v57 = vsel %vm3264_vm14, %v8114_v46, %v9487_v43 }
 0x612   : > { %v9502_v46 = vunpack.i.l.bf16 %v16259_v9 }
 0x615   : > { %v16257_v50 = vpop.permute.xlu1 %9495  ;;  %v16262_v23 = vpop.permute.xlu0 %9505 }
 0x619   : > { %v9511_v17 = vpop.permute.xlu1 %9510  ;;  %v9531_v49 = vpop.permute.xlu0 %9530 }
 0x61a   : > { %v9512_v33 = vunpack.i.l.bf16 %v9511_v17  ;;  %v9513_v52 = vunpack.i.h.bf16 %v9511_v17  ;;  %v9533_v60 = vunpack.i.h.bf16 %v9531_v49  ;;  %v9532_v58 = vunpack.i.l.bf16 %v9531_v49 }
 0x61c   : > { %v7740_v10 = vsel %vm3247_vm12, %v15897_v47, %v9512_v33  ;;  %v8113_v28 = vsel %vm3247_vm12, %v15998_v32, %v9513_v52  ;;  %v9473_v33 = vunpack.i.h.bf16 %v9471_v4  ;;  %v8128_v32 = vsel %vm3282_vm1, %v8121_v57, %v9478_v16 }
 0x61d   : > { %v9516_v53 = vpop.permute.xlu1 %9515  ;;  %v9536_v52 = vpop.permute.xlu0 %9535 }
 0x61e   : > { %v9518_v36 = vunpack.i.h.bf16 %v9516_v53  ;;  %v9517_v15 = vunpack.i.l.bf16 %v9516_v53  ;;  %v9477_v53 = vunpack.i.l.bf16 %v9476_v18  ;;  %v9538_v18 = vunpack.i.h.bf16 %v9536_v52 }
 0x620   : > { %v7747_v56 = vsel %vm3264_vm14, %v7740_v10, %v9517_v15  ;;  %v8120_v47 = vsel %vm3264_vm14, %v8113_v28, %v9518_v36  ;;  %v7780_v10 = vsel %vm7773_vm9, %v7771_v35, %v9472_v21  ;;  %v8136_v35 = vsel %vm3300_vm4, %v8128_v32, %v9533_v60 }
 0x621   : > { %v7755_v63 = vsel %vm3282_vm1, %v7747_v56, %v9398_v8  ;;  %v9521_v30 = vpop.permute.xlu1 %9520  ;;  %v8127_v36 = vsel %vm3282_vm1, %v8120_v47, %v9477_v53  ;;  %v8144_v16 = vsel %vm7764_vm0, %v8136_v35, %v9538_v18  ;;  %v9468_v35 = vunpack.i.h.bf16 %v16249_v41 }
 0x622   : > { %v7763_v17 = vsel %vm3300_vm4, %v7755_v63, %v9423_v51  ;;  %v9522_v15 = vunpack.i.l.bf16 %v9521_v30  ;;  %v9523_v43 = vunpack.i.h.bf16 %v9521_v30  ;;  %v8135_v21 = vsel %vm3300_vm4, %v8127_v36, %v9532_v58  ;;  %v16304_v63 = vpop.permute.xlu0 %9545 }
 0x623   : > { %v7772_v11 = vsel %vm7764_vm0, %v7763_v17, %v9428_v1  ;;  %v9537_v1 = vunpack.i.l.bf16 %v9536_v52  ;;  %v8152_v28 = vsel %vm7773_vm9, %v8144_v16, %v9467_v24  ;;  %v9507_v30 = vunpack.i.l.bf16 %v16262_v23 }
 0x624   : > { %v7781_v8 = vsel %vm7773_vm9, %v7772_v11, %v9408_v31  ;;  %v7789_v6 = vsel %vm7782_vm10, %v7780_v10, %v9522_v15  ;;  %v8160_v53 = vsel %vm7782_vm10, %v8152_v28, %v9502_v46  ;;  %v9462_v10 = vunpack.i.l.bf16 %v16247_v40 }
 0x625   : > { %v9526_v51 = vpop.permute.xlu1 %9525  ;;  %v7790_v4 = vsel %vm7782_vm10, %v7781_v8, %v9453_v42  ;;  %v8143_v31 = vsel %vm7764_vm0, %v8135_v21, %v9537_v1  ;;  %v8168_v39 = vsel %vm7791_vm11, %v8160_v53, %v9507_v30  ;;  %v9488_v8 = vunpack.i.h.bf16 %v16251_v22 }
 0x626   : > { %v9527_v56 = vunpack.i.l.bf16 %v9526_v51  ;;  %v9528_v49 = vunpack.i.h.bf16 %v9526_v51  ;;  %v7799_v5 = vsel %vm7791_vm11, %v7790_v4, %v9458_v19  ;;  %v8151_v42 = vsel %vm7773_vm9, %v8143_v31, %v9473_v33  ;;  %v16315_v24 = vpop.permute.xlu0 %9555 }
 0x627   : > { %v8159_v58 = vsel %vm7782_vm10, %v8151_v42, %v9523_v43  ;;  %v9483_v19 = vunpack.i.h.bf16 %v16255_v48  ;;  %v8129_v52 = vsel %vm3282_vm1, %v8120_v47, %v9462_v10  ;;  %v9492_v48 = vunpack.i.l.bf16 %v16253_v25 }
 0x628   : > { %v7798_v57 = vsel %vm7791_vm11, %v7789_v6, %v9527_v56  ;;  %v8167_v11 = vsel %vm7791_vm11, %v8159_v58, %v9528_v49  ;;  %v9463_v4 = vunpack.i.h.bf16 %v16247_v40  ;;  %v9497_v43 = vunpack.i.l.bf16 %v16257_v50 }
 0x629   : > { %v8178_v17 = vpack.c.bf16 %v7799_v5, %v7798_v57  ;;  %v16307_v60 = vpop.permute.xlu1 %9540  ;;  %v8179_v33 = vpack.c.bf16 %v8168_v39, %v8167_v11  ;;  %v8115_v46 = vsel %vm3247_vm12, %v15979_v45, %v9483_v19  ;;  %v8137_v18 = vsel %vm3300_vm4, %v8129_v52, %v9492_v48 }
 0x62a   : > { %v8099_v32 = vpop.permute.xlu0 %8098  ;;  %v8122_v51 = vsel %vm3264_vm14, %v8115_v46, %v9488_v8  ;;  %v9493_v22 = vunpack.i.h.bf16 %v16253_v25  ;;  %v8145_v47 = vsel %vm7764_vm0, %v8137_v18, %v9497_v43  ;;  %v9498_v31 = vunpack.i.h.bf16 %v16257_v50 }
 0x62b   : > { %8678 = vmatmul.mubr.msk.bf16.gmra.mrb[20].mxu0 %vm8226_vm13, %v8178_v17  ;;  %8681 = vmatprep.mubr.msk.bf16.mxu1 %vm8226_vm13, %v8179_v33  ;;  %v8130_v45 = vsel %vm3282_vm1, %v8122_v51, %v9463_v4  ;;  %v8153_v16 = vsel %vm7773_vm9, %v8145_v47, %v9468_v35  ;;  %v9503_v5 = vunpack.i.h.bf16 %v16259_v9  ;;  %v9508_v41 = vunpack.i.h.bf16 %v16262_v23 }
 0x62c   : > { %v8138_v6 = vsel %vm3300_vm4, %v8130_v45, %v9493_v22  ;;  %v9557_v33 = vunpack.i.l.bf16 %v16315_v24  ;;  %v9548_v8 = vunpack.i.h.bf16 %v16304_v63  ;;  %v9558_v51 = vunpack.i.h.bf16 %v16315_v24 }
 0x62d   : > { %v16317_v15 = vpop.permute.xlu1 %9550  ;;  %v8146_v25 = vsel %vm7764_vm0, %v8138_v6, %v9498_v31  ;;  %v8161_v30 = vsel %vm7782_vm10, %v8153_v16, %v9503_v5  ;;  %v9543_v35 = vunpack.i.h.bf16 %v16307_v60  ;;  %v9542_v24 = vunpack.i.l.bf16 %v16307_v60 }
 0x62e   : > { %v9566_v1 = vpop.permute.xlu0 %9565  ;;  %v9552_v42 = vunpack.i.l.bf16 %v16317_v15  ;;  %v8169_v46 = vsel %vm7791_vm11, %v8161_v30, %v9508_v41  ;;  %v9553_v6 = vunpack.i.h.bf16 %v16317_v15 }
 0x62f   : > { %v9567_v57 = vunpack.i.l.bf16 %v9566_v1  ;;  %v9568_v50 = vunpack.i.h.bf16 %v9566_v1 }
 0x630   : > { %v8154_v9 = vsel %vm7773_vm9, %v8146_v25, %v9552_v42 }
 0x631   : > { %v9561_v36 = vpop.permute.xlu1 %9560 }
 0x632   : > { %v9601_v56 = vpop.permute.xlu0 %9600  ;;  %v9562_v49 = vunpack.i.l.bf16 %v9561_v36  ;;  %v9563_v17 = vunpack.i.h.bf16 %v9561_v36 }
 0x633   : > { %v9602_v39 = vunpack.i.l.bf16 %v9601_v56  ;;  %v9603_v43 = vunpack.i.h.bf16 %v9601_v56 }
 0x634   : > { %v8116_v58 = vsel %vm3247_vm12, %v15991_v29, %v9562_v49  ;;  %v8117_v29 = vsel %vm3247_vm12, %v16076_v13, %v9563_v17  ;;  %v9547_v13 = vunpack.i.l.bf16 %v16304_v63 }
 0x635   : > { %v16330_v21 = vpop.permute.xlu1 %9570  ;;  %v8123_v11 = vsel %vm3264_vm14, %v8116_v58, %v9567_v57  ;;  %v8124_v4 = vsel %vm3264_vm14, %v8117_v29, %v9568_v50 }
 0x636   : > { %v9606_v28 = vpop.permute.xlu0 %9605  ;;  %v8131_v52 = vsel %vm3282_vm1, %v8123_v11, %v9557_v33  ;;  %v9573_v49 = vunpack.i.h.bf16 %v16330_v21  ;;  %v9572_v31 = vunpack.i.l.bf16 %v16330_v21  ;;  %v8132_v56 = vsel %vm3282_vm1, %v8124_v4, %v9558_v51 }
 0x637   : > { %v9607_v10 = vunpack.i.l.bf16 %v9606_v28  ;;  %v8139_v18 = vsel %vm3300_vm4, %v8131_v52, %v9602_v39  ;;  %v8140_v15 = vsel %vm3300_vm4, %v8132_v56, %v9603_v43 }
 0x639   : > { %v16337_v40 = vpop.permute.xlu1 %9575  ;;  %v8147_v45 = vsel %vm7764_vm0, %v8139_v18, %v9607_v10 }
 0x63a   : > { %v9578_v57 = vunpack.i.h.bf16 %v16337_v40  ;;  %v8155_v5 = vsel %vm7773_vm9, %v8147_v45, %v9553_v6  ;;  %v9611_v42 = vpop.permute.xlu0 %9610  ;;  %v9577_v21 = vunpack.i.l.bf16 %v16337_v40 }
 0x63b   : > { %v9612_v50 = vunpack.i.l.bf16 %v9611_v42  ;;  %v9613_v33 = vunpack.i.h.bf16 %v9611_v42 }
 0x63d   : > { %v9581_v53 = vpop.permute.xlu1 %9580 }
 0x63e   : > { %v9582_v19 = vunpack.i.l.bf16 %v9581_v53 }
 0x640   : > { %v8162_v23 = vsel %vm7782_vm10, %v8154_v9, %v9582_v19 }
 0x641   : > { %v8170_v36 = vsel %vm7791_vm11, %v8162_v23, %v8099_v32  ;;  %v9586_v48 = vpop.permute.xlu1 %9585  ;;  %v9608_v32 = vunpack.i.h.bf16 %v9606_v28  ;;  %v9583_v28 = vunpack.i.h.bf16 %v9581_v53 }
 0x642   : > { %v8180_v1 = vpack.c.bf16 %v8170_v36, %v8169_v46  ;;  %v9588_v22 = vunpack.i.h.bf16 %v9586_v48  ;;  %v9587_v47 = vunpack.i.l.bf16 %v9586_v48 }
 0x643   : > { %v8148_v30 = vsel %vm7764_vm0, %v8140_v15, %v9608_v32  ;;  %v8163_v11 = vsel %vm7782_vm10, %v8155_v5, %v9583_v28 }
 0x644   : > { %8682 = vmatmul.mubr.msk.bf16.vlgmr.msra.gmra.mrb[16].mxu1 %vm8226_vm13, %v8180_v1  ;;  %v8119_v60 = vsel %vm3247_vm12, %v16082_v14, %v9588_v22  ;;  %v8118_v41 = vsel %vm3247_vm12, %v16086_v7, %v9587_v47  ;;  %v8156_v10 = vsel %vm7773_vm9, %v8148_v30, %v9547_v13  ;;  %v8171_v48 = vsel %vm7791_vm11, %v8163_v11, %v9612_v50 }
 0x645   : > { %v9591_v16 = vpop.permute.xlu1 %9590 }
 0x646   : > { %v9593_v63 = vunpack.i.h.bf16 %v9591_v16  ;;  %v9592_v25 = vunpack.i.l.bf16 %v9591_v16 }
 0x648   : > { %v8125_v17 = vsel %vm3264_vm14, %v8118_v41, %v9592_v25  ;;  %v8126_v58 = vsel %vm3264_vm14, %v8119_v60, %v9593_v63 }
 0x649   : > { %v8133_v39 = vsel %vm3282_vm1, %v8125_v17, %v9542_v24  ;;  %v8134_v53 = vsel %vm3282_vm1, %v8126_v58, %v9543_v35  ;;  %v9596_v19 = vpop.permute.xlu1 %9595 }
 0x64a   : > { %v8142_v14 = vsel %vm3300_vm4, %v8134_v53, %v9573_v49  ;;  %v9598_v9 = vunpack.i.h.bf16 %v9596_v19  ;;  %v9597_v7 = vunpack.i.l.bf16 %v9596_v19  ;;  %v8141_v40 = vsel %vm3300_vm4, %v8133_v39, %v9572_v31 }
 0x64b   : > { %v8149_v46 = vsel %vm7764_vm0, %v8141_v40, %v9577_v21  ;;  %v8150_v23 = vsel %vm7764_vm0, %v8142_v14, %v9578_v57 }
 0x64c   : > { %v8164_v29 = vsel %vm7782_vm10, %v8156_v10, %v9597_v7  ;;  %v8157_v52 = vsel %vm7773_vm9, %v8149_v46, %v9548_v8  ;;  %v8158_v36 = vsel %vm7773_vm9, %v8150_v23, %v9547_v13  ;;  %v16403_v8 = vld [vmem:[%s16451_s6] ss:$0 sm:$0xff] }
 0x64d   : > { %v8105_v51 = vpop.permute.xlu1 %8104  ;;  %v8165_v4 = vsel %vm7782_vm10, %v8157_v52, %v9598_v9  ;;  %v8166_v18 = vsel %vm7782_vm10, %v8158_v36, %v9597_v7  ;;  %v8172_v1 = vsel %vm7791_vm11, %v8164_v29, %v9613_v33 }
 0x64e   : > { %v8173_v43 = vsel %vm7791_vm11, %v8165_v4, %v8105_v51  ;;  %v8174_v45 = vsel %vm7791_vm11, %v8166_v18, %v9613_v33  ;;  %v8181_v22 = vpack.c.bf16 %v8172_v1, %v8171_v48 }
 0x64f   : > { %v8182_v47 = vpack.c.bf16 %v8174_v45, %v8173_v43 }
 0x650   : > { %8685 = vmatprep.mubr.msk.bf16.mxu1 %vm8226_vm13, %v8181_v22 }
 0x651   : > { %8686 = vmatmul.mubr.msk.bf16.gmra.mrb[20].mxu1 %vm8226_vm13, %v8182_v47 }
 0x6b4   : > { %v8675_v35 = vpop.f32.mrb[16].mxu0 }
 0x6b5   : > { %v8289_v13 = vpop.f32.mrb[17].mxu0  ;;  %v8298_v56 = vadd.f32 %v8675_v35, %v16403_v8 }
 0x6b6   : > { %v8290_v6 = vadd.f32 %v16403_v8, %v8289_v13  ;;  %v8676_v32 = vpop.f32.mrb[18].mxu0 }
 0x6b7   : > { %v8292_v24 = vpop.f32.mrb[19].mxu0  ;;  %v8354_v5 = vmax.f32 %v8298_v56, 0.0  ;;  %v8301_v42 = vadd.f32 %v8676_v32, %v16403_v8 }
 0x6b8   : > { %v8352_v49 = vmax.f32 %v8290_v6, 0.0  ;;  %v8293_v31 = vadd.f32 %v16403_v8, %v8292_v24 }
 0x6b9   : > { %v8370_v25 = vadd.f32 %v8354_v5, %v15769_v61  ;;  %v8355_v15 = vmax.f32 %v8301_v42, 0.0 }
 0x6ba   : > { %v8368_v16 = vadd.f32 %v8352_v49, %v15772_v59  ;;  %v8353_v57 = vmax.f32 %v8293_v31, 0.0 }
 0x6bb   : > { %v8371_v28 = vadd.f32 %v8355_v15, %v15778_v26 }
 0x6bc   : > { %8384 = vxpose.xlu0.b32.start [1/16] (narrow) %v8368_v16, 8  ;;  %v8369_v63 = vadd.f32 %v8353_v57, %v15782_v2 }
 0x6c0   : > { %8385 = vxpose.xlu0.b32.cont [2/16] (narrow) %v8369_v63, 8 }
 0x6c4   : > { %8386 = vxpose.xlu0.b32.cont [3/16] (narrow) %v8370_v25, 8 }
 0x6c8   : > { %8387 = vxpose.xlu0.b32.cont [4/16] (narrow) %v8371_v28, 8 }
 0x6fe   : > { %v8679_v60 = vpop.f32.mrb[20].mxu0 }
 0x6ff   : > { %v8305_v41 = vpop.f32.mrb[21].mxu0  ;;  %v8314_v50 = vadd.f32 %v8679_v60, %v16403_v8 }
 0x700   : > { %v8306_v21 = vadd.f32 %v16403_v8, %v8305_v41  ;;  %v8680_v59 = vpop.f32.mrb[22].mxu0 }
 0x701   : > { %v8308_v30 = vpop.f32.mrb[23].mxu0  ;;  %v8358_v61 = vmax.f32 %v8314_v50, 0.0  ;;  %v8317_v39 = vadd.f32 %v8680_v59, %v16403_v8 }
 0x702   : > { %v8356_v17 = vmax.f32 %v8306_v21, 0.0  ;;  %v8309_v58 = vadd.f32 %v16403_v8, %v8308_v30 }
 0x703   : > { %v8374_v53 = vadd.f32 %v8358_v61, %v15849_v54  ;;  %v8359_v19 = vmax.f32 %v8317_v39, 0.0 }
 0x704   : > { %v8372_v2 = vadd.f32 %v8356_v17, %v15852_v38  ;;  %v8357_v11 = vmax.f32 %v8309_v58, 0.0 }
 0x705   : > { %v8375_v14 = vadd.f32 %v8359_v19, %v15855_v44 }
 0x706   : > { %8388 = vxpose.xlu0.b32.cont [5/16] (narrow) %v8372_v2, 8  ;;  %v8373_v26 = vadd.f32 %v8357_v11, %v15861_v34 }
 0x70a   : > { %8389 = vxpose.xlu0.b32.cont [6/16] (narrow) %v8373_v26, 8 }
 0x70e   : > { %8390 = vxpose.xlu0.b32.cont [7/16] (narrow) %v8374_v53, 8 }
 0x712   : > { %8391 = vxpose.xlu0.b32.cont [8/16] (narrow) %v8375_v14, 8 }
 0x717   : > { %v8683_v9 = vpop.f32.mrb[16].mxu1 }
 0x718   : > { %v8321_v7 = vpop.f32.mrb[17].mxu1  ;;  %v8330_v23 = vadd.f32 %v8683_v9, %v16403_v8 }
 0x719   : > { %v8322_v40 = vadd.f32 %v16403_v8, %v8321_v7  ;;  %v8684_v38 = vpop.f32.mrb[18].mxu1 }
 0x71a   : > { %v8324_v33 = vpop.f32.mrb[19].mxu1  ;;  %v8362_v54 = vmax.f32 %v8330_v23, 0.0  ;;  %v8333_v52 = vadd.f32 %v8684_v38, %v16403_v8 }
 0x71b   : > { %v8360_v10 = vmax.f32 %v8322_v40, 0.0  ;;  %v8325_v46 = vadd.f32 %v16403_v8, %v8324_v33 }
 0x71c   : > { %v8378_v48 = vadd.f32 %v8362_v54, %v15962_v27  ;;  %v8363_v51 = vmax.f32 %v8333_v52, 0.0 }
 0x71d   : > { %v8376_v34 = vadd.f32 %v8360_v10, %v15965_v62  ;;  %v8361_v29 = vmax.f32 %v8325_v46, 0.0 }
 0x71e   : > { %v8379_v62 = vadd.f32 %v8363_v51, %v15971_v55 }
 0x71f   : > { %8392 = vxpose.xlu0.b32.cont [9/16] (narrow) %v8376_v34, 8  ;;  %v8377_v44 = vadd.f32 %v8361_v29, %v15976_v12 }
 0x723   : > { %8393 = vxpose.xlu0.b32.cont [10/16] (narrow) %v8377_v44, 8 }
 0x724   : > { %v8687_v36 = vpop.f32.mrb[20].mxu1 }
 0x725   : > { %v8337_v4 = vpop.f32.mrb[21].mxu1  ;;  %v8346_v12 = vadd.f32 %v8687_v36, %v16403_v8 }
 0x726   : > { %v8338_v18 = vadd.f32 %v16403_v8, %v8337_v4  ;;  %v8688_v1 = vpop.f32.mrb[22].mxu1 }
 0x727   : > { %v8340_v43 = vpop.f32.mrb[23].mxu1  ;;  %8394 = vxpose.xlu0.b32.cont [11/16] (narrow) %v8378_v48, 8  ;;  %v8366_v35 = vmax.f32 %v8346_v12, 0.0  ;;  %v8349_v13 = vadd.f32 %v8688_v1, %v16403_v8 }
 0x728   : > { %v8364_v45 = vmax.f32 %v8338_v18, 0.0  ;;  %v8341_v22 = vadd.f32 %v16403_v8, %v8340_v43 }
 0x729   : > { %v8382_v55 = vadd.f32 %v8366_v35, %v16052_v20  ;;  %v8367_v32 = vmax.f32 %v8349_v13, 0.0 }
 0x72a   : > { %v8380_v47 = vadd.f32 %v8364_v45, %v16049_v37  ;;  %v8365_v27 = vmax.f32 %v8341_v22, 0.0 }
 0x72b   : > { %8395 = vxpose.xlu0.b32.cont [12/16] (narrow) %v8379_v62, 8  ;;  %v8383_v24 = vadd.f32 %v8367_v32, %v16046_v3 }
 0x72c   : > { %v8381_v6 = vadd.f32 %v8365_v27, %v16055_v0 }
 0x72f   : > { %8396 = vxpose.xlu0.b32.cont [13/16] (narrow) %v8380_v47, 8 }
 0x733   : > { %8397 = vxpose.xlu0.b32.cont [14/16] (narrow) %v8381_v6, 8 }
 0x737   : > { %8398 = vxpose.xlu0.b32.cont [15/16] (narrow) %v8382_v55, 8 }
 0x73b   : > { %8399 = vxpose.xlu0.b32.end [16/16] (narrow) %v8383_v24, 8 }
 0x77f   : > { %v8400_v37 = vpop.trf.xlu0 }
 0x780   : > { %8416 = vst [vmem:[%s281_s8] sm:$0xff] %v8400_v37 }
 0x781 PF: > { %s17_s24 = sadd.s32 1, %s9631_s24  }
 0x782   : > { %p14_p5 = scmp.ge.s32.totalorder %s17_s24, 4  }
 0x784   :  { %16 = sbr.rel (!%p14_p5) target bundleno = 1 (0x1), region = 79 }

</bundles_post_ra>
